<compile_context>
chip_gen: v7x
topology: tpu7x:2x2x1
jax: 0.10.0
libtpu: 0.0.40
codegen_flags: <defaults>
</compile_context>

<pallas_src>
import functools

import jax
import jax.numpy as jnp
from jax import lax
from jax.experimental import pallas as pl
from jax.experimental.pallas import tpu as pltpu


_INV_SQRT2 = 0.7071067811865476


def _gelu_exact(x):
    # matches torch.nn.GELU() default (erf-based, NOT tanh approximation)
    return 0.5 * x * (1.0 + lax.erf(x * _INV_SQRT2))


def _softmax_last(x):
    # in-kernel softmax: EUP reciprocal instead of a vector divide chain
    m = jnp.max(x, axis=-1, keepdims=True)
    e = jnp.exp(x - m)
    return e * pl.reciprocal(jnp.sum(e, axis=-1, keepdims=True), approx=True)


def _mmoe_kernel(x_ref,
                 w1_ref, b1_ref, w2_ref, b2_ref,                # packed experts
                 wt_ref, bt_ref,                                # task_transform
                 wg1_ref, bg1_ref, wa_ref, ba_ref,              # gate linear1 / feature attn
                 wg2_ref, bg2_ref,                              # gate linear2 (1/T folded in)
                 o_ref, *, num_experts, hidden, elem_dtype):
    f32 = jnp.float32
    bf16 = jnp.bfloat16
    E, H = num_experts, hidden

    x = x_ref[...]                                              # [TM, D] bf16

    # ---- gating network: FeatureLevelAttention(task_transform(x)) ----
    tx = jnp.dot(x, wt_ref[...], preferred_element_type=f32) + bt_ref[...]
    h = jnp.dot(tx.astype(bf16), wg1_ref[...], preferred_element_type=f32) + bg1_ref[...]
    h = jnp.maximum(h, 0.0)                                     # ReLU
    att = jnp.dot(h.astype(bf16), wa_ref[...], preferred_element_type=f32) + ba_ref[...]
    h = h * _softmax_last(att)                                  # feature-level attention
    # dropout(p=0.1) is identity in eval mode
    gl = jnp.dot(h.astype(bf16), wg2_ref[...], preferred_element_type=f32) + bg2_ref[...]
    tw = _softmax_last(gl)                                      # [TM, E] f32 (1/T pre-folded)
    tw_half = tw * 0.5                                          # GELU's 0.5 folded into the gate

    # ---- experts: one wide fc1, then per-expert GELU*gate on lane-aligned
    #      slices and per-expert fc2 accumulation (no K=3 MXU matmuls) ----
    he = jnp.dot(x, w1_ref[...], preferred_element_type=f32) + b1_ref[...]   # [TM, E*H]
    he = he.astype(elem_dtype)                                  # bf16 chain on v6e/v7x
    out = None
    for e in range(E):                                          # static unroll, E small
        blk = he[:, e * H:(e + 1) * H]                          # lane-aligned static slice
        g = blk * (1.0 + lax.erf(blk * _INV_SQRT2))             # = 2*GELU (0.5 is in tw_half)
        ge = (g * tw_half[:, e:e + 1].astype(g.dtype)).astype(bf16)
        pe = jnp.dot(ge, w2_ref[e * H:(e + 1) * H, :], preferred_element_type=f32)
        pe = pe + tw[:, e:e + 1] * b2_ref[e:e + 1, :]           # weighted fc2 bias on the VPU
        out = pe if out is None else out + pe
    o_ref[...] = out.astype(o_ref.dtype)


def _round_up(a, b):
    return ((a + b - 1) // b) * b


def _pad_to(a, shape, value=0.0):
    pads = [(0, t - s) for s, t in zip(a.shape, shape)]
    if all(p == (0, 0) for p in pads):
        return a
    return jnp.pad(a, pads, constant_values=value)


def _device_kind():
    try:
        return jax.devices()[0].device_kind.lower()
    except Exception:
        return ""


def _choose_tm(m, tm_max):
    # Target >= 4 grid steps when M permits (>= 2 per TensorCore on v7x) so the
    # x-tile DMA pipelines behind compute; otherwise one big tile. Large tiles
    # are rounded to 256-row multiples (integer number of MXU M-passes).
    quarter = (m + 3) // 4
    tm = max(16, _round_up(quarter, 16))
    if tm > 256:
        tm = _round_up(tm, 256)
    return int(min(tm_max, tm))


def mmoe_single_task_forward(x, params, *, temperature=1.0, tm=None):
    """x: [B, L, dim] float32. Returns [B, L, dim] (gating path, eval mode)."""
    B, L, D = x.shape
    M = B * L
    E, _, H = params["w1"].shape
    Hg = params["wg1"].shape[1]
    Hg_pad = max(128, _round_up(Hg, 128))       # lane-dense gate intermediates

    bf16, f32 = jnp.bfloat16, jnp.float32

    kind = _device_kind()
    older = any(t in kind for t in ("v2", "v3", "v4", "v5"))   # no bf16 VPU; small VMEM default
    tm_max = 256 if older else 512
    if tm is None:
        tm = _choose_tm(M, tm_max)
    tm = max(16, _round_up(tm, 16))
    M_pad = _round_up(M, tm)

    # token-major [M, D] rows, bf16 for the MXU (f32 accumulation in-kernel)
    x2 = x.reshape(M, D).astype(bf16)
    if M_pad != M:
        x2 = jnp.pad(x2, ((0, M_pad - M), (0, 0)))

    # ---- pack the E experts into wide matmul operands ----
    w1cat = jnp.transpose(params["w1"], (1, 0, 2)).reshape(D, E * H).astype(bf16)
    b1cat = params["b1"].reshape(1, E * H).astype(f32)
    w2cat = params["w2"].reshape(E * H, D).astype(bf16)
    b2c = params["b2"].astype(f32)                               # [E, D]

    # gating weights: 1/temperature folded into the last linear (exact); the Hg
    # axis is zero-padded to 128 lanes, with -1e9 in the padded attention bias
    # so its softmax ignores the pad lanes.
    inv_t = 1.0 / float(temperature)
    wt = params["wt"].astype(bf16)
    bt = params["bt"].astype(f32)
    wg1p = _pad_to(params["wg1"], (D, Hg_pad)).astype(bf16)
    bg1p = _pad_to(params["bg1"], (1, Hg_pad)).astype(f32)
    wap = _pad_to(params["wa"], (Hg_pad, Hg_pad)).astype(bf16)
    bap = _pad_to(params["ba"], (1, Hg_pad), value=-1e9).astype(f32)
    wg2p = _pad_to(params["wg2"] * inv_t, (Hg_pad, E)).astype(bf16)
    bg2c = (params["bg2"] * inv_t).astype(f32)

    weights = (w1cat, b1cat, w2cat, b2c, wt, bt, wg1p, bg1p, wap, bap, wg2p, bg2c)

    # Explicit VMEM budget: resident weights (x2 if double-buffered) + pipelined
    # row tiles + elementwise intermediates. Floor 32 MiB (v5e default is only
    # 16 MiB), cap 48 MiB (v7x physical VMEM is 64 MiB).
    wbytes = sum(int(a.size) * a.dtype.itemsize for a in weights)
    io_bytes = 2 * tm * D * (2 + 4)
    interm = 4 * tm * E * H * 4
    vmem_limit = int(min(max(2 * wbytes + io_bytes + interm + (4 << 20), 32 << 20), 48 << 20))

    def call(elem_dtype, single_buffer_weights):
        kern = functools.partial(_mmoe_kernel, num_experts=E, hidden=H,
                                 elem_dtype=elem_dtype)

        def const_spec(shape):
            zeros = (0,) * len(shape)

            def index_map(i):
                return zeros

            if single_buffer_weights:
                # constant index -> fetched once; a single buffer halves the
                # resident-weight VMEM with no perf cost.
                return pl.BlockSpec(shape, index_map, pipeline_mode=pl.Buffered(1))
            return pl.BlockSpec(shape, index_map)

        return pl.pallas_call(
            kern,
            out_shape=jax.ShapeDtypeStruct((M_pad, D), x.dtype),
            grid_spec=pltpu.PrefetchScalarGridSpec(
                num_scalar_prefetch=0,
                grid=(M_pad // tm,),
                in_specs=[
                    pl.BlockSpec((tm, D), lambda i: (i, 0)),   # x row tile
                    const_spec((D, E * H)),                    # packed expert fc1 W
                    const_spec((1, E * H)),                    # packed expert fc1 b
                    const_spec((E * H, D)),                    # packed expert fc2 W
                    const_spec((E, D)),                        # expert fc2 biases
                    const_spec((D, D)),                        # task_transform W
                    const_spec((1, D)),                        # task_transform b
                    const_spec((D, Hg_pad)),                   # gate.linear1 W (padded)
                    const_spec((1, Hg_pad)),                   # gate.linear1 b (padded)
                    const_spec((Hg_pad, Hg_pad)),              # gate.feature_attention W
                    const_spec((1, Hg_pad)),                   # gate.feature_attention b (-1e9 pads)
                    const_spec((Hg_pad, E)),                   # gate.linear2 W (/T)
                    const_spec((1, E)),                        # gate.linear2 b (/T)
                ],
                out_specs=pl.BlockSpec((tm, D), lambda i: (i, 0)),
            ),
            compiler_params=pltpu.CompilerParams(
                dimension_semantics=("parallel",),
                vmem_limit_bytes=vmem_limit,
            ),
        )(x2, *weights)

    # Fast config: bf16 elementwise GELU (v6e/v7x bf16 VPU) + single-buffered
    # resident weights; progressively fall back if a configuration fails to lower.
    configs = []
    if not older:
        configs += [(bf16, True), (bf16, False)]
    configs += [(f32, True), (f32, False)]

    out = None
    last_err = None
    for elem_dtype, single_buf in configs:
        try:
            out = call(elem_dtype, single_buf)
            break
        except Exception as e:              # fall back to a safer configuration
            last_err = e
    if out is None:
        raise last_err

    return out[:M].reshape(B, L, D)


def make_params(key, dim, hidden_dim, num_experts):
    """Deterministic synthetic parameters (module __init__ shapes)."""
    hg = int(dim * 0.5)
    keys = jax.random.split(key, 13)
    s = lambda k, shape, scale: (jax.random.normal(k, shape, jnp.float32) * scale)
    return {
        # experts: Mlp(dim -> hidden_dim -> dim), stacked over experts
        "w1": s(keys[0], (num_experts, dim, hidden_dim), 0.05),
        "b1": s(keys[1], (num_experts, hidden_dim), 0.05),
        "w2": s(keys[2], (num_experts, hidden_dim, dim), 0.05),
        "b2": s(keys[3], (num_experts, dim), 0.05),
        # task_transform: Linear(dim, dim)
        "wt": s(keys[4], (dim, dim), 0.05),
        "bt": s(keys[5], (1, dim), 0.05),
        # gate.linear1: Linear(dim, dim//2)
        "wg1": s(keys[6], (dim, hg), 0.05),
        "bg1": s(keys[7], (1, hg), 0.05),
        # gate.feature_attention: Linear(dim//2, dim//2)
        "wa": s(keys[8], (hg, hg), 0.05),
        "ba": s(keys[9], (1, hg), 0.05),
        # gate.linear2: Linear(dim//2, num_experts)
        "wg2": s(keys[10], (hg, num_experts), 0.05),
        "bg2": s(keys[11], (1, num_experts), 0.05),
    }


def reference_forward(x, p, temperature=1.0):
    """Plain-JAX f32 reference matching the PyTorch forward (gating path)."""
    E = p["w1"].shape[0]
    expert_outs = []
    for e in range(E):
        h = _gelu_exact(x @ p["w1"][e] + p["b1"][e])
        expert_outs.append(h @ p["w2"][e] + p["b2"][e])
    expert_outputs = jnp.stack(expert_outs, axis=-1)            # [B, L, D, E]
    tx = x @ p["wt"] + p["bt"][0]
    h = jax.nn.relu(tx @ p["wg1"] + p["bg1"][0])
    att = h @ p["wa"] + p["ba"][0]
    h = h * jax.nn.softmax(att, axis=-1)
    gl = h @ p["wg2"] + p["bg2"][0]
    tw = jax.nn.softmax(gl / temperature, axis=-1)              # [B, L, E]
    return jnp.sum(expert_outputs * tw[:, :, None, :], axis=-1)


if __name__ == "__main__":
    # Small shapes consistent with forward(x: [B, L, dim]); num_classes=2 -> 3 experts.
    # dim=128 keeps the output lane-dense (no masked partial stores).
    B, L, DIM, HID = 2, 16, 128, 256
    NUM_CLASSES = 2
    NUM_EXPERTS = NUM_CLASSES + 1   # 'Shared', 'Class_0', 'Class_1'

    key = jax.random.PRNGKey(0)
    kx, kp = jax.random.split(key)
    x = jax.random.normal(kx, (B, L, DIM), jnp.float32)
    params = make_params(kp, DIM, HID, NUM_EXPERTS)

    out = mmoe_single_task_forward(x, params, temperature=1.0)
    out = jax.block_until_ready(out)

    ref = reference_forward(x, params, temperature=1.0)
    assert out.shape == (B, L, DIM)
    # bf16 MXU inputs (and bf16 GELU chain on v6e/v7x) vs a pure-f32 reference
    err = float(jnp.max(jnp.abs(out - ref)))
    assert err < 2e-2, f"mismatch vs reference: max abs err {err}"

    # TODO(synk): the 'reconstruction' / is_pretrain+labels branches (hard label-based
    # expert weights) are host-side bookkeeping and are not implemented in this kernel.
    print("KERNEL_OK")
</pallas_src>

<mosaic_0001>
module attributes {stable_mosaic.version = 11 : i64} {
  func.func @_mmoe_kernel(%arg0: i32, %arg1: memref<16x128xbf16, #tpu.memory_space<vmem>>, %arg2: memref<128x768xbf16, #tpu.memory_space<vmem>>, %arg3: memref<1x768xf32, #tpu.memory_space<vmem>>, %arg4: memref<768x128xbf16, #tpu.memory_space<vmem>>, %arg5: memref<3x128xf32, #tpu.memory_space<vmem>>, %arg6: memref<128x128xbf16, #tpu.memory_space<vmem>>, %arg7: memref<1x128xf32, #tpu.memory_space<vmem>>, %arg8: memref<128x128xbf16, #tpu.memory_space<vmem>>, %arg9: memref<1x128xf32, #tpu.memory_space<vmem>>, %arg10: memref<128x128xbf16, #tpu.memory_space<vmem>>, %arg11: memref<1x128xf32, #tpu.memory_space<vmem>>, %arg12: memref<128x3xbf16, #tpu.memory_space<vmem>>, %arg13: memref<1x3xf32, #tpu.memory_space<vmem>>, %arg14: memref<16x128xf32, #tpu.memory_space<vmem>>) attributes {dimension_semantics = [#tpu.dimension_semantics<parallel>], iteration_bounds = array<i64: 2>, scalar_prefetch = 0 : i64, scratch_operands = 0 : i64, tpu.core_type = #tpu.core_type<tc>, window_params = [{transform_indices = @transform_0, window_bounds = array<i64: 16, 128>}, {pipeline_mode = #tpu.pipeline_mode<synchronous>, transform_indices = @transform_1, window_bounds = array<i64: 128, 768>}, {pipeline_mode = #tpu.pipeline_mode<synchronous>, transform_indices = @transform_2, window_bounds = array<i64: 1, 768>}, {pipeline_mode = #tpu.pipeline_mode<synchronous>, transform_indices = @transform_3, window_bounds = array<i64: 768, 128>}, {pipeline_mode = #tpu.pipeline_mode<synchronous>, transform_indices = @transform_4, window_bounds = array<i64: 3, 128>}, {pipeline_mode = #tpu.pipeline_mode<synchronous>, transform_indices = @transform_5, window_bounds = array<i64: 128, 128>}, {pipeline_mode = #tpu.pipeline_mode<synchronous>, transform_indices = @transform_6, window_bounds = array<i64: 1, 128>}, {pipeline_mode = #tpu.pipeline_mode<synchronous>, transform_indices = @transform_7, window_bounds = array<i64: 128, 128>}, {pipeline_mode = #tpu.pipeline_mode<synchronous>, transform_indices = @transform_8, window_bounds = array<i64: 1, 128>}, {pipeline_mode = #tpu.pipeline_mode<synchronous>, transform_indices = @transform_9, window_bounds = array<i64: 128, 128>}, {pipeline_mode = #tpu.pipeline_mode<synchronous>, transform_indices = @transform_10, window_bounds = array<i64: 1, 128>}, {pipeline_mode = #tpu.pipeline_mode<synchronous>, transform_indices = @transform_11, window_bounds = array<i64: 128, 3>}, {pipeline_mode = #tpu.pipeline_mode<synchronous>, transform_indices = @transform_12, window_bounds = array<i64: 1, 3>}, {transform_indices = @transform_13, window_bounds = array<i64: 16, 128>}]} {
    %c0 = arith.constant 0 : index
    %c0_0 = arith.constant 0 : index
    %0 = vector.load %arg1[%c0, %c0_0] : memref<16x128xbf16, #tpu.memory_space<vmem>>, vector<16x128xbf16>
    %c0_1 = arith.constant 0 : index
    %c0_2 = arith.constant 0 : index
    %1 = vector.load %arg6[%c0_1, %c0_2] : memref<128x128xbf16, #tpu.memory_space<vmem>>, vector<128x128xbf16>
    %cst = arith.constant dense<0.000000e+00> : vector<16x128xf32>
    %2 = tpu.matmul %0, %1, %cst {dimension_numbers = #tpu.dot_dimension_numbers<[1], [0], [0], [1], [0, 0, 1, 1], [], []>} : vector<16x128xbf16>, vector<128x128xbf16>, vector<16x128xf32> -> vector<16x128xf32>
    %c0_3 = arith.constant 0 : index
    %c0_4 = arith.constant 0 : index
    %3 = vector.load %arg7[%c0_3, %c0_4] : memref<1x128xf32, #tpu.memory_space<vmem>>, vector<1x128xf32>
    %4 = vector.broadcast %3 : vector<1x128xf32> to vector<16x128xf32>
    %5 = arith.addf %2, %4 : vector<16x128xf32>
    %6 = arith.truncf %5 : vector<16x128xf32> to vector<16x128xbf16>
    %c0_5 = arith.constant 0 : index
    %c0_6 = arith.constant 0 : index
    %7 = vector.load %arg8[%c0_5, %c0_6] : memref<128x128xbf16, #tpu.memory_space<vmem>>, vector<128x128xbf16>
    %cst_7 = arith.constant dense<0.000000e+00> : vector<16x128xf32>
    %8 = tpu.matmul %6, %7, %cst_7 {dimension_numbers = #tpu.dot_dimension_numbers<[1], [0], [0], [1], [0, 0, 1, 1], [], []>} : vector<16x128xbf16>, vector<128x128xbf16>, vector<16x128xf32> -> vector<16x128xf32>
    %c0_8 = arith.constant 0 : index
    %c0_9 = arith.constant 0 : index
    %9 = vector.load %arg9[%c0_8, %c0_9] : memref<1x128xf32, #tpu.memory_space<vmem>>, vector<1x128xf32>
    %10 = vector.broadcast %9 : vector<1x128xf32> to vector<16x128xf32>
    %11 = arith.addf %8, %10 : vector<16x128xf32>
    %cst_10 = arith.constant 0.000000e+00 : f32
    %12 = vector.broadcast %cst_10 : f32 to vector<16x128xf32>
    %13 = arith.maximumf %11, %12 : vector<16x128xf32>
    %14 = arith.truncf %13 : vector<16x128xf32> to vector<16x128xbf16>
    %c0_11 = arith.constant 0 : index
    %c0_12 = arith.constant 0 : index
    %15 = vector.load %arg10[%c0_11, %c0_12] : memref<128x128xbf16, #tpu.memory_space<vmem>>, vector<128x128xbf16>
    %cst_13 = arith.constant dense<0.000000e+00> : vector<16x128xf32>
    %16 = tpu.matmul %14, %15, %cst_13 {dimension_numbers = #tpu.dot_dimension_numbers<[1], [0], [0], [1], [0, 0, 1, 1], [], []>} : vector<16x128xbf16>, vector<128x128xbf16>, vector<16x128xf32> -> vector<16x128xf32>
    %c0_14 = arith.constant 0 : index
    %c0_15 = arith.constant 0 : index
    %17 = vector.load %arg11[%c0_14, %c0_15] : memref<1x128xf32, #tpu.memory_space<vmem>>, vector<1x128xf32>
    %18 = vector.broadcast %17 : vector<1x128xf32> to vector<16x128xf32>
    %19 = arith.addf %16, %18 : vector<16x128xf32>
    %cst_16 = arith.constant dense<0xFF800000> : vector<16xf32>
    %20 = vector.multi_reduction <maximumf>, %19, %cst_16 [1] : vector<16x128xf32> to vector<16xf32>
    %21 = vector.shape_cast %20 : vector<16xf32> to vector<16x1xf32>
    %22 = vector.broadcast %21 : vector<16x1xf32> to vector<16x128xf32>
    %23 = arith.subf %19, %22 : vector<16x128xf32>
    %24 = math.exp %23 : vector<16x128xf32>
    %cst_17 = arith.constant dense<0.000000e+00> : vector<16xf32>
    %25 = vector.multi_reduction <add>, %24, %cst_17 [1] : vector<16x128xf32> to vector<16xf32>
    %26 = vector.shape_cast %25 : vector<16xf32> to vector<16x1xf32>
    %27 = tpu.reciprocal %26 {approx = true} : vector<16x1xf32> -> vector<16x1xf32>
    %28 = vector.broadcast %27 : vector<16x1xf32> to vector<16x128xf32>
    %29 = arith.mulf %24, %28 : vector<16x128xf32>
    %30 = arith.mulf %13, %29 : vector<16x128xf32>
    %31 = arith.truncf %30 : vector<16x128xf32> to vector<16x128xbf16>
    %c0_18 = arith.constant 0 : index
    %c0_19 = arith.constant 0 : index
    %32 = vector.load %arg12[%c0_18, %c0_19] : memref<128x3xbf16, #tpu.memory_space<vmem>>, vector<128x3xbf16>
    %cst_20 = arith.constant dense<0.000000e+00> : vector<16x3xf32>
    %33 = tpu.matmul %31, %32, %cst_20 {dimension_numbers = #tpu.dot_dimension_numbers<[1], [0], [0], [1], [0, 0, 1, 1], [], []>} : vector<16x128xbf16>, vector<128x3xbf16>, vector<16x3xf32> -> vector<16x3xf32>
    %c0_21 = arith.constant 0 : index
    %c0_22 = arith.constant 0 : index
    %34 = vector.load %arg13[%c0_21, %c0_22] : memref<1x3xf32, #tpu.memory_space<vmem>>, vector<1x3xf32>
    %35 = vector.broadcast %34 : vector<1x3xf32> to vector<16x3xf32>
    %36 = arith.addf %33, %35 : vector<16x3xf32>
    %cst_23 = arith.constant dense<0xFF800000> : vector<16xf32>
    %37 = vector.multi_reduction <maximumf>, %36, %cst_23 [1] : vector<16x3xf32> to vector<16xf32>
    %38 = vector.shape_cast %37 : vector<16xf32> to vector<16x1xf32>
    %39 = vector.broadcast %38 : vector<16x1xf32> to vector<16x3xf32>
    %40 = arith.subf %36, %39 : vector<16x3xf32>
    %41 = math.exp %40 : vector<16x3xf32>
    %cst_24 = arith.constant dense<0.000000e+00> : vector<16xf32>
    %42 = vector.multi_reduction <add>, %41, %cst_24 [1] : vector<16x3xf32> to vector<16xf32>
    %43 = vector.shape_cast %42 : vector<16xf32> to vector<16x1xf32>
    %44 = tpu.reciprocal %43 {approx = true} : vector<16x1xf32> -> vector<16x1xf32>
    %45 = vector.broadcast %44 : vector<16x1xf32> to vector<16x3xf32>
    %46 = arith.mulf %41, %45 : vector<16x3xf32>
    %cst_25 = arith.constant 5.000000e-01 : f32
    %47 = vector.broadcast %cst_25 : f32 to vector<16x3xf32>
    %48 = arith.mulf %46, %47 : vector<16x3xf32>
    %c0_26 = arith.constant 0 : index
    %c0_27 = arith.constant 0 : index
    %49 = vector.load %arg2[%c0_26, %c0_27] : memref<128x768xbf16, #tpu.memory_space<vmem>>, vector<128x768xbf16>
    %cst_28 = arith.constant dense<0.000000e+00> : vector<16x768xf32>
    %50 = tpu.matmul %0, %49, %cst_28 {dimension_numbers = #tpu.dot_dimension_numbers<[1], [0], [0], [1], [0, 0, 1, 1], [], []>} : vector<16x128xbf16>, vector<128x768xbf16>, vector<16x768xf32> -> vector<16x768xf32>
    %c0_29 = arith.constant 0 : index
    %c0_30 = arith.constant 0 : index
    %51 = vector.load %arg3[%c0_29, %c0_30] : memref<1x768xf32, #tpu.memory_space<vmem>>, vector<1x768xf32>
    %52 = vector.broadcast %51 : vector<1x768xf32> to vector<16x768xf32>
    %53 = arith.addf %50, %52 : vector<16x768xf32>
    %54 = arith.truncf %53 : vector<16x768xf32> to vector<16x768xbf16>
    %55 = vector.extract_strided_slice %54 {offsets = [0, 0], sizes = [16, 256], strides = [1, 1]} : vector<16x768xbf16> to vector<16x256xbf16>
    %cst_31 = arith.constant 7.070310e-01 : bf16
    %56 = vector.broadcast %cst_31 : bf16 to vector<16x256xbf16>
    %57 = arith.mulf %55, %56 : vector<16x256xbf16>
    %58 = math.erf %57 : vector<16x256xbf16>
    %cst_32 = arith.constant 1.000000e+00 : bf16
    %59 = vector.broadcast %cst_32 : bf16 to vector<16x256xbf16>
    %60 = arith.addf %59, %58 : vector<16x256xbf16>
    %61 = arith.mulf %55, %60 : vector<16x256xbf16>
    %62 = vector.extract_strided_slice %48 {offsets = [0, 0], sizes = [16, 1], strides = [1, 1]} : vector<16x3xf32> to vector<16x1xf32>
    %63 = arith.truncf %62 : vector<16x1xf32> to vector<16x1xbf16>
    %64 = vector.broadcast %63 : vector<16x1xbf16> to vector<16x256xbf16>
    %65 = arith.mulf %61, %64 : vector<16x256xbf16>
    %c0_33 = arith.constant 0 : index
    %c0_34 = arith.constant 0 : index
    %66 = vector.load %arg4[%c0_33, %c0_34] : memref<768x128xbf16, #tpu.memory_space<vmem>>, vector<256x128xbf16>
    %cst_35 = arith.constant dense<0.000000e+00> : vector<16x128xf32>
    %67 = tpu.matmul %65, %66, %cst_35 {dimension_numbers = #tpu.dot_dimension_numbers<[1], [0], [0], [1], [0, 0, 1, 1], [], []>} : vector<16x256xbf16>, vector<256x128xbf16>, vector<16x128xf32> -> vector<16x128xf32>
    %68 = vector.extract_strided_slice %46 {offsets = [0, 0], sizes = [16, 1], strides = [1, 1]} : vector<16x3xf32> to vector<16x1xf32>
    %c0_36 = arith.constant 0 : index
    %c0_37 = arith.constant 0 : index
    %69 = vector.load %arg5[%c0_36, %c0_37] : memref<3x128xf32, #tpu.memory_space<vmem>>, vector<1x128xf32>
    %70 = vector.broadcast %68 : vector<16x1xf32> to vector<16x128xf32>
    %71 = vector.broadcast %69 : vector<1x128xf32> to vector<16x128xf32>
    %72 = arith.mulf %70, %71 : vector<16x128xf32>
    %73 = arith.addf %67, %72 : vector<16x128xf32>
    %74 = vector.extract_strided_slice %54 {offsets = [0, 256], sizes = [16, 256], strides = [1, 1]} : vector<16x768xbf16> to vector<16x256xbf16>
    %cst_38 = arith.constant 7.070310e-01 : bf16
    %75 = vector.broadcast %cst_38 : bf16 to vector<16x256xbf16>
    %76 = arith.mulf %74, %75 : vector<16x256xbf16>
    %77 = math.erf %76 : vector<16x256xbf16>
    %cst_39 = arith.constant 1.000000e+00 : bf16
    %78 = vector.broadcast %cst_39 : bf16 to vector<16x256xbf16>
    %79 = arith.addf %78, %77 : vector<16x256xbf16>
    %80 = arith.mulf %74, %79 : vector<16x256xbf16>
    %81 = vector.extract_strided_slice %48 {offsets = [0, 1], sizes = [16, 1], strides = [1, 1]} : vector<16x3xf32> to vector<16x1xf32>
    %82 = arith.truncf %81 : vector<16x1xf32> to vector<16x1xbf16>
    %83 = vector.broadcast %82 : vector<16x1xbf16> to vector<16x256xbf16>
    %84 = arith.mulf %80, %83 : vector<16x256xbf16>
    %c256 = arith.constant 256 : index
    %c0_40 = arith.constant 0 : index
    %85 = vector.load %arg4[%c256, %c0_40] : memref<768x128xbf16, #tpu.memory_space<vmem>>, vector<256x128xbf16>
    %cst_41 = arith.constant dense<0.000000e+00> : vector<16x128xf32>
    %86 = tpu.matmul %84, %85, %cst_41 {dimension_numbers = #tpu.dot_dimension_numbers<[1], [0], [0], [1], [0, 0, 1, 1], [], []>} : vector<16x256xbf16>, vector<256x128xbf16>, vector<16x128xf32> -> vector<16x128xf32>
    %87 = vector.extract_strided_slice %46 {offsets = [0, 1], sizes = [16, 1], strides = [1, 1]} : vector<16x3xf32> to vector<16x1xf32>
    %c1 = arith.constant 1 : index
    %c0_42 = arith.constant 0 : index
    %88 = vector.load %arg5[%c1, %c0_42] : memref<3x128xf32, #tpu.memory_space<vmem>>, vector<1x128xf32>
    %89 = vector.broadcast %87 : vector<16x1xf32> to vector<16x128xf32>
    %90 = vector.broadcast %88 : vector<1x128xf32> to vector<16x128xf32>
    %91 = arith.mulf %89, %90 : vector<16x128xf32>
    %92 = arith.addf %86, %91 : vector<16x128xf32>
    %93 = arith.addf %73, %92 : vector<16x128xf32>
    %94 = vector.extract_strided_slice %54 {offsets = [0, 512], sizes = [16, 256], strides = [1, 1]} : vector<16x768xbf16> to vector<16x256xbf16>
    %cst_43 = arith.constant 7.070310e-01 : bf16
    %95 = vector.broadcast %cst_43 : bf16 to vector<16x256xbf16>
    %96 = arith.mulf %94, %95 : vector<16x256xbf16>
    %97 = math.erf %96 : vector<16x256xbf16>
    %cst_44 = arith.constant 1.000000e+00 : bf16
    %98 = vector.broadcast %cst_44 : bf16 to vector<16x256xbf16>
    %99 = arith.addf %98, %97 : vector<16x256xbf16>
    %100 = arith.mulf %94, %99 : vector<16x256xbf16>
    %101 = vector.extract_strided_slice %48 {offsets = [0, 2], sizes = [16, 1], strides = [1, 1]} : vector<16x3xf32> to vector<16x1xf32>
    %102 = arith.truncf %101 : vector<16x1xf32> to vector<16x1xbf16>
    %103 = vector.broadcast %102 : vector<16x1xbf16> to vector<16x256xbf16>
    %104 = arith.mulf %100, %103 : vector<16x256xbf16>
    %c512 = arith.constant 512 : index
    %c0_45 = arith.constant 0 : index
    %105 = vector.load %arg4[%c512, %c0_45] : memref<768x128xbf16, #tpu.memory_space<vmem>>, vector<256x128xbf16>
    %cst_46 = arith.constant dense<0.000000e+00> : vector<16x128xf32>
    %106 = tpu.matmul %104, %105, %cst_46 {dimension_numbers = #tpu.dot_dimension_numbers<[1], [0], [0], [1], [0, 0, 1, 1], [], []>} : vector<16x256xbf16>, vector<256x128xbf16>, vector<16x128xf32> -> vector<16x128xf32>
    %107 = vector.extract_strided_slice %46 {offsets = [0, 2], sizes = [16, 1], strides = [1, 1]} : vector<16x3xf32> to vector<16x1xf32>
    %c2 = arith.constant 2 : index
    %c0_47 = arith.constant 0 : index
    %108 = vector.load %arg5[%c2, %c0_47] : memref<3x128xf32, #tpu.memory_space<vmem>>, vector<1x128xf32>
    %109 = vector.broadcast %107 : vector<16x1xf32> to vector<16x128xf32>
    %110 = vector.broadcast %108 : vector<1x128xf32> to vector<16x128xf32>
    %111 = arith.mulf %109, %110 : vector<16x128xf32>
    %112 = arith.addf %106, %111 : vector<16x128xf32>
    %113 = arith.addf %93, %112 : vector<16x128xf32>
    %c0_48 = arith.constant 0 : index
    %c0_49 = arith.constant 0 : index
    %114 = vector.load %arg14[%c0_48, %c0_49] : memref<16x128xf32, #tpu.memory_space<vmem>>, vector<16x128xf32>
    tpu.vector_store %arg14[%c0_48, %c0_49], %113 {strides = array<i32>} : memref<16x128xf32, #tpu.memory_space<vmem>>, vector<16x128xf32>,
    return
  }
  func.func @transform_0(%arg0: i32) -> (i32, i32) {
    %c0_i32 = arith.constant 0 : i32
    %c0_i32_0 = arith.constant 0 : i32
    return %arg0, %c0_i32 : i32, i32
  }
  func.func @transform_1(%arg0: i32) -> (i32, i32) {
    %c0_i32 = arith.constant 0 : i32
    %c0_i32_0 = arith.constant 0 : i32
    %c0_i32_1 = arith.constant 0 : i32
    return %c0_i32, %c0_i32_0 : i32, i32
  }
  func.func @transform_2(%arg0: i32) -> (i32, i32) {
    %c0_i32 = arith.constant 0 : i32
    %c0_i32_0 = arith.constant 0 : i32
    %c0_i32_1 = arith.constant 0 : i32
    return %c0_i32, %c0_i32_0 : i32, i32
  }
  func.func @transform_3(%arg0: i32) -> (i32, i32) {
    %c0_i32 = arith.constant 0 : i32
    %c0_i32_0 = arith.constant 0 : i32
    %c0_i32_1 = arith.constant 0 : i32
    return %c0_i32, %c0_i32_0 : i32, i32
  }
  func.func @transform_4(%arg0: i32) -> (i32, i32) {
    %c0_i32 = arith.constant 0 : i32
    %c0_i32_0 = arith.constant 0 : i32
    %c0_i32_1 = arith.constant 0 : i32
    return %c0_i32, %c0_i32_0 : i32, i32
  }
  func.func @transform_5(%arg0: i32) -> (i32, i32) {
    %c0_i32 = arith.constant 0 : i32
    %c0_i32_0 = arith.constant 0 : i32
    %c0_i32_1 = arith.constant 0 : i32
    return %c0_i32, %c0_i32_0 : i32, i32
  }
  func.func @transform_6(%arg0: i32) -> (i32, i32) {
    %c0_i32 = arith.constant 0 : i32
    %c0_i32_0 = arith.constant 0 : i32
    %c0_i32_1 = arith.constant 0 : i32
    return %c0_i32, %c0_i32_0 : i32, i32
  }
  func.func @transform_7(%arg0: i32) -> (i32, i32) {
    %c0_i32 = arith.constant 0 : i32
    %c0_i32_0 = arith.constant 0 : i32
    %c0_i32_1 = arith.constant 0 : i32
    return %c0_i32, %c0_i32_0 : i32, i32
  }
  func.func @transform_8(%arg0: i32) -> (i32, i32) {
    %c0_i32 = arith.constant 0 : i32
    %c0_i32_0 = arith.constant 0 : i32
    %c0_i32_1 = arith.constant 0 : i32
    return %c0_i32, %c0_i32_0 : i32, i32
  }
  func.func @transform_9(%arg0: i32) -> (i32, i32) {
    %c0_i32 = arith.constant 0 : i32
    %c0_i32_0 = arith.constant 0 : i32
    %c0_i32_1 = arith.constant 0 : i32
    return %c0_i32, %c0_i32_0 : i32, i32
  }
  func.func @transform_10(%arg0: i32) -> (i32, i32) {
    %c0_i32 = arith.constant 0 : i32
    %c0_i32_0 = arith.constant 0 : i32
    %c0_i32_1 = arith.constant 0 : i32
    return %c0_i32, %c0_i32_0 : i32, i32
  }
  func.func @transform_11(%arg0: i32) -> (i32, i32) {
    %c0_i32 = arith.constant 0 : i32
    %c0_i32_0 = arith.constant 0 : i32
    %c0_i32_1 = arith.constant 0 : i32
    return %c0_i32, %c0_i32_0 : i32, i32
  }
  func.func @transform_12(%arg0: i32) -> (i32, i32) {
    %c0_i32 = arith.constant 0 : i32
    %c0_i32_0 = arith.constant 0 : i32
    %c0_i32_1 = arith.constant 0 : i32
    return %c0_i32, %c0_i32_0 : i32, i32
  }
  func.func @transform_13(%arg0: i32) -> (i32, i32) {
    %c0_i32 = arith.constant 0 : i32
    %c0_i32_0 = arith.constant 0 : i32
    return %arg0, %c0_i32 : i32, i32
  }
}

module attributes {stable_mosaic.version = 11 : i64} {
  func.func @_mmoe_kernel(%arg0: i32, %arg1: memref<16x128xbf16, #tpu.memory_space<vmem>>, %arg2: memref<128x768xbf16, #tpu.memory_space<vmem>>, %arg3: memref<1x768xf32, #tpu.memory_space<vmem>>, %arg4: memref<768x128xbf16, #tpu.memory_space<vmem>>, %arg5: memref<3x128xf32, #tpu.memory_space<vmem>>, %arg6: memref<128x128xbf16, #tpu.memory_space<vmem>>, %arg7: memref<1x128xf32, #tpu.memory_space<vmem>>, %arg8: memref<128x128xbf16, #tpu.memory_space<vmem>>, %arg9: memref<1x128xf32, #tpu.memory_space<vmem>>, %arg10: memref<128x128xbf16, #tpu.memory_space<vmem>>, %arg11: memref<1x128xf32, #tpu.memory_space<vmem>>, %arg12: memref<128x3xbf16, #tpu.memory_space<vmem>>, %arg13: memref<1x3xf32, #tpu.memory_space<vmem>>, %arg14: memref<16x128xf32, #tpu.memory_space<vmem>>) attributes {dimension_semantics = [#tpu.dimension_semantics<parallel>], iteration_bounds = array<i64: 2>, scalar_prefetch = 0 : i64, scratch_operands = 0 : i64, tpu.core_type = #tpu.core_type<tc>, window_params = [{transform_indices = @transform_0, window_bounds = array<i64: 16, 128>}, {pipeline_mode = #tpu.pipeline_mode<synchronous>, transform_indices = @transform_1, window_bounds = array<i64: 128, 768>}, {pipeline_mode = #tpu.pipeline_mode<synchronous>, transform_indices = @transform_2, window_bounds = array<i64: 1, 768>}, {pipeline_mode = #tpu.pipeline_mode<synchronous>, transform_indices = @transform_3, window_bounds = array<i64: 768, 128>}, {pipeline_mode = #tpu.pipeline_mode<synchronous>, transform_indices = @transform_4, window_bounds = array<i64: 3, 128>}, {pipeline_mode = #tpu.pipeline_mode<synchronous>, transform_indices = @transform_5, window_bounds = array<i64: 128, 128>}, {pipeline_mode = #tpu.pipeline_mode<synchronous>, transform_indices = @transform_6, window_bounds = array<i64: 1, 128>}, {pipeline_mode = #tpu.pipeline_mode<synchronous>, transform_indices = @transform_7, window_bounds = array<i64: 128, 128>}, {pipeline_mode = #tpu.pipeline_mode<synchronous>, transform_indices = @transform_8, window_bounds = array<i64: 1, 128>}, {pipeline_mode = #tpu.pipeline_mode<synchronous>, transform_indices = @transform_9, window_bounds = array<i64: 128, 128>}, {pipeline_mode = #tpu.pipeline_mode<synchronous>, transform_indices = @transform_10, window_bounds = array<i64: 1, 128>}, {pipeline_mode = #tpu.pipeline_mode<synchronous>, transform_indices = @transform_11, window_bounds = array<i64: 128, 3>}, {pipeline_mode = #tpu.pipeline_mode<synchronous>, transform_indices = @transform_12, window_bounds = array<i64: 1, 3>}, {transform_indices = @transform_13, window_bounds = array<i64: 16, 128>}]} {
    %c0 = arith.constant 0 : index
    %c0_0 = arith.constant 0 : index
    %0 = vector.load %arg1[%c0, %c0_0] : memref<16x128xbf16, #tpu.memory_space<vmem>>, vector<16x128xbf16>
    %c0_1 = arith.constant 0 : index
    %c0_2 = arith.constant 0 : index
    %1 = vector.load %arg6[%c0_1, %c0_2] : memref<128x128xbf16, #tpu.memory_space<vmem>>, vector<128x128xbf16>
    %cst = arith.constant dense<0.000000e+00> : vector<16x128xf32>
    %2 = tpu.matmul %0, %1, %cst {dimension_numbers = #tpu.dot_dimension_numbers<[1], [0], [0], [1], [0, 0, 1, 1], [], []>} : vector<16x128xbf16>, vector<128x128xbf16>, vector<16x128xf32> -> vector<16x128xf32>
    %c0_3 = arith.constant 0 : index
    %c0_4 = arith.constant 0 : index
    %3 = vector.load %arg7[%c0_3, %c0_4] : memref<1x128xf32, #tpu.memory_space<vmem>>, vector<1x128xf32>
    %4 = vector.broadcast %3 : vector<1x128xf32> to vector<16x128xf32>
    %5 = arith.addf %2, %4 : vector<16x128xf32>
    %6 = arith.truncf %5 : vector<16x128xf32> to vector<16x128xbf16>
    %c0_5 = arith.constant 0 : index
    %c0_6 = arith.constant 0 : index
    %7 = vector.load %arg8[%c0_5, %c0_6] : memref<128x128xbf16, #tpu.memory_space<vmem>>, vector<128x128xbf16>
    %cst_7 = arith.constant dense<0.000000e+00> : vector<16x128xf32>
    %8 = tpu.matmul %6, %7, %cst_7 {dimension_numbers = #tpu.dot_dimension_numbers<[1], [0], [0], [1], [0, 0, 1, 1], [], []>} : vector<16x128xbf16>, vector<128x128xbf16>, vector<16x128xf32> -> vector<16x128xf32>
    %c0_8 = arith.constant 0 : index
    %c0_9 = arith.constant 0 : index
    %9 = vector.load %arg9[%c0_8, %c0_9] : memref<1x128xf32, #tpu.memory_space<vmem>>, vector<1x128xf32>
    %10 = vector.broadcast %9 : vector<1x128xf32> to vector<16x128xf32>
    %11 = arith.addf %8, %10 : vector<16x128xf32>
    %cst_10 = arith.constant 0.000000e+00 : f32
    %12 = vector.broadcast %cst_10 : f32 to vector<16x128xf32>
    %13 = arith.maximumf %11, %12 : vector<16x128xf32>
    %14 = arith.truncf %13 : vector<16x128xf32> to vector<16x128xbf16>
    %c0_11 = arith.constant 0 : index
    %c0_12 = arith.constant 0 : index
    %15 = vector.load %arg10[%c0_11, %c0_12] : memref<128x128xbf16, #tpu.memory_space<vmem>>, vector<128x128xbf16>
    %cst_13 = arith.constant dense<0.000000e+00> : vector<16x128xf32>
    %16 = tpu.matmul %14, %15, %cst_13 {dimension_numbers = #tpu.dot_dimension_numbers<[1], [0], [0], [1], [0, 0, 1, 1], [], []>} : vector<16x128xbf16>, vector<128x128xbf16>, vector<16x128xf32> -> vector<16x128xf32>
    %c0_14 = arith.constant 0 : index
    %c0_15 = arith.constant 0 : index
    %17 = vector.load %arg11[%c0_14, %c0_15] : memref<1x128xf32, #tpu.memory_space<vmem>>, vector<1x128xf32>
    %18 = vector.broadcast %17 : vector<1x128xf32> to vector<16x128xf32>
    %19 = arith.addf %16, %18 : vector<16x128xf32>
    %cst_16 = arith.constant dense<0xFF800000> : vector<16xf32>
    %20 = vector.multi_reduction <maximumf>, %19, %cst_16 [1] : vector<16x128xf32> to vector<16xf32>
    %21 = vector.shape_cast %20 : vector<16xf32> to vector<16x1xf32>
    %22 = vector.broadcast %21 : vector<16x1xf32> to vector<16x128xf32>
    %23 = arith.subf %19, %22 : vector<16x128xf32>
    %24 = math.exp %23 : vector<16x128xf32>
    %cst_17 = arith.constant dense<0.000000e+00> : vector<16xf32>
    %25 = vector.multi_reduction <add>, %24, %cst_17 [1] : vector<16x128xf32> to vector<16xf32>
    %26 = vector.shape_cast %25 : vector<16xf32> to vector<16x1xf32>
    %27 = tpu.reciprocal %26 {approx = true} : vector<16x1xf32> -> vector<16x1xf32>
    %28 = vector.broadcast %27 : vector<16x1xf32> to vector<16x128xf32>
    %29 = arith.mulf %24, %28 : vector<16x128xf32>
    %30 = arith.mulf %13, %29 : vector<16x128xf32>
    %31 = arith.truncf %30 : vector<16x128xf32> to vector<16x128xbf16>
    %c0_18 = arith.constant 0 : index
    %c0_19 = arith.constant 0 : index
    %32 = vector.load %arg12[%c0_18, %c0_19] : memref<128x3xbf16, #tpu.memory_space<vmem>>, vector<128x3xbf16>
    %cst_20 = arith.constant dense<0.000000e+00> : vector<16x3xf32>
    %33 = tpu.matmul %31, %32, %cst_20 {dimension_numbers = #tpu.dot_dimension_numbers<[1], [0], [0], [1], [0, 0, 1, 1], [], []>} : vector<16x128xbf16>, vector<128x3xbf16>, vector<16x3xf32> -> vector<16x3xf32>
    %c0_21 = arith.constant 0 : index
    %c0_22 = arith.constant 0 : index
    %34 = vector.load %arg13[%c0_21, %c0_22] : memref<1x3xf32, #tpu.memory_space<vmem>>, vector<1x3xf32>
    %35 = vector.broadcast %34 : vector<1x3xf32> to vector<16x3xf32>
    %36 = arith.addf %33, %35 : vector<16x3xf32>
    %cst_23 = arith.constant dense<0xFF800000> : vector<16xf32>
    %37 = vector.multi_reduction <maximumf>, %36, %cst_23 [1] : vector<16x3xf32> to vector<16xf32>
    %38 = vector.shape_cast %37 : vector<16xf32> to vector<16x1xf32>
    %39 = vector.broadcast %38 : vector<16x1xf32> to vector<16x3xf32>
    %40 = arith.subf %36, %39 : vector<16x3xf32>
    %41 = math.exp %40 : vector<16x3xf32>
    %cst_24 = arith.constant dense<0.000000e+00> : vector<16xf32>
    %42 = vector.multi_reduction <add>, %41, %cst_24 [1] : vector<16x3xf32> to vector<16xf32>
    %43 = vector.shape_cast %42 : vector<16xf32> to vector<16x1xf32>
    %44 = tpu.reciprocal %43 {approx = true} : vector<16x1xf32> -> vector<16x1xf32>
    %45 = vector.broadcast %44 : vector<16x1xf32> to vector<16x3xf32>
    %46 = arith.mulf %41, %45 : vector<16x3xf32>
    %cst_25 = arith.constant 5.000000e-01 : f32
    %47 = vector.broadcast %cst_25 : f32 to vector<16x3xf32>
    %48 = arith.mulf %46, %47 : vector<16x3xf32>
    %c0_26 = arith.constant 0 : index
    %c0_27 = arith.constant 0 : index
    %49 = vector.load %arg2[%c0_26, %c0_27] : memref<128x768xbf16, #tpu.memory_space<vmem>>, vector<128x768xbf16>
    %cst_28 = arith.constant dense<0.000000e+00> : vector<16x768xf32>
    %50 = tpu.matmul %0, %49, %cst_28 {dimension_numbers = #tpu.dot_dimension_numbers<[1], [0], [0], [1], [0, 0, 1, 1], [], []>} : vector<16x128xbf16>, vector<128x768xbf16>, vector<16x768xf32> -> vector<16x768xf32>
    %c0_29 = arith.constant 0 : index
    %c0_30 = arith.constant 0 : index
    %51 = vector.load %arg3[%c0_29, %c0_30] : memref<1x768xf32, #tpu.memory_space<vmem>>, vector<1x768xf32>
    %52 = vector.broadcast %51 : vector<1x768xf32> to vector<16x768xf32>
    %53 = arith.addf %50, %52 : vector<16x768xf32>
    %54 = arith.truncf %53 : vector<16x768xf32> to vector<16x768xbf16>
    %55 = vector.extract_strided_slice %54 {offsets = [0, 0], sizes = [16, 256], strides = [1, 1]} : vector<16x768xbf16> to vector<16x256xbf16>
    %cst_31 = arith.constant 7.070310e-01 : bf16
    %56 = vector.broadcast %cst_31 : bf16 to vector<16x256xbf16>
    %57 = arith.mulf %55, %56 : vector<16x256xbf16>
    %58 = math.erf %57 : vector<16x256xbf16>
    %cst_32 = arith.constant 1.000000e+00 : bf16
    %59 = vector.broadcast %cst_32 : bf16 to vector<16x256xbf16>
    %60 = arith.addf %59, %58 : vector<16x256xbf16>
    %61 = arith.mulf %55, %60 : vector<16x256xbf16>
    %62 = vector.extract_strided_slice %48 {offsets = [0, 0], sizes = [16, 1], strides = [1, 1]} : vector<16x3xf32> to vector<16x1xf32>
    %63 = arith.truncf %62 : vector<16x1xf32> to vector<16x1xbf16>
    %64 = vector.broadcast %63 : vector<16x1xbf16> to vector<16x256xbf16>
    %65 = arith.mulf %61, %64 : vector<16x256xbf16>
    %c0_33 = arith.constant 0 : index
    %c0_34 = arith.constant 0 : index
    %66 = vector.load %arg4[%c0_33, %c0_34] : memref<768x128xbf16, #tpu.memory_space<vmem>>, vector<256x128xbf16>
    %cst_35 = arith.constant dense<0.000000e+00> : vector<16x128xf32>
    %67 = tpu.matmul %65, %66, %cst_35 {dimension_numbers = #tpu.dot_dimension_numbers<[1], [0], [0], [1], [0, 0, 1, 1], [], []>} : vector<16x256xbf16>, vector<256x128xbf16>, vector<16x128xf32> -> vector<16x128xf32>
    %68 = vector.extract_strided_slice %46 {offsets = [0, 0], sizes = [16, 1], strides = [1, 1]} : vector<16x3xf32> to vector<16x1xf32>
    %c0_36 = arith.constant 0 : index
    %c0_37 = arith.constant 0 : index
    %69 = vector.load %arg5[%c0_36, %c0_37] : memref<3x128xf32, #tpu.memory_space<vmem>>, vector<1x128xf32>
    %70 = vector.broadcast %68 : vector<16x1xf32> to vector<16x128xf32>
    %71 = vector.broadcast %69 : vector<1x128xf32> to vector<16x128xf32>
    %72 = arith.mulf %70, %71 : vector<16x128xf32>
    %73 = arith.addf %67, %72 : vector<16x128xf32>
    %74 = vector.extract_strided_slice %54 {offsets = [0, 256], sizes = [16, 256], strides = [1, 1]} : vector<16x768xbf16> to vector<16x256xbf16>
    %cst_38 = arith.constant 7.070310e-01 : bf16
    %75 = vector.broadcast %cst_38 : bf16 to vector<16x256xbf16>
    %76 = arith.mulf %74, %75 : vector<16x256xbf16>
    %77 = math.erf %76 : vector<16x256xbf16>
    %cst_39 = arith.constant 1.000000e+00 : bf16
    %78 = vector.broadcast %cst_39 : bf16 to vector<16x256xbf16>
    %79 = arith.addf %78, %77 : vector<16x256xbf16>
    %80 = arith.mulf %74, %79 : vector<16x256xbf16>
    %81 = vector.extract_strided_slice %48 {offsets = [0, 1], sizes = [16, 1], strides = [1, 1]} : vector<16x3xf32> to vector<16x1xf32>
    %82 = arith.truncf %81 : vector<16x1xf32> to vector<16x1xbf16>
    %83 = vector.broadcast %82 : vector<16x1xbf16> to vector<16x256xbf16>
    %84 = arith.mulf %80, %83 : vector<16x256xbf16>
    %c256 = arith.constant 256 : index
    %c0_40 = arith.constant 0 : index
    %85 = vector.load %arg4[%c256, %c0_40] : memref<768x128xbf16, #tpu.memory_space<vmem>>, vector<256x128xbf16>
    %cst_41 = arith.constant dense<0.000000e+00> : vector<16x128xf32>
    %86 = tpu.matmul %84, %85, %cst_41 {dimension_numbers = #tpu.dot_dimension_numbers<[1], [0], [0], [1], [0, 0, 1, 1], [], []>} : vector<16x256xbf16>, vector<256x128xbf16>, vector<16x128xf32> -> vector<16x128xf32>
    %87 = vector.extract_strided_slice %46 {offsets = [0, 1], sizes = [16, 1], strides = [1, 1]} : vector<16x3xf32> to vector<16x1xf32>
    %c1 = arith.constant 1 : index
    %c0_42 = arith.constant 0 : index
    %88 = vector.load %arg5[%c1, %c0_42] : memref<3x128xf32, #tpu.memory_space<vmem>>, vector<1x128xf32>
    %89 = vector.broadcast %87 : vector<16x1xf32> to vector<16x128xf32>
    %90 = vector.broadcast %88 : vector<1x128xf32> to vector<16x128xf32>
    %91 = arith.mulf %89, %90 : vector<16x128xf32>
    %92 = arith.addf %86, %91 : vector<16x128xf32>
    %93 = arith.addf %73, %92 : vector<16x128xf32>
    %94 = vector.extract_strided_slice %54 {offsets = [0, 512], sizes = [16, 256], strides = [1, 1]} : vector<16x768xbf16> to vector<16x256xbf16>
    %cst_43 = arith.constant 7.070310e-01 : bf16
    %95 = vector.broadcast %cst_43 : bf16 to vector<16x256xbf16>
    %96 = arith.mulf %94, %95 : vector<16x256xbf16>
    %97 = math.erf %96 : vector<16x256xbf16>
    %cst_44 = arith.constant 1.000000e+00 : bf16
    %98 = vector.broadcast %cst_44 : bf16 to vector<16x256xbf16>
    %99 = arith.addf %98, %97 : vector<16x256xbf16>
    %100 = arith.mulf %94, %99 : vector<16x256xbf16>
    %101 = vector.extract_strided_slice %48 {offsets = [0, 2], sizes = [16, 1], strides = [1, 1]} : vector<16x3xf32> to vector<16x1xf32>
    %102 = arith.truncf %101 : vector<16x1xf32> to vector<16x1xbf16>
    %103 = vector.broadcast %102 : vector<16x1xbf16> to vector<16x256xbf16>
    %104 = arith.mulf %100, %103 : vector<16x256xbf16>
    %c512 = arith.constant 512 : index
    %c0_45 = arith.constant 0 : index
    %105 = vector.load %arg4[%c512, %c0_45] : memref<768x128xbf16, #tpu.memory_space<vmem>>, vector<256x128xbf16>
    %cst_46 = arith.constant dense<0.000000e+00> : vector<16x128xf32>
    %106 = tpu.matmul %104, %105, %cst_46 {dimension_numbers = #tpu.dot_dimension_numbers<[1], [0], [0], [1], [0, 0, 1, 1], [], []>} : vector<16x256xbf16>, vector<256x128xbf16>, vector<16x128xf32> -> vector<16x128xf32>
    %107 = vector.extract_strided_slice %46 {offsets = [0, 2], sizes = [16, 1], strides = [1, 1]} : vector<16x3xf32> to vector<16x1xf32>
    %c2 = arith.constant 2 : index
    %c0_47 = arith.constant 0 : index
    %108 = vector.load %arg5[%c2, %c0_47] : memref<3x128xf32, #tpu.memory_space<vmem>>, vector<1x128xf32>
    %109 = vector.broadcast %107 : vector<16x1xf32> to vector<16x128xf32>
    %110 = vector.broadcast %108 : vector<1x128xf32> to vector<16x128xf32>
    %111 = arith.mulf %109, %110 : vector<16x128xf32>
    %112 = arith.addf %106, %111 : vector<16x128xf32>
    %113 = arith.addf %93, %112 : vector<16x128xf32>
    %c0_48 = arith.constant 0 : index
    %c0_49 = arith.constant 0 : index
    %114 = vector.load %arg14[%c0_48, %c0_49] : memref<16x128xf32, #tpu.memory_space<vmem>>, vector<16x128xf32>
    tpu.vector_store %arg14[%c0_48, %c0_49], %113 {strides = array<i32>} : memref<16x128xf32, #tpu.memory_space<vmem>>, vector<16x128xf32>,
    return
  }
  func.func @transform_0(%arg0: i32) -> (i32, i32) {
    %c0_i32 = arith.constant 0 : i32
    %c0_i32_0 = arith.constant 0 : i32
    return %arg0, %c0_i32 : i32, i32
  }
  func.func @transform_1(%arg0: i32) -> (i32, i32) {
    %c0_i32 = arith.constant 0 : i32
    %c0_i32_0 = arith.constant 0 : i32
    %c0_i32_1 = arith.constant 0 : i32
    return %c0_i32, %c0_i32_0 : i32, i32
  }
  func.func @transform_2(%arg0: i32) -> (i32, i32) {
    %c0_i32 = arith.constant 0 : i32
    %c0_i32_0 = arith.constant 0 : i32
    %c0_i32_1 = arith.constant 0 : i32
    return %c0_i32, %c0_i32_0 : i32, i32
  }
  func.func @transform_3(%arg0: i32) -> (i32, i32) {
    %c0_i32 = arith.constant 0 : i32
    %c0_i32_0 = arith.constant 0 : i32
    %c0_i32_1 = arith.constant 0 : i32
    return %c0_i32, %c0_i32_0 : i32, i32
  }
  func.func @transform_4(%arg0: i32) -> (i32, i32) {
    %c0_i32 = arith.constant 0 : i32
    %c0_i32_0 = arith.constant 0 : i32
    %c0_i32_1 = arith.constant 0 : i32
    return %c0_i32, %c0_i32_0 : i32, i32
  }
  func.func @transform_5(%arg0: i32) -> (i32, i32) {
    %c0_i32 = arith.constant 0 : i32
    %c0_i32_0 = arith.constant 0 : i32
    %c0_i32_1 = arith.constant 0 : i32
    return %c0_i32, %c0_i32_0 : i32, i32
  }
  func.func @transform_6(%arg0: i32) -> (i32, i32) {
    %c0_i32 = arith.constant 0 : i32
    %c0_i32_0 = arith.constant 0 : i32
    %c0_i32_1 = arith.constant 0 : i32
    return %c0_i32, %c0_i32_0 : i32, i32
  }
  func.func @transform_7(%arg0: i32) -> (i32, i32) {
    %c0_i32 = arith.constant 0 : i32
    %c0_i32_0 = arith.constant 0 : i32
    %c0_i32_1 = arith.constant 0 : i32
    return %c0_i32, %c0_i32_0 : i32, i32
  }
  func.func @transform_8(%arg0: i32) -> (i32, i32) {
    %c0_i32 = arith.constant 0 : i32
    %c0_i32_0 = arith.constant 0 : i32
    %c0_i32_1 = arith.constant 0 : i32
    return %c0_i32, %c0_i32_0 : i32, i32
  }
  func.func @transform_9(%arg0: i32) -> (i32, i32) {
    %c0_i32 = arith.constant 0 : i32
    %c0_i32_0 = arith.constant 0 : i32
    %c0_i32_1 = arith.constant 0 : i32
    return %c0_i32, %c0_i32_0 : i32, i32
  }
  func.func @transform_10(%arg0: i32) -> (i32, i32) {
    %c0_i32 = arith.constant 0 : i32
    %c0_i32_0 = arith.constant 0 : i32
    %c0_i32_1 = arith.constant 0 : i32
    return %c0_i32, %c0_i32_0 : i32, i32
  }
  func.func @transform_11(%arg0: i32) -> (i32, i32) {
    %c0_i32 = arith.constant 0 : i32
    %c0_i32_0 = arith.constant 0 : i32
    %c0_i32_1 = arith.constant 0 : i32
    return %c0_i32, %c0_i32_0 : i32, i32
  }
  func.func @transform_12(%arg0: i32) -> (i32, i32) {
    %c0_i32 = arith.constant 0 : i32
    %c0_i32_0 = arith.constant 0 : i32
    %c0_i32_1 = arith.constant 0 : i32
    return %c0_i32, %c0_i32_0 : i32, i32
  }
  func.func @transform_13(%arg0: i32) -> (i32, i32) {
    %c0_i32 = arith.constant 0 : i32
    %c0_i32_0 = arith.constant 0 : i32
    return %arg0, %c0_i32 : i32, i32
  }
}

module attributes {stable_mosaic.version = 11 : i64} {
  func.func @_mmoe_kernel(%arg0: i32, %arg1: memref<16x128xbf16, #tpu.memory_space<vmem>>, %arg2: memref<128x768xbf16, #tpu.memory_space<vmem>>, %arg3: memref<1x768xf32, #tpu.memory_space<vmem>>, %arg4: memref<768x128xbf16, #tpu.memory_space<vmem>>, %arg5: memref<3x128xf32, #tpu.memory_space<vmem>>, %arg6: memref<128x128xbf16, #tpu.memory_space<vmem>>, %arg7: memref<1x128xf32, #tpu.memory_space<vmem>>, %arg8: memref<128x128xbf16, #tpu.memory_space<vmem>>, %arg9: memref<1x128xf32, #tpu.memory_space<vmem>>, %arg10: memref<128x128xbf16, #tpu.memory_space<vmem>>, %arg11: memref<1x128xf32, #tpu.memory_space<vmem>>, %arg12: memref<128x3xbf16, #tpu.memory_space<vmem>>, %arg13: memref<1x3xf32, #tpu.memory_space<vmem>>, %arg14: memref<16x128xf32, #tpu.memory_space<vmem>>) attributes {dimension_semantics = [#tpu.dimension_semantics<parallel>], iteration_bounds = array<i64: 2>, scalar_prefetch = 0 : i64, scratch_operands = 0 : i64, tpu.core_type = #tpu.core_type<tc>, window_params = [{transform_indices = @transform_0, window_bounds = array<i64: 16, 128>}, {pipeline_mode = #tpu.pipeline_mode<synchronous>, transform_indices = @transform_1, window_bounds = array<i64: 128, 768>}, {pipeline_mode = #tpu.pipeline_mode<synchronous>, transform_indices = @transform_2, window_bounds = array<i64: 1, 768>}, {pipeline_mode = #tpu.pipeline_mode<synchronous>, transform_indices = @transform_3, window_bounds = array<i64: 768, 128>}, {pipeline_mode = #tpu.pipeline_mode<synchronous>, transform_indices = @transform_4, window_bounds = array<i64: 3, 128>}, {pipeline_mode = #tpu.pipeline_mode<synchronous>, transform_indices = @transform_5, window_bounds = array<i64: 128, 128>}, {pipeline_mode = #tpu.pipeline_mode<synchronous>, transform_indices = @transform_6, window_bounds = array<i64: 1, 128>}, {pipeline_mode = #tpu.pipeline_mode<synchronous>, transform_indices = @transform_7, window_bounds = array<i64: 128, 128>}, {pipeline_mode = #tpu.pipeline_mode<synchronous>, transform_indices = @transform_8, window_bounds = array<i64: 1, 128>}, {pipeline_mode = #tpu.pipeline_mode<synchronous>, transform_indices = @transform_9, window_bounds = array<i64: 128, 128>}, {pipeline_mode = #tpu.pipeline_mode<synchronous>, transform_indices = @transform_10, window_bounds = array<i64: 1, 128>}, {pipeline_mode = #tpu.pipeline_mode<synchronous>, transform_indices = @transform_11, window_bounds = array<i64: 128, 3>}, {pipeline_mode = #tpu.pipeline_mode<synchronous>, transform_indices = @transform_12, window_bounds = array<i64: 1, 3>}, {transform_indices = @transform_13, window_bounds = array<i64: 16, 128>}]} {
    %c0 = arith.constant 0 : index
    %c0_0 = arith.constant 0 : index
    %0 = vector.load %arg1[%c0, %c0_0] : memref<16x128xbf16, #tpu.memory_space<vmem>>, vector<16x128xbf16>
    %c0_1 = arith.constant 0 : index
    %c0_2 = arith.constant 0 : index
    %1 = vector.load %arg6[%c0_1, %c0_2] : memref<128x128xbf16, #tpu.memory_space<vmem>>, vector<128x128xbf16>
    %cst = arith.constant dense<0.000000e+00> : vector<16x128xf32>
    %2 = tpu.matmul %0, %1, %cst {dimension_numbers = #tpu.dot_dimension_numbers<[1], [0], [0], [1], [0, 0, 1, 1], [], []>} : vector<16x128xbf16>, vector<128x128xbf16>, vector<16x128xf32> -> vector<16x128xf32>
    %c0_3 = arith.constant 0 : index
    %c0_4 = arith.constant 0 : index
    %3 = vector.load %arg7[%c0_3, %c0_4] : memref<1x128xf32, #tpu.memory_space<vmem>>, vector<1x128xf32>
    %4 = vector.broadcast %3 : vector<1x128xf32> to vector<16x128xf32>
    %5 = arith.addf %2, %4 : vector<16x128xf32>
    %6 = arith.truncf %5 : vector<16x128xf32> to vector<16x128xbf16>
    %c0_5 = arith.constant 0 : index
    %c0_6 = arith.constant 0 : index
    %7 = vector.load %arg8[%c0_5, %c0_6] : memref<128x128xbf16, #tpu.memory_space<vmem>>, vector<128x128xbf16>
    %cst_7 = arith.constant dense<0.000000e+00> : vector<16x128xf32>
    %8 = tpu.matmul %6, %7, %cst_7 {dimension_numbers = #tpu.dot_dimension_numbers<[1], [0], [0], [1], [0, 0, 1, 1], [], []>} : vector<16x128xbf16>, vector<128x128xbf16>, vector<16x128xf32> -> vector<16x128xf32>
    %c0_8 = arith.constant 0 : index
    %c0_9 = arith.constant 0 : index
    %9 = vector.load %arg9[%c0_8, %c0_9] : memref<1x128xf32, #tpu.memory_space<vmem>>, vector<1x128xf32>
    %10 = vector.broadcast %9 : vector<1x128xf32> to vector<16x128xf32>
    %11 = arith.addf %8, %10 : vector<16x128xf32>
    %cst_10 = arith.constant 0.000000e+00 : f32
    %12 = vector.broadcast %cst_10 : f32 to vector<16x128xf32>
    %13 = arith.maximumf %11, %12 : vector<16x128xf32>
    %14 = arith.truncf %13 : vector<16x128xf32> to vector<16x128xbf16>
    %c0_11 = arith.constant 0 : index
    %c0_12 = arith.constant 0 : index
    %15 = vector.load %arg10[%c0_11, %c0_12] : memref<128x128xbf16, #tpu.memory_space<vmem>>, vector<128x128xbf16>
    %cst_13 = arith.constant dense<0.000000e+00> : vector<16x128xf32>
    %16 = tpu.matmul %14, %15, %cst_13 {dimension_numbers = #tpu.dot_dimension_numbers<[1], [0], [0], [1], [0, 0, 1, 1], [], []>} : vector<16x128xbf16>, vector<128x128xbf16>, vector<16x128xf32> -> vector<16x128xf32>
    %c0_14 = arith.constant 0 : index
    %c0_15 = arith.constant 0 : index
    %17 = vector.load %arg11[%c0_14, %c0_15] : memref<1x128xf32, #tpu.memory_space<vmem>>, vector<1x128xf32>
    %18 = vector.broadcast %17 : vector<1x128xf32> to vector<16x128xf32>
    %19 = arith.addf %16, %18 : vector<16x128xf32>
    %cst_16 = arith.constant dense<0xFF800000> : vector<16xf32>
    %20 = vector.multi_reduction <maximumf>, %19, %cst_16 [1] : vector<16x128xf32> to vector<16xf32>
    %21 = vector.shape_cast %20 : vector<16xf32> to vector<16x1xf32>
    %22 = vector.broadcast %21 : vector<16x1xf32> to vector<16x128xf32>
    %23 = arith.subf %19, %22 : vector<16x128xf32>
    %24 = math.exp %23 : vector<16x128xf32>
    %cst_17 = arith.constant dense<0.000000e+00> : vector<16xf32>
    %25 = vector.multi_reduction <add>, %24, %cst_17 [1] : vector<16x128xf32> to vector<16xf32>
    %26 = vector.shape_cast %25 : vector<16xf32> to vector<16x1xf32>
    %27 = tpu.reciprocal %26 {approx = true} : vector<16x1xf32> -> vector<16x1xf32>
    %28 = vector.broadcast %27 : vector<16x1xf32> to vector<16x128xf32>
    %29 = arith.mulf %24, %28 : vector<16x128xf32>
    %30 = arith.mulf %13, %29 : vector<16x128xf32>
    %31 = arith.truncf %30 : vector<16x128xf32> to vector<16x128xbf16>
    %c0_18 = arith.constant 0 : index
    %c0_19 = arith.constant 0 : index
    %32 = vector.load %arg12[%c0_18, %c0_19] : memref<128x3xbf16, #tpu.memory_space<vmem>>, vector<128x3xbf16>
    %cst_20 = arith.constant dense<0.000000e+00> : vector<16x3xf32>
    %33 = tpu.matmul %31, %32, %cst_20 {dimension_numbers = #tpu.dot_dimension_numbers<[1], [0], [0], [1], [0, 0, 1, 1], [], []>} : vector<16x128xbf16>, vector<128x3xbf16>, vector<16x3xf32> -> vector<16x3xf32>
    %c0_21 = arith.constant 0 : index
    %c0_22 = arith.constant 0 : index
    %34 = vector.load %arg13[%c0_21, %c0_22] : memref<1x3xf32, #tpu.memory_space<vmem>>, vector<1x3xf32>
    %35 = vector.broadcast %34 : vector<1x3xf32> to vector<16x3xf32>
    %36 = arith.addf %33, %35 : vector<16x3xf32>
    %cst_23 = arith.constant dense<0xFF800000> : vector<16xf32>
    %37 = vector.multi_reduction <maximumf>, %36, %cst_23 [1] : vector<16x3xf32> to vector<16xf32>
    %38 = vector.shape_cast %37 : vector<16xf32> to vector<16x1xf32>
    %39 = vector.broadcast %38 : vector<16x1xf32> to vector<16x3xf32>
    %40 = arith.subf %36, %39 : vector<16x3xf32>
    %41 = math.exp %40 : vector<16x3xf32>
    %cst_24 = arith.constant dense<0.000000e+00> : vector<16xf32>
    %42 = vector.multi_reduction <add>, %41, %cst_24 [1] : vector<16x3xf32> to vector<16xf32>
    %43 = vector.shape_cast %42 : vector<16xf32> to vector<16x1xf32>
    %44 = tpu.reciprocal %43 {approx = true} : vector<16x1xf32> -> vector<16x1xf32>
    %45 = vector.broadcast %44 : vector<16x1xf32> to vector<16x3xf32>
    %46 = arith.mulf %41, %45 : vector<16x3xf32>
    %cst_25 = arith.constant 5.000000e-01 : f32
    %47 = vector.broadcast %cst_25 : f32 to vector<16x3xf32>
    %48 = arith.mulf %46, %47 : vector<16x3xf32>
    %c0_26 = arith.constant 0 : index
    %c0_27 = arith.constant 0 : index
    %49 = vector.load %arg2[%c0_26, %c0_27] : memref<128x768xbf16, #tpu.memory_space<vmem>>, vector<128x768xbf16>
    %cst_28 = arith.constant dense<0.000000e+00> : vector<16x768xf32>
    %50 = tpu.matmul %0, %49, %cst_28 {dimension_numbers = #tpu.dot_dimension_numbers<[1], [0], [0], [1], [0, 0, 1, 1], [], []>} : vector<16x128xbf16>, vector<128x768xbf16>, vector<16x768xf32> -> vector<16x768xf32>
    %c0_29 = arith.constant 0 : index
    %c0_30 = arith.constant 0 : index
    %51 = vector.load %arg3[%c0_29, %c0_30] : memref<1x768xf32, #tpu.memory_space<vmem>>, vector<1x768xf32>
    %52 = vector.broadcast %51 : vector<1x768xf32> to vector<16x768xf32>
    %53 = arith.addf %50, %52 : vector<16x768xf32>
    %54 = vector.extract_strided_slice %53 {offsets = [0, 0], sizes = [16, 256], strides = [1, 1]} : vector<16x768xf32> to vector<16x256xf32>
    %cst_31 = arith.constant 0.707106769 : f32
    %55 = vector.broadcast %cst_31 : f32 to vector<16x256xf32>
    %56 = arith.mulf %54, %55 : vector<16x256xf32>
    %57 = math.erf %56 : vector<16x256xf32>
    %cst_32 = arith.constant 1.000000e+00 : f32
    %58 = vector.broadcast %cst_32 : f32 to vector<16x256xf32>
    %59 = arith.addf %58, %57 : vector<16x256xf32>
    %60 = arith.mulf %54, %59 : vector<16x256xf32>
    %61 = vector.extract_strided_slice %48 {offsets = [0, 0], sizes = [16, 1], strides = [1, 1]} : vector<16x3xf32> to vector<16x1xf32>
    %62 = vector.broadcast %61 : vector<16x1xf32> to vector<16x256xf32>
    %63 = arith.mulf %60, %62 : vector<16x256xf32>
    %64 = arith.truncf %63 : vector<16x256xf32> to vector<16x256xbf16>
    %c0_33 = arith.constant 0 : index
    %c0_34 = arith.constant 0 : index
    %65 = vector.load %arg4[%c0_33, %c0_34] : memref<768x128xbf16, #tpu.memory_space<vmem>>, vector<256x128xbf16>
    %cst_35 = arith.constant dense<0.000000e+00> : vector<16x128xf32>
    %66 = tpu.matmul %64, %65, %cst_35 {dimension_numbers = #tpu.dot_dimension_numbers<[1], [0], [0], [1], [0, 0, 1, 1], [], []>} : vector<16x256xbf16>, vector<256x128xbf16>, vector<16x128xf32> -> vector<16x128xf32>
    %67 = vector.extract_strided_slice %46 {offsets = [0, 0], sizes = [16, 1], strides = [1, 1]} : vector<16x3xf32> to vector<16x1xf32>
    %c0_36 = arith.constant 0 : index
    %c0_37 = arith.constant 0 : index
    %68 = vector.load %arg5[%c0_36, %c0_37] : memref<3x128xf32, #tpu.memory_space<vmem>>, vector<1x128xf32>
    %69 = vector.broadcast %67 : vector<16x1xf32> to vector<16x128xf32>
    %70 = vector.broadcast %68 : vector<1x128xf32> to vector<16x128xf32>
    %71 = arith.mulf %69, %70 : vector<16x128xf32>
    %72 = arith.addf %66, %71 : vector<16x128xf32>
    %73 = vector.extract_strided_slice %53 {offsets = [0, 256], sizes = [16, 256], strides = [1, 1]} : vector<16x768xf32> to vector<16x256xf32>
    %cst_38 = arith.constant 0.707106769 : f32
    %74 = vector.broadcast %cst_38 : f32 to vector<16x256xf32>
    %75 = arith.mulf %73, %74 : vector<16x256xf32>
    %76 = math.erf %75 : vector<16x256xf32>
    %cst_39 = arith.constant 1.000000e+00 : f32
    %77 = vector.broadcast %cst_39 : f32 to vector<16x256xf32>
    %78 = arith.addf %77, %76 : vector<16x256xf32>
    %79 = arith.mulf %73, %78 : vector<16x256xf32>
    %80 = vector.extract_strided_slice %48 {offsets = [0, 1], sizes = [16, 1], strides = [1, 1]} : vector<16x3xf32> to vector<16x1xf32>
    %81 = vector.broadcast %80 : vector<16x1xf32> to vector<16x256xf32>
    %82 = arith.mulf %79, %81 : vector<16x256xf32>
    %83 = arith.truncf %82 : vector<16x256xf32> to vector<16x256xbf16>
    %c256 = arith.constant 256 : index
    %c0_40 = arith.constant 0 : index
    %84 = vector.load %arg4[%c256, %c0_40] : memref<768x128xbf16, #tpu.memory_space<vmem>>, vector<256x128xbf16>
    %cst_41 = arith.constant dense<0.000000e+00> : vector<16x128xf32>
    %85 = tpu.matmul %83, %84, %cst_41 {dimension_numbers = #tpu.dot_dimension_numbers<[1], [0], [0], [1], [0, 0, 1, 1], [], []>} : vector<16x256xbf16>, vector<256x128xbf16>, vector<16x128xf32> -> vector<16x128xf32>
    %86 = vector.extract_strided_slice %46 {offsets = [0, 1], sizes = [16, 1], strides = [1, 1]} : vector<16x3xf32> to vector<16x1xf32>
    %c1 = arith.constant 1 : index
    %c0_42 = arith.constant 0 : index
    %87 = vector.load %arg5[%c1, %c0_42] : memref<3x128xf32, #tpu.memory_space<vmem>>, vector<1x128xf32>
    %88 = vector.broadcast %86 : vector<16x1xf32> to vector<16x128xf32>
    %89 = vector.broadcast %87 : vector<1x128xf32> to vector<16x128xf32>
    %90 = arith.mulf %88, %89 : vector<16x128xf32>
    %91 = arith.addf %85, %90 : vector<16x128xf32>
    %92 = arith.addf %72, %91 : vector<16x128xf32>
    %93 = vector.extract_strided_slice %53 {offsets = [0, 512], sizes = [16, 256], strides = [1, 1]} : vector<16x768xf32> to vector<16x256xf32>
    %cst_43 = arith.constant 0.707106769 : f32
    %94 = vector.broadcast %cst_43 : f32 to vector<16x256xf32>
    %95 = arith.mulf %93, %94 : vector<16x256xf32>
    %96 = math.erf %95 : vector<16x256xf32>
    %cst_44 = arith.constant 1.000000e+00 : f32
    %97 = vector.broadcast %cst_44 : f32 to vector<16x256xf32>
    %98 = arith.addf %97, %96 : vector<16x256xf32>
    %99 = arith.mulf %93, %98 : vector<16x256xf32>
    %100 = vector.extract_strided_slice %48 {offsets = [0, 2], sizes = [16, 1], strides = [1, 1]} : vector<16x3xf32> to vector<16x1xf32>
    %101 = vector.broadcast %100 : vector<16x1xf32> to vector<16x256xf32>
    %102 = arith.mulf %99, %101 : vector<16x256xf32>
    %103 = arith.truncf %102 : vector<16x256xf32> to vector<16x256xbf16>
    %c512 = arith.constant 512 : index
    %c0_45 = arith.constant 0 : index
    %104 = vector.load %arg4[%c512, %c0_45] : memref<768x128xbf16, #tpu.memory_space<vmem>>, vector<256x128xbf16>
    %cst_46 = arith.constant dense<0.000000e+00> : vector<16x128xf32>
    %105 = tpu.matmul %103, %104, %cst_46 {dimension_numbers = #tpu.dot_dimension_numbers<[1], [0], [0], [1], [0, 0, 1, 1], [], []>} : vector<16x256xbf16>, vector<256x128xbf16>, vector<16x128xf32> -> vector<16x128xf32>
    %106 = vector.extract_strided_slice %46 {offsets = [0, 2], sizes = [16, 1], strides = [1, 1]} : vector<16x3xf32> to vector<16x1xf32>
    %c2 = arith.constant 2 : index
    %c0_47 = arith.constant 0 : index
    %107 = vector.load %arg5[%c2, %c0_47] : memref<3x128xf32, #tpu.memory_space<vmem>>, vector<1x128xf32>
    %108 = vector.broadcast %106 : vector<16x1xf32> to vector<16x128xf32>
    %109 = vector.broadcast %107 : vector<1x128xf32> to vector<16x128xf32>
    %110 = arith.mulf %108, %109 : vector<16x128xf32>
    %111 = arith.addf %105, %110 : vector<16x128xf32>
    %112 = arith.addf %92, %111 : vector<16x128xf32>
    %c0_48 = arith.constant 0 : index
    %c0_49 = arith.constant 0 : index
    %113 = vector.load %arg14[%c0_48, %c0_49] : memref<16x128xf32, #tpu.memory_space<vmem>>, vector<16x128xf32>
    tpu.vector_store %arg14[%c0_48, %c0_49], %112 {strides = array<i32>} : memref<16x128xf32, #tpu.memory_space<vmem>>, vector<16x128xf32>,
    return
  }
  func.func @transform_0(%arg0: i32) -> (i32, i32) {
    %c0_i32 = arith.constant 0 : i32
    %c0_i32_0 = arith.constant 0 : i32
    return %arg0, %c0_i32 : i32, i32
  }
  func.func @transform_1(%arg0: i32) -> (i32, i32) {
    %c0_i32 = arith.constant 0 : i32
    %c0_i32_0 = arith.constant 0 : i32
    %c0_i32_1 = arith.constant 0 : i32
    return %c0_i32, %c0_i32_0 : i32, i32
  }
  func.func @transform_2(%arg0: i32) -> (i32, i32) {
    %c0_i32 = arith.constant 0 : i32
    %c0_i32_0 = arith.constant 0 : i32
    %c0_i32_1 = arith.constant 0 : i32
    return %c0_i32, %c0_i32_0 : i32, i32
  }
  func.func @transform_3(%arg0: i32) -> (i32, i32) {
    %c0_i32 = arith.constant 0 : i32
    %c0_i32_0 = arith.constant 0 : i32
    %c0_i32_1 = arith.constant 0 : i32
    return %c0_i32, %c0_i32_0 : i32, i32
  }
  func.func @transform_4(%arg0: i32) -> (i32, i32) {
    %c0_i32 = arith.constant 0 : i32
    %c0_i32_0 = arith.constant 0 : i32
    %c0_i32_1 = arith.constant 0 : i32
    return %c0_i32, %c0_i32_0 : i32, i32
  }
  func.func @transform_5(%arg0: i32) -> (i32, i32) {
    %c0_i32 = arith.constant 0 : i32
    %c0_i32_0 = arith.constant 0 : i32
    %c0_i32_1 = arith.constant 0 : i32
    return %c0_i32, %c0_i32_0 : i32, i32
  }
  func.func @transform_6(%arg0: i32) -> (i32, i32) {
    %c0_i32 = arith.constant 0 : i32
    %c0_i32_0 = arith.constant 0 : i32
    %c0_i32_1 = arith.constant 0 : i32
    return %c0_i32, %c0_i32_0 : i32, i32
  }
  func.func @transform_7(%arg0: i32) -> (i32, i32) {
    %c0_i32 = arith.constant 0 : i32
    %c0_i32_0 = arith.constant 0 : i32
    %c0_i32_1 = arith.constant 0 : i32
    return %c0_i32, %c0_i32_0 : i32, i32
  }
  func.func @transform_8(%arg0: i32) -> (i32, i32) {
    %c0_i32 = arith.constant 0 : i32
    %c0_i32_0 = arith.constant 0 : i32
    %c0_i32_1 = arith.constant 0 : i32
    return %c0_i32, %c0_i32_0 : i32, i32
  }
  func.func @transform_9(%arg0: i32) -> (i32, i32) {
    %c0_i32 = arith.constant 0 : i32
    %c0_i32_0 = arith.constant 0 : i32
    %c0_i32_1 = arith.constant 0 : i32
    return %c0_i32, %c0_i32_0 : i32, i32
  }
  func.func @transform_10(%arg0: i32) -> (i32, i32) {
    %c0_i32 = arith.constant 0 : i32
    %c0_i32_0 = arith.constant 0 : i32
    %c0_i32_1 = arith.constant 0 : i32
    return %c0_i32, %c0_i32_0 : i32, i32
  }
  func.func @transform_11(%arg0: i32) -> (i32, i32) {
    %c0_i32 = arith.constant 0 : i32
    %c0_i32_0 = arith.constant 0 : i32
    %c0_i32_1 = arith.constant 0 : i32
    return %c0_i32, %c0_i32_0 : i32, i32
  }
  func.func @transform_12(%arg0: i32) -> (i32, i32) {
    %c0_i32 = arith.constant 0 : i32
    %c0_i32_0 = arith.constant 0 : i32
    %c0_i32_1 = arith.constant 0 : i32
    return %c0_i32, %c0_i32_0 : i32, i32
  }
  func.func @transform_13(%arg0: i32) -> (i32, i32) {
    %c0_i32 = arith.constant 0 : i32
    %c0_i32_0 = arith.constant 0 : i32
    return %arg0, %c0_i32 : i32, i32
  }
}

module attributes {stable_mosaic.version = 11 : i64} {
  func.func @_mmoe_kernel(%arg0: i32, %arg1: memref<16x128xbf16, #tpu.memory_space<vmem>>, %arg2: memref<128x768xbf16, #tpu.memory_space<vmem>>, %arg3: memref<1x768xf32, #tpu.memory_space<vmem>>, %arg4: memref<768x128xbf16, #tpu.memory_space<vmem>>, %arg5: memref<3x128xf32, #tpu.memory_space<vmem>>, %arg6: memref<128x128xbf16, #tpu.memory_space<vmem>>, %arg7: memref<1x128xf32, #tpu.memory_space<vmem>>, %arg8: memref<128x128xbf16, #tpu.memory_space<vmem>>, %arg9: memref<1x128xf32, #tpu.memory_space<vmem>>, %arg10: memref<128x128xbf16, #tpu.memory_space<vmem>>, %arg11: memref<1x128xf32, #tpu.memory_space<vmem>>, %arg12: memref<128x3xbf16, #tpu.memory_space<vmem>>, %arg13: memref<1x3xf32, #tpu.memory_space<vmem>>, %arg14: memref<16x128xf32, #tpu.memory_space<vmem>>) attributes {dimension_semantics = [#tpu.dimension_semantics<parallel>], iteration_bounds = array<i64: 2>, scalar_prefetch = 0 : i64, scratch_operands = 0 : i64, tpu.core_type = #tpu.core_type<tc>, window_params = [{transform_indices = @transform_0, window_bounds = array<i64: 16, 128>}, {pipeline_mode = #tpu.pipeline_mode<synchronous>, transform_indices = @transform_1, window_bounds = array<i64: 128, 768>}, {pipeline_mode = #tpu.pipeline_mode<synchronous>, transform_indices = @transform_2, window_bounds = array<i64: 1, 768>}, {pipeline_mode = #tpu.pipeline_mode<synchronous>, transform_indices = @transform_3, window_bounds = array<i64: 768, 128>}, {pipeline_mode = #tpu.pipeline_mode<synchronous>, transform_indices = @transform_4, window_bounds = array<i64: 3, 128>}, {pipeline_mode = #tpu.pipeline_mode<synchronous>, transform_indices = @transform_5, window_bounds = array<i64: 128, 128>}, {pipeline_mode = #tpu.pipeline_mode<synchronous>, transform_indices = @transform_6, window_bounds = array<i64: 1, 128>}, {pipeline_mode = #tpu.pipeline_mode<synchronous>, transform_indices = @transform_7, window_bounds = array<i64: 128, 128>}, {pipeline_mode = #tpu.pipeline_mode<synchronous>, transform_indices = @transform_8, window_bounds = array<i64: 1, 128>}, {pipeline_mode = #tpu.pipeline_mode<synchronous>, transform_indices = @transform_9, window_bounds = array<i64: 128, 128>}, {pipeline_mode = #tpu.pipeline_mode<synchronous>, transform_indices = @transform_10, window_bounds = array<i64: 1, 128>}, {pipeline_mode = #tpu.pipeline_mode<synchronous>, transform_indices = @transform_11, window_bounds = array<i64: 128, 3>}, {pipeline_mode = #tpu.pipeline_mode<synchronous>, transform_indices = @transform_12, window_bounds = array<i64: 1, 3>}, {transform_indices = @transform_13, window_bounds = array<i64: 16, 128>}]} {
    %c0 = arith.constant 0 : index
    %c0_0 = arith.constant 0 : index
    %0 = vector.load %arg1[%c0, %c0_0] : memref<16x128xbf16, #tpu.memory_space<vmem>>, vector<16x128xbf16>
    %c0_1 = arith.constant 0 : index
    %c0_2 = arith.constant 0 : index
    %1 = vector.load %arg6[%c0_1, %c0_2] : memref<128x128xbf16, #tpu.memory_space<vmem>>, vector<128x128xbf16>
    %cst = arith.constant dense<0.000000e+00> : vector<16x128xf32>
    %2 = tpu.matmul %0, %1, %cst {dimension_numbers = #tpu.dot_dimension_numbers<[1], [0], [0], [1], [0, 0, 1, 1], [], []>} : vector<16x128xbf16>, vector<128x128xbf16>, vector<16x128xf32> -> vector<16x128xf32>
    %c0_3 = arith.constant 0 : index
    %c0_4 = arith.constant 0 : index
    %3 = vector.load %arg7[%c0_3, %c0_4] : memref<1x128xf32, #tpu.memory_space<vmem>>, vector<1x128xf32>
    %4 = vector.broadcast %3 : vector<1x128xf32> to vector<16x128xf32>
    %5 = arith.addf %2, %4 : vector<16x128xf32>
    %6 = arith.truncf %5 : vector<16x128xf32> to vector<16x128xbf16>
    %c0_5 = arith.constant 0 : index
    %c0_6 = arith.constant 0 : index
    %7 = vector.load %arg8[%c0_5, %c0_6] : memref<128x128xbf16, #tpu.memory_space<vmem>>, vector<128x128xbf16>
    %cst_7 = arith.constant dense<0.000000e+00> : vector<16x128xf32>
    %8 = tpu.matmul %6, %7, %cst_7 {dimension_numbers = #tpu.dot_dimension_numbers<[1], [0], [0], [1], [0, 0, 1, 1], [], []>} : vector<16x128xbf16>, vector<128x128xbf16>, vector<16x128xf32> -> vector<16x128xf32>
    %c0_8 = arith.constant 0 : index
    %c0_9 = arith.constant 0 : index
    %9 = vector.load %arg9[%c0_8, %c0_9] : memref<1x128xf32, #tpu.memory_space<vmem>>, vector<1x128xf32>
    %10 = vector.broadcast %9 : vector<1x128xf32> to vector<16x128xf32>
    %11 = arith.addf %8, %10 : vector<16x128xf32>
    %cst_10 = arith.constant 0.000000e+00 : f32
    %12 = vector.broadcast %cst_10 : f32 to vector<16x128xf32>
    %13 = arith.maximumf %11, %12 : vector<16x128xf32>
    %14 = arith.truncf %13 : vector<16x128xf32> to vector<16x128xbf16>
    %c0_11 = arith.constant 0 : index
    %c0_12 = arith.constant 0 : index
    %15 = vector.load %arg10[%c0_11, %c0_12] : memref<128x128xbf16, #tpu.memory_space<vmem>>, vector<128x128xbf16>
    %cst_13 = arith.constant dense<0.000000e+00> : vector<16x128xf32>
    %16 = tpu.matmul %14, %15, %cst_13 {dimension_numbers = #tpu.dot_dimension_numbers<[1], [0], [0], [1], [0, 0, 1, 1], [], []>} : vector<16x128xbf16>, vector<128x128xbf16>, vector<16x128xf32> -> vector<16x128xf32>
    %c0_14 = arith.constant 0 : index
    %c0_15 = arith.constant 0 : index
    %17 = vector.load %arg11[%c0_14, %c0_15] : memref<1x128xf32, #tpu.memory_space<vmem>>, vector<1x128xf32>
    %18 = vector.broadcast %17 : vector<1x128xf32> to vector<16x128xf32>
    %19 = arith.addf %16, %18 : vector<16x128xf32>
    %cst_16 = arith.constant dense<0xFF800000> : vector<16xf32>
    %20 = vector.multi_reduction <maximumf>, %19, %cst_16 [1] : vector<16x128xf32> to vector<16xf32>
    %21 = vector.shape_cast %20 : vector<16xf32> to vector<16x1xf32>
    %22 = vector.broadcast %21 : vector<16x1xf32> to vector<16x128xf32>
    %23 = arith.subf %19, %22 : vector<16x128xf32>
    %24 = math.exp %23 : vector<16x128xf32>
    %cst_17 = arith.constant dense<0.000000e+00> : vector<16xf32>
    %25 = vector.multi_reduction <add>, %24, %cst_17 [1] : vector<16x128xf32> to vector<16xf32>
    %26 = vector.shape_cast %25 : vector<16xf32> to vector<16x1xf32>
    %27 = tpu.reciprocal %26 {approx = true} : vector<16x1xf32> -> vector<16x1xf32>
    %28 = vector.broadcast %27 : vector<16x1xf32> to vector<16x128xf32>
    %29 = arith.mulf %24, %28 : vector<16x128xf32>
    %30 = arith.mulf %13, %29 : vector<16x128xf32>
    %31 = arith.truncf %30 : vector<16x128xf32> to vector<16x128xbf16>
    %c0_18 = arith.constant 0 : index
    %c0_19 = arith.constant 0 : index
    %32 = vector.load %arg12[%c0_18, %c0_19] : memref<128x3xbf16, #tpu.memory_space<vmem>>, vector<128x3xbf16>
    %cst_20 = arith.constant dense<0.000000e+00> : vector<16x3xf32>
    %33 = tpu.matmul %31, %32, %cst_20 {dimension_numbers = #tpu.dot_dimension_numbers<[1], [0], [0], [1], [0, 0, 1, 1], [], []>} : vector<16x128xbf16>, vector<128x3xbf16>, vector<16x3xf32> -> vector<16x3xf32>
    %c0_21 = arith.constant 0 : index
    %c0_22 = arith.constant 0 : index
    %34 = vector.load %arg13[%c0_21, %c0_22] : memref<1x3xf32, #tpu.memory_space<vmem>>, vector<1x3xf32>
    %35 = vector.broadcast %34 : vector<1x3xf32> to vector<16x3xf32>
    %36 = arith.addf %33, %35 : vector<16x3xf32>
    %cst_23 = arith.constant dense<0xFF800000> : vector<16xf32>
    %37 = vector.multi_reduction <maximumf>, %36, %cst_23 [1] : vector<16x3xf32> to vector<16xf32>
    %38 = vector.shape_cast %37 : vector<16xf32> to vector<16x1xf32>
    %39 = vector.broadcast %38 : vector<16x1xf32> to vector<16x3xf32>
    %40 = arith.subf %36, %39 : vector<16x3xf32>
    %41 = math.exp %40 : vector<16x3xf32>
    %cst_24 = arith.constant dense<0.000000e+00> : vector<16xf32>
    %42 = vector.multi_reduction <add>, %41, %cst_24 [1] : vector<16x3xf32> to vector<16xf32>
    %43 = vector.shape_cast %42 : vector<16xf32> to vector<16x1xf32>
    %44 = tpu.reciprocal %43 {approx = true} : vector<16x1xf32> -> vector<16x1xf32>
    %45 = vector.broadcast %44 : vector<16x1xf32> to vector<16x3xf32>
    %46 = arith.mulf %41, %45 : vector<16x3xf32>
    %cst_25 = arith.constant 5.000000e-01 : f32
    %47 = vector.broadcast %cst_25 : f32 to vector<16x3xf32>
    %48 = arith.mulf %46, %47 : vector<16x3xf32>
    %c0_26 = arith.constant 0 : index
    %c0_27 = arith.constant 0 : index
    %49 = vector.load %arg2[%c0_26, %c0_27] : memref<128x768xbf16, #tpu.memory_space<vmem>>, vector<128x768xbf16>
    %cst_28 = arith.constant dense<0.000000e+00> : vector<16x768xf32>
    %50 = tpu.matmul %0, %49, %cst_28 {dimension_numbers = #tpu.dot_dimension_numbers<[1], [0], [0], [1], [0, 0, 1, 1], [], []>} : vector<16x128xbf16>, vector<128x768xbf16>, vector<16x768xf32> -> vector<16x768xf32>
    %c0_29 = arith.constant 0 : index
    %c0_30 = arith.constant 0 : index
    %51 = vector.load %arg3[%c0_29, %c0_30] : memref<1x768xf32, #tpu.memory_space<vmem>>, vector<1x768xf32>
    %52 = vector.broadcast %51 : vector<1x768xf32> to vector<16x768xf32>
    %53 = arith.addf %50, %52 : vector<16x768xf32>
    %54 = vector.extract_strided_slice %53 {offsets = [0, 0], sizes = [16, 256], strides = [1, 1]} : vector<16x768xf32> to vector<16x256xf32>
    %cst_31 = arith.constant 0.707106769 : f32
    %55 = vector.broadcast %cst_31 : f32 to vector<16x256xf32>
    %56 = arith.mulf %54, %55 : vector<16x256xf32>
    %57 = math.erf %56 : vector<16x256xf32>
    %cst_32 = arith.constant 1.000000e+00 : f32
    %58 = vector.broadcast %cst_32 : f32 to vector<16x256xf32>
    %59 = arith.addf %58, %57 : vector<16x256xf32>
    %60 = arith.mulf %54, %59 : vector<16x256xf32>
    %61 = vector.extract_strided_slice %48 {offsets = [0, 0], sizes = [16, 1], strides = [1, 1]} : vector<16x3xf32> to vector<16x1xf32>
    %62 = vector.broadcast %61 : vector<16x1xf32> to vector<16x256xf32>
    %63 = arith.mulf %60, %62 : vector<16x256xf32>
    %64 = arith.truncf %63 : vector<16x256xf32> to vector<16x256xbf16>
    %c0_33 = arith.constant 0 : index
    %c0_34 = arith.constant 0 : index
    %65 = vector.load %arg4[%c0_33, %c0_34] : memref<768x128xbf16, #tpu.memory_space<vmem>>, vector<256x128xbf16>
    %cst_35 = arith.constant dense<0.000000e+00> : vector<16x128xf32>
    %66 = tpu.matmul %64, %65, %cst_35 {dimension_numbers = #tpu.dot_dimension_numbers<[1], [0], [0], [1], [0, 0, 1, 1], [], []>} : vector<16x256xbf16>, vector<256x128xbf16>, vector<16x128xf32> -> vector<16x128xf32>
    %67 = vector.extract_strided_slice %46 {offsets = [0, 0], sizes = [16, 1], strides = [1, 1]} : vector<16x3xf32> to vector<16x1xf32>
    %c0_36 = arith.constant 0 : index
    %c0_37 = arith.constant 0 : index
    %68 = vector.load %arg5[%c0_36, %c0_37] : memref<3x128xf32, #tpu.memory_space<vmem>>, vector<1x128xf32>
    %69 = vector.broadcast %67 : vector<16x1xf32> to vector<16x128xf32>
    %70 = vector.broadcast %68 : vector<1x128xf32> to vector<16x128xf32>
    %71 = arith.mulf %69, %70 : vector<16x128xf32>
    %72 = arith.addf %66, %71 : vector<16x128xf32>
    %73 = vector.extract_strided_slice %53 {offsets = [0, 256], sizes = [16, 256], strides = [1, 1]} : vector<16x768xf32> to vector<16x256xf32>
    %cst_38 = arith.constant 0.707106769 : f32
    %74 = vector.broadcast %cst_38 : f32 to vector<16x256xf32>
    %75 = arith.mulf %73, %74 : vector<16x256xf32>
    %76 = math.erf %75 : vector<16x256xf32>
    %cst_39 = arith.constant 1.000000e+00 : f32
    %77 = vector.broadcast %cst_39 : f32 to vector<16x256xf32>
    %78 = arith.addf %77, %76 : vector<16x256xf32>
    %79 = arith.mulf %73, %78 : vector<16x256xf32>
    %80 = vector.extract_strided_slice %48 {offsets = [0, 1], sizes = [16, 1], strides = [1, 1]} : vector<16x3xf32> to vector<16x1xf32>
    %81 = vector.broadcast %80 : vector<16x1xf32> to vector<16x256xf32>
    %82 = arith.mulf %79, %81 : vector<16x256xf32>
    %83 = arith.truncf %82 : vector<16x256xf32> to vector<16x256xbf16>
    %c256 = arith.constant 256 : index
    %c0_40 = arith.constant 0 : index
    %84 = vector.load %arg4[%c256, %c0_40] : memref<768x128xbf16, #tpu.memory_space<vmem>>, vector<256x128xbf16>
    %cst_41 = arith.constant dense<0.000000e+00> : vector<16x128xf32>
    %85 = tpu.matmul %83, %84, %cst_41 {dimension_numbers = #tpu.dot_dimension_numbers<[1], [0], [0], [1], [0, 0, 1, 1], [], []>} : vector<16x256xbf16>, vector<256x128xbf16>, vector<16x128xf32> -> vector<16x128xf32>
    %86 = vector.extract_strided_slice %46 {offsets = [0, 1], sizes = [16, 1], strides = [1, 1]} : vector<16x3xf32> to vector<16x1xf32>
    %c1 = arith.constant 1 : index
    %c0_42 = arith.constant 0 : index
    %87 = vector.load %arg5[%c1, %c0_42] : memref<3x128xf32, #tpu.memory_space<vmem>>, vector<1x128xf32>
    %88 = vector.broadcast %86 : vector<16x1xf32> to vector<16x128xf32>
    %89 = vector.broadcast %87 : vector<1x128xf32> to vector<16x128xf32>
    %90 = arith.mulf %88, %89 : vector<16x128xf32>
    %91 = arith.addf %85, %90 : vector<16x128xf32>
    %92 = arith.addf %72, %91 : vector<16x128xf32>
    %93 = vector.extract_strided_slice %53 {offsets = [0, 512], sizes = [16, 256], strides = [1, 1]} : vector<16x768xf32> to vector<16x256xf32>
    %cst_43 = arith.constant 0.707106769 : f32
    %94 = vector.broadcast %cst_43 : f32 to vector<16x256xf32>
    %95 = arith.mulf %93, %94 : vector<16x256xf32>
    %96 = math.erf %95 : vector<16x256xf32>
    %cst_44 = arith.constant 1.000000e+00 : f32
    %97 = vector.broadcast %cst_44 : f32 to vector<16x256xf32>
    %98 = arith.addf %97, %96 : vector<16x256xf32>
    %99 = arith.mulf %93, %98 : vector<16x256xf32>
    %100 = vector.extract_strided_slice %48 {offsets = [0, 2], sizes = [16, 1], strides = [1, 1]} : vector<16x3xf32> to vector<16x1xf32>
    %101 = vector.broadcast %100 : vector<16x1xf32> to vector<16x256xf32>
    %102 = arith.mulf %99, %101 : vector<16x256xf32>
    %103 = arith.truncf %102 : vector<16x256xf32> to vector<16x256xbf16>
    %c512 = arith.constant 512 : index
    %c0_45 = arith.constant 0 : index
    %104 = vector.load %arg4[%c512, %c0_45] : memref<768x128xbf16, #tpu.memory_space<vmem>>, vector<256x128xbf16>
    %cst_46 = arith.constant dense<0.000000e+00> : vector<16x128xf32>
    %105 = tpu.matmul %103, %104, %cst_46 {dimension_numbers = #tpu.dot_dimension_numbers<[1], [0], [0], [1], [0, 0, 1, 1], [], []>} : vector<16x256xbf16>, vector<256x128xbf16>, vector<16x128xf32> -> vector<16x128xf32>
    %106 = vector.extract_strided_slice %46 {offsets = [0, 2], sizes = [16, 1], strides = [1, 1]} : vector<16x3xf32> to vector<16x1xf32>
    %c2 = arith.constant 2 : index
    %c0_47 = arith.constant 0 : index
    %107 = vector.load %arg5[%c2, %c0_47] : memref<3x128xf32, #tpu.memory_space<vmem>>, vector<1x128xf32>
    %108 = vector.broadcast %106 : vector<16x1xf32> to vector<16x128xf32>
    %109 = vector.broadcast %107 : vector<1x128xf32> to vector<16x128xf32>
    %110 = arith.mulf %108, %109 : vector<16x128xf32>
    %111 = arith.addf %105, %110 : vector<16x128xf32>
    %112 = arith.addf %92, %111 : vector<16x128xf32>
    %c0_48 = arith.constant 0 : index
    %c0_49 = arith.constant 0 : index
    %113 = vector.load %arg14[%c0_48, %c0_49] : memref<16x128xf32, #tpu.memory_space<vmem>>, vector<16x128xf32>
    tpu.vector_store %arg14[%c0_48, %c0_49], %112 {strides = array<i32>} : memref<16x128xf32, #tpu.memory_space<vmem>>, vector<16x128xf32>,
    return
  }
  func.func @transform_0(%arg0: i32) -> (i32, i32) {
    %c0_i32 = arith.constant 0 : i32
    %c0_i32_0 = arith.constant 0 : i32
    return %arg0, %c0_i32 : i32, i32
  }
  func.func @transform_1(%arg0: i32) -> (i32, i32) {
    %c0_i32 = arith.constant 0 : i32
    %c0_i32_0 = arith.constant 0 : i32
    %c0_i32_1 = arith.constant 0 : i32
    return %c0_i32, %c0_i32_0 : i32, i32
  }
  func.func @transform_2(%arg0: i32) -> (i32, i32) {
    %c0_i32 = arith.constant 0 : i32
    %c0_i32_0 = arith.constant 0 : i32
    %c0_i32_1 = arith.constant 0 : i32
    return %c0_i32, %c0_i32_0 : i32, i32
  }
  func.func @transform_3(%arg0: i32) -> (i32, i32) {
    %c0_i32 = arith.constant 0 : i32
    %c0_i32_0 = arith.constant 0 : i32
    %c0_i32_1 = arith.constant 0 : i32
    return %c0_i32, %c0_i32_0 : i32, i32
  }
  func.func @transform_4(%arg0: i32) -> (i32, i32) {
    %c0_i32 = arith.constant 0 : i32
    %c0_i32_0 = arith.constant 0 : i32
    %c0_i32_1 = arith.constant 0 : i32
    return %c0_i32, %c0_i32_0 : i32, i32
  }
  func.func @transform_5(%arg0: i32) -> (i32, i32) {
    %c0_i32 = arith.constant 0 : i32
    %c0_i32_0 = arith.constant 0 : i32
    %c0_i32_1 = arith.constant 0 : i32
    return %c0_i32, %c0_i32_0 : i32, i32
  }
  func.func @transform_6(%arg0: i32) -> (i32, i32) {
    %c0_i32 = arith.constant 0 : i32
    %c0_i32_0 = arith.constant 0 : i32
    %c0_i32_1 = arith.constant 0 : i32
    return %c0_i32, %c0_i32_0 : i32, i32
  }
  func.func @transform_7(%arg0: i32) -> (i32, i32) {
    %c0_i32 = arith.constant 0 : i32
    %c0_i32_0 = arith.constant 0 : i32
    %c0_i32_1 = arith.constant 0 : i32
    return %c0_i32, %c0_i32_0 : i32, i32
  }
  func.func @transform_8(%arg0: i32) -> (i32, i32) {
    %c0_i32 = arith.constant 0 : i32
    %c0_i32_0 = arith.constant 0 : i32
    %c0_i32_1 = arith.constant 0 : i32
    return %c0_i32, %c0_i32_0 : i32, i32
  }
  func.func @transform_9(%arg0: i32) -> (i32, i32) {
    %c0_i32 = arith.constant 0 : i32
    %c0_i32_0 = arith.constant 0 : i32
    %c0_i32_1 = arith.constant 0 : i32
    return %c0_i32, %c0_i32_0 : i32, i32
  }
  func.func @transform_10(%arg0: i32) -> (i32, i32) {
    %c0_i32 = arith.constant 0 : i32
    %c0_i32_0 = arith.constant 0 : i32
    %c0_i32_1 = arith.constant 0 : i32
    return %c0_i32, %c0_i32_0 : i32, i32
  }
  func.func @transform_11(%arg0: i32) -> (i32, i32) {
    %c0_i32 = arith.constant 0 : i32
    %c0_i32_0 = arith.constant 0 : i32
    %c0_i32_1 = arith.constant 0 : i32
    return %c0_i32, %c0_i32_0 : i32, i32
  }
  func.func @transform_12(%arg0: i32) -> (i32, i32) {
    %c0_i32 = arith.constant 0 : i32
    %c0_i32_0 = arith.constant 0 : i32
    %c0_i32_1 = arith.constant 0 : i32
    return %c0_i32, %c0_i32_0 : i32, i32
  }
  func.func @transform_13(%arg0: i32) -> (i32, i32) {
    %c0_i32 = arith.constant 0 : i32
    %c0_i32_0 = arith.constant 0 : i32
    return %arg0, %c0_i32 : i32, i32
  }
}

</mosaic_0001>

<bundles_post_ra>
// kernel: tpu_custom_call.1
= control target key start
LH: loop header
LB: loop body
LE: loop exit
PB: predicated region body
PF: predicated region fallthrough
CT: control target
= control target key end

     0   :  { %s3546_s0 = inlined_call_operand.vmem [shape: bf16[32,128], index: 0, kind: input, shape index: {}]   ;;  %s3547_s1 = inlined_call_operand.hbm [shape: bf16[128,768], index: 1, kind: input, shape index: {}]   ;;  %s3548_s2 = inlined_call_operand.hbm [shape: f32[1,768], index: 2, kind: input, shape index: {}]   ;;  %s3549_s3 = inlined_call_operand.hbm [shape: bf16[768,128], index: 3, kind: input, shape index: {}]   ;;  %s3550_s4 = inlined_call_operand.vmem [shape: f32[3,128], index: 4, kind: input, shape index: {}]   ;;  %s3551_s5 = inlined_call_operand.vmem [shape: bf16[128,128], index: 5, kind: input, shape index: {}]   ;;  %s3552_s6 = inlined_call_operand.vmem [shape: f32[1,128], index: 6, kind: input, shape index: {}]   ;;  %s3553_s7 = inlined_call_operand.hbm [shape: bf16[128,128], index: 7, kind: input, shape index: {}]   ;;  %s3554_s8 = inlined_call_operand.vmem [shape: f32[1,128], index: 8, kind: input, shape index: {}]   ;;  %s3555_s9 = inlined_call_operand.hbm [shape: bf16[128,128], index: 9, kind: input, shape index: {}]   ;;  %s3556_s10 = inlined_call_operand.vmem [shape: f32[1,128], index: 10, kind: input, shape index: {}]   ;;  %s3557_s11 = inlined_call_operand.vmem [shape: bf16[128,3], index: 11, kind: input, shape index: {}]   ;;  %s3558_s12 = inlined_call_operand.vmem [shape: f32[1,3], index: 12, kind: input, shape index: {}]   ;;  %s3559_s13 = inlined_call_operand.hbm [shape: f32[32,128], index: 13, kind: output, shape index: {}]  }
   0x1   :  { %3577 = sst [smem:[#allocation24_spill]] %s3548_s2 }
   0x2   :  { %3578 = sst [smem:[#allocation25_spill]] %s3553_s7 }
   0x3   :  { %3579 = sst [smem:[#allocation26_spill]] %s3559_s13 }
   0x4   :  { %18 = vsyncpa [#allocation3], 0 }
   0x5   :  { %19 = vsyncpa [#allocation6], 0 }
   0x6   :  { %20 = vsyncpa [#allocation9], 0 }
   0x7   :  { %21 = vsyncpa [#allocation4], 0 }
   0x8   :  { %23 = vsyncpa [#allocation4 + $0x1], 0  ;;  %s3140_s25 = smov 0   ;;  %s3142_s26 = smov 0  }
   0x9   :  { %s3144_s27 = smov 0   ;;  %s3146_s28 = smov 0  }
   0xa LB: > { %3580 = sst [smem:[#allocation16_spill]] %s3039_s25  ;;  %s3161_s29 = sadd.s32 4294967295, %s3051_s28   ;;  %s3051_s28 = sphi %s3146_s28, %s3613_s28   ;;  %s3047_s27 = sphi %s3144_s27, %s3616_s27   ;;  %s3043_s26 = sphi %s3142_s26, %s3615_s26   ;;  %s3039_s25 = sphi %s3140_s25, %s3614_s25  }
   0xb   : > { %3581 = sst [smem:[#allocation17_spill]] %s3043_s26  ;;  %s2207_s30 = sadd.s32 4294967294, %s3051_s28  }
   0xc   : > { %3582 = sst [smem:[#allocation18_spill]] %s3047_s27  ;;  %s3165_s14 = sadd.s32 1, %s3051_s28  }
   0xd   : > { %3583 = sst [smem:[#allocation19_spill]] %s3051_s28  ;;  %s314_s15 = sadd.s32 1, %s3047_s27 }
   0xe   : > { %3584 = sst [smem:[#allocation20_spill]] %s3165_s14  ;;  %s311_s16 = ssub.s32 %s3051_s28, %s3165_s14 }
   0xf   : > { %p324_p0 = scmp.ne.s32.totalorder %s3047_s27, %s3043_s26  ;;  %p312_p1 = scmp.eq.s32.totalorder %s311_s16, 0 }
  0x10   : > { %p325_p2 = scmp.eq.s32.totalorder %s3161_s29, 1  ;;  %p330_p3 = scmp.ne.s32.totalorder %s3043_s26, %s3039_s25 }
  0x11   : > { %p331_p4 = scmp.eq.s32.totalorder %s2207_s30, 1  ;;  %p2208_p7 = scmp.ge.s32.totalorder %s3051_s28, 1 }
  0x12   : > { %s3176_s17 = scalar_select %p312_p1, %s3047_s27, %s314_s15  }
  0x13   : > { %p3178_p5 = por %p325_p2, %p324_p0  ;;  %p3182_p6 = por %p331_p4, %p330_p3 }
  0x14   : > { %3585 = sst [smem:[#allocation21_spill]] %s3176_s17  ;;  %p338_p8 = scmp.lt.s32.totalorder %s3051_s28, 3 }
  0x15   : > { %s3586_s18 = scalar_select %p3178_p5, 1, 0 }
  0x16   : > { %s3588_s19 = scalar_select %p3182_p6, 1, 0 }
  0x17   : > { %3587 = sst [smem:[#allocation22_spill]] %s3586_s18  ;;  %p3565_p9 = scmp.eq.s32.totalorder %s3161_s29, 0 }
  0x18   : > { %3589 = sst [smem:[#allocation23_spill]] %s3588_s19  ;;  %p3189_p10 = pnand %p2208_p7, %p338_p8 }
  0x19   : > { %s3053_s21 = smov [#allocation5]   ;;  %s3054_s24 = smov [#allocation8]  }
  0x1a   : > { %s3590_s20 = scalar_select %p3189_p10, 1, 0 }
  0x1b   : > { %s364_s22 = sshll.u32 %s3053_s21, 4  ;;  %p2570_p11 = pneg %p3189_p10  ;;  %s365_s22 = int_to_ptr.vmem [resolvable:$true] %s364_s22 }
  0x1c   : > { %s396_s30 = sshll.u32 %s3054_s24, 4  ;;  %s3055_s15 = smov [#allocation2]   ;;  %s3201_s30 = int_to_ptr.vmem [resolvable:$true] %s396_s30 }
  0x1d   : > { %p3197_p12 = pnand %p3565_p9, %p2570_p11  ;;  %s3203_s16 = sshll.u32 %s3055_s15, 4  ;;  %s351_s16 = int_to_ptr.vmem [resolvable:$true] %s3203_s16 }
  0x1e   : > { %s3592_s2 = sld [smem:[#allocation24_spill]] }
  0x1f   : > { %p3213_p0 = pneg %p3197_p12 }
  0x24   : > { %s2837_s21 = scalar_lea.hbm %s3592_s2, 96 }
  0x25   : > { %p2838_p13 = scmp.ne.s32.totalorder %s3592_s2, %s2837_s21  ;;  %p2844_p3 = scmp.lt.u32.totalorder %s2837_s21, %s3592_s2 }
  0x27   : > { %p2840_p1 = pnand %p3213_p0, %p2838_p13 }
  0x29   : > { %p2841_p2 = pneg %p2840_p1 }
  0x2b   : > { %p2846_p4 = pnand %p2844_p3, %p2841_p2 }
  0x2d   : > { %2849 = shalt.err (!%p2846_p4)
}
  0x2e   : > { %s2850_s27 = scalar_lea.vmem %s365_s22, 96  ;;  %p2858_p9 = scmp.lt.s32.totalorder %s365_s22, %s365_s22 }
  0x2f   : > { %p2851_p7 = scmp.ne.s32.totalorder %s365_s22, %s2850_s27  ;;  %p2859_p6 = scmp.lt.s32.totalorder %s2850_s27, %s2850_s27 }
  0x31   : > { %p2853_p8 = pnand %p2851_p7, %p3213_p0  ;;  %p2860_p5 = por %p2859_p6, %p2858_p9 }
  0x33   : > { %p2854_p11 = pneg %p2853_p8 }
  0x35   : > { %p2861_p10 = pnand %p2860_p5, %p2854_p11 }
  0x37   : > { %2864 = shalt.err (!%p2861_p10)
}
  0x38   : > { %2576 = dma.hbm_to_vmem [thread:$0]  (!%p3197_p12), %s3592_s2, 96, %s365_s22, [#allocation6]  }
  0x39   : > { %s3594_s7 = sld [smem:[#allocation25_spill]] }
  0x3f   : > { %s2865_s24 = scalar_lea.hbm %s3594_s7, 1024 }
  0x40   : > { %p2866_p13 = scmp.ne.s32.totalorder %s3594_s7, %s2865_s24  ;;  %p2872_p5 = scmp.lt.u32.totalorder %s2865_s24, %s3594_s7 }
  0x42   : > { %p2868_p1 = pnand %p2866_p13, %p3213_p0 }
  0x44   : > { %p2869_p6 = pneg %p2868_p1 }
  0x46   : > { %p2874_p9 = pnand %p2872_p5, %p2869_p6 }
  0x48   : > { %2877 = shalt.err (!%p2874_p9)
}
  0x49   : > { %s2878_s22 = scalar_lea.vmem %s3201_s30, 1024  ;;  %p2886_p4 = scmp.lt.s32.totalorder %s3201_s30, %s3201_s30 }
  0x4a   : > { %p2879_p10 = scmp.ne.s32.totalorder %s3201_s30, %s2878_s22  ;;  %p2887_p7 = scmp.lt.s32.totalorder %s2878_s22, %s2878_s22 }
  0x4c   : > { %p2881_p2 = pnand %p2879_p10, %p3213_p0  ;;  %p2888_p8 = por %p2887_p7, %p2886_p4 }
  0x4e   : > { %p2882_p3 = pneg %p2881_p2 }
  0x50   : > { %p2889_p11 = pnand %p2888_p8, %p2882_p3 }
  0x52   : > { %2892 = shalt.err (!%p2889_p11)
}
  0x53   : > { %s3570_s28 = smov 64   ;;  %s3572_s13 = smov 4  }
  0x54   : > { %2582 = dma.hbm_to_vmem [thread:$0]  (!%p3197_p12), %s3594_s7, 1024, %s3201_s30, [#allocation9], %s3570_s28, %s3570_s28, %s3572_s13  }
  0x55   : > { %s2893_s24 = scalar_lea.hbm %s3547_s1, 6144 }
  0x56   : > { %p2894_p13 = scmp.ne.s32.totalorder %s3547_s1, %s2893_s24  ;;  %p2900_p5 = scmp.lt.u32.totalorder %s2893_s24, %s3547_s1 }
  0x58   : > { %p2896_p1 = pnand %p2894_p13, %p3213_p0 }
  0x5a   : > { %p2897_p6 = pneg %p2896_p1 }
  0x5c   : > { %p2902_p9 = pnand %p2900_p5, %p2897_p6 }
  0x5e   : > { %2905 = shalt.err (!%p2902_p9)
}
  0x5f   : > { %s2906_s14 = scalar_lea.vmem %s351_s16, 6144  ;;  %p2914_p4 = scmp.lt.s32.totalorder %s351_s16, %s351_s16 }
  0x60   : > { %p2907_p10 = scmp.ne.s32.totalorder %s351_s16, %s2906_s14  ;;  %p2915_p7 = scmp.lt.s32.totalorder %s2906_s14, %s2906_s14 }
  0x62   : > { %p2909_p2 = pnand %p2907_p10, %p3213_p0  ;;  %p2916_p8 = por %p2915_p7, %p2914_p4 }
  0x64   : > { %p2910_p3 = pneg %p2909_p2 }
  0x66   : > { %p2917_p11 = pnand %p2916_p8, %p2910_p3 }
  0x68   : > { %2920 = shalt.err (!%p2917_p11)
}
  0x69   : > { %s3058_s30 = smov 384   ;;  %s3059_s17 = smov 24  }
  0x6a   : > { %2573 = dma.hbm_to_vmem [thread:$0]  (!%p3197_p12), %s3547_s1, 6144, %s351_s16, [#allocation3], %s3058_s30, %s3058_s30, %s3059_s17  }
  0x6b   : > { %s3060_s21 = smov [#allocation7]   ;;  %s3061_s15 = smov [#allocation10]  }
  0x6c   : > { %s374_s24 = sshll.u32 %s3060_s21, 4  ;;  %s412_s27 = sshll.u32 %s3061_s15, 4  ;;  %s375_s24 = int_to_ptr.vmem [resolvable:$true] %s374_s24  ;;  %s413_s27 = int_to_ptr.vmem [resolvable:$true] %s412_s27 }
  0x6d   : > { %s2921_s14 = scalar_lea.hbm %s3549_s3, 6144 }
  0x6e   : > { %p2922_p13 = scmp.ne.s32.totalorder %s3549_s3, %s2921_s14  ;;  %p2928_p5 = scmp.lt.u32.totalorder %s2921_s14, %s3549_s3 }
  0x70   : > { %p2924_p1 = pnand %p2922_p13, %p3213_p0 }
  0x72   : > { %p2925_p6 = pneg %p2924_p1 }
  0x74   : > { %p2930_p9 = pnand %p2928_p5, %p2925_p6 }
  0x76   : > { %2933 = shalt.err (!%p2930_p9)
}
  0x77   : > { %s2934_s16 = scalar_lea.vmem %s375_s24, 6144  ;;  %p2942_p4 = scmp.lt.s32.totalorder %s375_s24, %s375_s24 }
  0x78   : > { %p2935_p10 = scmp.ne.s32.totalorder %s375_s24, %s2934_s16  ;;  %p2943_p7 = scmp.lt.s32.totalorder %s2934_s16, %s2934_s16 }
  0x7a   : > { %p2937_p2 = pnand %p2935_p10, %p3213_p0  ;;  %p2944_p8 = por %p2943_p7, %p2942_p4 }
  0x7c   : > { %p2938_p3 = pneg %p2937_p2 }
  0x7e   : > { %p2945_p11 = pnand %p2944_p8, %p2938_p3 }
  0x80   : > { %2948 = shalt.err (!%p2945_p11)
}
  0x81   : > { %s3595_s7 = smov 4   ;;  %s3596_s28 = smov 64  }
  0x82   : > { %2579 = dma.hbm_to_vmem [thread:$0]  (!%p3197_p12), %s3549_s3, 6144, %s375_s24, [#allocation6], %s3596_s28, %s3596_s28, %s3595_s7  }
  0x83   : > { %s2949_s17 = scalar_lea.hbm %s3555_s9, 1024 }
  0x84   : > { %p2950_p13 = scmp.ne.s32.totalorder %s3555_s9, %s2949_s17  ;;  %p2956_p5 = scmp.lt.u32.totalorder %s2949_s17, %s3555_s9 }
  0x86   : > { %p2952_p1 = pnand %p2950_p13, %p3213_p0 }
  0x88   : > { %p2953_p6 = pneg %p2952_p1 }
  0x8a   : > { %p2958_p9 = pnand %p2956_p5, %p2953_p6 }
  0x8c   : > { %2961 = shalt.err (!%p2958_p9)
}
  0x8d   : > { %s2962_s22 = scalar_lea.vmem %s413_s27, 1024  ;;  %p2970_p4 = scmp.lt.s32.totalorder %s413_s27, %s413_s27 }
  0x8e   : > { %p2963_p10 = scmp.ne.s32.totalorder %s413_s27, %s2962_s22  ;;  %p2971_p7 = scmp.lt.s32.totalorder %s2962_s22, %s2962_s22 }
  0x90   : > { %p2965_p2 = pnand %p2963_p10, %p3213_p0  ;;  %p2972_p8 = por %p2971_p7, %p2970_p4 }
  0x92   : > { %p2966_p3 = pneg %p2965_p2 }
  0x94   : > { %p2973_p11 = pnand %p2972_p8, %p2966_p3 }
  0x96   : > { %2976 = shalt.err (!%p2973_p11)
}
  0x97   : > { %2585 = dma.hbm_to_vmem [thread:$0]  (!%p3197_p12), %s3555_s9, 1024, %s413_s27, [#allocation9], %s3596_s28, %s3596_s28, %s3595_s7  }
  0x98   : > { %p3597_p13 = scmp.ne.s32.totalorder %s3590_s20, 0 }
  0x99   : > { %p3598_p0 = scmp.eq.s32.totalorder (!%p3597_p13), %s3161_s29, 0 }
  0x9a   : > { %446 = sbr.rel (%p3597_p13) target bundleno = 2107 (0x83b), region = 72 }
  0xa1   : > { %3022 = dma.done.wait (%p3598_p0), [#allocation3], 6144   ;;  %p3599_p1 = pmov %p3598_p0 }
  0xa2   : > { %p3600_p6 = pmov %p3598_p0 }
  0xa3   : > { %3024 = vsyncadd (%p3599_p1), [#allocation3], 4294961152 }
  0xa4   : > { %3026 = dma.done.wait (%p3600_p6), [#allocation6], 6240   ;;  %p3601_p5 = pmov %p3598_p0 }
  0xa5   : > { %p3602_p9 = pmov %p3598_p0 }
  0xa6   : > { %3028 = vsyncadd (%p3601_p5), [#allocation6], 4294961056 }
  0xa7   : > { %3030 = dma.done.wait (%p3602_p9), [#allocation9], 2048   ;;  %p3603_p12 = pmov %p3598_p0 }
  0xa8   : > { %s2222_s25 = sshll.u32 %s3161_s29, 1  ;;  %v3062_v0 = vmov 0.0   ;;  %vm3063_vm0 = vmmov 0   ;;  %v2656_v1 = vld [vmem:[%s3551_s5] sm:$0xff]   ;;  %v2657_v2 = vld [vmem:[%s3551_s5 + $0x8] sm:$0xff]   ;;  %v2658_v3 = vld [vmem:[%s3551_s5 + $0x10] sm:$0xff]  }
  0xa9   : > { %3032 = vsyncadd (%p3603_p12), [#allocation9], 4294965248  ;;  %2468 = vmatprep.subr.bf16.mxu0 %v3062_v0  ;;  %2484 = vmatprep.mubr.msk.bf16.mxu0 %vm3063_vm0, %v3062_v0  ;;  %p507_p10 = scmp.lt.s32.totalorder %s2222_s25, 3  ;;  %v2665_v4 = vld [vmem:[#allocation8] sm:$0xff]   ;;  %v2659_v5 = vld [vmem:[%s3551_s5 + $0x18] sm:$0xff]   ;;  %vm997_vm1 = vcmask 23552  }
  0xaa   : > { %2488 = vmatprep.subr.bf16.mxu1 %v3062_v0  ;;  %2504 = vmatprep.mubr.msk.bf16.mxu1 %vm3063_vm0, %v3062_v0  ;;  %v2666_v6 = vld [vmem:[#allocation8 + $0x8] sm:$0xff]   ;;  %v2660_v7 = vld [vmem:[%s3551_s5 + $0x20] sm:$0xff]   ;;  %v2667_v8 = vld [vmem:[#allocation8 + $0x10] sm:$0xff]   ;;  %s3604_s17 = sld [smem:[#allocation17_spill]]  ;;  %s3605_s22 = sld [smem:[#allocation22_spill]] }
  0xab   : > { %s3618_s25 = smov (!%p507_p10, %s2222_s25), 3  ;;  %2469 = vmatpush3.bf16.msra.mxu0 %v2656_v1  ;;  %2489 = vmatpush3.bf16.msra.mxu1 %v2665_v4  ;;  %v2661_v9 = vld [vmem:[%s3551_s5 + $0x28] sm:$0xff]   ;;  %v2668_v10 = vld [vmem:[#allocation8 + $0x18] sm:$0xff]   ;;  %v2662_v11 = vld [vmem:[%s3551_s5 + $0x30] sm:$0xff]   ;;  %s3606_s27 = sld [smem:[#allocation26_spill]] }
  0xac   : > { %2470 = vmatprep.subr.bf16.mxu0 %v3062_v0  ;;  %s2223_s7 = sshll.u32 %s3618_s25, 2  ;;  %2490 = vmatprep.subr.bf16.mxu1 %v3062_v0  ;;  %v2669_v12 = vld [vmem:[#allocation8 + $0x20] sm:$0xff]   ;;  %v2663_v13 = vld [vmem:[%s3551_s5 + $0x38] sm:$0xff]   ;;  %v2670_v14 = vld [vmem:[#allocation8 + $0x28] sm:$0xff]   ;;  %s2365_s25 = sshll.u32 %s3161_s29, 8 }
  0xad   : > { %s510_s30 = scalar_lea.vmem %s3546_s0, %s2223_s7  ;;  %v2671_v16 = vld [vmem:[#allocation8 + $0x30] sm:$0xff]   ;;  %v2672_v17 = vld [vmem:[#allocation8 + $0x38] sm:$0xff]   ;;  %v2673_v18 = vld [vmem:[#allocation10] sm:$0xff]   ;;  %s3067_s29 = smov [#allocation11]  }
  0xae   : > { %v3375_v15 = vld [vmem:[%s510_s30] sm:$0xff]   ;;  %v2674_v19 = vld [vmem:[#allocation10 + $0x8] sm:$0xff]   ;;  %v2675_v20 = vld [vmem:[#allocation10 + $0x10] sm:$0xff]   ;;  %s2981_s18 = sshll.u32 %s3067_s29, 4  ;;  %s2982_s18 = int_to_ptr.vmem [resolvable:$false] %s2981_s18 }
  0xaf   : > { %2471 = vmatpush3.bf16.msra.mxu0 %v2657_v2  ;;  %2491 = vmatpush3.bf16.msra.mxu1 %v2666_v6  ;;  %v2676_v21 = vld [vmem:[#allocation10 + $0x18] sm:$0xff]   ;;  %v2677_v22 = vld [vmem:[#allocation10 + $0x20] sm:$0xff]   ;;  %v2678_v23 = vld [vmem:[#allocation10 + $0x28] sm:$0xff]   ;;  %s2983_s13 = scalar_lea.vmem %s2982_s18, 512 }
  0xb0   : > { %2472 = vmatprep.subr.bf16.mxu0 %v3062_v0  ;;  %2492 = vmatprep.subr.bf16.mxu1 %v3062_v0  ;;  %v2224_v24 = vld [vmem:[%s3552_s6] ss:$0 sm:$0xff]  ;;  %v2679_v32 = vld [vmem:[#allocation10 + $0x30] sm:$0xff]   ;;  %v2682_v52 = vld [vmem:[%s3557_s11 + $0x8] sm:$0xff]   ;;  %s503_s2 = sand.u32 1, %s3604_s17   ;;  %p3608_p3 = scmp.ne.s32.totalorder %s3605_s22, 0 }
  0xb1   : > { %v2680_v33 = vld [vmem:[#allocation10 + $0x38] sm:$0xff]   ;;  %v2683_v53 = vld [vmem:[%s3557_s11 + $0x10] sm:$0xff]   ;;  %v2686_v1 = vld [vmem:[%s3557_s11 + $0x28] sm:$0xff]   ;;  %s2221_s19 = sshll.u32 %s503_s2, 4  ;;  %s3607_s16 = smov %s3606_s27 }
  0xb2   : > { %v2234_v34 = vld [vmem:[%s3554_s8] ss:$0 sm:$0xff]  ;;  %v2684_v62 = vld [vmem:[%s3557_s11 + $0x18] sm:$0xff]   ;;  %v2687_v2 = vld [vmem:[%s3557_s11 + $0x30] sm:$0xff]   ;;  %s505_s24 = scalar_lea.vmem [#allocation11], %s2221_s19  ;;  %s3503_s7 = scalar_lea.hbm %s3606_s27, %s2365_s25 }
  0xb3   : > { %2473 = vmatpush3.bf16.msra.mxu0 %v2658_v3  ;;  %2493 = vmatpush3.bf16.msra.mxu1 %v2667_v8  ;;  %v2243_v44 = vld [vmem:[%s3556_s10] ss:$0 sm:$0xff]  ;;  %v2688_v3 = vld [vmem:[%s3557_s11 + $0x38] sm:$0xff]   ;;  %s2095_s14 = sshll.u32 %s505_s24, 4  ;;  %s3505_s28 = scalar_lea.sflag [#allocation4], %s503_s2  ;;  %s3498_s14 = int_to_ptr.vmem [resolvable:$true] %s2095_s14 }
  0xb4   : > { %2474 = vmatprep.subr.bf16.mxu0 %v3062_v0  ;;  %2494 = vmatprep.subr.bf16.mxu1 %v3062_v0  ;;  %v2681_v51 = vld [vmem:[%s3557_s11] sm:$0xff]   ;;  %s2977_s26 = scalar_lea.vmem %s3498_s14, 256  ;;  %p2984_p8 = scmp.lt.s32.totalorder %s3498_s14, %s2982_s18 }
  0xb5   : > { %v2685_v63 = vld [vmem:[%s3557_s11 + $0x20] sm:$0xff]   ;;  %p2978_p2 = scmp.ne.s32.totalorder %s3498_s14, %s2977_s26  ;;  %p2985_p11 = scmp.lt.s32.totalorder %s2983_s13, %s2977_s26 }
  0xb7   : > { %2475 = vmatpush3.bf16.msra.mxu0 %v2659_v5  ;;  %2495 = vmatpush3.bf16.msra.mxu1 %v2668_v10  ;;  %p2979_p4 = pnand %p2978_p2, %p3608_p3  ;;  %p2986_p13 = por %p2985_p11, %p2984_p8 }
  0xb8   : > { %2476 = vmatprep.subr.bf16.mxu0 %v3062_v0  ;;  %2496 = vmatprep.subr.bf16.mxu1 %v3062_v0 }
  0xb9   : > { %p2980_p7 = pneg %p2979_p4 }
  0xbb   : > { %2477 = vmatpush3.bf16.msra.mxu0 %v2660_v7  ;;  %2497 = vmatpush3.bf16.msra.mxu1 %v2669_v12  ;;  %p2987_p0 = pnand %p2986_p13, %p2980_p7 }
  0xbc   : > { %2478 = vmatprep.subr.bf16.mxu0 %v3062_v0  ;;  %2498 = vmatprep.subr.bf16.mxu1 %v3062_v0 }
  0xbf   : > { %2479 = vmatpush3.bf16.msra.mxu0 %v2661_v9  ;;  %2499 = vmatpush3.bf16.msra.mxu1 %v2670_v14 }
  0xc0   : > { %2480 = vmatprep.subr.bf16.mxu0 %v3062_v0  ;;  %2500 = vmatprep.subr.bf16.mxu1 %v3062_v0 }
  0xc3   : > { %2481 = vmatpush3.bf16.msra.mxu0 %v2662_v11  ;;  %2501 = vmatpush3.bf16.msra.mxu1 %v2671_v16 }
  0xc4   : > { %2482 = vmatprep.subr.bf16.mxu0 %v3062_v0  ;;  %2502 = vmatprep.subr.bf16.mxu1 %v3062_v0 }
  0xc7   : > { %2483 = vmatpush3.bf16.msra.mxu0 %v2663_v13  ;;  %2503 = vmatpush3.bf16.msra.mxu1 %v2672_v17  ;;  %v2252_v13 = vld [vmem:[%s3558_s12] ss:$0 sm:$0xff] }
  0xc8   : > { %2508 = vmatprep.subr.bf16.mxu0 %v3062_v0  ;;  %2528 = vmatprep.subr.bf16.mxu1 %v3062_v0 }
  0xca   : > { %2485 = vmatmul.mubr.bf16.vlgmr.msra.gmra.mrb[0].mxu0 %v3375_v15 }
  0xcb   : > { %2524 = vmatprep.mubr.msk.bf16.mxu0 %vm3063_vm0, %v3062_v0  ;;  %2509 = vmatpush3.bf16.msra.mxu0 %v2673_v18 }
  0xcc   : > { %2510 = vmatprep.subr.bf16.mxu0 %v3062_v0 }
  0xcf   : > { %2511 = vmatpush3.bf16.msra.mxu0 %v2674_v19 }
  0xd0   : > { %2512 = vmatprep.subr.bf16.mxu0 %v3062_v0 }
  0xd3   : > { %2513 = vmatpush3.bf16.msra.mxu0 %v2675_v20 }
  0xd4   : > { %2514 = vmatprep.subr.bf16.mxu0 %v3062_v0 }
  0xd7   : > { %2515 = vmatpush3.bf16.msra.mxu0 %v2676_v21 }
  0xd8   : > { %2516 = vmatprep.subr.bf16.mxu0 %v3062_v0 }
  0xdb   : > { %2517 = vmatpush3.bf16.msra.mxu0 %v2677_v22  ;;  %v2689_v22 = vld [vmem:[#allocation2] ss:$24 sps:$4 sm:$0xff]  }
  0xdc   : > { %2518 = vmatprep.subr.bf16.mxu0 %v3062_v0 }
  0xdf   : > { %2519 = vmatpush3.bf16.msra.mxu0 %v2678_v23  ;;  %v2691_v23 = vld [vmem:[#allocation2 + $0x4] ss:$24 sps:$4 sm:$0xff]  }
  0xe0   : > { %2520 = vmatprep.subr.bf16.mxu0 %v3062_v0 }
  0xe3   : > { %2521 = vmatpush3.bf16.msra.mxu0 %v2679_v32  ;;  %v2712_v32 = vld [vmem:[#allocation2 + $0xc] ss:$24 sps:$4 sm:$0xff]  }
  0xe4   : > { %2522 = vmatprep.subr.bf16.mxu0 %v3062_v0 }
  0xe7   : > { %2523 = vmatpush3.bf16.msra.mxu0 %v2680_v33  ;;  %v2701_v33 = vld [vmem:[#allocation2 + $0xc0] ss:$24 sps:$4 sm:$0xff]  }
  0xe8   : > { %1342 = vmatprep.subr.bf16.mxu0 %v2691_v23  ;;  %v2767_v23 = vld [vmem:[#allocation7 + $0xc8] sm:$0xff]  }
 0x19d   : > { %v629_v25 = vpop.f32.mrb[0].mxu0 }
 0x19e   : > { %v2486_v26 = vpop.f32.mrb[1].mxu0  ;;  %v630_v28 = vadd.f32 %v2224_v24, %v629_v25  ;;  %v2692_v25 = vld [vmem:[#allocation2 + $0x30] ss:$24 sps:$4 sm:$0xff]  }
 0x19f   : > { %v632_v27 = vpop.f32.mrb[2].mxu0  ;;  %v2697_v26 = vld [vmem:[#allocation2 + $0x64] ss:$24 sps:$4 sm:$0xff]  }
 0x1a0   : > { %v633_v29 = vadd.f32 %v2224_v24, %v632_v27  ;;  %v2487_v30 = vpop.f32.mrb[3].mxu0  ;;  %v2694_v24 = vld [vmem:[#allocation2 + $0x34] ss:$24 sps:$4 sm:$0xff]   ;;  %v2695_v27 = vld [vmem:[#allocation2 + $0x60] ss:$24 sps:$4 sm:$0xff]  }
 0x1a1   : > { %v2703_v30 = vld [vmem:[#allocation2 + $0xc4] ss:$24 sps:$4 sm:$0xff]  }
 0x1a2   : > { %v636_v31 = vpack.c.bf16 %v633_v29, %v630_v28  ;;  %v2698_v28 = vld [vmem:[#allocation2 + $0x90] ss:$24 sps:$4 sm:$0xff]   ;;  %v2700_v29 = vld [vmem:[#allocation2 + $0x94] ss:$24 sps:$4 sm:$0xff]  }
 0x1a4   : > { %2505 = vmatmul.mubr.bf16.vlgmr.msra.gmra.mrb[0].mxu1 %v636_v31  ;;  %v2710_v31 = vld [vmem:[#allocation2 + $0x8] ss:$24 sps:$4 sm:$0xff]  }
 0x1a5   : > { %2544 = vmatprep.mubr.msk.bf16.mxu1 %vm3063_vm0, %v3062_v0  ;;  %2529 = vmatpush3.bf16.msra.mxu1 %v2681_v51  ;;  %v2719_v51 = vld [vmem:[#allocation2 + $0x10] ss:$24 sps:$4 sm:$0xff]  }
 0x1a6   : > { %2530 = vmatprep.subr.bf16.mxu1 %v3062_v0 }
 0x1a9   : > { %2531 = vmatpush3.bf16.msra.mxu1 %v2682_v52  ;;  %v2727_v52 = vld [vmem:[#allocation2 + $0x44] ss:$24 sps:$4 sm:$0xff]  }
 0x1aa   : > { %2532 = vmatprep.subr.bf16.mxu1 %v3062_v0 }
 0x1ad   : > { %2533 = vmatpush3.bf16.msra.mxu1 %v2683_v53  ;;  %v2740_v53 = vld [vmem:[#allocation2 + $0xf8] ss:$24 sps:$4 sm:$0xff]  }
 0x1ae   : > { %2534 = vmatprep.subr.bf16.mxu1 %v3062_v0 }
 0x1b1   : > { %2535 = vmatpush3.bf16.msra.mxu1 %v2684_v62  ;;  %v2737_v62 = vld [vmem:[#allocation2 + $0xa0] ss:$24 sps:$4 sm:$0xff]  }
 0x1b2   : > { %2536 = vmatprep.subr.bf16.mxu1 %v3062_v0 }
 0x1b5   : > { %2537 = vmatpush3.bf16.msra.mxu1 %v2685_v63  ;;  %v2745_v63 = vld [vmem:[#allocation2 + $0xd4] ss:$24 sps:$4 sm:$0xff]  }
 0x1b6   : > { %2538 = vmatprep.subr.bf16.mxu1 %v3062_v0 }
 0x1b9   : > { %2539 = vmatpush3.bf16.msra.mxu1 %v2686_v1  ;;  %v2743_v1 = vld [vmem:[#allocation2 + $0xd0] ss:$24 sps:$4 sm:$0xff]  }
 0x1ba   : > { %2540 = vmatprep.subr.bf16.mxu1 %v3062_v0 }
 0x1bd   : > { %2541 = vmatpush3.bf16.msra.mxu1 %v2687_v2  ;;  %v2751_v2 = vld [vmem:[#allocation2 + $0x104] ss:$24 sps:$4 sm:$0xff]  }
 0x1be   : > { %2542 = vmatprep.subr.bf16.mxu1 %v3062_v0 }
 0x1c1   : > { %2543 = vmatpush3.bf16.msra.mxu1 %v2688_v3  ;;  %v2749_v3 = vld [vmem:[#allocation2 + $0x100] ss:$24 sps:$4 sm:$0xff]  }
 0x1c2   : > { %1385 = vmatprep.subr.bf16.mxu1 %v2712_v32  ;;  %v2774_v32 = vld [vmem:[#allocation7 + $0x18] sm:$0xff]  }
 0x277   : > { %v742_v35 = vpop.f32.mrb[0].mxu1 }
 0x278   : > { %v743_v36 = vadd.f32 %v2234_v34, %v742_v35  ;;  %v2506_v37 = vpop.f32.mrb[1].mxu1  ;;  %v2706_v35 = vld [vmem:[#allocation2 + $0xf4] ss:$24 sps:$4 sm:$0xff]  }
 0x279   : > { %v745_v38 = vpop.f32.mrb[2].mxu1  ;;  %v3064_v37 = vmov 0  }
 0x27a   : > { %v746_v39 = vadd.f32 %v2234_v34, %v745_v38  ;;  %v2507_v40 = vpop.f32.mrb[3].mxu1  ;;  %v749_v41 = vmax.f32 %v743_v36, 0.0  ;;  %v2718_v34 = vld [vmem:[#allocation2 + $0x3c] ss:$24 sps:$4 sm:$0xff]   ;;  %v2716_v36 = vld [vmem:[#allocation2 + $0x38] ss:$24 sps:$4 sm:$0xff]   ;;  %2649 = vset.pattern.permute.xlu0 %v3064_v37 }
 0x27b   : > { %v2724_v38 = vld [vmem:[#allocation2 + $0x6c] ss:$24 sps:$4 sm:$0xff]  }
 0x27c   : > { %v750_v42 = vmax.f32 %v746_v39, 0.0  ;;  %v2704_v39 = vld [vmem:[#allocation2 + $0xf0] ss:$24 sps:$4 sm:$0xff]   ;;  %v2709_v40 = vld [vmem:[#allocation2 + $0x124] ss:$24 sps:$4 sm:$0xff]  }
 0x27e   : > { %v751_v43 = vpack.c.bf16 %v750_v42, %v749_v41 }
 0x280   : > { %2525 = vmatmul.mubr.bf16.vlgmr.msra.gmra.mrb[4].mxu0 %v751_v43  ;;  %v2707_v43 = vld [vmem:[#allocation2 + $0x120] ss:$24 sps:$4 sm:$0xff]  }
 0x281   : > { %1343 = vmatpush1.bf16.msra.mxu0 %v2689_v22  ;;  %1374 = vmatprep.mubr.bf16.mxu0 %v3064_v37  ;;  %v2765_v22 = vld [vmem:[#allocation7 + $0x48] sm:$0xff]  }
 0x282   : > { %1344 = vmatprep.subr.bf16.mxu0 %v2694_v24  ;;  %v2766_v24 = vld [vmem:[#allocation7 + $0x8] sm:$0xff]  }
 0x285   : > { %1345 = vmatpush1.bf16.msra.mxu0 %v2692_v25  ;;  %v2768_v25 = vld [vmem:[#allocation7 + $0x88] sm:$0xff]  }
 0x286   : > { %1346 = vmatprep.subr.bf16.mxu0 %v2697_v26  ;;  %v2769_v26 = vld [vmem:[#allocation7 + $0x50] sm:$0xff]  }
 0x289   : > { %1347 = vmatpush1.bf16.msra.mxu0 %v2695_v27  ;;  %v2771_v27 = vld [vmem:[#allocation7 + $0xd0] sm:$0xff]  }
 0x28a   : > { %1348 = vmatprep.subr.bf16.mxu0 %v2700_v29  ;;  %v2772_v29 = vld [vmem:[#allocation7 + $0x90] sm:$0xff]  }
 0x28d   : > { %1349 = vmatpush1.bf16.msra.mxu0 %v2698_v28  ;;  %v2770_v28 = vld [vmem:[#allocation7 + $0x10] sm:$0xff]  }
 0x28e   : > { %1350 = vmatprep.subr.bf16.mxu0 %v2703_v30  ;;  %v2773_v30 = vld [vmem:[#allocation7 + $0x58] sm:$0xff]  }
 0x291   : > { %1351 = vmatpush1.bf16.msra.mxu0 %v2701_v33  ;;  %v2776_v33 = vld [vmem:[#allocation7 + $0x98] sm:$0xff]  }
 0x292   : > { %1352 = vmatprep.subr.bf16.mxu0 %v2706_v35  ;;  %v2779_v35 = vld [vmem:[#allocation7 + $0xe0] sm:$0xff]  }
 0x295   : > { %1353 = vmatpush1.bf16.msra.mxu0 %v2704_v39  ;;  %v2781_v39 = vld [vmem:[#allocation7 + $0x68] sm:$0xff]  }
 0x296   : > { %1354 = vmatprep.subr.bf16.mxu0 %v2709_v40  ;;  %v2783_v40 = vld [vmem:[#allocation7 + $0xe8] sm:$0xff]  }
 0x299   : > { %1355 = vmatpush1.bf16.msra.mxu0 %v2707_v43  ;;  %v2785_v43 = vld [vmem:[#allocation7 + $0x70] sm:$0xff]  }
 0x353   : > { %v857_v45 = vpop.f32.mrb[4].mxu0 }
 0x354   : > { %v858_v46 = vadd.f32 %v2243_v44, %v857_v45  ;;  %v2526_v47 = vpop.f32.mrb[5].mxu0  ;;  %v2728_v45 = vld [vmem:[#allocation2 + $0x98] ss:$24 sps:$4 sm:$0xff]  }
 0x355   : > { %v860_v48 = vpop.f32.mrb[6].mxu0  ;;  %v2713_v47 = vld [vmem:[#allocation2 + $0x150] ss:$24 sps:$4 sm:$0xff]  }
 0x356   : > { %864 = vmax.xlane.f32.xlu0 %v858_v46  ;;  %v2527_v49 = vpop.f32.mrb[7].mxu0  ;;  %v861_v50 = vadd.f32 %v2243_v44, %v860_v48  ;;  %v2715_v44 = vld [vmem:[#allocation2 + $0x154] ss:$24 sps:$4 sm:$0xff]  }
 0x357   : > { %1356 = vmatprep.subr.bf16.mxu0 %v2715_v44  ;;  %v2721_v48 = vld [vmem:[#allocation2 + $0x14] ss:$24 sps:$4 sm:$0xff]   ;;  %v2734_v49 = vld [vmem:[#allocation2 + $0xc8] ss:$24 sps:$4 sm:$0xff]  }
 0x358   : > { %1357 = vmatpush1.bf16.msra.mxu0 %v2713_v47  ;;  %v2787_v44 = vld [vmem:[#allocation7 + $0xf0] sm:$0xff]   ;;  %v2789_v47 = vld [vmem:[#allocation7 + $0x78] sm:$0xff]  }
 0x359   : > { %1428 = vmatprep.subr.bf16.mxu0 %v2721_v48  ;;  %v2791_v48 = vld [vmem:[#allocation7 + $0xf8] sm:$0xff]  }
 0x35a   : > { %866 = vmax.xlane.f32.xlu0 %v861_v50 }
 0x35b   : > { %1375 = vmatmul.mubr.bf16.vlgmr.msra.gmra.mrb[8].mxu0 %v3375_v15 }
 0x35c   : > { %1429 = vmatpush1.bf16.msra.mxu0 %v2719_v51  ;;  %1460 = vmatprep.mubr.bf16.mxu0 %v3064_v37 }
 0x35d   : > { %1430 = vmatprep.subr.bf16.mxu0 %v2727_v52 }
 0x3e3   : > { %v865_v54 = vpop.xlane.xlu0 %864 }
 0x3e4   : > { %v868_v55 = vsub.f32 %v858_v46, %v865_v54  ;;  %v2736_v46 = vld [vmem:[#allocation2 + $0xcc] ss:$24 sps:$4 sm:$0xff]  }
 0x3e5   : > { %v2748_v54 = vld [vmem:[#allocation2 + $0x12c] ss:$24 sps:$4 sm:$0xff]  }
 0x3e6   : > { %v870_v56 = vmul.f32 1.442695, %v868_v55  ;;  %v2725_v55 = vld [vmem:[#allocation2 + $0x40] ss:$24 sps:$4 sm:$0xff]  }
 0x3e7   : > { %v867_v57 = vpop.xlane.xlu0 %866  ;;  %1431 = vmatpush1.bf16.msra.mxu0 %v2725_v55 }
 0x3e8   : > { %2809 = vpow2.f32 %v870_v56  ;;  %v869_v58 = vsub.f32 %v861_v50, %v867_v57  ;;  %v2742_v50 = vld [vmem:[#allocation2 + $0xfc] ss:$24 sps:$4 sm:$0xff]   ;;  %v2746_v57 = vld [vmem:[#allocation2 + $0x128] ss:$24 sps:$4 sm:$0xff]  }
 0x3e9   : > { %v2733_v56 = vld [vmem:[#allocation2 + $0x74] ss:$24 sps:$4 sm:$0xff]  }
 0x3ea   : > { %v872_v59 = vmul.f32 1.442695, %v869_v58  ;;  %v2754_v58 = vld [vmem:[#allocation2 + $0x15c] ss:$24 sps:$4 sm:$0xff]   ;;  %1432 = vmatprep.subr.bf16.mxu0 %v2733_v56 }
 0x3ec   : > { %2811 = vpow2.f32 %v872_v59  ;;  %v2731_v59 = vld [vmem:[#allocation2 + $0x70] ss:$24 sps:$4 sm:$0xff]  }
 0x3ed   : > { %1433 = vmatpush1.bf16.msra.mxu0 %v2731_v59 }
 0x3f2   : > { %v2810_v60 = vpop.eup %2809 }
 0x3f3   : > { %874 = vadd.xlane.f32.xlu1 %v2810_v60 }
 0x3f6   : > { %v2812_v61 = vpop.eup %2811 }
 0x3f7   : > { %876 = vadd.xlane.f32.xlu1 %v2812_v61 }
 0x480   : > { %v875_v4 = vpop.xlane.xlu1 %874 }
 0x481   : > { %2813 = vrcp.f32 %v875_v4  ;;  %v2757_v4 = vld [vmem:[#allocation2 + $0x134] ss:$24 sps:$4 sm:$0xff]  }
 0x484   : > { %v877_v5 = vpop.xlane.xlu1 %876 }
 0x485   : > { %2815 = vrcp.f32 %v877_v5  ;;  %v2755_v5 = vld [vmem:[#allocation2 + $0x130] ss:$24 sps:$4 sm:$0xff]  }
 0x48b   : > { %v2814_v6 = vpop.eup %2813 }
 0x48c   : > { %v880_v7 = vmul.f32 %v2814_v6, %v2810_v60  ;;  %v2739_v60 = vld [vmem:[#allocation2 + $0xa4] ss:$24 sps:$4 sm:$0xff]  }
 0x48d   : > { %1434 = vmatprep.subr.bf16.mxu0 %v2739_v60  ;;  %v2760_v6 = vld [vmem:[#allocation2 + $0x164] ss:$24 sps:$4 sm:$0xff]  }
 0x48e   : > { %v882_v10 = vmul.f32 %v880_v7, %v749_v41  ;;  %v2722_v41 = vld [vmem:[#allocation2 + $0x68] ss:$24 sps:$4 sm:$0xff]   ;;  %1435 = vmatpush1.bf16.msra.mxu0 %v2737_v62 }
 0x48f   : > { %v2816_v8 = vpop.eup %2815  ;;  %1436 = vmatprep.subr.bf16.mxu0 %v2745_v63  ;;  %v2758_v7 = vld [vmem:[#allocation2 + $0x160] ss:$24 sps:$4 sm:$0xff]  }
 0x490   : > { %v881_v9 = vmul.f32 %v2816_v8, %v2812_v61  ;;  %v2752_v61 = vld [vmem:[#allocation2 + $0x158] ss:$24 sps:$4 sm:$0xff]  }
 0x492   : > { %v883_v11 = vmul.f32 %v881_v9, %v750_v42  ;;  %v2730_v42 = vld [vmem:[#allocation2 + $0x9c] ss:$24 sps:$4 sm:$0xff]   ;;  %1437 = vmatpush1.bf16.msra.mxu0 %v2743_v1 }
 0x493   : > { %1438 = vmatprep.subr.bf16.mxu0 %v2751_v2 }
 0x494   : > { %v884_v12 = vpack.c.bf16 %v883_v11, %v882_v10 }
 0x496   : > { %2545 = vmatmul.mubr.bf16.vlgmr.msra.gmra.mrb[4].mxu1 %v884_v12  ;;  %1439 = vmatpush1.bf16.msra.mxu0 %v2749_v3 }
 0x497   : > { %1386 = vmatpush1.bf16.msra.mxu1 %v2710_v31  ;;  %1417 = vmatprep.mubr.bf16.mxu1 %v3064_v37  ;;  %v2775_v31 = vld [vmem:[#allocation7 + $0xd8] sm:$0xff]  }
 0x498   : > { %1387 = vmatprep.subr.bf16.mxu1 %v2718_v34  ;;  %1440 = vmatprep.subr.bf16.mxu0 %v2757_v4  ;;  %v2777_v34 = vld [vmem:[#allocation7 + $0x60] sm:$0xff]  }
 0x49a   : > { %1441 = vmatpush1.bf16.msra.mxu0 %v2755_v5 }
 0x49b   : > { %1388 = vmatpush1.bf16.msra.mxu1 %v2716_v36  ;;  %1442 = vmatprep.subr.bf16.mxu0 %v2760_v6  ;;  %v2778_v36 = vld [vmem:[#allocation7 + $0x20] sm:$0xff]  }
 0x49c   : > { %1389 = vmatprep.subr.bf16.mxu1 %v2724_v38  ;;  %v2780_v38 = vld [vmem:[#allocation7 + $0xa0] sm:$0xff]  }
 0x49e   : > { %1443 = vmatpush1.bf16.msra.mxu0 %v2758_v7 }
 0x49f   : > { %1390 = vmatpush1.bf16.msra.mxu1 %v2722_v41  ;;  %v2782_v41 = vld [vmem:[#allocation7 + $0x28] sm:$0xff]  }
 0x4a0   : > { %1391 = vmatprep.subr.bf16.mxu1 %v2730_v42  ;;  %v2784_v42 = vld [vmem:[#allocation7 + $0xa8] sm:$0xff]  }
 0x4a1   : > { %1461 = vmatmul.mubr.bf16.vlgmr.msra.gmra.mrb[12].mxu0 %v3375_v15 }
 0x4a3   : > { %1392 = vmatpush1.bf16.msra.mxu1 %v2728_v45  ;;  %v2786_v45 = vld [vmem:[#allocation7 + $0x30] sm:$0xff]  }
 0x4a4   : > { %1393 = vmatprep.subr.bf16.mxu1 %v2736_v46  ;;  %v2788_v46 = vld [vmem:[#allocation7 + $0xb0] sm:$0xff]  }
 0x4a7   : > { %1394 = vmatpush1.bf16.msra.mxu1 %v2734_v49  ;;  %v2790_v49 = vld [vmem:[#allocation7 + $0x38] sm:$0xff]  }
 0x4a8   : > { %1395 = vmatprep.subr.bf16.mxu1 %v2742_v50  ;;  %v1072_v50 = vlaneseq }
 0x4aa   : > { %v1073_v51 = vshrl.u32 %v1072_v50, 7 }
 0x4ab   : > { %1396 = vmatpush1.bf16.msra.mxu1 %v2740_v53  ;;  %v1070_v53 = vld [vmem:[#allocation5] sm:$0x3f] }
 0x4ac   : > { %1397 = vmatprep.subr.bf16.mxu1 %v2748_v54  ;;  %v1074_v52 = vsub.s32 0, %v1073_v51  ;;  %v1078_v54 = vsub.s32 1, %v1073_v51  ;;  %v1082_v4 = vsub.s32 2, %v1073_v51  ;;  %v1086_v5 = vsub.s32 3, %v1073_v51 }
 0x4ae   : > { %v1075_v55 = vrot.slane %v1070_v53, %v1074_v52  ;;  %v1079_v56 = vrot.slane %v1070_v53, %v1078_v54  ;;  %v1083_v6 = vrot.slane %v1070_v53, %v1082_v4  ;;  %v1087_v7 = vrot.slane %v1070_v53, %v1086_v5 }
 0x4af   : > { %1398 = vmatpush1.bf16.msra.mxu1 %v2746_v57  ;;  %v1376_v57 = vpop.f32.mrb[8].mxu0 }
 0x4b0   : > { %1399 = vmatprep.subr.bf16.mxu1 %v2754_v58  ;;  %v1377_v58 = vadd.f32 %v1376_v57, %v1075_v55  ;;  %v1378_v59 = vpop.f32.mrb[9].mxu0 }
 0x4b1   : > { %v1379_v60 = vadd.f32 %v1378_v59, %v1079_v56 }
 0x4b3   : > { %1400 = vmatpush1.bf16.msra.mxu1 %v2752_v61  ;;  %v1380_v61 = vpop.f32.mrb[10].mxu0 }
 0x4b4   : > { %v1381_v62 = vadd.f32 %v1380_v61, %v1075_v55  ;;  %v1382_v63 = vpop.f32.mrb[11].mxu0 }
 0x4b5   : > { %v1383_v1 = vadd.f32 %v1382_v63, %v1079_v56 }
 0x4b6   : > { %1418 = vmatmul.mubr.bf16.vlgmr.msra.gmra.mrb[8].mxu1 %v3375_v15  ;;  %v3463_v2 = vpack.c.bf16 %v1381_v62, %v1377_v58 }
 0x4b7   : > { %v3465_v3 = vpack.c.bf16 %v1383_v1, %v1379_v60 }
 0x569   : > { %v990_v14 = vpop.f32.mrb[4].mxu1 }
 0x56a   : > { %v3437_v0 = vadd.f32 %v2252_v13, %v990_v14  ;;  %v2546_v16 = vpop.f32.mrb[5].mxu1 }
 0x56b   : > { %v993_v17 = vpop.f32.mrb[6].mxu1 }
 0x56c   : > { %v3439_v18 = vadd.f32 %v2252_v13, %v993_v17  ;;  %v2547_v19 = vpop.f32.mrb[7].mxu1  ;;  %v998_v20 = vsel %vm997_vm1, %v3437_v0, -inf }
 0x56d   : > { %999 = vmax.xlane.f32.xlu0 %v998_v20  ;;  %v2761_v19 = vld [vmem:[#allocation7 + $0x40] sm:$0xff]  }
 0x56e   : > { %v1001_v21 = vsel %vm997_vm1, %v3439_v18, -inf  ;;  %v2763_v20 = vld [vmem:[#allocation7 + $0xc0] sm:$0xff]   ;;  %2402 = vmatprep.subr.bf16.mxu1 %v2761_v19 }
 0x56f   : > { %1002 = vmax.xlane.f32.xlu1 %v1001_v21  ;;  %v2764_v21 = vld [vmem:[#allocation7 + $0x80] sm:$0xff]   ;;  %2424 = vmatprep.subr.bf16.mxu0 %v2763_v20  ;;  %v1090_v20 = vsub.s32 4, %v1073_v51 }
 0x570   : > { %2425 = vmatpush3.bf16.msra.mxu0 %v2764_v21  ;;  %v1094_v21 = vsub.s32 5, %v1073_v51 }
 0x571   : > { %2426 = vmatprep.subr.bf16.mxu0 %v2767_v23 }
 0x572   : > { %v1095_v23 = vrot.slane %v1070_v53, %v1094_v21  ;;  %v2804_v21 = vld [vmem:[#allocation7 + $0x128] sm:$0xff]  }
 0x574   : > { %2427 = vmatpush3.bf16.msra.mxu0 %v2768_v25 }
 0x575   : > { %2428 = vmatprep.subr.bf16.mxu0 %v2771_v27 }
 0x578   : > { %2429 = vmatpush3.bf16.msra.mxu0 %v2772_v29 }
 0x579   : > { %2430 = vmatprep.subr.bf16.mxu0 %v2775_v31 }
 0x57c   : > { %2431 = vmatpush3.bf16.msra.mxu0 %v2776_v33 }
 0x57d   : > { %2432 = vmatprep.subr.bf16.mxu0 %v2779_v35 }
 0x580   : > { %2433 = vmatpush3.bf16.msra.mxu0 %v2780_v38 }
 0x581   : > { %2434 = vmatprep.subr.bf16.mxu0 %v2783_v40 }
 0x584   : > { %2435 = vmatpush3.bf16.msra.mxu0 %v2784_v42 }
 0x585   : > { %2436 = vmatprep.subr.bf16.mxu0 %v2787_v44  ;;  %v2792_v44 = vld [vmem:[#allocation7 + $0xb8] sm:$0xff]  }
 0x588   : > { %2437 = vmatpush3.bf16.msra.mxu0 %v2788_v46  ;;  %v3066_v46 = vmov 2  }
 0x589   : > { %2438 = vmatprep.subr.bf16.mxu0 %v2791_v48  ;;  %v1478_v48 = vmul.bf16 1060454197, %v3465_v3 }
 0x58c   : > { %2439 = vmatpush3.bf16.msra.mxu0 %v2792_v44 }
 0x5fa   : > { %v1000_v8 = vpop.xlane.xlu0 %999 }
 0x5fb   : > { %v1004_v9 = vsub.f32 %v3437_v0, %v1000_v8  ;;  %v3065_v0 = vmov 1   ;;  %v1419_v8 = vpop.f32.mrb[8].mxu1 }
 0x5fc   : > { %v1003_v10 = vpop.xlane.xlu1 %1002  ;;  %2650 = vset.pattern.permute.xlu1 %v3065_v0 }
 0x5fd   : > { %v1006_v11 = vmul.f32 1.442695, %v1004_v9  ;;  %v1005_v12 = vsub.f32 %v3439_v18, %v1003_v10  ;;  %v2762_v18 = vld [vmem:[#allocation7] sm:$0xff]   ;;  %v1420_v9 = vadd.f32 %v1419_v8, %v1083_v6  ;;  %v1421_v10 = vpop.f32.mrb[9].mxu1 }
 0x5fe   : > { %2403 = vmatpush3.bf16.msra.mxu1 %v2762_v18 }
 0x5ff   : > { %2817 = vpow2.f32 %v1006_v11  ;;  %v1008_v13 = vmul.f32 1.442695, %v1005_v12  ;;  %2404 = vmatprep.subr.bf16.mxu1 %v2765_v22  ;;  %v1422_v11 = vadd.f32 %v1421_v10, %v1087_v7  ;;  %v1423_v12 = vpop.f32.mrb[10].mxu1  ;;  %v1091_v22 = vrot.slane %v1070_v53, %v1090_v20  ;;  %v2803_v20 = vld [vmem:[#allocation7 + $0x168] sm:$0xff]  }
 0x601   : > { %2819 = vpow2.f32 %v1008_v13  ;;  %v1424_v13 = vadd.f32 %v1423_v12, %v1083_v6 }
 0x602   : > { %2405 = vmatpush3.bf16.msra.mxu1 %v2766_v24  ;;  %v1462_v24 = vpop.f32.mrb[12].mxu0 }
 0x603   : > { %2406 = vmatprep.subr.bf16.mxu1 %v2769_v26  ;;  %v3467_v19 = vpack.c.bf16 %v1424_v13, %v1420_v9  ;;  %v1463_v26 = vadd.f32 %v1462_v24, %v1091_v22  ;;  %v1464_v27 = vpop.f32.mrb[13].mxu0  ;;  %v2795_v9 = vld [vmem:[#allocation7 + $0x148] sm:$0xff]   ;;  %v2798_v13 = vld [vmem:[#allocation7 + $0x110] sm:$0xff]  }
 0x604   : > { %v1466_v29 = vpop.f32.mrb[14].mxu0  ;;  %v2806_v24 = vld [vmem:[#allocation7 + $0x130] sm:$0xff]  }
 0x605   : > { %v1467_v31 = vadd.f32 %v1466_v29, %v1091_v22  ;;  %v2805_v22 = vld [vmem:[#allocation7 + $0x170] sm:$0xff]  }
 0x606   : > { %2407 = vmatpush3.bf16.msra.mxu1 %v2770_v28  ;;  %v1465_v28 = vadd.f32 %v1464_v27, %v1095_v23  ;;  %v2808_v27 = vld [vmem:[#allocation7 + $0x138] sm:$0xff]  }
 0x607   : > { %2408 = vmatprep.subr.bf16.mxu1 %v2773_v30 }
 0x609   : > { %v3454_v14 = vpop.eup %2817 }
 0x60a   : > { %v1010_v16 = vsel %vm997_vm1, %v3454_v14, 0.0  ;;  %2409 = vmatpush3.bf16.msra.mxu1 %v2774_v32  ;;  %v1468_v32 = vpop.f32.mrb[15].mxu0 }
 0x60b   : > { %v3458_v17 = vpop.eup %2819  ;;  %1011 = vadd.xlane.f32.xlu0 %v1010_v16  ;;  %2410 = vmatprep.subr.bf16.mxu1 %v2777_v34  ;;  %v1425_v16 = vpop.f32.mrb[11].mxu1  ;;  %v1469_v33 = vadd.f32 %v1468_v32, %v1095_v23  ;;  %v3471_v34 = vpack.c.bf16 %v1467_v31, %v1463_v26  ;;  %v2807_v26 = vld [vmem:[#allocation7 + $0x178] sm:$0xff]  }
 0x60c   : > { %v1013_v15 = vsel %vm997_vm1, %v3458_v17, 0.0 }
 0x60d   : > { %1014 = vadd.xlane.f32.xlu1 %v1013_v15  ;;  %v1426_v15 = vadd.f32 %v1425_v16, %v1087_v7  ;;  %v1476_v35 = vpack.c.bf16 %v1469_v33, %v1465_v28  ;;  %v2794_v7 = vld [vmem:[#allocation7 + $0x100] sm:$0xff]   ;;  %v2799_v16 = vld [vmem:[#allocation7 + $0x158] sm:$0xff]  }
 0x60e   : > { %2411 = vmatpush3.bf16.msra.mxu1 %v2778_v36  ;;  %v2309_v33 = vld [vmem:[%s3550_s4] ss:$0 sm:$0xff] }
 0x60f   : > { %2412 = vmatprep.subr.bf16.mxu1 %v2781_v39  ;;  %v3469_v18 = vpack.c.bf16 %v1426_v15, %v1422_v11  ;;  %v2796_v11 = vld [vmem:[#allocation7 + $0x108] sm:$0xff]   ;;  %v2800_v15 = vld [vmem:[#allocation7 + $0x118] sm:$0xff]  }
 0x612   : > { %2413 = vmatpush3.bf16.msra.mxu1 %v2782_v41 }
 0x613   : > { %2414 = vmatprep.subr.bf16.mxu1 %v2785_v43 }
 0x616   : > { %2415 = vmatpush3.bf16.msra.mxu1 %v2786_v45  ;;  %v2793_v45 = vld [vmem:[#allocation7 + $0x140] sm:$0xff]  }
 0x617   : > { %2416 = vmatprep.subr.bf16.mxu1 %v2789_v47  ;;  %v1477_v47 = vmul.bf16 1060454197, %v3463_v2 }
 0x61a   : > { %2417 = vmatpush3.bf16.msra.mxu1 %v2790_v49 }
 0x61b   : > { %2446 = vmatprep.subr.bf16.mxu1 %v2793_v45 }
 0x698   : > { %v1012_v25 = vpop.xlane.xlu0 %1011 }
 0x699   : > { %2821 = vrcp.f32 %v1012_v25 }
 0x69a   : > { %v1015_v30 = vpop.xlane.xlu1 %1014 }
 0x69b   : > { %2823 = vrcp.f32 %v1015_v30 }
 0x6a3   : > { %v2822_v36 = vpop.eup %2821 }
 0x6a4   : > { %v1018_v38 = vmul.f32 %v2822_v36, %v3454_v14  ;;  %v1679_v14 = vmul.bf16 1060454197, %v3467_v19 }
 0x6a5   : > { %v2824_v39 = vpop.eup %2823 }
 0x6a6   : > { %v1019_v40 = vmul.f32 %v2824_v39, %v3458_v17  ;;  %v1020_v41 = vmul.f32 0.5, %v1018_v38  ;;  %v1680_v17 = vmul.bf16 1060454197, %v3469_v18  ;;  %2825 = verf.bf16 %v1679_v14 }
 0x6a8   : > { %v1021_v42 = vmul.f32 0.5, %v1019_v40  ;;  %2827 = verf.bf16 %v1680_v17 }
 0x6a9   : > { %2829 = verf.bf16 %v1477_v47 }
 0x6aa   : > { %v1485_v43 = vpack.c.bf16 %v1021_v42, %v1020_v41  ;;  %2831 = verf.bf16 %v1478_v48 }
 0x6ac   : > { %1688 = vperm.xlu1 %2650, %v1485_v43   ;;  %1488 = vperm.xlu0 %2649, %v1485_v43  }
 0x6b0   : > { %2651 = vset.pattern.permute.xlu1 %v3066_v46  ;;  %2655 = vset.pattern.permute.xlu0 %v3066_v46 }
 0x6b1   : > { %1888 = vperm.xlu1 %2651, %v1485_v43  }
 0x6b5   : > { %2652 = vset.pattern.permute.xlu1 %v3064_v37  ;;  %v1880_v37 = vmul.bf16 1060454197, %v1476_v35 }
 0x6b6   : > { %1528 = vperm.xlu1 %2652, %v1018_v38  }
 0x6b7   : > { %2833 = verf.bf16 %v1880_v37 }
 0x6ba   : > { %1533 = vperm.xlu1 %2652, %v1019_v40  }
 0x6be   : > { %2653 = vset.pattern.permute.xlu1 %v3065_v0  ;;  %v2826_v0 = vpop.eup %2825 }
 0x6bf   : > { %1727 = vperm.xlu1 %2653, %v1018_v38   ;;  %v2828_v49 = vpop.eup %2827  ;;  %v1683_v52 = vadd.bf16 1065369472, %v2826_v0 }
 0x6c0   : > { %v2830_v50 = vpop.eup %2829  ;;  %v1684_v53 = vadd.bf16 1065369472, %v2828_v49 }
 0x6c1   : > { %v2832_v51 = vpop.eup %2831  ;;  %v1481_v55 = vadd.bf16 1065369472, %v2830_v50  ;;  %v1685_v57 = vmul.bf16 %v1683_v52, %v3467_v19  ;;  %v2801_v19 = vld [vmem:[#allocation7 + $0x160] sm:$0xff]  }
 0x6c2   : > { %v2834_v54 = vpop.eup %2833  ;;  %v1482_v56 = vadd.bf16 1065369472, %v2832_v51  ;;  %v1686_v58 = vmul.bf16 %v1684_v53, %v3469_v18  ;;  %v2802_v18 = vld [vmem:[#allocation7 + $0x120] sm:$0xff]  }
 0x6c3   : > { %1731 = vperm.xlu1 %2653, %v1019_v40   ;;  %v1884_v59 = vadd.bf16 1065369472, %v2834_v54  ;;  %v1483_v60 = vmul.bf16 %v1481_v55, %v3463_v2  ;;  %v2797_v2 = vld [vmem:[#allocation7 + $0x150] sm:$0xff]  }
 0x6c4   : > { %v1484_v61 = vmul.bf16 %v1482_v56, %v3465_v3  ;;  %v1879_v3 = vmul.bf16 1060454197, %v3471_v34  ;;  %v2343_v56 = vld [vmem:[%s3550_s4 + $0x2] ss:$0 sm:$0xff] }
 0x6c5   : > { %v1886_v8 = vmul.bf16 %v1884_v59, %v1476_v35  ;;  %v2326_v35 = vld [vmem:[%s3550_s4 + $0x1] ss:$0 sm:$0xff] }
 0x6c6   : > { %2835 = verf.bf16 %v1879_v3 }
 0x6c7   : > { %2654 = vset.pattern.permute.xlu1 %v3066_v46 }
 0x6c8   : > { %1927 = vperm.xlu1 %2654, %v1018_v38  }
 0x6cc   : > { %1931 = vperm.xlu1 %2654, %v1019_v40  }
 0x6d1   : > { %v2836_v23 = vpop.eup %2835 }
 0x6d2   : > { %v1883_v25 = vadd.bf16 1065369472, %v2836_v23 }
 0x6d4   : > { %v1885_v28 = vmul.bf16 %v1883_v25, %v3471_v34 }
 0x72b   : > { %v1689_v62 = vpop.permute.xlu1 %1688  ;;  %v1489_v63 = vpop.permute.xlu0 %1488 }
 0x72c   : > { %v1691_v1 = vmul.bf16 %v1689_v62, %v1685_v57  ;;  %v1692_v4 = vmul.bf16 %v1689_v62, %v1686_v58  ;;  %v1491_v5 = vmul.bf16 %v1489_v63, %v1483_v60  ;;  %v1492_v6 = vmul.bf16 %v1489_v63, %v1484_v61 }
 0x72e   : > { %1670 = vmatprep.mubr.bf16.mxu1 %v1492_v6  ;;  %1868 = vmatprep.mubr.bf16.mxu0 %v1692_v4 }
 0x72f   : > { %1671 = vmatmul.mubr.bf16.vlgmr.msra.gmra.mrb[12].mxu1 %v1491_v5  ;;  %1869 = vmatmul.mubr.bf16.vlgmr.msra.gmra.mrb[16].mxu0 %v1691_v1 }
 0x730   : > { %2447 = vmatpush3.bf16.msra.mxu1 %v2794_v7  ;;  %v1889_v10 = vpop.permute.xlu1 %1888 }
 0x731   : > { %v1892_v12 = vmul.bf16 %v1889_v10, %v1886_v8  ;;  %2448 = vmatprep.subr.bf16.mxu1 %v2795_v9  ;;  %v1891_v29 = vmul.bf16 %v1889_v10, %v1885_v28 }
 0x733   : > { %2068 = vmatprep.mubr.bf16.mxu1 %v1892_v12 }
 0x734   : > { %2449 = vmatpush3.bf16.msra.mxu1 %v2796_v11 }
 0x735   : > { %2450 = vmatprep.subr.bf16.mxu1 %v2797_v2  ;;  %v1529_v30 = vpop.permute.xlu1 %1528 }
 0x736   : > { %v1540_v41 = vmul.f32 %v2309_v33, %v1529_v30 }
 0x738   : > { %2451 = vmatpush3.bf16.msra.mxu1 %v2798_v13 }
 0x739   : > { %2452 = vmatprep.subr.bf16.mxu1 %v2799_v16  ;;  %v1534_v31 = vpop.permute.xlu1 %1533 }
 0x73a   : > { %v1541_v14 = vmul.f32 %v2309_v33, %v1534_v31 }
 0x73c   : > { %2453 = vmatpush3.bf16.msra.mxu1 %v2800_v15 }
 0x73d   : > { %2454 = vmatprep.subr.bf16.mxu1 %v2801_v19 }
 0x73e   : > { %v1728_v32 = vpop.permute.xlu1 %1727 }
 0x73f   : > { %v1738_v42 = vmul.f32 %v2326_v35, %v1728_v32 }
 0x740   : > { %2455 = vmatpush3.bf16.msra.mxu1 %v2802_v18 }
 0x741   : > { %2456 = vmatprep.subr.bf16.mxu1 %v2803_v20 }
 0x742   : > { %v1732_v36 = vpop.permute.xlu1 %1731 }
 0x743   : > { %v1739_v17 = vmul.f32 %v2326_v35, %v1732_v36 }
 0x744   : > { %2457 = vmatpush3.bf16.msra.mxu1 %v2804_v21 }
 0x745   : > { %2458 = vmatprep.subr.bf16.mxu1 %v2805_v22 }
 0x747   : > { %v1928_v55 = vpop.permute.xlu1 %1927 }
 0x748   : > { %2459 = vmatpush3.bf16.msra.mxu1 %v2806_v24  ;;  %v1938_v60 = vmul.f32 %v2343_v56, %v1928_v55 }
 0x749   : > { %2460 = vmatprep.subr.bf16.mxu1 %v2807_v26 }
 0x74b   : > { %v1932_v58 = vpop.permute.xlu1 %1931 }
 0x74c   : > { %2461 = vmatpush3.bf16.msra.mxu1 %v2808_v27  ;;  %v1939_v1 = vmul.f32 %v2343_v56, %v1932_v58 }
 0x74f   : > { %2069 = vmatmul.mubr.bf16.vlgmr.msra.gmra.mrb[16].mxu1 %v1891_v29 }
 0x802   : > { %v2418_v38 = vpop.f32.mrb[12].mxu1  ;;  %v2440_v39 = vpop.f32.mrb[16].mxu0 }
 0x803   : > { %v2419_v40 = vpop.f32.mrb[13].mxu1  ;;  %v2441_v34 = vpop.f32.mrb[17].mxu0 }
 0x804   : > { %v2420_v43 = vadd.f32 %v2419_v40, %v2418_v38  ;;  %v2442_v44 = vadd.f32 %v2441_v34, %v2440_v39  ;;  %v2421_v45 = vpop.f32.mrb[14].mxu1  ;;  %v2443_v46 = vpop.f32.mrb[18].mxu0 }
 0x805   : > { %v2422_v47 = vpop.f32.mrb[15].mxu1  ;;  %v2444_v48 = vpop.f32.mrb[19].mxu0 }
 0x806   : > { %v1673_v37 = vadd.f32 %v2420_v43, %v1540_v41  ;;  %v1871_v0 = vadd.f32 %v2442_v44, %v1738_v42  ;;  %v2423_v49 = vadd.f32 %v2422_v47, %v2421_v45  ;;  %v2445_v50 = vadd.f32 %v2444_v48, %v2443_v46 }
 0x808   : > { %v1877_v51 = vadd.f32 %v1871_v0, %v1673_v37  ;;  %v1676_v52 = vadd.f32 %v2423_v49, %v1541_v14  ;;  %v1874_v53 = vadd.f32 %v2445_v50, %v1739_v17 }
 0x80a   : > { %v1878_v54 = vadd.f32 %v1874_v53, %v1676_v52 }
 0x822   : > { %v2462_v57 = vpop.f32.mrb[16].mxu1 }
 0x823   : > { %v2463_v59 = vpop.f32.mrb[17].mxu1 }
 0x824   : > { %v2464_v61 = vadd.f32 %v2463_v59, %v2462_v57  ;;  %v2465_v62 = vpop.f32.mrb[18].mxu1 }
 0x825   : > { %v2466_v63 = vpop.f32.mrb[19].mxu1 }
 0x826   : > { %v2071_v4 = vadd.f32 %v2464_v61, %v1938_v60  ;;  %v2467_v5 = vadd.f32 %v2466_v63, %v2465_v62 }
 0x828   : > { %v2077_v6 = vadd.f32 %v2071_v4, %v1877_v51  ;;  %v2074_v7 = vadd.f32 %v2467_v5, %v1939_v1 }
 0x82a   : > { %2079 = vst [vmem:[%s505_s24] sm:$0xff] %v2077_v6  ;;  %v2078_v8 = vadd.f32 %v2074_v7, %v1878_v54 }
 0x82c   : > { %2080 = vst [vmem:[%s505_s24 + $0x8] sm:$0xff] %v2078_v8 }
 0x82d   : > { %2990 = shalt.err (!%p2987_p0)
}
 0x82e   : > { %s2991_s30 = scalar_lea.hbm %s3503_s7, 256  ;;  %s2995_s19 = scalar_lea.hbm %s3607_s16, 512 }
 0x82f   : > { %p2992_p1 = scmp.ne.s32.totalorder %s3503_s7, %s2991_s30  ;;  %p2996_p9 = scmp.lt.u32.totalorder %s3503_s7, %s3607_s16 }
 0x830   : > { %p2997_p12 = scmp.lt.u32.totalorder %s2995_s19, %s2991_s30  ;;  %p2999_p2 = scmp.lt.u32.totalorder %s2991_s30, %s3503_s7 }
 0x831   : > { %p2993_p6 = pnand %p2992_p1, %p3608_p3 }
 0x832   : > { %p2998_p10 = por %p2997_p12, %p2996_p9 }
 0x833   : > { %p2994_p5 = pneg %p2993_p6 }
 0x834   : > { %p3000_p4 = por %p2999_p2, %p2998_p10 }
 0x836   : > { %p3001_p7 = pnand %p3000_p4, %p2994_p5 }
 0x838   : > { %3004 = shalt.err (!%p3001_p7)
}
 0x839   : > { %s3068_s24 = smov 128   ;;  %s3069_s25 = smov 8  }
 0x83a   : > { %2568 = dma.vmem_to_hbm [thread:$0]  (%p3608_p3), %s3498_s14, 256, %s3503_s7, %s3505_s28, %s3068_s24, %s3068_s24, %s3069_s25  }
 0x83b PF: > { %s3609_s20 = sld [smem:[#allocation19_spill]]  ;;  %s3610_s23 = sld [smem:[#allocation16_spill]] }
 0x83c   : > { %s3611_s27 = sld [smem:[#allocation23_spill]] }
 0x841   : > { %p2600_p8 = scmp.ge.s32.totalorder %s3609_s20, 2  ;;  %s2110_s26 = sand.u32 1, %s3610_s23  }
 0x842   : > { %p3612_p11 = scmp.ne.s32.totalorder %s3611_s27, 0  ;;  %s2111_s29 = scalar_lea.sflag [#allocation4], %s2110_s26 }
 0x844   : > { %p2587_p13 = pnand %p2600_p8, %p3612_p11 }
 0x846   : > { %3034 = dma.done.wait (!%p2587_p13), %s2111_s29, 256  }
 0x847   : > { %3036 = vsyncadd (!%p2587_p13), %s2111_s29, 4294967040  ;;  %s3613_s28 = sld [smem:[#allocation20_spill]]  ;;  %s3614_s25 = sld [smem:[#allocation17_spill]] }
 0x848   : > { %s3615_s26 = sld [smem:[#allocation18_spill]]  ;;  %s3616_s27 = sld [smem:[#allocation21_spill]] }
 0x84d   : > { %p26_p0 = scmp.ge.s32.totalorder %s3613_s28, 4  }
 0x84f   :  { %28 = sbr.rel (!%p26_p0) target bundleno = 10 (0xa), region = 128 }
 0x856   :  { %2116 = vsyncpa [#allocation3], 1 }
 0x857   :  { %2118 = vsyncpa [#allocation3 + $0x1], 1 }
 0x858   :  { %2119 = vsyncpa [#allocation6], 1 }
 0x859   :  { %2120 = vsyncpa [#allocation9], 1 }
 0x85a   :  { %2121 = vsyncpa [#allocation4], 1 }
 0x85b   :  { %2123 = vsyncpa [#allocation4 + $0x1], 1 }

// kernel: tpu_custom_call.1
= control target key start
LH: loop header
LB: loop body
LE: loop exit
PB: predicated region body
PF: predicated region fallthrough
CT: control target
= control target key end

     0   :  { %s3546_s0 = inlined_call_operand.vmem [shape: bf16[32,128], index: 0, kind: input, shape index: {}]   ;;  %s3547_s1 = inlined_call_operand.hbm [shape: bf16[128,768], index: 1, kind: input, shape index: {}]   ;;  %s3548_s2 = inlined_call_operand.hbm [shape: f32[1,768], index: 2, kind: input, shape index: {}]   ;;  %s3549_s3 = inlined_call_operand.hbm [shape: bf16[768,128], index: 3, kind: input, shape index: {}]   ;;  %s3550_s4 = inlined_call_operand.vmem [shape: f32[3,128], index: 4, kind: input, shape index: {}]   ;;  %s3551_s5 = inlined_call_operand.vmem [shape: bf16[128,128], index: 5, kind: input, shape index: {}]   ;;  %s3552_s6 = inlined_call_operand.vmem [shape: f32[1,128], index: 6, kind: input, shape index: {}]   ;;  %s3553_s7 = inlined_call_operand.hbm [shape: bf16[128,128], index: 7, kind: input, shape index: {}]   ;;  %s3554_s8 = inlined_call_operand.vmem [shape: f32[1,128], index: 8, kind: input, shape index: {}]   ;;  %s3555_s9 = inlined_call_operand.hbm [shape: bf16[128,128], index: 9, kind: input, shape index: {}]   ;;  %s3556_s10 = inlined_call_operand.vmem [shape: f32[1,128], index: 10, kind: input, shape index: {}]   ;;  %s3557_s11 = inlined_call_operand.vmem [shape: bf16[128,3], index: 11, kind: input, shape index: {}]   ;;  %s3558_s12 = inlined_call_operand.vmem [shape: f32[1,3], index: 12, kind: input, shape index: {}]   ;;  %s3559_s13 = inlined_call_operand.hbm [shape: f32[32,128], index: 13, kind: output, shape index: {}]  }
   0x1   :  { %3577 = sst [smem:[#allocation24_spill]] %s3548_s2 }
   0x2   :  { %3578 = sst [smem:[#allocation25_spill]] %s3553_s7 }
   0x3   :  { %3579 = sst [smem:[#allocation26_spill]] %s3559_s13 }
   0x4   :  { %18 = vsyncpa [#allocation3], 0 }
   0x5   :  { %19 = vsyncpa [#allocation6], 0 }
   0x6   :  { %20 = vsyncpa [#allocation9], 0 }
   0x7   :  { %21 = vsyncpa [#allocation4], 0 }
   0x8   :  { %23 = vsyncpa [#allocation4 + $0x1], 0  ;;  %s3140_s25 = smov 0   ;;  %s3142_s26 = smov 0  }
   0x9   :  { %s3144_s27 = smov 0   ;;  %s3146_s28 = smov 0  }
   0xa LB: > { %3580 = sst [smem:[#allocation16_spill]] %s3039_s25  ;;  %s3161_s29 = sadd.s32 4294967295, %s3051_s28   ;;  %s3051_s28 = sphi %s3146_s28, %s3613_s28   ;;  %s3047_s27 = sphi %s3144_s27, %s3616_s27   ;;  %s3043_s26 = sphi %s3142_s26, %s3615_s26   ;;  %s3039_s25 = sphi %s3140_s25, %s3614_s25  }
   0xb   : > { %3581 = sst [smem:[#allocation17_spill]] %s3043_s26  ;;  %s2207_s30 = sadd.s32 4294967294, %s3051_s28  }
   0xc   : > { %3582 = sst [smem:[#allocation18_spill]] %s3047_s27  ;;  %s3165_s14 = sadd.s32 1, %s3051_s28  }
   0xd   : > { %3583 = sst [smem:[#allocation19_spill]] %s3051_s28  ;;  %s314_s15 = sadd.s32 1, %s3047_s27 }
   0xe   : > { %3584 = sst [smem:[#allocation20_spill]] %s3165_s14  ;;  %s311_s16 = ssub.s32 %s3051_s28, %s3165_s14 }
   0xf   : > { %p324_p0 = scmp.ne.s32.totalorder %s3047_s27, %s3043_s26  ;;  %p312_p1 = scmp.eq.s32.totalorder %s311_s16, 0 }
  0x10   : > { %p325_p2 = scmp.eq.s32.totalorder %s3161_s29, 1  ;;  %p330_p3 = scmp.ne.s32.totalorder %s3043_s26, %s3039_s25 }
  0x11   : > { %p331_p4 = scmp.eq.s32.totalorder %s2207_s30, 1  ;;  %p2208_p7 = scmp.ge.s32.totalorder %s3051_s28, 1 }
  0x12   : > { %s3176_s17 = scalar_select %p312_p1, %s3047_s27, %s314_s15  }
  0x13   : > { %p3178_p5 = por %p325_p2, %p324_p0  ;;  %p3182_p6 = por %p331_p4, %p330_p3 }
  0x14   : > { %3585 = sst [smem:[#allocation21_spill]] %s3176_s17  ;;  %p338_p8 = scmp.lt.s32.totalorder %s3051_s28, 3 }
  0x15   : > { %s3586_s18 = scalar_select %p3178_p5, 1, 0 }
  0x16   : > { %s3588_s19 = scalar_select %p3182_p6, 1, 0 }
  0x17   : > { %3587 = sst [smem:[#allocation22_spill]] %s3586_s18  ;;  %p3565_p9 = scmp.eq.s32.totalorder %s3161_s29, 0 }
  0x18   : > { %3589 = sst [smem:[#allocation23_spill]] %s3588_s19  ;;  %p3189_p10 = pnand %p2208_p7, %p338_p8 }
  0x19   : > { %s3053_s21 = smov [#allocation5]   ;;  %s3054_s24 = smov [#allocation8]  }
  0x1a   : > { %s3590_s20 = scalar_select %p3189_p10, 1, 0 }
  0x1b   : > { %s364_s22 = sshll.u32 %s3053_s21, 4  ;;  %p2570_p11 = pneg %p3189_p10  ;;  %s365_s22 = int_to_ptr.vmem [resolvable:$true] %s364_s22 }
  0x1c   : > { %s396_s30 = sshll.u32 %s3054_s24, 4  ;;  %s3055_s15 = smov [#allocation2]   ;;  %s3201_s30 = int_to_ptr.vmem [resolvable:$true] %s396_s30 }
  0x1d   : > { %p3197_p12 = pnand %p3565_p9, %p2570_p11  ;;  %s3203_s16 = sshll.u32 %s3055_s15, 4  ;;  %s351_s16 = int_to_ptr.vmem [resolvable:$true] %s3203_s16 }
  0x1e   : > { %s3592_s2 = sld [smem:[#allocation24_spill]] }
  0x1f   : > { %p3213_p0 = pneg %p3197_p12 }
  0x24   : > { %s2837_s21 = scalar_lea.hbm %s3592_s2, 96 }
  0x25   : > { %p2838_p13 = scmp.ne.s32.totalorder %s3592_s2, %s2837_s21  ;;  %p2844_p3 = scmp.lt.u32.totalorder %s2837_s21, %s3592_s2 }
  0x27   : > { %p2840_p1 = pnand %p3213_p0, %p2838_p13 }
  0x29   : > { %p2841_p2 = pneg %p2840_p1 }
  0x2b   : > { %p2846_p4 = pnand %p2844_p3, %p2841_p2 }
  0x2d   : > { %2849 = shalt.err (!%p2846_p4)
}
  0x2e   : > { %s2850_s27 = scalar_lea.vmem %s365_s22, 96  ;;  %p2858_p9 = scmp.lt.s32.totalorder %s365_s22, %s365_s22 }
  0x2f   : > { %p2851_p7 = scmp.ne.s32.totalorder %s365_s22, %s2850_s27  ;;  %p2859_p6 = scmp.lt.s32.totalorder %s2850_s27, %s2850_s27 }
  0x31   : > { %p2853_p8 = pnand %p2851_p7, %p3213_p0  ;;  %p2860_p5 = por %p2859_p6, %p2858_p9 }
  0x33   : > { %p2854_p11 = pneg %p2853_p8 }
  0x35   : > { %p2861_p10 = pnand %p2860_p5, %p2854_p11 }
  0x37   : > { %2864 = shalt.err (!%p2861_p10)
}
  0x38   : > { %2576 = dma.hbm_to_vmem [thread:$0]  (!%p3197_p12), %s3592_s2, 96, %s365_s22, [#allocation6]  }
  0x39   : > { %s3594_s7 = sld [smem:[#allocation25_spill]] }
  0x3f   : > { %s2865_s24 = scalar_lea.hbm %s3594_s7, 1024 }
  0x40   : > { %p2866_p13 = scmp.ne.s32.totalorder %s3594_s7, %s2865_s24  ;;  %p2872_p5 = scmp.lt.u32.totalorder %s2865_s24, %s3594_s7 }
  0x42   : > { %p2868_p1 = pnand %p2866_p13, %p3213_p0 }
  0x44   : > { %p2869_p6 = pneg %p2868_p1 }
  0x46   : > { %p2874_p9 = pnand %p2872_p5, %p2869_p6 }
  0x48   : > { %2877 = shalt.err (!%p2874_p9)
}
  0x49   : > { %s2878_s22 = scalar_lea.vmem %s3201_s30, 1024  ;;  %p2886_p4 = scmp.lt.s32.totalorder %s3201_s30, %s3201_s30 }
  0x4a   : > { %p2879_p10 = scmp.ne.s32.totalorder %s3201_s30, %s2878_s22  ;;  %p2887_p7 = scmp.lt.s32.totalorder %s2878_s22, %s2878_s22 }
  0x4c   : > { %p2881_p2 = pnand %p2879_p10, %p3213_p0  ;;  %p2888_p8 = por %p2887_p7, %p2886_p4 }
  0x4e   : > { %p2882_p3 = pneg %p2881_p2 }
  0x50   : > { %p2889_p11 = pnand %p2888_p8, %p2882_p3 }
  0x52   : > { %2892 = shalt.err (!%p2889_p11)
}
  0x53   : > { %s3570_s28 = smov 64   ;;  %s3572_s13 = smov 4  }
  0x54   : > { %2582 = dma.hbm_to_vmem [thread:$0]  (!%p3197_p12), %s3594_s7, 1024, %s3201_s30, [#allocation9], %s3570_s28, %s3570_s28, %s3572_s13  }
  0x55   : > { %s2893_s24 = scalar_lea.hbm %s3547_s1, 6144 }
  0x56   : > { %p2894_p13 = scmp.ne.s32.totalorder %s3547_s1, %s2893_s24  ;;  %p2900_p5 = scmp.lt.u32.totalorder %s2893_s24, %s3547_s1 }
  0x58   : > { %p2896_p1 = pnand %p2894_p13, %p3213_p0 }
  0x5a   : > { %p2897_p6 = pneg %p2896_p1 }
  0x5c   : > { %p2902_p9 = pnand %p2900_p5, %p2897_p6 }
  0x5e   : > { %2905 = shalt.err (!%p2902_p9)
}
  0x5f   : > { %s2906_s14 = scalar_lea.vmem %s351_s16, 6144  ;;  %p2914_p4 = scmp.lt.s32.totalorder %s351_s16, %s351_s16 }
  0x60   : > { %p2907_p10 = scmp.ne.s32.totalorder %s351_s16, %s2906_s14  ;;  %p2915_p7 = scmp.lt.s32.totalorder %s2906_s14, %s2906_s14 }
  0x62   : > { %p2909_p2 = pnand %p2907_p10, %p3213_p0  ;;  %p2916_p8 = por %p2915_p7, %p2914_p4 }
  0x64   : > { %p2910_p3 = pneg %p2909_p2 }
  0x66   : > { %p2917_p11 = pnand %p2916_p8, %p2910_p3 }
  0x68   : > { %2920 = shalt.err (!%p2917_p11)
}
  0x69   : > { %s3058_s30 = smov 384   ;;  %s3059_s17 = smov 24  }
  0x6a   : > { %2573 = dma.hbm_to_vmem [thread:$0]  (!%p3197_p12), %s3547_s1, 6144, %s351_s16, [#allocation3], %s3058_s30, %s3058_s30, %s3059_s17  }
  0x6b   : > { %s3060_s21 = smov [#allocation7]   ;;  %s3061_s15 = smov [#allocation10]  }
  0x6c   : > { %s374_s24 = sshll.u32 %s3060_s21, 4  ;;  %s412_s27 = sshll.u32 %s3061_s15, 4  ;;  %s375_s24 = int_to_ptr.vmem [resolvable:$true] %s374_s24  ;;  %s413_s27 = int_to_ptr.vmem [resolvable:$true] %s412_s27 }
  0x6d   : > { %s2921_s14 = scalar_lea.hbm %s3549_s3, 6144 }
  0x6e   : > { %p2922_p13 = scmp.ne.s32.totalorder %s3549_s3, %s2921_s14  ;;  %p2928_p5 = scmp.lt.u32.totalorder %s2921_s14, %s3549_s3 }
  0x70   : > { %p2924_p1 = pnand %p2922_p13, %p3213_p0 }
  0x72   : > { %p2925_p6 = pneg %p2924_p1 }
  0x74   : > { %p2930_p9 = pnand %p2928_p5, %p2925_p6 }
  0x76   : > { %2933 = shalt.err (!%p2930_p9)
}
  0x77   : > { %s2934_s16 = scalar_lea.vmem %s375_s24, 6144  ;;  %p2942_p4 = scmp.lt.s32.totalorder %s375_s24, %s375_s24 }
  0x78   : > { %p2935_p10 = scmp.ne.s32.totalorder %s375_s24, %s2934_s16  ;;  %p2943_p7 = scmp.lt.s32.totalorder %s2934_s16, %s2934_s16 }
  0x7a   : > { %p2937_p2 = pnand %p2935_p10, %p3213_p0  ;;  %p2944_p8 = por %p2943_p7, %p2942_p4 }
  0x7c   : > { %p2938_p3 = pneg %p2937_p2 }
  0x7e   : > { %p2945_p11 = pnand %p2944_p8, %p2938_p3 }
  0x80   : > { %2948 = shalt.err (!%p2945_p11)
}
  0x81   : > { %s3595_s7 = smov 4   ;;  %s3596_s28 = smov 64  }
  0x82   : > { %2579 = dma.hbm_to_vmem [thread:$0]  (!%p3197_p12), %s3549_s3, 6144, %s375_s24, [#allocation6], %s3596_s28, %s3596_s28, %s3595_s7  }
  0x83   : > { %s2949_s17 = scalar_lea.hbm %s3555_s9, 1024 }
  0x84   : > { %p2950_p13 = scmp.ne.s32.totalorder %s3555_s9, %s2949_s17  ;;  %p2956_p5 = scmp.lt.u32.totalorder %s2949_s17, %s3555_s9 }
  0x86   : > { %p2952_p1 = pnand %p2950_p13, %p3213_p0 }
  0x88   : > { %p2953_p6 = pneg %p2952_p1 }
  0x8a   : > { %p2958_p9 = pnand %p2956_p5, %p2953_p6 }
  0x8c   : > { %2961 = shalt.err (!%p2958_p9)
}
  0x8d   : > { %s2962_s22 = scalar_lea.vmem %s413_s27, 1024  ;;  %p2970_p4 = scmp.lt.s32.totalorder %s413_s27, %s413_s27 }
  0x8e   : > { %p2963_p10 = scmp.ne.s32.totalorder %s413_s27, %s2962_s22  ;;  %p2971_p7 = scmp.lt.s32.totalorder %s2962_s22, %s2962_s22 }
  0x90   : > { %p2965_p2 = pnand %p2963_p10, %p3213_p0  ;;  %p2972_p8 = por %p2971_p7, %p2970_p4 }
  0x92   : > { %p2966_p3 = pneg %p2965_p2 }
  0x94   : > { %p2973_p11 = pnand %p2972_p8, %p2966_p3 }
  0x96   : > { %2976 = shalt.err (!%p2973_p11)
}
  0x97   : > { %2585 = dma.hbm_to_vmem [thread:$0]  (!%p3197_p12), %s3555_s9, 1024, %s413_s27, [#allocation9], %s3596_s28, %s3596_s28, %s3595_s7  }
  0x98   : > { %p3597_p13 = scmp.ne.s32.totalorder %s3590_s20, 0 }
  0x99   : > { %p3598_p0 = scmp.eq.s32.totalorder (!%p3597_p13), %s3161_s29, 0 }
  0x9a   : > { %446 = sbr.rel (%p3597_p13) target bundleno = 2107 (0x83b), region = 72 }
  0xa1   : > { %3022 = dma.done.wait (%p3598_p0), [#allocation3], 6144   ;;  %p3599_p1 = pmov %p3598_p0 }
  0xa2   : > { %p3600_p6 = pmov %p3598_p0 }
  0xa3   : > { %3024 = vsyncadd (%p3599_p1), [#allocation3], 4294961152 }
  0xa4   : > { %3026 = dma.done.wait (%p3600_p6), [#allocation6], 6240   ;;  %p3601_p5 = pmov %p3598_p0 }
  0xa5   : > { %p3602_p9 = pmov %p3598_p0 }
  0xa6   : > { %3028 = vsyncadd (%p3601_p5), [#allocation6], 4294961056 }
  0xa7   : > { %3030 = dma.done.wait (%p3602_p9), [#allocation9], 2048   ;;  %p3603_p12 = pmov %p3598_p0 }
  0xa8   : > { %s2222_s25 = sshll.u32 %s3161_s29, 1  ;;  %v3062_v0 = vmov 0.0   ;;  %vm3063_vm0 = vmmov 0   ;;  %v2656_v1 = vld [vmem:[%s3551_s5] sm:$0xff]   ;;  %v2657_v2 = vld [vmem:[%s3551_s5 + $0x8] sm:$0xff]   ;;  %v2658_v3 = vld [vmem:[%s3551_s5 + $0x10] sm:$0xff]  }
  0xa9   : > { %3032 = vsyncadd (%p3603_p12), [#allocation9], 4294965248  ;;  %2468 = vmatprep.subr.bf16.mxu0 %v3062_v0  ;;  %2484 = vmatprep.mubr.msk.bf16.mxu0 %vm3063_vm0, %v3062_v0  ;;  %p507_p10 = scmp.lt.s32.totalorder %s2222_s25, 3  ;;  %v2665_v4 = vld [vmem:[#allocation8] sm:$0xff]   ;;  %v2659_v5 = vld [vmem:[%s3551_s5 + $0x18] sm:$0xff]   ;;  %vm997_vm1 = vcmask 23552  }
  0xaa   : > { %2488 = vmatprep.subr.bf16.mxu1 %v3062_v0  ;;  %2504 = vmatprep.mubr.msk.bf16.mxu1 %vm3063_vm0, %v3062_v0  ;;  %v2666_v6 = vld [vmem:[#allocation8 + $0x8] sm:$0xff]   ;;  %v2660_v7 = vld [vmem:[%s3551_s5 + $0x20] sm:$0xff]   ;;  %v2667_v8 = vld [vmem:[#allocation8 + $0x10] sm:$0xff]   ;;  %s3604_s17 = sld [smem:[#allocation17_spill]]  ;;  %s3605_s22 = sld [smem:[#allocation22_spill]] }
  0xab   : > { %s3618_s25 = smov (!%p507_p10, %s2222_s25), 3  ;;  %2469 = vmatpush3.bf16.msra.mxu0 %v2656_v1  ;;  %2489 = vmatpush3.bf16.msra.mxu1 %v2665_v4  ;;  %v2661_v9 = vld [vmem:[%s3551_s5 + $0x28] sm:$0xff]   ;;  %v2668_v10 = vld [vmem:[#allocation8 + $0x18] sm:$0xff]   ;;  %v2662_v11 = vld [vmem:[%s3551_s5 + $0x30] sm:$0xff]   ;;  %s3606_s27 = sld [smem:[#allocation26_spill]] }
  0xac   : > { %2470 = vmatprep.subr.bf16.mxu0 %v3062_v0  ;;  %s2223_s7 = sshll.u32 %s3618_s25, 2  ;;  %2490 = vmatprep.subr.bf16.mxu1 %v3062_v0  ;;  %v2669_v12 = vld [vmem:[#allocation8 + $0x20] sm:$0xff]   ;;  %v2663_v13 = vld [vmem:[%s3551_s5 + $0x38] sm:$0xff]   ;;  %v2670_v14 = vld [vmem:[#allocation8 + $0x28] sm:$0xff]   ;;  %s2365_s25 = sshll.u32 %s3161_s29, 8 }
  0xad   : > { %s510_s30 = scalar_lea.vmem %s3546_s0, %s2223_s7  ;;  %v2671_v16 = vld [vmem:[#allocation8 + $0x30] sm:$0xff]   ;;  %v2672_v17 = vld [vmem:[#allocation8 + $0x38] sm:$0xff]   ;;  %v2673_v18 = vld [vmem:[#allocation10] sm:$0xff]   ;;  %s3067_s29 = smov [#allocation11]  }
  0xae   : > { %v3375_v15 = vld [vmem:[%s510_s30] sm:$0xff]   ;;  %v2674_v19 = vld [vmem:[#allocation10 + $0x8] sm:$0xff]   ;;  %v2675_v20 = vld [vmem:[#allocation10 + $0x10] sm:$0xff]   ;;  %s2981_s18 = sshll.u32 %s3067_s29, 4  ;;  %s2982_s18 = int_to_ptr.vmem [resolvable:$false] %s2981_s18 }
  0xaf   : > { %2471 = vmatpush3.bf16.msra.mxu0 %v2657_v2  ;;  %2491 = vmatpush3.bf16.msra.mxu1 %v2666_v6  ;;  %v2676_v21 = vld [vmem:[#allocation10 + $0x18] sm:$0xff]   ;;  %v2677_v22 = vld [vmem:[#allocation10 + $0x20] sm:$0xff]   ;;  %v2678_v23 = vld [vmem:[#allocation10 + $0x28] sm:$0xff]   ;;  %s2983_s13 = scalar_lea.vmem %s2982_s18, 512 }
  0xb0   : > { %2472 = vmatprep.subr.bf16.mxu0 %v3062_v0  ;;  %2492 = vmatprep.subr.bf16.mxu1 %v3062_v0  ;;  %v2224_v24 = vld [vmem:[%s3552_s6] ss:$0 sm:$0xff]  ;;  %v2679_v32 = vld [vmem:[#allocation10 + $0x30] sm:$0xff]   ;;  %v2682_v52 = vld [vmem:[%s3557_s11 + $0x8] sm:$0xff]   ;;  %s503_s2 = sand.u32 1, %s3604_s17   ;;  %p3608_p3 = scmp.ne.s32.totalorder %s3605_s22, 0 }
  0xb1   : > { %v2680_v33 = vld [vmem:[#allocation10 + $0x38] sm:$0xff]   ;;  %v2683_v53 = vld [vmem:[%s3557_s11 + $0x10] sm:$0xff]   ;;  %v2686_v1 = vld [vmem:[%s3557_s11 + $0x28] sm:$0xff]   ;;  %s2221_s19 = sshll.u32 %s503_s2, 4  ;;  %s3607_s16 = smov %s3606_s27 }
  0xb2   : > { %v2234_v34 = vld [vmem:[%s3554_s8] ss:$0 sm:$0xff]  ;;  %v2684_v62 = vld [vmem:[%s3557_s11 + $0x18] sm:$0xff]   ;;  %v2687_v2 = vld [vmem:[%s3557_s11 + $0x30] sm:$0xff]   ;;  %s505_s24 = scalar_lea.vmem [#allocation11], %s2221_s19  ;;  %s3503_s7 = scalar_lea.hbm %s3606_s27, %s2365_s25 }
  0xb3   : > { %2473 = vmatpush3.bf16.msra.mxu0 %v2658_v3  ;;  %2493 = vmatpush3.bf16.msra.mxu1 %v2667_v8  ;;  %v2243_v44 = vld [vmem:[%s3556_s10] ss:$0 sm:$0xff]  ;;  %v2688_v3 = vld [vmem:[%s3557_s11 + $0x38] sm:$0xff]   ;;  %s2095_s14 = sshll.u32 %s505_s24, 4  ;;  %s3505_s28 = scalar_lea.sflag [#allocation4], %s503_s2  ;;  %s3498_s14 = int_to_ptr.vmem [resolvable:$true] %s2095_s14 }
  0xb4   : > { %2474 = vmatprep.subr.bf16.mxu0 %v3062_v0  ;;  %2494 = vmatprep.subr.bf16.mxu1 %v3062_v0  ;;  %v2681_v51 = vld [vmem:[%s3557_s11] sm:$0xff]   ;;  %s2977_s26 = scalar_lea.vmem %s3498_s14, 256  ;;  %p2984_p8 = scmp.lt.s32.totalorder %s3498_s14, %s2982_s18 }
  0xb5   : > { %v2685_v63 = vld [vmem:[%s3557_s11 + $0x20] sm:$0xff]   ;;  %p2978_p2 = scmp.ne.s32.totalorder %s3498_s14, %s2977_s26  ;;  %p2985_p11 = scmp.lt.s32.totalorder %s2983_s13, %s2977_s26 }
  0xb7   : > { %2475 = vmatpush3.bf16.msra.mxu0 %v2659_v5  ;;  %2495 = vmatpush3.bf16.msra.mxu1 %v2668_v10  ;;  %p2979_p4 = pnand %p2978_p2, %p3608_p3  ;;  %p2986_p13 = por %p2985_p11, %p2984_p8 }
  0xb8   : > { %2476 = vmatprep.subr.bf16.mxu0 %v3062_v0  ;;  %2496 = vmatprep.subr.bf16.mxu1 %v3062_v0 }
  0xb9   : > { %p2980_p7 = pneg %p2979_p4 }
  0xbb   : > { %2477 = vmatpush3.bf16.msra.mxu0 %v2660_v7  ;;  %2497 = vmatpush3.bf16.msra.mxu1 %v2669_v12  ;;  %p2987_p0 = pnand %p2986_p13, %p2980_p7 }
  0xbc   : > { %2478 = vmatprep.subr.bf16.mxu0 %v3062_v0  ;;  %2498 = vmatprep.subr.bf16.mxu1 %v3062_v0 }
  0xbf   : > { %2479 = vmatpush3.bf16.msra.mxu0 %v2661_v9  ;;  %2499 = vmatpush3.bf16.msra.mxu1 %v2670_v14 }
  0xc0   : > { %2480 = vmatprep.subr.bf16.mxu0 %v3062_v0  ;;  %2500 = vmatprep.subr.bf16.mxu1 %v3062_v0 }
  0xc3   : > { %2481 = vmatpush3.bf16.msra.mxu0 %v2662_v11  ;;  %2501 = vmatpush3.bf16.msra.mxu1 %v2671_v16 }
  0xc4   : > { %2482 = vmatprep.subr.bf16.mxu0 %v3062_v0  ;;  %2502 = vmatprep.subr.bf16.mxu1 %v3062_v0 }
  0xc7   : > { %2483 = vmatpush3.bf16.msra.mxu0 %v2663_v13  ;;  %2503 = vmatpush3.bf16.msra.mxu1 %v2672_v17  ;;  %v2252_v13 = vld [vmem:[%s3558_s12] ss:$0 sm:$0xff] }
  0xc8   : > { %2508 = vmatprep.subr.bf16.mxu0 %v3062_v0  ;;  %2528 = vmatprep.subr.bf16.mxu1 %v3062_v0 }
  0xca   : > { %2485 = vmatmul.mubr.bf16.vlgmr.msra.gmra.mrb[0].mxu0 %v3375_v15 }
  0xcb   : > { %2524 = vmatprep.mubr.msk.bf16.mxu0 %vm3063_vm0, %v3062_v0  ;;  %2509 = vmatpush3.bf16.msra.mxu0 %v2673_v18 }
  0xcc   : > { %2510 = vmatprep.subr.bf16.mxu0 %v3062_v0 }
  0xcf   : > { %2511 = vmatpush3.bf16.msra.mxu0 %v2674_v19 }
  0xd0   : > { %2512 = vmatprep.subr.bf16.mxu0 %v3062_v0 }
  0xd3   : > { %2513 = vmatpush3.bf16.msra.mxu0 %v2675_v20 }
  0xd4   : > { %2514 = vmatprep.subr.bf16.mxu0 %v3062_v0 }
  0xd7   : > { %2515 = vmatpush3.bf16.msra.mxu0 %v2676_v21 }
  0xd8   : > { %2516 = vmatprep.subr.bf16.mxu0 %v3062_v0 }
  0xdb   : > { %2517 = vmatpush3.bf16.msra.mxu0 %v2677_v22  ;;  %v2689_v22 = vld [vmem:[#allocation2] ss:$24 sps:$4 sm:$0xff]  }
  0xdc   : > { %2518 = vmatprep.subr.bf16.mxu0 %v3062_v0 }
  0xdf   : > { %2519 = vmatpush3.bf16.msra.mxu0 %v2678_v23  ;;  %v2691_v23 = vld [vmem:[#allocation2 + $0x4] ss:$24 sps:$4 sm:$0xff]  }
  0xe0   : > { %2520 = vmatprep.subr.bf16.mxu0 %v3062_v0 }
  0xe3   : > { %2521 = vmatpush3.bf16.msra.mxu0 %v2679_v32  ;;  %v2712_v32 = vld [vmem:[#allocation2 + $0xc] ss:$24 sps:$4 sm:$0xff]  }
  0xe4   : > { %2522 = vmatprep.subr.bf16.mxu0 %v3062_v0 }
  0xe7   : > { %2523 = vmatpush3.bf16.msra.mxu0 %v2680_v33  ;;  %v2701_v33 = vld [vmem:[#allocation2 + $0xc0] ss:$24 sps:$4 sm:$0xff]  }
  0xe8   : > { %1342 = vmatprep.subr.bf16.mxu0 %v2691_v23  ;;  %v2767_v23 = vld [vmem:[#allocation7 + $0xc8] sm:$0xff]  }
 0x19d   : > { %v629_v25 = vpop.f32.mrb[0].mxu0 }
 0x19e   : > { %v2486_v26 = vpop.f32.mrb[1].mxu0  ;;  %v630_v28 = vadd.f32 %v2224_v24, %v629_v25  ;;  %v2692_v25 = vld [vmem:[#allocation2 + $0x30] ss:$24 sps:$4 sm:$0xff]  }
 0x19f   : > { %v632_v27 = vpop.f32.mrb[2].mxu0  ;;  %v2697_v26 = vld [vmem:[#allocation2 + $0x64] ss:$24 sps:$4 sm:$0xff]  }
 0x1a0   : > { %v633_v29 = vadd.f32 %v2224_v24, %v632_v27  ;;  %v2487_v30 = vpop.f32.mrb[3].mxu0  ;;  %v2694_v24 = vld [vmem:[#allocation2 + $0x34] ss:$24 sps:$4 sm:$0xff]   ;;  %v2695_v27 = vld [vmem:[#allocation2 + $0x60] ss:$24 sps:$4 sm:$0xff]  }
 0x1a1   : > { %v2703_v30 = vld [vmem:[#allocation2 + $0xc4] ss:$24 sps:$4 sm:$0xff]  }
 0x1a2   : > { %v636_v31 = vpack.c.bf16 %v633_v29, %v630_v28  ;;  %v2698_v28 = vld [vmem:[#allocation2 + $0x90] ss:$24 sps:$4 sm:$0xff]   ;;  %v2700_v29 = vld [vmem:[#allocation2 + $0x94] ss:$24 sps:$4 sm:$0xff]  }
 0x1a4   : > { %2505 = vmatmul.mubr.bf16.vlgmr.msra.gmra.mrb[0].mxu1 %v636_v31  ;;  %v2710_v31 = vld [vmem:[#allocation2 + $0x8] ss:$24 sps:$4 sm:$0xff]  }
 0x1a5   : > { %2544 = vmatprep.mubr.msk.bf16.mxu1 %vm3063_vm0, %v3062_v0  ;;  %2529 = vmatpush3.bf16.msra.mxu1 %v2681_v51  ;;  %v2719_v51 = vld [vmem:[#allocation2 + $0x10] ss:$24 sps:$4 sm:$0xff]  }
 0x1a6   : > { %2530 = vmatprep.subr.bf16.mxu1 %v3062_v0 }
 0x1a9   : > { %2531 = vmatpush3.bf16.msra.mxu1 %v2682_v52  ;;  %v2727_v52 = vld [vmem:[#allocation2 + $0x44] ss:$24 sps:$4 sm:$0xff]  }
 0x1aa   : > { %2532 = vmatprep.subr.bf16.mxu1 %v3062_v0 }
 0x1ad   : > { %2533 = vmatpush3.bf16.msra.mxu1 %v2683_v53  ;;  %v2740_v53 = vld [vmem:[#allocation2 + $0xf8] ss:$24 sps:$4 sm:$0xff]  }
 0x1ae   : > { %2534 = vmatprep.subr.bf16.mxu1 %v3062_v0 }
 0x1b1   : > { %2535 = vmatpush3.bf16.msra.mxu1 %v2684_v62  ;;  %v2737_v62 = vld [vmem:[#allocation2 + $0xa0] ss:$24 sps:$4 sm:$0xff]  }
 0x1b2   : > { %2536 = vmatprep.subr.bf16.mxu1 %v3062_v0 }
 0x1b5   : > { %2537 = vmatpush3.bf16.msra.mxu1 %v2685_v63  ;;  %v2745_v63 = vld [vmem:[#allocation2 + $0xd4] ss:$24 sps:$4 sm:$0xff]  }
 0x1b6   : > { %2538 = vmatprep.subr.bf16.mxu1 %v3062_v0 }
 0x1b9   : > { %2539 = vmatpush3.bf16.msra.mxu1 %v2686_v1  ;;  %v2743_v1 = vld [vmem:[#allocation2 + $0xd0] ss:$24 sps:$4 sm:$0xff]  }
 0x1ba   : > { %2540 = vmatprep.subr.bf16.mxu1 %v3062_v0 }
 0x1bd   : > { %2541 = vmatpush3.bf16.msra.mxu1 %v2687_v2  ;;  %v2751_v2 = vld [vmem:[#allocation2 + $0x104] ss:$24 sps:$4 sm:$0xff]  }
 0x1be   : > { %2542 = vmatprep.subr.bf16.mxu1 %v3062_v0 }
 0x1c1   : > { %2543 = vmatpush3.bf16.msra.mxu1 %v2688_v3  ;;  %v2749_v3 = vld [vmem:[#allocation2 + $0x100] ss:$24 sps:$4 sm:$0xff]  }
 0x1c2   : > { %1385 = vmatprep.subr.bf16.mxu1 %v2712_v32  ;;  %v2774_v32 = vld [vmem:[#allocation7 + $0x18] sm:$0xff]  }
 0x277   : > { %v742_v35 = vpop.f32.mrb[0].mxu1 }
 0x278   : > { %v743_v36 = vadd.f32 %v2234_v34, %v742_v35  ;;  %v2506_v37 = vpop.f32.mrb[1].mxu1  ;;  %v2706_v35 = vld [vmem:[#allocation2 + $0xf4] ss:$24 sps:$4 sm:$0xff]  }
 0x279   : > { %v745_v38 = vpop.f32.mrb[2].mxu1  ;;  %v3064_v37 = vmov 0  }
 0x27a   : > { %v746_v39 = vadd.f32 %v2234_v34, %v745_v38  ;;  %v2507_v40 = vpop.f32.mrb[3].mxu1  ;;  %v749_v41 = vmax.f32 %v743_v36, 0.0  ;;  %v2718_v34 = vld [vmem:[#allocation2 + $0x3c] ss:$24 sps:$4 sm:$0xff]   ;;  %v2716_v36 = vld [vmem:[#allocation2 + $0x38] ss:$24 sps:$4 sm:$0xff]   ;;  %2649 = vset.pattern.permute.xlu0 %v3064_v37 }
 0x27b   : > { %v2724_v38 = vld [vmem:[#allocation2 + $0x6c] ss:$24 sps:$4 sm:$0xff]  }
 0x27c   : > { %v750_v42 = vmax.f32 %v746_v39, 0.0  ;;  %v2704_v39 = vld [vmem:[#allocation2 + $0xf0] ss:$24 sps:$4 sm:$0xff]   ;;  %v2709_v40 = vld [vmem:[#allocation2 + $0x124] ss:$24 sps:$4 sm:$0xff]  }
 0x27e   : > { %v751_v43 = vpack.c.bf16 %v750_v42, %v749_v41 }
 0x280   : > { %2525 = vmatmul.mubr.bf16.vlgmr.msra.gmra.mrb[4].mxu0 %v751_v43  ;;  %v2707_v43 = vld [vmem:[#allocation2 + $0x120] ss:$24 sps:$4 sm:$0xff]  }
 0x281   : > { %1343 = vmatpush1.bf16.msra.mxu0 %v2689_v22  ;;  %1374 = vmatprep.mubr.bf16.mxu0 %v3064_v37  ;;  %v2765_v22 = vld [vmem:[#allocation7 + $0x48] sm:$0xff]  }
 0x282   : > { %1344 = vmatprep.subr.bf16.mxu0 %v2694_v24  ;;  %v2766_v24 = vld [vmem:[#allocation7 + $0x8] sm:$0xff]  }
 0x285   : > { %1345 = vmatpush1.bf16.msra.mxu0 %v2692_v25  ;;  %v2768_v25 = vld [vmem:[#allocation7 + $0x88] sm:$0xff]  }
 0x286   : > { %1346 = vmatprep.subr.bf16.mxu0 %v2697_v26  ;;  %v2769_v26 = vld [vmem:[#allocation7 + $0x50] sm:$0xff]  }
 0x289   : > { %1347 = vmatpush1.bf16.msra.mxu0 %v2695_v27  ;;  %v2771_v27 = vld [vmem:[#allocation7 + $0xd0] sm:$0xff]  }
 0x28a   : > { %1348 = vmatprep.subr.bf16.mxu0 %v2700_v29  ;;  %v2772_v29 = vld [vmem:[#allocation7 + $0x90] sm:$0xff]  }
 0x28d   : > { %1349 = vmatpush1.bf16.msra.mxu0 %v2698_v28  ;;  %v2770_v28 = vld [vmem:[#allocation7 + $0x10] sm:$0xff]  }
 0x28e   : > { %1350 = vmatprep.subr.bf16.mxu0 %v2703_v30  ;;  %v2773_v30 = vld [vmem:[#allocation7 + $0x58] sm:$0xff]  }
 0x291   : > { %1351 = vmatpush1.bf16.msra.mxu0 %v2701_v33  ;;  %v2776_v33 = vld [vmem:[#allocation7 + $0x98] sm:$0xff]  }
 0x292   : > { %1352 = vmatprep.subr.bf16.mxu0 %v2706_v35  ;;  %v2779_v35 = vld [vmem:[#allocation7 + $0xe0] sm:$0xff]  }
 0x295   : > { %1353 = vmatpush1.bf16.msra.mxu0 %v2704_v39  ;;  %v2781_v39 = vld [vmem:[#allocation7 + $0x68] sm:$0xff]  }
 0x296   : > { %1354 = vmatprep.subr.bf16.mxu0 %v2709_v40  ;;  %v2783_v40 = vld [vmem:[#allocation7 + $0xe8] sm:$0xff]  }
 0x299   : > { %1355 = vmatpush1.bf16.msra.mxu0 %v2707_v43  ;;  %v2785_v43 = vld [vmem:[#allocation7 + $0x70] sm:$0xff]  }
 0x353   : > { %v857_v45 = vpop.f32.mrb[4].mxu0 }
 0x354   : > { %v858_v46 = vadd.f32 %v2243_v44, %v857_v45  ;;  %v2526_v47 = vpop.f32.mrb[5].mxu0  ;;  %v2728_v45 = vld [vmem:[#allocation2 + $0x98] ss:$24 sps:$4 sm:$0xff]  }
 0x355   : > { %v860_v48 = vpop.f32.mrb[6].mxu0  ;;  %v2713_v47 = vld [vmem:[#allocation2 + $0x150] ss:$24 sps:$4 sm:$0xff]  }
 0x356   : > { %864 = vmax.xlane.f32.xlu0 %v858_v46  ;;  %v2527_v49 = vpop.f32.mrb[7].mxu0  ;;  %v861_v50 = vadd.f32 %v2243_v44, %v860_v48  ;;  %v2715_v44 = vld [vmem:[#allocation2 + $0x154] ss:$24 sps:$4 sm:$0xff]  }
 0x357   : > { %1356 = vmatprep.subr.bf16.mxu0 %v2715_v44  ;;  %v2721_v48 = vld [vmem:[#allocation2 + $0x14] ss:$24 sps:$4 sm:$0xff]   ;;  %v2734_v49 = vld [vmem:[#allocation2 + $0xc8] ss:$24 sps:$4 sm:$0xff]  }
 0x358   : > { %1357 = vmatpush1.bf16.msra.mxu0 %v2713_v47  ;;  %v2787_v44 = vld [vmem:[#allocation7 + $0xf0] sm:$0xff]   ;;  %v2789_v47 = vld [vmem:[#allocation7 + $0x78] sm:$0xff]  }
 0x359   : > { %1428 = vmatprep.subr.bf16.mxu0 %v2721_v48  ;;  %v2791_v48 = vld [vmem:[#allocation7 + $0xf8] sm:$0xff]  }
 0x35a   : > { %866 = vmax.xlane.f32.xlu0 %v861_v50 }
 0x35b   : > { %1375 = vmatmul.mubr.bf16.vlgmr.msra.gmra.mrb[8].mxu0 %v3375_v15 }
 0x35c   : > { %1429 = vmatpush1.bf16.msra.mxu0 %v2719_v51  ;;  %1460 = vmatprep.mubr.bf16.mxu0 %v3064_v37 }
 0x35d   : > { %1430 = vmatprep.subr.bf16.mxu0 %v2727_v52 }
 0x3e3   : > { %v865_v54 = vpop.xlane.xlu0 %864 }
 0x3e4   : > { %v868_v55 = vsub.f32 %v858_v46, %v865_v54  ;;  %v2736_v46 = vld [vmem:[#allocation2 + $0xcc] ss:$24 sps:$4 sm:$0xff]  }
 0x3e5   : > { %v2748_v54 = vld [vmem:[#allocation2 + $0x12c] ss:$24 sps:$4 sm:$0xff]  }
 0x3e6   : > { %v870_v56 = vmul.f32 1.442695, %v868_v55  ;;  %v2725_v55 = vld [vmem:[#allocation2 + $0x40] ss:$24 sps:$4 sm:$0xff]  }
 0x3e7   : > { %v867_v57 = vpop.xlane.xlu0 %866  ;;  %1431 = vmatpush1.bf16.msra.mxu0 %v2725_v55 }
 0x3e8   : > { %2809 = vpow2.f32 %v870_v56  ;;  %v869_v58 = vsub.f32 %v861_v50, %v867_v57  ;;  %v2742_v50 = vld [vmem:[#allocation2 + $0xfc] ss:$24 sps:$4 sm:$0xff]   ;;  %v2746_v57 = vld [vmem:[#allocation2 + $0x128] ss:$24 sps:$4 sm:$0xff]  }
 0x3e9   : > { %v2733_v56 = vld [vmem:[#allocation2 + $0x74] ss:$24 sps:$4 sm:$0xff]  }
 0x3ea   : > { %v872_v59 = vmul.f32 1.442695, %v869_v58  ;;  %v2754_v58 = vld [vmem:[#allocation2 + $0x15c] ss:$24 sps:$4 sm:$0xff]   ;;  %1432 = vmatprep.subr.bf16.mxu0 %v2733_v56 }
 0x3ec   : > { %2811 = vpow2.f32 %v872_v59  ;;  %v2731_v59 = vld [vmem:[#allocation2 + $0x70] ss:$24 sps:$4 sm:$0xff]  }
 0x3ed   : > { %1433 = vmatpush1.bf16.msra.mxu0 %v2731_v59 }
 0x3f2   : > { %v2810_v60 = vpop.eup %2809 }
 0x3f3   : > { %874 = vadd.xlane.f32.xlu1 %v2810_v60 }
 0x3f6   : > { %v2812_v61 = vpop.eup %2811 }
 0x3f7   : > { %876 = vadd.xlane.f32.xlu1 %v2812_v61 }
 0x480   : > { %v875_v4 = vpop.xlane.xlu1 %874 }
 0x481   : > { %2813 = vrcp.f32 %v875_v4  ;;  %v2757_v4 = vld [vmem:[#allocation2 + $0x134] ss:$24 sps:$4 sm:$0xff]  }
 0x484   : > { %v877_v5 = vpop.xlane.xlu1 %876 }
 0x485   : > { %2815 = vrcp.f32 %v877_v5  ;;  %v2755_v5 = vld [vmem:[#allocation2 + $0x130] ss:$24 sps:$4 sm:$0xff]  }
 0x48b   : > { %v2814_v6 = vpop.eup %2813 }
 0x48c   : > { %v880_v7 = vmul.f32 %v2814_v6, %v2810_v60  ;;  %v2739_v60 = vld [vmem:[#allocation2 + $0xa4] ss:$24 sps:$4 sm:$0xff]  }
 0x48d   : > { %1434 = vmatprep.subr.bf16.mxu0 %v2739_v60  ;;  %v2760_v6 = vld [vmem:[#allocation2 + $0x164] ss:$24 sps:$4 sm:$0xff]  }
 0x48e   : > { %v882_v10 = vmul.f32 %v880_v7, %v749_v41  ;;  %v2722_v41 = vld [vmem:[#allocation2 + $0x68] ss:$24 sps:$4 sm:$0xff]   ;;  %1435 = vmatpush1.bf16.msra.mxu0 %v2737_v62 }
 0x48f   : > { %v2816_v8 = vpop.eup %2815  ;;  %1436 = vmatprep.subr.bf16.mxu0 %v2745_v63  ;;  %v2758_v7 = vld [vmem:[#allocation2 + $0x160] ss:$24 sps:$4 sm:$0xff]  }
 0x490   : > { %v881_v9 = vmul.f32 %v2816_v8, %v2812_v61  ;;  %v2752_v61 = vld [vmem:[#allocation2 + $0x158] ss:$24 sps:$4 sm:$0xff]  }
 0x492   : > { %v883_v11 = vmul.f32 %v881_v9, %v750_v42  ;;  %v2730_v42 = vld [vmem:[#allocation2 + $0x9c] ss:$24 sps:$4 sm:$0xff]   ;;  %1437 = vmatpush1.bf16.msra.mxu0 %v2743_v1 }
 0x493   : > { %1438 = vmatprep.subr.bf16.mxu0 %v2751_v2 }
 0x494   : > { %v884_v12 = vpack.c.bf16 %v883_v11, %v882_v10 }
 0x496   : > { %2545 = vmatmul.mubr.bf16.vlgmr.msra.gmra.mrb[4].mxu1 %v884_v12  ;;  %1439 = vmatpush1.bf16.msra.mxu0 %v2749_v3 }
 0x497   : > { %1386 = vmatpush1.bf16.msra.mxu1 %v2710_v31  ;;  %1417 = vmatprep.mubr.bf16.mxu1 %v3064_v37  ;;  %v2775_v31 = vld [vmem:[#allocation7 + $0xd8] sm:$0xff]  }
 0x498   : > { %1387 = vmatprep.subr.bf16.mxu1 %v2718_v34  ;;  %1440 = vmatprep.subr.bf16.mxu0 %v2757_v4  ;;  %v2777_v34 = vld [vmem:[#allocation7 + $0x60] sm:$0xff]  }
 0x49a   : > { %1441 = vmatpush1.bf16.msra.mxu0 %v2755_v5 }
 0x49b   : > { %1388 = vmatpush1.bf16.msra.mxu1 %v2716_v36  ;;  %1442 = vmatprep.subr.bf16.mxu0 %v2760_v6  ;;  %v2778_v36 = vld [vmem:[#allocation7 + $0x20] sm:$0xff]  }
 0x49c   : > { %1389 = vmatprep.subr.bf16.mxu1 %v2724_v38  ;;  %v2780_v38 = vld [vmem:[#allocation7 + $0xa0] sm:$0xff]  }
 0x49e   : > { %1443 = vmatpush1.bf16.msra.mxu0 %v2758_v7 }
 0x49f   : > { %1390 = vmatpush1.bf16.msra.mxu1 %v2722_v41  ;;  %v2782_v41 = vld [vmem:[#allocation7 + $0x28] sm:$0xff]  }
 0x4a0   : > { %1391 = vmatprep.subr.bf16.mxu1 %v2730_v42  ;;  %v2784_v42 = vld [vmem:[#allocation7 + $0xa8] sm:$0xff]  }
 0x4a1   : > { %1461 = vmatmul.mubr.bf16.vlgmr.msra.gmra.mrb[12].mxu0 %v3375_v15 }
 0x4a3   : > { %1392 = vmatpush1.bf16.msra.mxu1 %v2728_v45  ;;  %v2786_v45 = vld [vmem:[#allocation7 + $0x30] sm:$0xff]  }
 0x4a4   : > { %1393 = vmatprep.subr.bf16.mxu1 %v2736_v46  ;;  %v2788_v46 = vld [vmem:[#allocation7 + $0xb0] sm:$0xff]  }
 0x4a7   : > { %1394 = vmatpush1.bf16.msra.mxu1 %v2734_v49  ;;  %v2790_v49 = vld [vmem:[#allocation7 + $0x38] sm:$0xff]  }
 0x4a8   : > { %1395 = vmatprep.subr.bf16.mxu1 %v2742_v50  ;;  %v1072_v50 = vlaneseq }
 0x4aa   : > { %v1073_v51 = vshrl.u32 %v1072_v50, 7 }
 0x4ab   : > { %1396 = vmatpush1.bf16.msra.mxu1 %v2740_v53  ;;  %v1070_v53 = vld [vmem:[#allocation5] sm:$0x3f] }
 0x4ac   : > { %1397 = vmatprep.subr.bf16.mxu1 %v2748_v54  ;;  %v1074_v52 = vsub.s32 0, %v1073_v51  ;;  %v1078_v54 = vsub.s32 1, %v1073_v51  ;;  %v1082_v4 = vsub.s32 2, %v1073_v51  ;;  %v1086_v5 = vsub.s32 3, %v1073_v51 }
 0x4ae   : > { %v1075_v55 = vrot.slane %v1070_v53, %v1074_v52  ;;  %v1079_v56 = vrot.slane %v1070_v53, %v1078_v54  ;;  %v1083_v6 = vrot.slane %v1070_v53, %v1082_v4  ;;  %v1087_v7 = vrot.slane %v1070_v53, %v1086_v5 }
 0x4af   : > { %1398 = vmatpush1.bf16.msra.mxu1 %v2746_v57  ;;  %v1376_v57 = vpop.f32.mrb[8].mxu0 }
 0x4b0   : > { %1399 = vmatprep.subr.bf16.mxu1 %v2754_v58  ;;  %v1377_v58 = vadd.f32 %v1376_v57, %v1075_v55  ;;  %v1378_v59 = vpop.f32.mrb[9].mxu0 }
 0x4b1   : > { %v1379_v60 = vadd.f32 %v1378_v59, %v1079_v56 }
 0x4b3   : > { %1400 = vmatpush1.bf16.msra.mxu1 %v2752_v61  ;;  %v1380_v61 = vpop.f32.mrb[10].mxu0 }
 0x4b4   : > { %v1381_v62 = vadd.f32 %v1380_v61, %v1075_v55  ;;  %v1382_v63 = vpop.f32.mrb[11].mxu0 }
 0x4b5   : > { %v1383_v1 = vadd.f32 %v1382_v63, %v1079_v56 }
 0x4b6   : > { %1418 = vmatmul.mubr.bf16.vlgmr.msra.gmra.mrb[8].mxu1 %v3375_v15  ;;  %v3463_v2 = vpack.c.bf16 %v1381_v62, %v1377_v58 }
 0x4b7   : > { %v3465_v3 = vpack.c.bf16 %v1383_v1, %v1379_v60 }
 0x569   : > { %v990_v14 = vpop.f32.mrb[4].mxu1 }
 0x56a   : > { %v3437_v0 = vadd.f32 %v2252_v13, %v990_v14  ;;  %v2546_v16 = vpop.f32.mrb[5].mxu1 }
 0x56b   : > { %v993_v17 = vpop.f32.mrb[6].mxu1 }
 0x56c   : > { %v3439_v18 = vadd.f32 %v2252_v13, %v993_v17  ;;  %v2547_v19 = vpop.f32.mrb[7].mxu1  ;;  %v998_v20 = vsel %vm997_vm1, %v3437_v0, -inf }
 0x56d   : > { %999 = vmax.xlane.f32.xlu0 %v998_v20  ;;  %v2761_v19 = vld [vmem:[#allocation7 + $0x40] sm:$0xff]  }
 0x56e   : > { %v1001_v21 = vsel %vm997_vm1, %v3439_v18, -inf  ;;  %v2763_v20 = vld [vmem:[#allocation7 + $0xc0] sm:$0xff]   ;;  %2402 = vmatprep.subr.bf16.mxu1 %v2761_v19 }
 0x56f   : > { %1002 = vmax.xlane.f32.xlu1 %v1001_v21  ;;  %v2764_v21 = vld [vmem:[#allocation7 + $0x80] sm:$0xff]   ;;  %2424 = vmatprep.subr.bf16.mxu0 %v2763_v20  ;;  %v1090_v20 = vsub.s32 4, %v1073_v51 }
 0x570   : > { %2425 = vmatpush3.bf16.msra.mxu0 %v2764_v21  ;;  %v1094_v21 = vsub.s32 5, %v1073_v51 }
 0x571   : > { %2426 = vmatprep.subr.bf16.mxu0 %v2767_v23 }
 0x572   : > { %v1095_v23 = vrot.slane %v1070_v53, %v1094_v21  ;;  %v2804_v21 = vld [vmem:[#allocation7 + $0x128] sm:$0xff]  }
 0x574   : > { %2427 = vmatpush3.bf16.msra.mxu0 %v2768_v25 }
 0x575   : > { %2428 = vmatprep.subr.bf16.mxu0 %v2771_v27 }
 0x578   : > { %2429 = vmatpush3.bf16.msra.mxu0 %v2772_v29 }
 0x579   : > { %2430 = vmatprep.subr.bf16.mxu0 %v2775_v31 }
 0x57c   : > { %2431 = vmatpush3.bf16.msra.mxu0 %v2776_v33 }
 0x57d   : > { %2432 = vmatprep.subr.bf16.mxu0 %v2779_v35 }
 0x580   : > { %2433 = vmatpush3.bf16.msra.mxu0 %v2780_v38 }
 0x581   : > { %2434 = vmatprep.subr.bf16.mxu0 %v2783_v40 }
 0x584   : > { %2435 = vmatpush3.bf16.msra.mxu0 %v2784_v42 }
 0x585   : > { %2436 = vmatprep.subr.bf16.mxu0 %v2787_v44  ;;  %v2792_v44 = vld [vmem:[#allocation7 + $0xb8] sm:$0xff]  }
 0x588   : > { %2437 = vmatpush3.bf16.msra.mxu0 %v2788_v46  ;;  %v3066_v46 = vmov 2  }
 0x589   : > { %2438 = vmatprep.subr.bf16.mxu0 %v2791_v48  ;;  %v1478_v48 = vmul.bf16 1060454197, %v3465_v3 }
 0x58c   : > { %2439 = vmatpush3.bf16.msra.mxu0 %v2792_v44 }
 0x5fa   : > { %v1000_v8 = vpop.xlane.xlu0 %999 }
 0x5fb   : > { %v1004_v9 = vsub.f32 %v3437_v0, %v1000_v8  ;;  %v3065_v0 = vmov 1   ;;  %v1419_v8 = vpop.f32.mrb[8].mxu1 }
 0x5fc   : > { %v1003_v10 = vpop.xlane.xlu1 %1002  ;;  %2650 = vset.pattern.permute.xlu1 %v3065_v0 }
 0x5fd   : > { %v1006_v11 = vmul.f32 1.442695, %v1004_v9  ;;  %v1005_v12 = vsub.f32 %v3439_v18, %v1003_v10  ;;  %v2762_v18 = vld [vmem:[#allocation7] sm:$0xff]   ;;  %v1420_v9 = vadd.f32 %v1419_v8, %v1083_v6  ;;  %v1421_v10 = vpop.f32.mrb[9].mxu1 }
 0x5fe   : > { %2403 = vmatpush3.bf16.msra.mxu1 %v2762_v18 }
 0x5ff   : > { %2817 = vpow2.f32 %v1006_v11  ;;  %v1008_v13 = vmul.f32 1.442695, %v1005_v12  ;;  %2404 = vmatprep.subr.bf16.mxu1 %v2765_v22  ;;  %v1422_v11 = vadd.f32 %v1421_v10, %v1087_v7  ;;  %v1423_v12 = vpop.f32.mrb[10].mxu1  ;;  %v1091_v22 = vrot.slane %v1070_v53, %v1090_v20  ;;  %v2803_v20 = vld [vmem:[#allocation7 + $0x168] sm:$0xff]  }
 0x601   : > { %2819 = vpow2.f32 %v1008_v13  ;;  %v1424_v13 = vadd.f32 %v1423_v12, %v1083_v6 }
 0x602   : > { %2405 = vmatpush3.bf16.msra.mxu1 %v2766_v24  ;;  %v1462_v24 = vpop.f32.mrb[12].mxu0 }
 0x603   : > { %2406 = vmatprep.subr.bf16.mxu1 %v2769_v26  ;;  %v3467_v19 = vpack.c.bf16 %v1424_v13, %v1420_v9  ;;  %v1463_v26 = vadd.f32 %v1462_v24, %v1091_v22  ;;  %v1464_v27 = vpop.f32.mrb[13].mxu0  ;;  %v2795_v9 = vld [vmem:[#allocation7 + $0x148] sm:$0xff]   ;;  %v2798_v13 = vld [vmem:[#allocation7 + $0x110] sm:$0xff]  }
 0x604   : > { %v1466_v29 = vpop.f32.mrb[14].mxu0  ;;  %v2806_v24 = vld [vmem:[#allocation7 + $0x130] sm:$0xff]  }
 0x605   : > { %v1467_v31 = vadd.f32 %v1466_v29, %v1091_v22  ;;  %v2805_v22 = vld [vmem:[#allocation7 + $0x170] sm:$0xff]  }
 0x606   : > { %2407 = vmatpush3.bf16.msra.mxu1 %v2770_v28  ;;  %v1465_v28 = vadd.f32 %v1464_v27, %v1095_v23  ;;  %v2808_v27 = vld [vmem:[#allocation7 + $0x138] sm:$0xff]  }
 0x607   : > { %2408 = vmatprep.subr.bf16.mxu1 %v2773_v30 }
 0x609   : > { %v3454_v14 = vpop.eup %2817 }
 0x60a   : > { %v1010_v16 = vsel %vm997_vm1, %v3454_v14, 0.0  ;;  %2409 = vmatpush3.bf16.msra.mxu1 %v2774_v32  ;;  %v1468_v32 = vpop.f32.mrb[15].mxu0 }
 0x60b   : > { %v3458_v17 = vpop.eup %2819  ;;  %1011 = vadd.xlane.f32.xlu0 %v1010_v16  ;;  %2410 = vmatprep.subr.bf16.mxu1 %v2777_v34  ;;  %v1425_v16 = vpop.f32.mrb[11].mxu1  ;;  %v1469_v33 = vadd.f32 %v1468_v32, %v1095_v23  ;;  %v3471_v34 = vpack.c.bf16 %v1467_v31, %v1463_v26  ;;  %v2807_v26 = vld [vmem:[#allocation7 + $0x178] sm:$0xff]  }
 0x60c   : > { %v1013_v15 = vsel %vm997_vm1, %v3458_v17, 0.0 }
 0x60d   : > { %1014 = vadd.xlane.f32.xlu1 %v1013_v15  ;;  %v1426_v15 = vadd.f32 %v1425_v16, %v1087_v7  ;;  %v1476_v35 = vpack.c.bf16 %v1469_v33, %v1465_v28  ;;  %v2794_v7 = vld [vmem:[#allocation7 + $0x100] sm:$0xff]   ;;  %v2799_v16 = vld [vmem:[#allocation7 + $0x158] sm:$0xff]  }
 0x60e   : > { %2411 = vmatpush3.bf16.msra.mxu1 %v2778_v36  ;;  %v2309_v33 = vld [vmem:[%s3550_s4] ss:$0 sm:$0xff] }
 0x60f   : > { %2412 = vmatprep.subr.bf16.mxu1 %v2781_v39  ;;  %v3469_v18 = vpack.c.bf16 %v1426_v15, %v1422_v11  ;;  %v2796_v11 = vld [vmem:[#allocation7 + $0x108] sm:$0xff]   ;;  %v2800_v15 = vld [vmem:[#allocation7 + $0x118] sm:$0xff]  }
 0x612   : > { %2413 = vmatpush3.bf16.msra.mxu1 %v2782_v41 }
 0x613   : > { %2414 = vmatprep.subr.bf16.mxu1 %v2785_v43 }
 0x616   : > { %2415 = vmatpush3.bf16.msra.mxu1 %v2786_v45  ;;  %v2793_v45 = vld [vmem:[#allocation7 + $0x140] sm:$0xff]  }
 0x617   : > { %2416 = vmatprep.subr.bf16.mxu1 %v2789_v47  ;;  %v1477_v47 = vmul.bf16 1060454197, %v3463_v2 }
 0x61a   : > { %2417 = vmatpush3.bf16.msra.mxu1 %v2790_v49 }
 0x61b   : > { %2446 = vmatprep.subr.bf16.mxu1 %v2793_v45 }
 0x698   : > { %v1012_v25 = vpop.xlane.xlu0 %1011 }
 0x699   : > { %2821 = vrcp.f32 %v1012_v25 }
 0x69a   : > { %v1015_v30 = vpop.xlane.xlu1 %1014 }
 0x69b   : > { %2823 = vrcp.f32 %v1015_v30 }
 0x6a3   : > { %v2822_v36 = vpop.eup %2821 }
 0x6a4   : > { %v1018_v38 = vmul.f32 %v2822_v36, %v3454_v14  ;;  %v1679_v14 = vmul.bf16 1060454197, %v3467_v19 }
 0x6a5   : > { %v2824_v39 = vpop.eup %2823 }
 0x6a6   : > { %v1019_v40 = vmul.f32 %v2824_v39, %v3458_v17  ;;  %v1020_v41 = vmul.f32 0.5, %v1018_v38  ;;  %v1680_v17 = vmul.bf16 1060454197, %v3469_v18  ;;  %2825 = verf.bf16 %v1679_v14 }
 0x6a8   : > { %v1021_v42 = vmul.f32 0.5, %v1019_v40  ;;  %2827 = verf.bf16 %v1680_v17 }
 0x6a9   : > { %2829 = verf.bf16 %v1477_v47 }
 0x6aa   : > { %v1485_v43 = vpack.c.bf16 %v1021_v42, %v1020_v41  ;;  %2831 = verf.bf16 %v1478_v48 }
 0x6ac   : > { %1688 = vperm.xlu1 %2650, %v1485_v43   ;;  %1488 = vperm.xlu0 %2649, %v1485_v43  }
 0x6b0   : > { %2651 = vset.pattern.permute.xlu1 %v3066_v46  ;;  %2655 = vset.pattern.permute.xlu0 %v3066_v46 }
 0x6b1   : > { %1888 = vperm.xlu1 %2651, %v1485_v43  }
 0x6b5   : > { %2652 = vset.pattern.permute.xlu1 %v3064_v37  ;;  %v1880_v37 = vmul.bf16 1060454197, %v1476_v35 }
 0x6b6   : > { %1528 = vperm.xlu1 %2652, %v1018_v38  }
 0x6b7   : > { %2833 = verf.bf16 %v1880_v37 }
 0x6ba   : > { %1533 = vperm.xlu1 %2652, %v1019_v40  }
 0x6be   : > { %2653 = vset.pattern.permute.xlu1 %v3065_v0  ;;  %v2826_v0 = vpop.eup %2825 }
 0x6bf   : > { %1727 = vperm.xlu1 %2653, %v1018_v38   ;;  %v2828_v49 = vpop.eup %2827  ;;  %v1683_v52 = vadd.bf16 1065369472, %v2826_v0 }
 0x6c0   : > { %v2830_v50 = vpop.eup %2829  ;;  %v1684_v53 = vadd.bf16 1065369472, %v2828_v49 }
 0x6c1   : > { %v2832_v51 = vpop.eup %2831  ;;  %v1481_v55 = vadd.bf16 1065369472, %v2830_v50  ;;  %v1685_v57 = vmul.bf16 %v1683_v52, %v3467_v19  ;;  %v2801_v19 = vld [vmem:[#allocation7 + $0x160] sm:$0xff]  }
 0x6c2   : > { %v2834_v54 = vpop.eup %2833  ;;  %v1482_v56 = vadd.bf16 1065369472, %v2832_v51  ;;  %v1686_v58 = vmul.bf16 %v1684_v53, %v3469_v18  ;;  %v2802_v18 = vld [vmem:[#allocation7 + $0x120] sm:$0xff]  }
 0x6c3   : > { %1731 = vperm.xlu1 %2653, %v1019_v40   ;;  %v1884_v59 = vadd.bf16 1065369472, %v2834_v54  ;;  %v1483_v60 = vmul.bf16 %v1481_v55, %v3463_v2  ;;  %v2797_v2 = vld [vmem:[#allocation7 + $0x150] sm:$0xff]  }
 0x6c4   : > { %v1484_v61 = vmul.bf16 %v1482_v56, %v3465_v3  ;;  %v1879_v3 = vmul.bf16 1060454197, %v3471_v34  ;;  %v2343_v56 = vld [vmem:[%s3550_s4 + $0x2] ss:$0 sm:$0xff] }
 0x6c5   : > { %v1886_v8 = vmul.bf16 %v1884_v59, %v1476_v35  ;;  %v2326_v35 = vld [vmem:[%s3550_s4 + $0x1] ss:$0 sm:$0xff] }
 0x6c6   : > { %2835 = verf.bf16 %v1879_v3 }
 0x6c7   : > { %2654 = vset.pattern.permute.xlu1 %v3066_v46 }
 0x6c8   : > { %1927 = vperm.xlu1 %2654, %v1018_v38  }
 0x6cc   : > { %1931 = vperm.xlu1 %2654, %v1019_v40  }
 0x6d1   : > { %v2836_v23 = vpop.eup %2835 }
 0x6d2   : > { %v1883_v25 = vadd.bf16 1065369472, %v2836_v23 }
 0x6d4   : > { %v1885_v28 = vmul.bf16 %v1883_v25, %v3471_v34 }
 0x72b   : > { %v1689_v62 = vpop.permute.xlu1 %1688  ;;  %v1489_v63 = vpop.permute.xlu0 %1488 }
 0x72c   : > { %v1691_v1 = vmul.bf16 %v1689_v62, %v1685_v57  ;;  %v1692_v4 = vmul.bf16 %v1689_v62, %v1686_v58  ;;  %v1491_v5 = vmul.bf16 %v1489_v63, %v1483_v60  ;;  %v1492_v6 = vmul.bf16 %v1489_v63, %v1484_v61 }
 0x72e   : > { %1670 = vmatprep.mubr.bf16.mxu1 %v1492_v6  ;;  %1868 = vmatprep.mubr.bf16.mxu0 %v1692_v4 }
 0x72f   : > { %1671 = vmatmul.mubr.bf16.vlgmr.msra.gmra.mrb[12].mxu1 %v1491_v5  ;;  %1869 = vmatmul.mubr.bf16.vlgmr.msra.gmra.mrb[16].mxu0 %v1691_v1 }
 0x730   : > { %2447 = vmatpush3.bf16.msra.mxu1 %v2794_v7  ;;  %v1889_v10 = vpop.permute.xlu1 %1888 }
 0x731   : > { %v1892_v12 = vmul.bf16 %v1889_v10, %v1886_v8  ;;  %2448 = vmatprep.subr.bf16.mxu1 %v2795_v9  ;;  %v1891_v29 = vmul.bf16 %v1889_v10, %v1885_v28 }
 0x733   : > { %2068 = vmatprep.mubr.bf16.mxu1 %v1892_v12 }
 0x734   : > { %2449 = vmatpush3.bf16.msra.mxu1 %v2796_v11 }
 0x735   : > { %2450 = vmatprep.subr.bf16.mxu1 %v2797_v2  ;;  %v1529_v30 = vpop.permute.xlu1 %1528 }
 0x736   : > { %v1540_v41 = vmul.f32 %v2309_v33, %v1529_v30 }
 0x738   : > { %2451 = vmatpush3.bf16.msra.mxu1 %v2798_v13 }
 0x739   : > { %2452 = vmatprep.subr.bf16.mxu1 %v2799_v16  ;;  %v1534_v31 = vpop.permute.xlu1 %1533 }
 0x73a   : > { %v1541_v14 = vmul.f32 %v2309_v33, %v1534_v31 }
 0x73c   : > { %2453 = vmatpush3.bf16.msra.mxu1 %v2800_v15 }
 0x73d   : > { %2454 = vmatprep.subr.bf16.mxu1 %v2801_v19 }
 0x73e   : > { %v1728_v32 = vpop.permute.xlu1 %1727 }
 0x73f   : > { %v1738_v42 = vmul.f32 %v2326_v35, %v1728_v32 }
 0x740   : > { %2455 = vmatpush3.bf16.msra.mxu1 %v2802_v18 }
 0x741   : > { %2456 = vmatprep.subr.bf16.mxu1 %v2803_v20 }
 0x742   : > { %v1732_v36 = vpop.permute.xlu1 %1731 }
 0x743   : > { %v1739_v17 = vmul.f32 %v2326_v35, %v1732_v36 }
 0x744   : > { %2457 = vmatpush3.bf16.msra.mxu1 %v2804_v21 }
 0x745   : > { %2458 = vmatprep.subr.bf16.mxu1 %v2805_v22 }
 0x747   : > { %v1928_v55 = vpop.permute.xlu1 %1927 }
 0x748   : > { %2459 = vmatpush3.bf16.msra.mxu1 %v2806_v24  ;;  %v1938_v60 = vmul.f32 %v2343_v56, %v1928_v55 }
 0x749   : > { %2460 = vmatprep.subr.bf16.mxu1 %v2807_v26 }
 0x74b   : > { %v1932_v58 = vpop.permute.xlu1 %1931 }
 0x74c   : > { %2461 = vmatpush3.bf16.msra.mxu1 %v2808_v27  ;;  %v1939_v1 = vmul.f32 %v2343_v56, %v1932_v58 }
 0x74f   : > { %2069 = vmatmul.mubr.bf16.vlgmr.msra.gmra.mrb[16].mxu1 %v1891_v29 }
 0x802   : > { %v2418_v38 = vpop.f32.mrb[12].mxu1  ;;  %v2440_v39 = vpop.f32.mrb[16].mxu0 }
 0x803   : > { %v2419_v40 = vpop.f32.mrb[13].mxu1  ;;  %v2441_v34 = vpop.f32.mrb[17].mxu0 }
 0x804   : > { %v2420_v43 = vadd.f32 %v2419_v40, %v2418_v38  ;;  %v2442_v44 = vadd.f32 %v2441_v34, %v2440_v39  ;;  %v2421_v45 = vpop.f32.mrb[14].mxu1  ;;  %v2443_v46 = vpop.f32.mrb[18].mxu0 }
 0x805   : > { %v2422_v47 = vpop.f32.mrb[15].mxu1  ;;  %v2444_v48 = vpop.f32.mrb[19].mxu0 }
 0x806   : > { %v1673_v37 = vadd.f32 %v2420_v43, %v1540_v41  ;;  %v1871_v0 = vadd.f32 %v2442_v44, %v1738_v42  ;;  %v2423_v49 = vadd.f32 %v2422_v47, %v2421_v45  ;;  %v2445_v50 = vadd.f32 %v2444_v48, %v2443_v46 }
 0x808   : > { %v1877_v51 = vadd.f32 %v1871_v0, %v1673_v37  ;;  %v1676_v52 = vadd.f32 %v2423_v49, %v1541_v14  ;;  %v1874_v53 = vadd.f32 %v2445_v50, %v1739_v17 }
 0x80a   : > { %v1878_v54 = vadd.f32 %v1874_v53, %v1676_v52 }
 0x822   : > { %v2462_v57 = vpop.f32.mrb[16].mxu1 }
 0x823   : > { %v2463_v59 = vpop.f32.mrb[17].mxu1 }
 0x824   : > { %v2464_v61 = vadd.f32 %v2463_v59, %v2462_v57  ;;  %v2465_v62 = vpop.f32.mrb[18].mxu1 }
 0x825   : > { %v2466_v63 = vpop.f32.mrb[19].mxu1 }
 0x826   : > { %v2071_v4 = vadd.f32 %v2464_v61, %v1938_v60  ;;  %v2467_v5 = vadd.f32 %v2466_v63, %v2465_v62 }
 0x828   : > { %v2077_v6 = vadd.f32 %v2071_v4, %v1877_v51  ;;  %v2074_v7 = vadd.f32 %v2467_v5, %v1939_v1 }
 0x82a   : > { %2079 = vst [vmem:[%s505_s24] sm:$0xff] %v2077_v6  ;;  %v2078_v8 = vadd.f32 %v2074_v7, %v1878_v54 }
 0x82c   : > { %2080 = vst [vmem:[%s505_s24 + $0x8] sm:$0xff] %v2078_v8 }
 0x82d   : > { %2990 = shalt.err (!%p2987_p0)
}
 0x82e   : > { %s2991_s30 = scalar_lea.hbm %s3503_s7, 256  ;;  %s2995_s19 = scalar_lea.hbm %s3607_s16, 512 }
 0x82f   : > { %p2992_p1 = scmp.ne.s32.totalorder %s3503_s7, %s2991_s30  ;;  %p2996_p9 = scmp.lt.u32.totalorder %s3503_s7, %s3607_s16 }
 0x830   : > { %p2997_p12 = scmp.lt.u32.totalorder %s2995_s19, %s2991_s30  ;;  %p2999_p2 = scmp.lt.u32.totalorder %s2991_s30, %s3503_s7 }
 0x831   : > { %p2993_p6 = pnand %p2992_p1, %p3608_p3 }
 0x832   : > { %p2998_p10 = por %p2997_p12, %p2996_p9 }
 0x833   : > { %p2994_p5 = pneg %p2993_p6 }
 0x834   : > { %p3000_p4 = por %p2999_p2, %p2998_p10 }
 0x836   : > { %p3001_p7 = pnand %p3000_p4, %p2994_p5 }
 0x838   : > { %3004 = shalt.err (!%p3001_p7)
}
 0x839   : > { %s3068_s24 = smov 128   ;;  %s3069_s25 = smov 8  }
 0x83a   : > { %2568 = dma.vmem_to_hbm [thread:$0]  (%p3608_p3), %s3498_s14, 256, %s3503_s7, %s3505_s28, %s3068_s24, %s3068_s24, %s3069_s25  }
 0x83b PF: > { %s3609_s20 = sld [smem:[#allocation19_spill]]  ;;  %s3610_s23 = sld [smem:[#allocation16_spill]] }
 0x83c   : > { %s3611_s27 = sld [smem:[#allocation23_spill]] }
 0x841   : > { %p2600_p8 = scmp.ge.s32.totalorder %s3609_s20, 2  ;;  %s2110_s26 = sand.u32 1, %s3610_s23  }
 0x842   : > { %p3612_p11 = scmp.ne.s32.totalorder %s3611_s27, 0  ;;  %s2111_s29 = scalar_lea.sflag [#allocation4], %s2110_s26 }
 0x844   : > { %p2587_p13 = pnand %p2600_p8, %p3612_p11 }
 0x846   : > { %3034 = dma.done.wait (!%p2587_p13), %s2111_s29, 256  }
 0x847   : > { %3036 = vsyncadd (!%p2587_p13), %s2111_s29, 4294967040  ;;  %s3613_s28 = sld [smem:[#allocation20_spill]]  ;;  %s3614_s25 = sld [smem:[#allocation17_spill]] }
 0x848   : > { %s3615_s26 = sld [smem:[#allocation18_spill]]  ;;  %s3616_s27 = sld [smem:[#allocation21_spill]] }
 0x84d   : > { %p26_p0 = scmp.ge.s32.totalorder %s3613_s28, 4  }
 0x84f   :  { %28 = sbr.rel (!%p26_p0) target bundleno = 10 (0xa), region = 128 }
 0x856   :  { %2116 = vsyncpa [#allocation3], 1 }
 0x857   :  { %2118 = vsyncpa [#allocation3 + $0x1], 1 }
 0x858   :  { %2119 = vsyncpa [#allocation6], 1 }
 0x859   :  { %2120 = vsyncpa [#allocation9], 1 }
 0x85a   :  { %2121 = vsyncpa [#allocation4], 1 }
 0x85b   :  { %2123 = vsyncpa [#allocation4 + $0x1], 1 }

// kernel: tpu_custom_call.1
= control target key start
LH: loop header
LB: loop body
LE: loop exit
PB: predicated region body
PF: predicated region fallthrough
CT: control target
= control target key end

     0   :  { %s3649_s0 = inlined_call_operand.vmem [shape: bf16[32,128], index: 0, kind: input, shape index: {}]   ;;  %s3650_s1 = inlined_call_operand.hbm [shape: bf16[128,768], index: 1, kind: input, shape index: {}]   ;;  %s3651_s2 = inlined_call_operand.hbm [shape: f32[1,768], index: 2, kind: input, shape index: {}]   ;;  %s3652_s3 = inlined_call_operand.hbm [shape: bf16[768,128], index: 3, kind: input, shape index: {}]   ;;  %s3653_s4 = inlined_call_operand.vmem [shape: f32[3,128], index: 4, kind: input, shape index: {}]   ;;  %s3654_s5 = inlined_call_operand.vmem [shape: bf16[128,128], index: 5, kind: input, shape index: {}]   ;;  %s3655_s6 = inlined_call_operand.vmem [shape: f32[1,128], index: 6, kind: input, shape index: {}]   ;;  %s3656_s7 = inlined_call_operand.hbm [shape: bf16[128,128], index: 7, kind: input, shape index: {}]   ;;  %s3657_s8 = inlined_call_operand.vmem [shape: f32[1,128], index: 8, kind: input, shape index: {}]   ;;  %s3658_s9 = inlined_call_operand.hbm [shape: bf16[128,128], index: 9, kind: input, shape index: {}]   ;;  %s3659_s10 = inlined_call_operand.vmem [shape: f32[1,128], index: 10, kind: input, shape index: {}]   ;;  %s3660_s11 = inlined_call_operand.vmem [shape: bf16[128,3], index: 11, kind: input, shape index: {}]   ;;  %s3661_s12 = inlined_call_operand.vmem [shape: f32[1,3], index: 12, kind: input, shape index: {}]   ;;  %s3662_s13 = inlined_call_operand.hbm [shape: f32[32,128], index: 13, kind: output, shape index: {}]  }
   0x1   :  { %3680 = sst [smem:[#allocation24_spill]] %s3651_s2 }
   0x2   :  { %3681 = sst [smem:[#allocation25_spill]] %s3656_s7 }
   0x3   :  { %3682 = sst [smem:[#allocation26_spill]] %s3662_s13 }
   0x4   :  { %18 = vsyncpa [#allocation3], 0 }
   0x5   :  { %19 = vsyncpa [#allocation6], 0 }
   0x6   :  { %20 = vsyncpa [#allocation9], 0 }
   0x7   :  { %21 = vsyncpa [#allocation4], 0 }
   0x8   :  { %23 = vsyncpa [#allocation4 + $0x1], 0  ;;  %s3196_s25 = smov 0   ;;  %s3198_s26 = smov 0  }
   0x9   :  { %s3200_s27 = smov 0   ;;  %s3202_s28 = smov 0  }
   0xa LB: > { %3683 = sst [smem:[#allocation16_spill]] %s3095_s25  ;;  %s3217_s29 = sadd.s32 4294967295, %s3107_s28   ;;  %s3107_s28 = sphi %s3202_s28, %s3716_s28   ;;  %s3103_s27 = sphi %s3200_s27, %s3719_s27   ;;  %s3099_s26 = sphi %s3198_s26, %s3718_s26   ;;  %s3095_s25 = sphi %s3196_s25, %s3717_s25  }
   0xb   : > { %3684 = sst [smem:[#allocation17_spill]] %s3099_s26  ;;  %s2247_s30 = sadd.s32 4294967294, %s3107_s28  }
   0xc   : > { %3685 = sst [smem:[#allocation18_spill]] %s3103_s27  ;;  %s3221_s14 = sadd.s32 1, %s3107_s28  }
   0xd   : > { %3686 = sst [smem:[#allocation19_spill]] %s3107_s28  ;;  %s314_s15 = sadd.s32 1, %s3103_s27 }
   0xe   : > { %3687 = sst [smem:[#allocation20_spill]] %s3221_s14  ;;  %s311_s16 = ssub.s32 %s3107_s28, %s3221_s14 }
   0xf   : > { %p324_p0 = scmp.ne.s32.totalorder %s3103_s27, %s3099_s26  ;;  %p312_p1 = scmp.eq.s32.totalorder %s311_s16, 0 }
  0x10   : > { %p325_p2 = scmp.eq.s32.totalorder %s3217_s29, 1  ;;  %p330_p3 = scmp.ne.s32.totalorder %s3099_s26, %s3095_s25 }
  0x11   : > { %p331_p4 = scmp.eq.s32.totalorder %s2247_s30, 1  ;;  %p2248_p7 = scmp.ge.s32.totalorder %s3107_s28, 1 }
  0x12   : > { %s3232_s17 = scalar_select %p312_p1, %s3103_s27, %s314_s15  }
  0x13   : > { %p3234_p5 = por %p325_p2, %p324_p0  ;;  %p3238_p6 = por %p331_p4, %p330_p3 }
  0x14   : > { %3688 = sst [smem:[#allocation21_spill]] %s3232_s17  ;;  %p338_p8 = scmp.lt.s32.totalorder %s3107_s28, 3 }
  0x15   : > { %s3689_s18 = scalar_select %p3234_p5, 1, 0 }
  0x16   : > { %s3691_s19 = scalar_select %p3238_p6, 1, 0 }
  0x17   : > { %3690 = sst [smem:[#allocation22_spill]] %s3689_s18  ;;  %p3668_p9 = scmp.eq.s32.totalorder %s3217_s29, 0 }
  0x18   : > { %3692 = sst [smem:[#allocation23_spill]] %s3691_s19  ;;  %p3245_p10 = pnand %p2248_p7, %p338_p8 }
  0x19   : > { %s3109_s21 = smov [#allocation5]   ;;  %s3110_s24 = smov [#allocation8]  }
  0x1a   : > { %s3693_s20 = scalar_select %p3245_p10, 1, 0 }
  0x1b   : > { %s364_s22 = sshll.u32 %s3109_s21, 4  ;;  %p2610_p11 = pneg %p3245_p10  ;;  %s365_s22 = int_to_ptr.vmem [resolvable:$true] %s364_s22 }
  0x1c   : > { %s396_s30 = sshll.u32 %s3110_s24, 4  ;;  %s3111_s15 = smov [#allocation2]   ;;  %s3257_s30 = int_to_ptr.vmem [resolvable:$true] %s396_s30 }
  0x1d   : > { %p3253_p12 = pnand %p3668_p9, %p2610_p11  ;;  %s3259_s16 = sshll.u32 %s3111_s15, 4  ;;  %s351_s16 = int_to_ptr.vmem [resolvable:$true] %s3259_s16 }
  0x1e   : > { %s3695_s2 = sld [smem:[#allocation24_spill]] }
  0x1f   : > { %p3269_p0 = pneg %p3253_p12 }
  0x24   : > { %s2893_s21 = scalar_lea.hbm %s3695_s2, 96 }
  0x25   : > { %p2894_p13 = scmp.ne.s32.totalorder %s3695_s2, %s2893_s21  ;;  %p2900_p3 = scmp.lt.u32.totalorder %s2893_s21, %s3695_s2 }
  0x27   : > { %p2896_p1 = pnand %p3269_p0, %p2894_p13 }
  0x29   : > { %p2897_p2 = pneg %p2896_p1 }
  0x2b   : > { %p2902_p4 = pnand %p2900_p3, %p2897_p2 }
  0x2d   : > { %2905 = shalt.err (!%p2902_p4)
}
  0x2e   : > { %s2906_s27 = scalar_lea.vmem %s365_s22, 96  ;;  %p2914_p9 = scmp.lt.s32.totalorder %s365_s22, %s365_s22 }
  0x2f   : > { %p2907_p7 = scmp.ne.s32.totalorder %s365_s22, %s2906_s27  ;;  %p2915_p6 = scmp.lt.s32.totalorder %s2906_s27, %s2906_s27 }
  0x31   : > { %p2909_p8 = pnand %p2907_p7, %p3269_p0  ;;  %p2916_p5 = por %p2915_p6, %p2914_p9 }
  0x33   : > { %p2910_p11 = pneg %p2909_p8 }
  0x35   : > { %p2917_p10 = pnand %p2916_p5, %p2910_p11 }
  0x37   : > { %2920 = shalt.err (!%p2917_p10)
}
  0x38   : > { %2616 = dma.hbm_to_vmem [thread:$0]  (!%p3253_p12), %s3695_s2, 96, %s365_s22, [#allocation6]  }
  0x39   : > { %s3697_s7 = sld [smem:[#allocation25_spill]] }
  0x3f   : > { %s2921_s24 = scalar_lea.hbm %s3697_s7, 1024 }
  0x40   : > { %p2922_p13 = scmp.ne.s32.totalorder %s3697_s7, %s2921_s24  ;;  %p2928_p5 = scmp.lt.u32.totalorder %s2921_s24, %s3697_s7 }
  0x42   : > { %p2924_p1 = pnand %p2922_p13, %p3269_p0 }
  0x44   : > { %p2925_p6 = pneg %p2924_p1 }
  0x46   : > { %p2930_p9 = pnand %p2928_p5, %p2925_p6 }
  0x48   : > { %2933 = shalt.err (!%p2930_p9)
}
  0x49   : > { %s2934_s22 = scalar_lea.vmem %s3257_s30, 1024  ;;  %p2942_p4 = scmp.lt.s32.totalorder %s3257_s30, %s3257_s30 }
  0x4a   : > { %p2935_p10 = scmp.ne.s32.totalorder %s3257_s30, %s2934_s22  ;;  %p2943_p7 = scmp.lt.s32.totalorder %s2934_s22, %s2934_s22 }
  0x4c   : > { %p2937_p2 = pnand %p2935_p10, %p3269_p0  ;;  %p2944_p8 = por %p2943_p7, %p2942_p4 }
  0x4e   : > { %p2938_p3 = pneg %p2937_p2 }
  0x50   : > { %p2945_p11 = pnand %p2944_p8, %p2938_p3 }
  0x52   : > { %2948 = shalt.err (!%p2945_p11)
}
  0x53   : > { %s3673_s28 = smov 64   ;;  %s3675_s13 = smov 4  }
  0x54   : > { %2622 = dma.hbm_to_vmem [thread:$0]  (!%p3253_p12), %s3697_s7, 1024, %s3257_s30, [#allocation9], %s3673_s28, %s3673_s28, %s3675_s13  }
  0x55   : > { %s2949_s24 = scalar_lea.hbm %s3650_s1, 6144 }
  0x56   : > { %p2950_p13 = scmp.ne.s32.totalorder %s3650_s1, %s2949_s24  ;;  %p2956_p5 = scmp.lt.u32.totalorder %s2949_s24, %s3650_s1 }
  0x58   : > { %p2952_p1 = pnand %p2950_p13, %p3269_p0 }
  0x5a   : > { %p2953_p6 = pneg %p2952_p1 }
  0x5c   : > { %p2958_p9 = pnand %p2956_p5, %p2953_p6 }
  0x5e   : > { %2961 = shalt.err (!%p2958_p9)
}
  0x5f   : > { %s2962_s14 = scalar_lea.vmem %s351_s16, 6144  ;;  %p2970_p4 = scmp.lt.s32.totalorder %s351_s16, %s351_s16 }
  0x60   : > { %p2963_p10 = scmp.ne.s32.totalorder %s351_s16, %s2962_s14  ;;  %p2971_p7 = scmp.lt.s32.totalorder %s2962_s14, %s2962_s14 }
  0x62   : > { %p2965_p2 = pnand %p2963_p10, %p3269_p0  ;;  %p2972_p8 = por %p2971_p7, %p2970_p4 }
  0x64   : > { %p2966_p3 = pneg %p2965_p2 }
  0x66   : > { %p2973_p11 = pnand %p2972_p8, %p2966_p3 }
  0x68   : > { %2976 = shalt.err (!%p2973_p11)
}
  0x69   : > { %s3114_s30 = smov 384   ;;  %s3115_s17 = smov 24  }
  0x6a   : > { %2613 = dma.hbm_to_vmem [thread:$0]  (!%p3253_p12), %s3650_s1, 6144, %s351_s16, [#allocation3], %s3114_s30, %s3114_s30, %s3115_s17  }
  0x6b   : > { %s3116_s21 = smov [#allocation7]   ;;  %s3117_s15 = smov [#allocation10]  }
  0x6c   : > { %s374_s24 = sshll.u32 %s3116_s21, 4  ;;  %s412_s27 = sshll.u32 %s3117_s15, 4  ;;  %s375_s24 = int_to_ptr.vmem [resolvable:$true] %s374_s24  ;;  %s413_s27 = int_to_ptr.vmem [resolvable:$true] %s412_s27 }
  0x6d   : > { %s2977_s14 = scalar_lea.hbm %s3652_s3, 6144 }
  0x6e   : > { %p2978_p13 = scmp.ne.s32.totalorder %s3652_s3, %s2977_s14  ;;  %p2984_p5 = scmp.lt.u32.totalorder %s2977_s14, %s3652_s3 }
  0x70   : > { %p2980_p1 = pnand %p2978_p13, %p3269_p0 }
  0x72   : > { %p2981_p6 = pneg %p2980_p1 }
  0x74   : > { %p2986_p9 = pnand %p2984_p5, %p2981_p6 }
  0x76   : > { %2989 = shalt.err (!%p2986_p9)
}
  0x77   : > { %s2990_s16 = scalar_lea.vmem %s375_s24, 6144  ;;  %p2998_p4 = scmp.lt.s32.totalorder %s375_s24, %s375_s24 }
  0x78   : > { %p2991_p10 = scmp.ne.s32.totalorder %s375_s24, %s2990_s16  ;;  %p2999_p7 = scmp.lt.s32.totalorder %s2990_s16, %s2990_s16 }
  0x7a   : > { %p2993_p2 = pnand %p2991_p10, %p3269_p0  ;;  %p3000_p8 = por %p2999_p7, %p2998_p4 }
  0x7c   : > { %p2994_p3 = pneg %p2993_p2 }
  0x7e   : > { %p3001_p11 = pnand %p3000_p8, %p2994_p3 }
  0x80   : > { %3004 = shalt.err (!%p3001_p11)
}
  0x81   : > { %s3698_s7 = smov 4   ;;  %s3699_s28 = smov 64  }
  0x82   : > { %2619 = dma.hbm_to_vmem [thread:$0]  (!%p3253_p12), %s3652_s3, 6144, %s375_s24, [#allocation6], %s3699_s28, %s3699_s28, %s3698_s7  }
  0x83   : > { %s3005_s17 = scalar_lea.hbm %s3658_s9, 1024 }
  0x84   : > { %p3006_p13 = scmp.ne.s32.totalorder %s3658_s9, %s3005_s17  ;;  %p3012_p5 = scmp.lt.u32.totalorder %s3005_s17, %s3658_s9 }
  0x86   : > { %p3008_p1 = pnand %p3006_p13, %p3269_p0 }
  0x88   : > { %p3009_p6 = pneg %p3008_p1 }
  0x8a   : > { %p3014_p9 = pnand %p3012_p5, %p3009_p6 }
  0x8c   : > { %3017 = shalt.err (!%p3014_p9)
}
  0x8d   : > { %s3018_s22 = scalar_lea.vmem %s413_s27, 1024  ;;  %p3026_p4 = scmp.lt.s32.totalorder %s413_s27, %s413_s27 }
  0x8e   : > { %p3019_p10 = scmp.ne.s32.totalorder %s413_s27, %s3018_s22  ;;  %p3027_p7 = scmp.lt.s32.totalorder %s3018_s22, %s3018_s22 }
  0x90   : > { %p3021_p2 = pnand %p3019_p10, %p3269_p0  ;;  %p3028_p8 = por %p3027_p7, %p3026_p4 }
  0x92   : > { %p3022_p3 = pneg %p3021_p2 }
  0x94   : > { %p3029_p11 = pnand %p3028_p8, %p3022_p3 }
  0x96   : > { %3032 = shalt.err (!%p3029_p11)
}
  0x97   : > { %2625 = dma.hbm_to_vmem [thread:$0]  (!%p3253_p12), %s3658_s9, 1024, %s413_s27, [#allocation9], %s3699_s28, %s3699_s28, %s3698_s7  }
  0x98   : > { %p3700_p13 = scmp.ne.s32.totalorder %s3693_s20, 0 }
  0x99   : > { %p3701_p0 = scmp.eq.s32.totalorder (!%p3700_p13), %s3217_s29, 0 }
  0x9a   : > { %446 = sbr.rel (%p3700_p13) target bundleno = 2107 (0x83b), region = 72 }
  0xa1   : > { %3078 = dma.done.wait (%p3701_p0), [#allocation3], 6144   ;;  %p3702_p1 = pmov %p3701_p0 }
  0xa2   : > { %p3703_p6 = pmov %p3701_p0 }
  0xa3   : > { %3080 = vsyncadd (%p3702_p1), [#allocation3], 4294961152 }
  0xa4   : > { %3082 = dma.done.wait (%p3703_p6), [#allocation6], 6240   ;;  %p3704_p5 = pmov %p3701_p0 }
  0xa5   : > { %p3705_p9 = pmov %p3701_p0 }
  0xa6   : > { %3084 = vsyncadd (%p3704_p5), [#allocation6], 4294961056 }
  0xa7   : > { %3086 = dma.done.wait (%p3705_p9), [#allocation9], 2048   ;;  %p3706_p12 = pmov %p3701_p0 }
  0xa8   : > { %s2262_s25 = sshll.u32 %s3217_s29, 1  ;;  %v3118_v0 = vmov 0.0   ;;  %vm3119_vm0 = vmmov 0   ;;  %v2700_v1 = vld [vmem:[%s3654_s5] sm:$0xff]   ;;  %v2701_v2 = vld [vmem:[%s3654_s5 + $0x8] sm:$0xff]   ;;  %v2702_v3 = vld [vmem:[%s3654_s5 + $0x10] sm:$0xff]  }
  0xa9   : > { %3088 = vsyncadd (%p3706_p12), [#allocation9], 4294965248  ;;  %2508 = vmatprep.subr.bf16.mxu0 %v3118_v0  ;;  %2524 = vmatprep.mubr.msk.bf16.mxu0 %vm3119_vm0, %v3118_v0  ;;  %p507_p10 = scmp.lt.s32.totalorder %s2262_s25, 3  ;;  %v2709_v4 = vld [vmem:[#allocation8] sm:$0xff]   ;;  %v2703_v5 = vld [vmem:[%s3654_s5 + $0x18] sm:$0xff]   ;;  %vm995_vm1 = vcmask 23552  }
  0xaa   : > { %2528 = vmatprep.subr.bf16.mxu1 %v3118_v0  ;;  %2544 = vmatprep.mubr.msk.bf16.mxu1 %vm3119_vm0, %v3118_v0  ;;  %v2710_v6 = vld [vmem:[#allocation8 + $0x8] sm:$0xff]   ;;  %v2704_v7 = vld [vmem:[%s3654_s5 + $0x20] sm:$0xff]   ;;  %v2711_v8 = vld [vmem:[#allocation8 + $0x10] sm:$0xff]   ;;  %s3707_s17 = sld [smem:[#allocation17_spill]]  ;;  %s3708_s22 = sld [smem:[#allocation22_spill]] }
  0xab   : > { %s3721_s25 = smov (!%p507_p10, %s2262_s25), 3  ;;  %2509 = vmatpush3.bf16.msra.mxu0 %v2700_v1  ;;  %2529 = vmatpush3.bf16.msra.mxu1 %v2709_v4  ;;  %v2705_v9 = vld [vmem:[%s3654_s5 + $0x28] sm:$0xff]   ;;  %v2712_v10 = vld [vmem:[#allocation8 + $0x18] sm:$0xff]   ;;  %v2706_v11 = vld [vmem:[%s3654_s5 + $0x30] sm:$0xff]   ;;  %s3709_s27 = sld [smem:[#allocation26_spill]] }
  0xac   : > { %2510 = vmatprep.subr.bf16.mxu0 %v3118_v0  ;;  %s2263_s7 = sshll.u32 %s3721_s25, 2  ;;  %2530 = vmatprep.subr.bf16.mxu1 %v3118_v0  ;;  %v2713_v12 = vld [vmem:[#allocation8 + $0x20] sm:$0xff]   ;;  %v2707_v13 = vld [vmem:[%s3654_s5 + $0x38] sm:$0xff]   ;;  %v2714_v14 = vld [vmem:[#allocation8 + $0x28] sm:$0xff]   ;;  %s2405_s25 = sshll.u32 %s3217_s29, 8 }
  0xad   : > { %s510_s30 = scalar_lea.vmem %s3649_s0, %s2263_s7  ;;  %v2715_v16 = vld [vmem:[#allocation8 + $0x30] sm:$0xff]   ;;  %v2716_v17 = vld [vmem:[#allocation8 + $0x38] sm:$0xff]   ;;  %v2717_v18 = vld [vmem:[#allocation10] sm:$0xff]   ;;  %s3123_s29 = smov [#allocation11]  }
  0xae   : > { %v3431_v15 = vld [vmem:[%s510_s30] sm:$0xff]   ;;  %v2718_v19 = vld [vmem:[#allocation10 + $0x8] sm:$0xff]   ;;  %v2719_v20 = vld [vmem:[#allocation10 + $0x10] sm:$0xff]   ;;  %s3037_s18 = sshll.u32 %s3123_s29, 4  ;;  %s3038_s18 = int_to_ptr.vmem [resolvable:$false] %s3037_s18 }
  0xaf   : > { %2511 = vmatpush3.bf16.msra.mxu0 %v2701_v2  ;;  %2531 = vmatpush3.bf16.msra.mxu1 %v2710_v6  ;;  %v2720_v21 = vld [vmem:[#allocation10 + $0x18] sm:$0xff]   ;;  %v2721_v22 = vld [vmem:[#allocation10 + $0x20] sm:$0xff]   ;;  %v2722_v23 = vld [vmem:[#allocation10 + $0x28] sm:$0xff]   ;;  %s3039_s13 = scalar_lea.vmem %s3038_s18, 512 }
  0xb0   : > { %2512 = vmatprep.subr.bf16.mxu0 %v3118_v0  ;;  %2532 = vmatprep.subr.bf16.mxu1 %v3118_v0  ;;  %v2264_v24 = vld [vmem:[%s3655_s6] ss:$0 sm:$0xff]  ;;  %v2723_v32 = vld [vmem:[#allocation10 + $0x30] sm:$0xff]   ;;  %v2726_v52 = vld [vmem:[%s3660_s11 + $0x8] sm:$0xff]   ;;  %s503_s2 = sand.u32 1, %s3707_s17   ;;  %p3711_p3 = scmp.ne.s32.totalorder %s3708_s22, 0 }
  0xb1   : > { %v2724_v33 = vld [vmem:[#allocation10 + $0x38] sm:$0xff]   ;;  %v2727_v53 = vld [vmem:[%s3660_s11 + $0x10] sm:$0xff]   ;;  %v2730_v1 = vld [vmem:[%s3660_s11 + $0x28] sm:$0xff]   ;;  %s2261_s19 = sshll.u32 %s503_s2, 4  ;;  %s3710_s16 = smov %s3709_s27 }
  0xb2   : > { %v2274_v34 = vld [vmem:[%s3657_s8] ss:$0 sm:$0xff]  ;;  %v2728_v62 = vld [vmem:[%s3660_s11 + $0x18] sm:$0xff]   ;;  %v2731_v2 = vld [vmem:[%s3660_s11 + $0x30] sm:$0xff]   ;;  %s505_s24 = scalar_lea.vmem [#allocation11], %s2261_s19  ;;  %s3606_s7 = scalar_lea.hbm %s3709_s27, %s2405_s25 }
  0xb3   : > { %2513 = vmatpush3.bf16.msra.mxu0 %v2702_v3  ;;  %2533 = vmatpush3.bf16.msra.mxu1 %v2711_v8  ;;  %v2283_v44 = vld [vmem:[%s3659_s10] ss:$0 sm:$0xff]  ;;  %v2732_v3 = vld [vmem:[%s3660_s11 + $0x38] sm:$0xff]   ;;  %s2135_s14 = sshll.u32 %s505_s24, 4  ;;  %s3608_s28 = scalar_lea.sflag [#allocation4], %s503_s2  ;;  %s3601_s14 = int_to_ptr.vmem [resolvable:$true] %s2135_s14 }
  0xb4   : > { %2514 = vmatprep.subr.bf16.mxu0 %v3118_v0  ;;  %2534 = vmatprep.subr.bf16.mxu1 %v3118_v0  ;;  %v2725_v51 = vld [vmem:[%s3660_s11] sm:$0xff]   ;;  %s3033_s26 = scalar_lea.vmem %s3601_s14, 256  ;;  %p3040_p8 = scmp.lt.s32.totalorder %s3601_s14, %s3038_s18 }
  0xb5   : > { %v2729_v63 = vld [vmem:[%s3660_s11 + $0x20] sm:$0xff]   ;;  %p3034_p2 = scmp.ne.s32.totalorder %s3601_s14, %s3033_s26  ;;  %p3041_p11 = scmp.lt.s32.totalorder %s3039_s13, %s3033_s26 }
  0xb7   : > { %2515 = vmatpush3.bf16.msra.mxu0 %v2703_v5  ;;  %2535 = vmatpush3.bf16.msra.mxu1 %v2712_v10  ;;  %p3035_p4 = pnand %p3034_p2, %p3711_p3  ;;  %p3042_p13 = por %p3041_p11, %p3040_p8 }
  0xb8   : > { %2516 = vmatprep.subr.bf16.mxu0 %v3118_v0  ;;  %2536 = vmatprep.subr.bf16.mxu1 %v3118_v0 }
  0xb9   : > { %p3036_p7 = pneg %p3035_p4 }
  0xbb   : > { %2517 = vmatpush3.bf16.msra.mxu0 %v2704_v7  ;;  %2537 = vmatpush3.bf16.msra.mxu1 %v2713_v12  ;;  %p3043_p0 = pnand %p3042_p13, %p3036_p7 }
  0xbc   : > { %2518 = vmatprep.subr.bf16.mxu0 %v3118_v0  ;;  %2538 = vmatprep.subr.bf16.mxu1 %v3118_v0 }
  0xbf   : > { %2519 = vmatpush3.bf16.msra.mxu0 %v2705_v9  ;;  %2539 = vmatpush3.bf16.msra.mxu1 %v2714_v14 }
  0xc0   : > { %2520 = vmatprep.subr.bf16.mxu0 %v3118_v0  ;;  %2540 = vmatprep.subr.bf16.mxu1 %v3118_v0 }
  0xc3   : > { %2521 = vmatpush3.bf16.msra.mxu0 %v2706_v11  ;;  %2541 = vmatpush3.bf16.msra.mxu1 %v2715_v16 }
  0xc4   : > { %2522 = vmatprep.subr.bf16.mxu0 %v3118_v0  ;;  %2542 = vmatprep.subr.bf16.mxu1 %v3118_v0 }
  0xc7   : > { %2523 = vmatpush3.bf16.msra.mxu0 %v2707_v13  ;;  %2543 = vmatpush3.bf16.msra.mxu1 %v2716_v17  ;;  %v2292_v13 = vld [vmem:[%s3661_s12] ss:$0 sm:$0xff] }
  0xc8   : > { %2548 = vmatprep.subr.bf16.mxu0 %v3118_v0  ;;  %2568 = vmatprep.subr.bf16.mxu1 %v3118_v0 }
  0xca   : > { %2525 = vmatmul.mubr.bf16.vlgmr.msra.gmra.mrb[0].mxu0 %v3431_v15 }
  0xcb   : > { %2564 = vmatprep.mubr.msk.bf16.mxu0 %vm3119_vm0, %v3118_v0  ;;  %2549 = vmatpush3.bf16.msra.mxu0 %v2717_v18 }
  0xcc   : > { %2550 = vmatprep.subr.bf16.mxu0 %v3118_v0 }
  0xcf   : > { %2551 = vmatpush3.bf16.msra.mxu0 %v2718_v19 }
  0xd0   : > { %2552 = vmatprep.subr.bf16.mxu0 %v3118_v0 }
  0xd3   : > { %2553 = vmatpush3.bf16.msra.mxu0 %v2719_v20 }
  0xd4   : > { %2554 = vmatprep.subr.bf16.mxu0 %v3118_v0 }
  0xd7   : > { %2555 = vmatpush3.bf16.msra.mxu0 %v2720_v21 }
  0xd8   : > { %2556 = vmatprep.subr.bf16.mxu0 %v3118_v0 }
  0xdb   : > { %2557 = vmatpush3.bf16.msra.mxu0 %v2721_v22  ;;  %v2735_v22 = vld [vmem:[#allocation2 + $0x4] ss:$24 sps:$4 sm:$0xff]  }
  0xdc   : > { %2558 = vmatprep.subr.bf16.mxu0 %v3118_v0 }
  0xdf   : > { %2559 = vmatpush3.bf16.msra.mxu0 %v2722_v23  ;;  %v2733_v23 = vld [vmem:[#allocation2] ss:$24 sps:$4 sm:$0xff]  }
  0xe0   : > { %2560 = vmatprep.subr.bf16.mxu0 %v3118_v0 }
  0xe3   : > { %2561 = vmatpush3.bf16.msra.mxu0 %v2723_v32  ;;  %v2760_v32 = vld [vmem:[#allocation2 + $0x38] ss:$24 sps:$4 sm:$0xff]  }
  0xe4   : > { %2562 = vmatprep.subr.bf16.mxu0 %v3118_v0 }
  0xe7   : > { %2563 = vmatpush3.bf16.msra.mxu0 %v2724_v33  ;;  %v3120_v33 = vmov 0  }
  0xe8   : > { %1340 = vmatprep.subr.bf16.mxu0 %v2735_v22  ;;  %2689 = vset.pattern.permute.xlu0 %v3120_v33  ;;  %v2809_v22 = vld [vmem:[#allocation7 + $0x50] sm:$0xff]  }
  0xe9   : > { %2690 = vset.pattern.permute.xlu1 %v3120_v33 }
 0x19d   : > { %v627_v25 = vpop.f32.mrb[0].mxu0 }
 0x19e   : > { %v2526_v26 = vpop.f32.mrb[1].mxu0  ;;  %v628_v28 = vadd.f32 %v2264_v24, %v627_v25  ;;  %v2738_v25 = vld [vmem:[#allocation2 + $0x34] ss:$24 sps:$4 sm:$0xff]  }
 0x19f   : > { %v630_v27 = vpop.f32.mrb[2].mxu0  ;;  %v2741_v26 = vld [vmem:[#allocation2 + $0x64] ss:$24 sps:$4 sm:$0xff]  }
 0x1a0   : > { %v631_v29 = vadd.f32 %v2264_v24, %v630_v27  ;;  %v2527_v30 = vpop.f32.mrb[3].mxu0  ;;  %v2736_v24 = vld [vmem:[#allocation2 + $0x30] ss:$24 sps:$4 sm:$0xff]   ;;  %v2739_v27 = vld [vmem:[#allocation2 + $0x60] ss:$24 sps:$4 sm:$0xff]  }
 0x1a1   : > { %v2744_v30 = vld [vmem:[#allocation2 + $0x94] ss:$24 sps:$4 sm:$0xff]  }
 0x1a2   : > { %v634_v31 = vpack.c.bf16 %v631_v29, %v628_v28  ;;  %v2754_v28 = vld [vmem:[#allocation2 + $0x8] ss:$24 sps:$4 sm:$0xff]   ;;  %v2756_v29 = vld [vmem:[#allocation2 + $0xc] ss:$24 sps:$4 sm:$0xff]  }
 0x1a4   : > { %2545 = vmatmul.mubr.bf16.vlgmr.msra.gmra.mrb[0].mxu1 %v634_v31  ;;  %v2762_v31 = vld [vmem:[#allocation2 + $0x3c] ss:$24 sps:$4 sm:$0xff]  }
 0x1a5   : > { %2584 = vmatprep.mubr.msk.bf16.mxu1 %vm3119_vm0, %v3118_v0  ;;  %2569 = vmatpush3.bf16.msra.mxu1 %v2725_v51  ;;  %v2792_v51 = vld [vmem:[#allocation2 + $0x12c] ss:$24 sps:$4 sm:$0xff]  }
 0x1a6   : > { %2570 = vmatprep.subr.bf16.mxu1 %v3118_v0 }
 0x1a9   : > { %2571 = vmatpush3.bf16.msra.mxu1 %v2726_v52  ;;  %v2765_v52 = vld [vmem:[#allocation2 + $0x14] ss:$24 sps:$4 sm:$0xff]  }
 0x1aa   : > { %2572 = vmatprep.subr.bf16.mxu1 %v3118_v0 }
 0x1ad   : > { %2573 = vmatpush3.bf16.msra.mxu1 %v2727_v53  ;;  %v2790_v53 = vld [vmem:[#allocation2 + $0x128] ss:$24 sps:$4 sm:$0xff]  }
 0x1ae   : > { %2574 = vmatprep.subr.bf16.mxu1 %v3118_v0 }
 0x1b1   : > { %2575 = vmatpush3.bf16.msra.mxu1 %v2728_v62  ;;  %v2781_v62 = vld [vmem:[#allocation2 + $0xa0] ss:$24 sps:$4 sm:$0xff]  }
 0x1b2   : > { %2576 = vmatprep.subr.bf16.mxu1 %v3118_v0 }
 0x1b5   : > { %2577 = vmatpush3.bf16.msra.mxu1 %v2729_v63  ;;  %v2789_v63 = vld [vmem:[#allocation2 + $0xd4] ss:$24 sps:$4 sm:$0xff]  }
 0x1b6   : > { %2578 = vmatprep.subr.bf16.mxu1 %v3118_v0 }
 0x1b9   : > { %2579 = vmatpush3.bf16.msra.mxu1 %v2730_v1  ;;  %v2787_v1 = vld [vmem:[#allocation2 + $0xd0] ss:$24 sps:$4 sm:$0xff]  }
 0x1ba   : > { %2580 = vmatprep.subr.bf16.mxu1 %v3118_v0 }
 0x1bd   : > { %2581 = vmatpush3.bf16.msra.mxu1 %v2731_v2  ;;  %v2795_v2 = vld [vmem:[#allocation2 + $0x104] ss:$24 sps:$4 sm:$0xff]  }
 0x1be   : > { %2582 = vmatprep.subr.bf16.mxu1 %v3118_v0 }
 0x1c1   : > { %2583 = vmatpush3.bf16.msra.mxu1 %v2732_v3  ;;  %v2793_v3 = vld [vmem:[#allocation2 + $0x100] ss:$24 sps:$4 sm:$0xff]  }
 0x1c2   : > { %1383 = vmatprep.subr.bf16.mxu1 %v2756_v29  ;;  %v2824_v29 = vld [vmem:[#allocation7 + $0x90] sm:$0xff]  }
 0x277   : > { %v740_v35 = vpop.f32.mrb[0].mxu1 }
 0x278   : > { %v741_v36 = vadd.f32 %v2274_v34, %v740_v35  ;;  %v2546_v37 = vpop.f32.mrb[1].mxu1  ;;  %v2768_v35 = vld [vmem:[#allocation2 + $0x6c] ss:$24 sps:$4 sm:$0xff]  }
 0x279   : > { %v743_v38 = vpop.f32.mrb[2].mxu1  ;;  %v2766_v37 = vld [vmem:[#allocation2 + $0x68] ss:$24 sps:$4 sm:$0xff]  }
 0x27a   : > { %v744_v39 = vadd.f32 %v2274_v34, %v743_v38  ;;  %v2547_v40 = vpop.f32.mrb[3].mxu1  ;;  %v747_v41 = vmax.f32 %v741_v36, 0.0  ;;  %v2742_v34 = vld [vmem:[#allocation2 + $0x90] ss:$24 sps:$4 sm:$0xff]   ;;  %v2747_v36 = vld [vmem:[#allocation2 + $0xc4] ss:$24 sps:$4 sm:$0xff]  }
 0x27b   : > { %v2745_v38 = vld [vmem:[#allocation2 + $0xc0] ss:$24 sps:$4 sm:$0xff]   ;;  %v2750_v40 = vld [vmem:[#allocation2 + $0xf4] ss:$24 sps:$4 sm:$0xff]  }
 0x27c   : > { %v748_v42 = vmax.f32 %v744_v39, 0.0  ;;  %v2774_v39 = vld [vmem:[#allocation2 + $0x9c] ss:$24 sps:$4 sm:$0xff]  }
 0x27e   : > { %v749_v43 = vpack.c.bf16 %v748_v42, %v747_v41 }
 0x280   : > { %2565 = vmatmul.mubr.bf16.vlgmr.msra.gmra.mrb[4].mxu0 %v749_v43  ;;  %v2780_v43 = vld [vmem:[#allocation2 + $0xcc] ss:$24 sps:$4 sm:$0xff]  }
 0x281   : > { %1341 = vmatpush1.bf16.msra.mxu0 %v2733_v23  ;;  %1372 = vmatprep.mubr.bf16.mxu0 %v3120_v33  ;;  %v2816_v23 = vld [vmem:[#allocation7 + $0x80] sm:$0xff]  }
 0x282   : > { %1342 = vmatprep.subr.bf16.mxu0 %v2738_v25  ;;  %v2820_v25 = vld [vmem:[#allocation7 + $0x88] sm:$0xff]  }
 0x285   : > { %1343 = vmatpush1.bf16.msra.mxu0 %v2736_v24  ;;  %v2818_v24 = vld [vmem:[#allocation7 + $0xc8] sm:$0xff]  }
 0x286   : > { %1344 = vmatprep.subr.bf16.mxu0 %v2741_v26  ;;  %v2810_v26 = vld [vmem:[#allocation7 + $0x10] sm:$0xff]  }
 0x289   : > { %1345 = vmatpush1.bf16.msra.mxu0 %v2739_v27  ;;  %v2822_v27 = vld [vmem:[#allocation7 + $0xd0] sm:$0xff]  }
 0x28a   : > { %1346 = vmatprep.subr.bf16.mxu0 %v2744_v30  ;;  %v2812_v30 = vld [vmem:[#allocation7 + $0x18] sm:$0xff]  }
 0x28d   : > { %1347 = vmatpush1.bf16.msra.mxu0 %v2742_v34  ;;  %v2817_v34 = vld [vmem:[#allocation7 + $0x68] sm:$0xff]  }
 0x28e   : > { %1348 = vmatprep.subr.bf16.mxu0 %v2747_v36  ;;  %v2821_v36 = vld [vmem:[#allocation7 + $0x70] sm:$0xff]  }
 0x291   : > { %1349 = vmatpush1.bf16.msra.mxu0 %v2745_v38 }
 0x292   : > { %1350 = vmatprep.subr.bf16.mxu0 %v2750_v40 }
 0x353   : > { %v855_v45 = vpop.f32.mrb[4].mxu0 }
 0x354   : > { %v856_v46 = vadd.f32 %v2283_v44, %v855_v45  ;;  %v2566_v47 = vpop.f32.mrb[5].mxu0  ;;  %v2778_v45 = vld [vmem:[#allocation2 + $0xc8] ss:$24 sps:$4 sm:$0xff]  }
 0x355   : > { %v858_v48 = vpop.f32.mrb[6].mxu0  ;;  %v2786_v47 = vld [vmem:[#allocation2 + $0xfc] ss:$24 sps:$4 sm:$0xff]  }
 0x356   : > { %862 = vmax.xlane.f32.xlu0 %v856_v46  ;;  %v2567_v49 = vpop.f32.mrb[7].mxu0  ;;  %v859_v50 = vadd.f32 %v2283_v44, %v858_v48  ;;  %v2753_v44 = vld [vmem:[#allocation2 + $0x124] ss:$24 sps:$4 sm:$0xff]   ;;  %v2759_v48 = vld [vmem:[#allocation2 + $0x154] ss:$24 sps:$4 sm:$0xff]  }
 0x357   : > { %v2784_v49 = vld [vmem:[#allocation2 + $0xf8] ss:$24 sps:$4 sm:$0xff]  }
 0x35a   : > { %864 = vmax.xlane.f32.xlu0 %v859_v50 }
 0x3e3   : > { %v863_v54 = vpop.xlane.xlu0 %862 }
 0x3e4   : > { %v866_v55 = vsub.f32 %v856_v46, %v863_v54  ;;  %v2751_v46 = vld [vmem:[#allocation2 + $0x120] ss:$24 sps:$4 sm:$0xff]   ;;  %v2763_v54 = vld [vmem:[#allocation2 + $0x10] ss:$24 sps:$4 sm:$0xff]  }
 0x3e6   : > { %v868_v56 = vmul.f32 1.442695, %v866_v55  ;;  %v2798_v55 = vld [vmem:[#allocation2 + $0x15c] ss:$24 sps:$4 sm:$0xff]  }
 0x3e7   : > { %v865_v57 = vpop.xlane.xlu0 %864 }
 0x3e8   : > { %2853 = vpow2.f32 %v868_v56  ;;  %v867_v58 = vsub.f32 %v859_v50, %v865_v57  ;;  %v2757_v50 = vld [vmem:[#allocation2 + $0x150] ss:$24 sps:$4 sm:$0xff]   ;;  %v2771_v56 = vld [vmem:[#allocation2 + $0x44] ss:$24 sps:$4 sm:$0xff]  }
 0x3e9   : > { %v2796_v57 = vld [vmem:[#allocation2 + $0x158] ss:$24 sps:$4 sm:$0xff]  }
 0x3ea   : > { %v870_v59 = vmul.f32 1.442695, %v867_v58  ;;  %v2769_v58 = vld [vmem:[#allocation2 + $0x40] ss:$24 sps:$4 sm:$0xff]  }
 0x3ec   : > { %2855 = vpow2.f32 %v870_v59  ;;  %v2777_v59 = vld [vmem:[#allocation2 + $0x74] ss:$24 sps:$4 sm:$0xff]  }
 0x3f2   : > { %v2854_v60 = vpop.eup %2853 }
 0x3f3   : > { %872 = vadd.xlane.f32.xlu1 %v2854_v60 }
 0x3f6   : > { %v2856_v61 = vpop.eup %2855 }
 0x3f7   : > { %874 = vadd.xlane.f32.xlu1 %v2856_v61 }
 0x480   : > { %v873_v4 = vpop.xlane.xlu1 %872 }
 0x481   : > { %2857 = vrcp.f32 %v873_v4  ;;  %v2801_v4 = vld [vmem:[#allocation2 + $0x134] ss:$24 sps:$4 sm:$0xff]  }
 0x484   : > { %v875_v5 = vpop.xlane.xlu1 %874 }
 0x485   : > { %2859 = vrcp.f32 %v875_v5  ;;  %v2799_v5 = vld [vmem:[#allocation2 + $0x130] ss:$24 sps:$4 sm:$0xff]  }
 0x48b   : > { %v2858_v6 = vpop.eup %2857 }
 0x48c   : > { %v878_v7 = vmul.f32 %v2858_v6, %v2854_v60  ;;  %v2775_v60 = vld [vmem:[#allocation2 + $0x70] ss:$24 sps:$4 sm:$0xff]   ;;  %v2804_v6 = vld [vmem:[#allocation2 + $0x164] ss:$24 sps:$4 sm:$0xff]  }
 0x48e   : > { %v880_v10 = vmul.f32 %v878_v7, %v747_v41  ;;  %v2772_v41 = vld [vmem:[#allocation2 + $0x98] ss:$24 sps:$4 sm:$0xff]  }
 0x48f   : > { %v2860_v8 = vpop.eup %2859  ;;  %v2802_v7 = vld [vmem:[#allocation2 + $0x160] ss:$24 sps:$4 sm:$0xff]  }
 0x490   : > { %v879_v9 = vmul.f32 %v2860_v8, %v2856_v61  ;;  %v2783_v61 = vld [vmem:[#allocation2 + $0xa4] ss:$24 sps:$4 sm:$0xff]  }
 0x492   : > { %v881_v11 = vmul.f32 %v879_v9, %v748_v42  ;;  %v2748_v42 = vld [vmem:[#allocation2 + $0xf0] ss:$24 sps:$4 sm:$0xff]  }
 0x493   : > { %1351 = vmatpush1.bf16.msra.mxu0 %v2748_v42 }
 0x494   : > { %v882_v12 = vpack.c.bf16 %v881_v11, %v880_v10  ;;  %1352 = vmatprep.subr.bf16.mxu0 %v2753_v44 }
 0x496   : > { %2585 = vmatmul.mubr.bf16.vlgmr.msra.gmra.mrb[4].mxu1 %v882_v12 }
 0x497   : > { %1384 = vmatpush1.bf16.msra.mxu1 %v2754_v28  ;;  %1415 = vmatprep.mubr.bf16.mxu1 %v3120_v33  ;;  %v2811_v28 = vld [vmem:[#allocation7 + $0x58] sm:$0xff]  }
 0x498   : > { %1385 = vmatprep.subr.bf16.mxu1 %v2762_v31  ;;  %1353 = vmatpush1.bf16.msra.mxu0 %v2751_v46  ;;  %v2813_v31 = vld [vmem:[#allocation7 + $0x60] sm:$0xff]  }
 0x499   : > { %1354 = vmatprep.subr.bf16.mxu0 %v2759_v48 }
 0x49b   : > { %1386 = vmatpush1.bf16.msra.mxu1 %v2760_v32  ;;  %v2815_v32 = vld [vmem:[#allocation7 + $0x20] sm:$0xff]  }
 0x49c   : > { %1387 = vmatprep.subr.bf16.mxu1 %v2768_v35  ;;  %1355 = vmatpush1.bf16.msra.mxu0 %v2757_v50  ;;  %v2819_v35 = vld [vmem:[#allocation7 + $0x28] sm:$0xff]  }
 0x49d   : > { %1426 = vmatprep.subr.bf16.mxu0 %v2765_v52 }
 0x49f   : > { %1388 = vmatpush1.bf16.msra.mxu1 %v2766_v37  ;;  %1373 = vmatmul.mubr.bf16.vlgmr.msra.gmra.mrb[8].mxu0 %v3431_v15  ;;  %v2823_v37 = vld [vmem:[#allocation7 + $0x30] sm:$0xff]  }
 0x4a0   : > { %1389 = vmatprep.subr.bf16.mxu1 %v2774_v39  ;;  %1427 = vmatpush1.bf16.msra.mxu0 %v2763_v54 }
 0x4a1   : > { %1428 = vmatprep.subr.bf16.mxu0 %v2771_v56  ;;  %1458 = vmatprep.mubr.bf16.mxu0 %v3120_v33 }
 0x4a3   : > { %1390 = vmatpush1.bf16.msra.mxu1 %v2772_v41 }
 0x4a4   : > { %1391 = vmatprep.subr.bf16.mxu1 %v2780_v43  ;;  %1429 = vmatpush1.bf16.msra.mxu0 %v2769_v58  ;;  %v2825_v58 = vld [vmem:[#allocation7 + $0x78] sm:$0xff]  }
 0x4a5   : > { %1430 = vmatprep.subr.bf16.mxu0 %v2777_v59  ;;  %v2826_v59 = vld [vmem:[#allocation7 + $0xd8] sm:$0xff]  }
 0x4a7   : > { %1392 = vmatpush1.bf16.msra.mxu1 %v2778_v45 }
 0x4a8   : > { %1393 = vmatprep.subr.bf16.mxu1 %v2786_v47  ;;  %1431 = vmatpush1.bf16.msra.mxu0 %v2775_v60  ;;  %v2827_v60 = vld [vmem:[#allocation7 + $0x38] sm:$0xff]  }
 0x4a9   : > { %1432 = vmatprep.subr.bf16.mxu0 %v2783_v61  ;;  %v2828_v61 = vld [vmem:[#allocation7 + $0x98] sm:$0xff]  }
 0x4ab   : > { %1394 = vmatpush1.bf16.msra.mxu1 %v2784_v49 }
 0x4ac   : > { %1395 = vmatprep.subr.bf16.mxu1 %v2792_v51  ;;  %1433 = vmatpush1.bf16.msra.mxu0 %v2781_v62  ;;  %v3121_v62 = vmov 1  }
 0x4ad   : > { %1434 = vmatprep.subr.bf16.mxu0 %v2789_v63  ;;  %v2829_v63 = vld [vmem:[#allocation7 + $0xe0] sm:$0xff]  }
 0x4af   : > { %1396 = vmatpush1.bf16.msra.mxu1 %v2790_v53 }
 0x4b0   : > { %1397 = vmatprep.subr.bf16.mxu1 %v2798_v55  ;;  %1435 = vmatpush1.bf16.msra.mxu0 %v2787_v1  ;;  %v2830_v1 = vld [vmem:[#allocation7 + $0x140] sm:$0xff]  }
 0x4b1   : > { %1436 = vmatprep.subr.bf16.mxu0 %v2795_v2  ;;  %v2831_v2 = vld [vmem:[#allocation7 + $0xa0] sm:$0xff]  }
 0x4b3   : > { %1398 = vmatpush1.bf16.msra.mxu1 %v2796_v57 }
 0x4b4   : > { %1437 = vmatpush1.bf16.msra.mxu0 %v2793_v3  ;;  %v2833_v3 = vld [vmem:[#allocation7 + $0xe8] sm:$0xff]  }
 0x4b5   : > { %1438 = vmatprep.subr.bf16.mxu0 %v2801_v4  ;;  %v2835_v4 = vld [vmem:[#allocation7 + $0xa8] sm:$0xff]  }
 0x4b6   : > { %1416 = vmatmul.mubr.bf16.vlgmr.msra.gmra.mrb[8].mxu1 %v3431_v15 }
 0x4b8   : > { %1439 = vmatpush1.bf16.msra.mxu0 %v2799_v5  ;;  %v3122_v5 = vmov 2  }
 0x4b9   : > { %1440 = vmatprep.subr.bf16.mxu0 %v2804_v6  ;;  %v2837_v6 = vld [vmem:[#allocation7 + $0xf0] sm:$0xff]  }
 0x4bc   : > { %1441 = vmatpush1.bf16.msra.mxu0 %v2802_v7  ;;  %v2839_v7 = vld [vmem:[#allocation7 + $0xb0] sm:$0xff]  }
 0x4bf   : > { %1459 = vmatmul.mubr.bf16.vlgmr.msra.gmra.mrb[12].mxu0 %v3431_v15 }
 0x569   : > { %v988_v14 = vpop.f32.mrb[4].mxu1 }
 0x56a   : > { %v3493_v0 = vadd.f32 %v2292_v13, %v988_v14  ;;  %v2586_v16 = vpop.f32.mrb[5].mxu1 }
 0x56b   : > { %v991_v17 = vpop.f32.mrb[6].mxu1 }
 0x56c   : > { %v3495_v18 = vadd.f32 %v2292_v13, %v991_v17  ;;  %v2587_v19 = vpop.f32.mrb[7].mxu1  ;;  %v996_v20 = vsel %vm995_vm1, %v3493_v0, -inf }
 0x56d   : > { %997 = vmax.xlane.f32.xlu0 %v996_v20  ;;  %v2806_v19 = vld [vmem:[#allocation7] sm:$0xff]   ;;  %v2807_v20 = vld [vmem:[#allocation7 + $0x48] sm:$0xff]  }
 0x56e   : > { %v999_v21 = vsel %vm995_vm1, %v3495_v18, -inf }
 0x56f   : > { %1000 = vmax.xlane.f32.xlu1 %v999_v21  ;;  %v2814_v21 = vld [vmem:[#allocation7 + $0xc0] sm:$0xff]  }
 0x570   : > { %2464 = vmatprep.subr.bf16.mxu0 %v2814_v21 }
 0x571   : > { %2465 = vmatpush3.bf16.msra.mxu0 %v2816_v23 }
 0x572   : > { %2466 = vmatprep.subr.bf16.mxu0 %v2818_v24  ;;  %v3519_v38 = vpop.f32.mrb[8].mxu0 }
 0x573   : > { %v3521_v39 = vpop.f32.mrb[9].mxu0 }
 0x574   : > { %v3523_v40 = vpop.f32.mrb[10].mxu0 }
 0x575   : > { %2467 = vmatpush3.bf16.msra.mxu0 %v2820_v25  ;;  %v3525_v41 = vpop.f32.mrb[11].mxu0 }
 0x576   : > { %2468 = vmatprep.subr.bf16.mxu0 %v2822_v27 }
 0x579   : > { %2469 = vmatpush3.bf16.msra.mxu0 %v2824_v29 }
 0x57a   : > { %2470 = vmatprep.subr.bf16.mxu0 %v2826_v59 }
 0x57d   : > { %2471 = vmatpush3.bf16.msra.mxu0 %v2828_v61 }
 0x57e   : > { %2472 = vmatprep.subr.bf16.mxu0 %v2829_v63 }
 0x581   : > { %2473 = vmatpush3.bf16.msra.mxu0 %v2831_v2 }
 0x582   : > { %2474 = vmatprep.subr.bf16.mxu0 %v2833_v3 }
 0x585   : > { %2475 = vmatpush3.bf16.msra.mxu0 %v2835_v4 }
 0x586   : > { %2476 = vmatprep.subr.bf16.mxu0 %v2837_v6  ;;  %v2832_v6 = vld [vmem:[#allocation7 + $0x100] sm:$0xff]  }
 0x589   : > { %v3527_v42 = vpop.f32.mrb[8].mxu1  ;;  %2477 = vmatpush3.bf16.msra.mxu0 %v2839_v7 }
 0x58a   : > { %v3529_v43 = vpop.f32.mrb[9].mxu1 }
 0x58b   : > { %v3531_v44 = vpop.f32.mrb[10].mxu1 }
 0x58c   : > { %v3533_v45 = vpop.f32.mrb[11].mxu1 }
 0x592   : > { %v3535_v48 = vpop.f32.mrb[12].mxu0 }
 0x593   : > { %v3537_v49 = vpop.f32.mrb[13].mxu0 }
 0x594   : > { %v3539_v50 = vpop.f32.mrb[14].mxu0 }
 0x595   : > { %v3541_v51 = vpop.f32.mrb[15].mxu0 }
 0x5fa   : > { %v998_v8 = vpop.xlane.xlu0 %997 }
 0x5fb   : > { %v1002_v9 = vsub.f32 %v3493_v0, %v998_v8  ;;  %v2805_v0 = vld [vmem:[#allocation7 + $0x40] sm:$0xff]   ;;  %v2841_v8 = vld [vmem:[#allocation7 + $0xf8] sm:$0xff]  }
 0x5fc   : > { %v1001_v10 = vpop.xlane.xlu1 %1000  ;;  %2442 = vmatprep.subr.bf16.mxu1 %v2805_v0  ;;  %2478 = vmatprep.subr.bf16.mxu0 %v2841_v8  ;;  %v2834_v8 = vld [vmem:[#allocation7 + $0x148] sm:$0xff]  }
 0x5fd   : > { %v1004_v11 = vmul.f32 1.442695, %v1002_v9  ;;  %v1003_v12 = vsub.f32 %v3495_v18, %v1001_v10  ;;  %2443 = vmatpush3.bf16.msra.mxu1 %v2806_v19  ;;  %v2808_v18 = vld [vmem:[#allocation7 + $0x8] sm:$0xff]   ;;  %v2843_v9 = vld [vmem:[#allocation7 + $0xb8] sm:$0xff]   ;;  %v1070_v10 = vlaneseq }
 0x5fe   : > { %2444 = vmatprep.subr.bf16.mxu1 %v2807_v20  ;;  %2479 = vmatpush3.bf16.msra.mxu0 %v2843_v9 }
 0x5ff   : > { %2861 = vpow2.f32 %v1004_v11  ;;  %v1006_v13 = vmul.f32 1.442695, %v1003_v12  ;;  %v1071_v11 = vshrl.u32 %v1070_v10, 7 }
 0x601   : > { %2863 = vpow2.f32 %v1006_v13  ;;  %2445 = vmatpush3.bf16.msra.mxu1 %v2808_v18  ;;  %v1072_v12 = vsub.s32 0, %v1071_v11  ;;  %v1068_v13 = vld [vmem:[#allocation5] sm:$0x3f]  ;;  %v1084_v24 = vsub.s32 3, %v1071_v11  ;;  %v1088_v27 = vsub.s32 4, %v1071_v11 }
 0x602   : > { %2446 = vmatprep.subr.bf16.mxu1 %v2809_v22  ;;  %v1080_v22 = vsub.s32 2, %v1071_v11 }
 0x604   : > { %v1081_v25 = vrot.slane %v1068_v13, %v1080_v22 }
 0x605   : > { %2447 = vmatpush3.bf16.msra.mxu1 %v2810_v26  ;;  %v1085_v26 = vrot.slane %v1068_v13, %v1084_v24  ;;  %v2842_v24 = vld [vmem:[#allocation7 + $0x158] sm:$0xff]  }
 0x606   : > { %2448 = vmatprep.subr.bf16.mxu1 %v2811_v28  ;;  %v1092_v28 = vsub.s32 5, %v1071_v11  ;;  %v3551_v29 = vadd.f32 %v3527_v42, %v1081_v25 }
 0x609   : > { %v3511_v14 = vpop.eup %2861  ;;  %2449 = vmatpush3.bf16.msra.mxu1 %v2812_v30  ;;  %v3554_v30 = vadd.f32 %v3529_v43, %v1085_v26 }
 0x60a   : > { %v1008_v16 = vsel %vm995_vm1, %v3511_v14, 0.0  ;;  %2450 = vmatprep.subr.bf16.mxu1 %v2813_v31  ;;  %v1089_v31 = vrot.slane %v1068_v13, %v1088_v27 }
 0x60b   : > { %v3515_v17 = vpop.eup %2863  ;;  %1009 = vadd.xlane.f32.xlu0 %v1008_v16  ;;  %v1073_v16 = vrot.slane %v1068_v13, %v1072_v12  ;;  %v2836_v12 = vld [vmem:[#allocation7 + $0x108] sm:$0xff]  }
 0x60c   : > { %v1011_v15 = vsel %vm995_vm1, %v3515_v17, 0.0 }
 0x60d   : > { %1012 = vadd.xlane.f32.xlu1 %v1011_v15  ;;  %2451 = vmatpush3.bf16.msra.mxu1 %v2815_v32  ;;  %v1375_v15 = vadd.f32 %v3519_v38, %v1073_v16  ;;  %v1093_v32 = vrot.slane %v1068_v13, %v1092_v28 }
 0x60e   : > { %2452 = vmatprep.subr.bf16.mxu1 %v2817_v34  ;;  %v3557_v34 = vadd.f32 %v3531_v44, %v1081_v25 }
 0x60f   : > { %v1469_v20 = vmul.f32 0.70710677, %v1375_v15  ;;  %v3568_v42 = vadd.f32 %v3537_v49, %v1093_v32 }
 0x610   : > { %v1689_v44 = vmul.f32 0.70710677, %v3557_v34 }
 0x611   : > { %2453 = vmatpush3.bf16.msra.mxu1 %v2819_v35 }
 0x612   : > { %2454 = vmatprep.subr.bf16.mxu1 %v2821_v36  ;;  %v1687_v36 = vmul.f32 0.70710677, %v3551_v29 }
 0x615   : > { %2455 = vmatpush3.bf16.msra.mxu1 %v2823_v37  ;;  %v3561_v37 = vadd.f32 %v3533_v45, %v1085_v26 }
 0x616   : > { %2456 = vmatprep.subr.bf16.mxu1 %v2825_v58 }
 0x617   : > { %v1690_v45 = vmul.f32 0.70710677, %v3561_v37 }
 0x619   : > { %2457 = vmatpush3.bf16.msra.mxu1 %v2827_v60 }
 0x61a   : > { %2486 = vmatprep.subr.bf16.mxu1 %v2830_v1 }
 0x698   : > { %v1010_v46 = vpop.xlane.xlu0 %1009 }
 0x699   : > { %2865 = vrcp.f32 %v1010_v46  ;;  %v3572_v46 = vadd.f32 %v3539_v50, %v1089_v31 }
 0x69a   : > { %v1013_v47 = vpop.xlane.xlu1 %1012 }
 0x69b   : > { %2867 = vrcp.f32 %v1013_v47 }
 0x69c   : > { %2869 = verf.f32 %v1469_v20 }
 0x6a3   : > { %v2866_v52 = vpop.eup %2865 }
 0x6a4   : > { %v1016_v53 = vmul.f32 %v2866_v52, %v3511_v14  ;;  %v1076_v14 = vsub.s32 1, %v1071_v11 }
 0x6a5   : > { %v2868_v54 = vpop.eup %2867 }
 0x6a6   : > { %v1017_v55 = vmul.f32 %v2868_v54, %v3515_v17  ;;  %v1018_v56 = vmul.f32 0.5, %v1016_v53  ;;  %v1077_v17 = vrot.slane %v1068_v13, %v1076_v14  ;;  %v2870_v35 = vpop.eup %2869 }
 0x6a7   : > { %v1477_v47 = vadd.f32 1.0, %v2870_v35 }
 0x6a8   : > { %1487 = vperm.xlu0 %2689, %v1018_v56   ;;  %v1019_v57 = vmul.f32 0.5, %v1017_v55  ;;  %v1377_v0 = vadd.f32 %v3521_v39, %v1077_v17  ;;  %v1381_v19 = vadd.f32 %v3525_v41, %v1077_v17  ;;  %v1688_v39 = vmul.f32 0.70710677, %v3554_v30  ;;  %v2838_v17 = vld [vmem:[#allocation7 + $0x150] sm:$0xff]  }
 0x6a9   : > { %v1481_v50 = vmul.f32 %v1477_v47, %v1375_v15 }
 0x6aa   : > { %1492 = vperm.xlu1 %2690, %v1019_v57   ;;  %v1470_v18 = vmul.f32 0.70710677, %v1377_v0  ;;  %v1472_v23 = vmul.f32 0.70710677, %v1381_v19 }
 0x6ac   : > { %2697 = vset.pattern.permute.xlu0 %v3121_v62  ;;  %2871 = verf.f32 %v1470_v18  ;;  %v2840_v18 = vld [vmem:[#allocation7 + $0x110] sm:$0xff]  }
 0x6ad   : > { %1755 = vperm.xlu0 %2697, %v1017_v55  }
 0x6ae   : > { %2691 = vset.pattern.permute.xlu1 %v3121_v62 }
 0x6af   : > { %1704 = vperm.xlu1 %2691, %v1018_v56  }
 0x6b1   : > { %2699 = vset.pattern.permute.xlu0 %v3122_v5 }
 0x6b3   : > { %2692 = vset.pattern.permute.xlu1 %v3122_v5 }
 0x6b4   : > { %1920 = vperm.xlu1 %2692, %v1018_v56   ;;  %v1905_v56 = vmul.f32 0.70710677, %v3572_v46 }
 0x6b6   : > { %v2872_v38 = vpop.eup %2871 }
 0x6b8   : > { %2693 = vset.pattern.permute.xlu1 %v3121_v62 }
 0x6b9   : > { %1708 = vperm.xlu1 %2693, %v1019_v57  }
 0x6bd   : > { %2694 = vset.pattern.permute.xlu1 %v3122_v5 }
 0x6be   : > { %1924 = vperm.xlu1 %2694, %v1019_v57  }
 0x6c2   : > { %2695 = vset.pattern.permute.xlu1 %v3120_v33  ;;  %v1379_v33 = vadd.f32 %v3523_v40, %v1073_v16  ;;  %v3565_v40 = vadd.f32 %v3535_v48, %v1089_v31  ;;  %v3577_v48 = vadd.f32 %v3541_v51, %v1093_v32 }
 0x6c3   : > { %1536 = vperm.xlu1 %2695, %v1016_v53  }
 0x6c4   : > { %v1471_v21 = vmul.f32 0.70710677, %v1379_v33  ;;  %v1903_v52 = vmul.f32 0.70710677, %v3565_v40  ;;  %v1906_v57 = vmul.f32 0.70710677, %v3577_v48 }
 0x6c6   : > { %2873 = verf.f32 %v1471_v21 }
 0x6c7   : > { %1541 = vperm.xlu1 %2695, %v1017_v55   ;;  %2875 = verf.f32 %v1472_v23 }
 0x6c8   : > { %2877 = verf.f32 %v1687_v36  ;;  %v2844_v36 = vld [vmem:[#allocation7 + $0x118] sm:$0xff]  }
 0x6c9   : > { %2879 = verf.f32 %v1688_v39 }
 0x6ca   : > { %2881 = verf.f32 %v1689_v44 }
 0x6cb   : > { %2696 = vset.pattern.permute.xlu1 %v3121_v62  ;;  %2883 = verf.f32 %v1690_v45 }
 0x6cc   : > { %1751 = vperm.xlu1 %2696, %v1016_v53   ;;  %2885 = verf.f32 %v1903_v52  ;;  %v2846_v52 = vld [vmem:[#allocation7 + $0x120] sm:$0xff]  }
 0x6d0   : > { %2698 = vset.pattern.permute.xlu1 %v3122_v5  ;;  %v2874_v41 = vpop.eup %2873 }
 0x6d1   : > { %1967 = vperm.xlu1 %2698, %v1016_v53   ;;  %v2876_v43 = vpop.eup %2875  ;;  %v1478_v53 = vadd.f32 1.0, %v2872_v38  ;;  %v1479_v54 = vadd.f32 1.0, %v2874_v41 }
 0x6d2   : > { %v1480_v49 = vadd.f32 1.0, %v2876_v43  ;;  %v2878_v3 = vpop.eup %2877 }
 0x6d3   : > { %v1482_v59 = vmul.f32 %v1478_v53, %v1377_v0  ;;  %v1483_v60 = vmul.f32 %v1479_v54, %v1379_v33  ;;  %v2880_v7 = vpop.eup %2879  ;;  %v1695_v14 = vadd.f32 1.0, %v2878_v3  ;;  %v2847_v54 = vld [vmem:[#allocation7 + $0x168] sm:$0xff]  }
 0x6d4   : > { %v1484_v61 = vmul.f32 %v1480_v49, %v1381_v19  ;;  %v2882_v10 = vpop.eup %2881  ;;  %v1696_v16 = vadd.f32 1.0, %v2880_v7 }
 0x6d5   : > { %1971 = vperm.xlu1 %2698, %v1017_v55   ;;  %v1904_v55 = vmul.f32 0.70710677, %v3568_v42  ;;  %v2884_v11 = vpop.eup %2883  ;;  %v1697_v33 = vadd.f32 1.0, %v2882_v10  ;;  %v1699_v22 = vmul.f32 %v1695_v14, %v3551_v29  ;;  %v2845_v29 = vld [vmem:[#allocation7 + $0x160] sm:$0xff]  }
 0x6d6   : > { %v2886_v13 = vpop.eup %2885  ;;  %v1698_v19 = vadd.f32 1.0, %v2884_v11  ;;  %v1700_v23 = vmul.f32 %v1696_v16, %v3554_v30 }
 0x6d7   : > { %2887 = verf.f32 %v1904_v55  ;;  %v1911_v25 = vadd.f32 1.0, %v2886_v13  ;;  %v1701_v27 = vmul.f32 %v1697_v33, %v3557_v34 }
 0x6d8   : > { %2889 = verf.f32 %v1905_v56  ;;  %v1702_v28 = vmul.f32 %v1698_v19, %v3561_v37 }
 0x6d9   : > { %2891 = verf.f32 %v1906_v57  ;;  %v1915_v30 = vmul.f32 %v1911_v25, %v3565_v40 }
 0x6e1   : > { %v2888_v15 = vpop.eup %2887 }
 0x6e2   : > { %v2890_v0 = vpop.eup %2889  ;;  %v1912_v26 = vadd.f32 1.0, %v2888_v15 }
 0x6e3   : > { %v2892_v21 = vpop.eup %2891  ;;  %v1913_v31 = vadd.f32 1.0, %v2890_v0 }
 0x6e4   : > { %v1914_v32 = vadd.f32 1.0, %v2892_v21  ;;  %v1916_v44 = vmul.f32 %v1912_v26, %v3568_v42  ;;  %v2848_v42 = vld [vmem:[#allocation7 + $0x128] sm:$0xff]  }
 0x6e5   : > { %v1917_v34 = vmul.f32 %v1913_v31, %v3572_v46  ;;  %v2850_v46 = vld [vmem:[#allocation7 + $0x130] sm:$0xff]  }
 0x6e6   : > { %v1918_v37 = vmul.f32 %v1914_v32, %v3577_v48  ;;  %v2851_v48 = vld [vmem:[#allocation7 + $0x178] sm:$0xff]  }
 0x727   : > { %v1488_v58 = vpop.permute.xlu0 %1487 }
 0x728   : > { %v1495_v62 = vmul.f32 %v1488_v58, %v1481_v50  ;;  %v1496_v63 = vmul.f32 %v1488_v58, %v1482_v59  ;;  %v2849_v58 = vld [vmem:[#allocation7 + $0x170] sm:$0xff]   ;;  %v2852_v59 = vld [vmem:[#allocation7 + $0x138] sm:$0xff]  }
 0x729   : > { %v1493_v51 = vpop.permute.xlu1 %1492 }
 0x72a   : > { %v1497_v1 = vmul.f32 %v1493_v51, %v1483_v60  ;;  %v1498_v2 = vmul.f32 %v1493_v51, %v1484_v61 }
 0x72c   : > { %v1499_v4 = vpack.c.bf16 %v1497_v1, %v1495_v62  ;;  %v1500_v5 = vpack.c.bf16 %v1498_v2, %v1496_v63  ;;  %v1756_v7 = vpop.permute.xlu0 %1755 }
 0x72e   : > { %v1705_v9 = vpop.permute.xlu1 %1704  ;;  %1678 = vmatprep.mubr.bf16.mxu1 %v1500_v5 }
 0x72f   : > { %1679 = vmatmul.mubr.bf16.vlgmr.msra.gmra.mrb[12].mxu1 %v1499_v4  ;;  %v1711_v38 = vmul.f32 %v1705_v9, %v1699_v22  ;;  %v1712_v39 = vmul.f32 %v1705_v9, %v1700_v23  ;;  %v2349_v4 = vld [vmem:[%s3653_s4] ss:$0 sm:$0xff]  ;;  %v2383_v23 = vld [vmem:[%s3653_s4 + $0x2] ss:$0 sm:$0xff] }
 0x730   : > { %2487 = vmatpush3.bf16.msra.mxu1 %v2832_v6  ;;  %v2366_v6 = vld [vmem:[%s3653_s4 + $0x1] ss:$0 sm:$0xff] }
 0x731   : > { %2488 = vmatprep.subr.bf16.mxu1 %v2834_v8  ;;  %v1763_v14 = vmul.f32 %v2366_v6, %v1756_v7 }
 0x733   : > { %v1921_v20 = vpop.permute.xlu1 %1920 }
 0x734   : > { %2489 = vmatpush3.bf16.msra.mxu1 %v2836_v12  ;;  %v1927_v49 = vmul.f32 %v1921_v20, %v1915_v30  ;;  %v1928_v55 = vmul.f32 %v1921_v20, %v1916_v44 }
 0x735   : > { %2490 = vmatprep.subr.bf16.mxu1 %v2838_v17 }
 0x738   : > { %2491 = vmatpush3.bf16.msra.mxu1 %v2840_v18  ;;  %v1709_v35 = vpop.permute.xlu1 %1708 }
 0x739   : > { %v1713_v41 = vmul.f32 %v1709_v35, %v1701_v27  ;;  %v1714_v43 = vmul.f32 %v1709_v35, %v1702_v28  ;;  %2492 = vmatprep.subr.bf16.mxu1 %v2842_v24 }
 0x73b   : > { %v1715_v45 = vpack.c.bf16 %v1713_v41, %v1711_v38  ;;  %v1716_v47 = vpack.c.bf16 %v1714_v43, %v1712_v39 }
 0x73c   : > { %2493 = vmatpush3.bf16.msra.mxu1 %v2844_v36 }
 0x73d   : > { %v1925_v53 = vpop.permute.xlu1 %1924  ;;  %1892 = vmatprep.mubr.bf16.mxu0 %v1716_v47  ;;  %2494 = vmatprep.subr.bf16.mxu1 %v2845_v29 }
 0x73e   : > { %v1929_v56 = vmul.f32 %v1925_v53, %v1917_v34  ;;  %v1930_v50 = vmul.f32 %v1925_v53, %v1918_v37  ;;  %1893 = vmatmul.mubr.bf16.vlgmr.msra.gmra.mrb[16].mxu0 %v1715_v45 }
 0x740   : > { %v1931_v40 = vpack.c.bf16 %v1929_v56, %v1927_v49  ;;  %v1932_v57 = vpack.c.bf16 %v1930_v50, %v1928_v55  ;;  %2495 = vmatpush3.bf16.msra.mxu1 %v2846_v52 }
 0x741   : > { %2496 = vmatprep.subr.bf16.mxu1 %v2847_v54 }
 0x742   : > { %2108 = vmatprep.mubr.bf16.mxu1 %v1932_v57  ;;  %v1537_v51 = vpop.permute.xlu1 %1536 }
 0x743   : > { %v1548_v10 = vmul.f32 %v2349_v4, %v1537_v51 }
 0x744   : > { %2497 = vmatpush3.bf16.msra.mxu1 %v2848_v42 }
 0x745   : > { %2498 = vmatprep.subr.bf16.mxu1 %v2849_v58 }
 0x746   : > { %v1542_v3 = vpop.permute.xlu1 %1541 }
 0x747   : > { %v1549_v17 = vmul.f32 %v2349_v4, %v1542_v3 }
 0x748   : > { %2499 = vmatpush3.bf16.msra.mxu1 %v2850_v46 }
 0x749   : > { %2500 = vmatprep.subr.bf16.mxu1 %v2851_v48 }
 0x74b   : > { %v1752_v5 = vpop.permute.xlu1 %1751 }
 0x74c   : > { %2501 = vmatpush3.bf16.msra.mxu1 %v2852_v59  ;;  %v1762_v11 = vmul.f32 %v2366_v6, %v1752_v5 }
 0x74f   : > { %2109 = vmatmul.mubr.bf16.vlgmr.msra.gmra.mrb[16].mxu1 %v1931_v40 }
 0x750   : > { %v1968_v22 = vpop.permute.xlu1 %1967 }
 0x751   : > { %v1978_v27 = vmul.f32 %v2383_v23, %v1968_v22 }
 0x754   : > { %v1972_v25 = vpop.permute.xlu1 %1971 }
 0x755   : > { %v1979_v35 = vmul.f32 %v2383_v23, %v1972_v25 }
 0x802   : > { %v2458_v60 = vpop.f32.mrb[12].mxu1 }
 0x803   : > { %v2459_v61 = vpop.f32.mrb[13].mxu1 }
 0x804   : > { %v2460_v62 = vadd.f32 %v2459_v61, %v2458_v60  ;;  %v2461_v63 = vpop.f32.mrb[14].mxu1 }
 0x805   : > { %v2462_v1 = vpop.f32.mrb[15].mxu1 }
 0x806   : > { %v2463_v2 = vadd.f32 %v2462_v1, %v2461_v63  ;;  %v1681_v15 = vadd.f32 %v2460_v62, %v1548_v10 }
 0x808   : > { %v1684_v19 = vadd.f32 %v2463_v2, %v1549_v17 }
 0x811   : > { %v2480_v8 = vpop.f32.mrb[16].mxu0 }
 0x812   : > { %v2481_v9 = vpop.f32.mrb[17].mxu0 }
 0x813   : > { %v2482_v12 = vadd.f32 %v2481_v9, %v2480_v8  ;;  %v2483_v13 = vpop.f32.mrb[18].mxu0 }
 0x814   : > { %v2484_v16 = vpop.f32.mrb[19].mxu0 }
 0x815   : > { %v1895_v0 = vadd.f32 %v2482_v12, %v1762_v11  ;;  %v2485_v33 = vadd.f32 %v2484_v16, %v2483_v13 }
 0x817   : > { %v1901_v20 = vadd.f32 %v1895_v0, %v1681_v15  ;;  %v1898_v18 = vadd.f32 %v2485_v33, %v1763_v14 }
 0x819   : > { %v1902_v21 = vadd.f32 %v1898_v18, %v1684_v19 }
 0x822   : > { %v2502_v24 = vpop.f32.mrb[16].mxu1 }
 0x823   : > { %v2503_v26 = vpop.f32.mrb[17].mxu1 }
 0x824   : > { %v2504_v28 = vadd.f32 %v2503_v26, %v2502_v24  ;;  %v2505_v31 = vpop.f32.mrb[18].mxu1 }
 0x825   : > { %v2506_v32 = vpop.f32.mrb[19].mxu1 }
 0x826   : > { %v2111_v36 = vadd.f32 %v2504_v28, %v1978_v27  ;;  %v2507_v38 = vadd.f32 %v2506_v32, %v2505_v31 }
 0x828   : > { %v2117_v39 = vadd.f32 %v2111_v36, %v1901_v20  ;;  %v2114_v41 = vadd.f32 %v2507_v38, %v1979_v35 }
 0x82a   : > { %2119 = vst [vmem:[%s505_s24] sm:$0xff] %v2117_v39  ;;  %v2118_v43 = vadd.f32 %v2114_v41, %v1902_v21 }
 0x82c   : > { %2120 = vst [vmem:[%s505_s24 + $0x8] sm:$0xff] %v2118_v43 }
 0x82d   : > { %3046 = shalt.err (!%p3043_p0)
}
 0x82e   : > { %s3047_s30 = scalar_lea.hbm %s3606_s7, 256  ;;  %s3051_s19 = scalar_lea.hbm %s3710_s16, 512 }
 0x82f   : > { %p3048_p1 = scmp.ne.s32.totalorder %s3606_s7, %s3047_s30  ;;  %p3052_p9 = scmp.lt.u32.totalorder %s3606_s7, %s3710_s16 }
 0x830   : > { %p3053_p12 = scmp.lt.u32.totalorder %s3051_s19, %s3047_s30  ;;  %p3055_p2 = scmp.lt.u32.totalorder %s3047_s30, %s3606_s7 }
 0x831   : > { %p3049_p6 = pnand %p3048_p1, %p3711_p3 }
 0x832   : > { %p3054_p10 = por %p3053_p12, %p3052_p9 }
 0x833   : > { %p3050_p5 = pneg %p3049_p6 }
 0x834   : > { %p3056_p4 = por %p3055_p2, %p3054_p10 }
 0x836   : > { %p3057_p7 = pnand %p3056_p4, %p3050_p5 }
 0x838   : > { %3060 = shalt.err (!%p3057_p7)
}
 0x839   : > { %s3124_s24 = smov 128   ;;  %s3125_s25 = smov 8  }
 0x83a   : > { %2608 = dma.vmem_to_hbm [thread:$0]  (%p3711_p3), %s3601_s14, 256, %s3606_s7, %s3608_s28, %s3124_s24, %s3124_s24, %s3125_s25  }
 0x83b PF: > { %s3712_s20 = sld [smem:[#allocation19_spill]]  ;;  %s3713_s23 = sld [smem:[#allocation16_spill]] }
 0x83c   : > { %s3714_s27 = sld [smem:[#allocation23_spill]] }
 0x841   : > { %p2640_p8 = scmp.ge.s32.totalorder %s3712_s20, 2  ;;  %s2150_s26 = sand.u32 1, %s3713_s23  }
 0x842   : > { %p3715_p11 = scmp.ne.s32.totalorder %s3714_s27, 0  ;;  %s2151_s29 = scalar_lea.sflag [#allocation4], %s2150_s26 }
 0x844   : > { %p2627_p13 = pnand %p2640_p8, %p3715_p11 }
 0x846   : > { %3090 = dma.done.wait (!%p2627_p13), %s2151_s29, 256  }
 0x847   : > { %3092 = vsyncadd (!%p2627_p13), %s2151_s29, 4294967040  ;;  %s3716_s28 = sld [smem:[#allocation20_spill]]  ;;  %s3717_s25 = sld [smem:[#allocation17_spill]] }
 0x848   : > { %s3718_s26 = sld [smem:[#allocation18_spill]]  ;;  %s3719_s27 = sld [smem:[#allocation21_spill]] }
 0x84d   : > { %p26_p0 = scmp.ge.s32.totalorder %s3716_s28, 4  }
 0x84f   :  { %28 = sbr.rel (!%p26_p0) target bundleno = 10 (0xa), region = 128 }
 0x856   :  { %2156 = vsyncpa [#allocation3], 1 }
 0x857   :  { %2158 = vsyncpa [#allocation3 + $0x1], 1 }
 0x858   :  { %2159 = vsyncpa [#allocation6], 1 }
 0x859   :  { %2160 = vsyncpa [#allocation9], 1 }
 0x85a   :  { %2161 = vsyncpa [#allocation4], 1 }
 0x85b   :  { %2163 = vsyncpa [#allocation4 + $0x1], 1 }

// kernel: tpu_custom_call.1
= control target key start
LH: loop header
LB: loop body
LE: loop exit
PB: predicated region body
PF: predicated region fallthrough
CT: control target
= control target key end

     0   :  { %s3649_s0 = inlined_call_operand.vmem [shape: bf16[32,128], index: 0, kind: input, shape index: {}]   ;;  %s3650_s1 = inlined_call_operand.hbm [shape: bf16[128,768], index: 1, kind: input, shape index: {}]   ;;  %s3651_s2 = inlined_call_operand.hbm [shape: f32[1,768], index: 2, kind: input, shape index: {}]   ;;  %s3652_s3 = inlined_call_operand.hbm [shape: bf16[768,128], index: 3, kind: input, shape index: {}]   ;;  %s3653_s4 = inlined_call_operand.vmem [shape: f32[3,128], index: 4, kind: input, shape index: {}]   ;;  %s3654_s5 = inlined_call_operand.vmem [shape: bf16[128,128], index: 5, kind: input, shape index: {}]   ;;  %s3655_s6 = inlined_call_operand.vmem [shape: f32[1,128], index: 6, kind: input, shape index: {}]   ;;  %s3656_s7 = inlined_call_operand.hbm [shape: bf16[128,128], index: 7, kind: input, shape index: {}]   ;;  %s3657_s8 = inlined_call_operand.vmem [shape: f32[1,128], index: 8, kind: input, shape index: {}]   ;;  %s3658_s9 = inlined_call_operand.hbm [shape: bf16[128,128], index: 9, kind: input, shape index: {}]   ;;  %s3659_s10 = inlined_call_operand.vmem [shape: f32[1,128], index: 10, kind: input, shape index: {}]   ;;  %s3660_s11 = inlined_call_operand.vmem [shape: bf16[128,3], index: 11, kind: input, shape index: {}]   ;;  %s3661_s12 = inlined_call_operand.vmem [shape: f32[1,3], index: 12, kind: input, shape index: {}]   ;;  %s3662_s13 = inlined_call_operand.hbm [shape: f32[32,128], index: 13, kind: output, shape index: {}]  }
   0x1   :  { %3680 = sst [smem:[#allocation24_spill]] %s3651_s2 }
   0x2   :  { %3681 = sst [smem:[#allocation25_spill]] %s3656_s7 }
   0x3   :  { %3682 = sst [smem:[#allocation26_spill]] %s3662_s13 }
   0x4   :  { %18 = vsyncpa [#allocation3], 0 }
   0x5   :  { %19 = vsyncpa [#allocation6], 0 }
   0x6   :  { %20 = vsyncpa [#allocation9], 0 }
   0x7   :  { %21 = vsyncpa [#allocation4], 0 }
   0x8   :  { %23 = vsyncpa [#allocation4 + $0x1], 0  ;;  %s3196_s25 = smov 0   ;;  %s3198_s26 = smov 0  }
   0x9   :  { %s3200_s27 = smov 0   ;;  %s3202_s28 = smov 0  }
   0xa LB: > { %3683 = sst [smem:[#allocation16_spill]] %s3095_s25  ;;  %s3217_s29 = sadd.s32 4294967295, %s3107_s28   ;;  %s3107_s28 = sphi %s3202_s28, %s3716_s28   ;;  %s3103_s27 = sphi %s3200_s27, %s3719_s27   ;;  %s3099_s26 = sphi %s3198_s26, %s3718_s26   ;;  %s3095_s25 = sphi %s3196_s25, %s3717_s25  }
   0xb   : > { %3684 = sst [smem:[#allocation17_spill]] %s3099_s26  ;;  %s2247_s30 = sadd.s32 4294967294, %s3107_s28  }
   0xc   : > { %3685 = sst [smem:[#allocation18_spill]] %s3103_s27  ;;  %s3221_s14 = sadd.s32 1, %s3107_s28  }
   0xd   : > { %3686 = sst [smem:[#allocation19_spill]] %s3107_s28  ;;  %s314_s15 = sadd.s32 1, %s3103_s27 }
   0xe   : > { %3687 = sst [smem:[#allocation20_spill]] %s3221_s14  ;;  %s311_s16 = ssub.s32 %s3107_s28, %s3221_s14 }
   0xf   : > { %p324_p0 = scmp.ne.s32.totalorder %s3103_s27, %s3099_s26  ;;  %p312_p1 = scmp.eq.s32.totalorder %s311_s16, 0 }
  0x10   : > { %p325_p2 = scmp.eq.s32.totalorder %s3217_s29, 1  ;;  %p330_p3 = scmp.ne.s32.totalorder %s3099_s26, %s3095_s25 }
  0x11   : > { %p331_p4 = scmp.eq.s32.totalorder %s2247_s30, 1  ;;  %p2248_p7 = scmp.ge.s32.totalorder %s3107_s28, 1 }
  0x12   : > { %s3232_s17 = scalar_select %p312_p1, %s3103_s27, %s314_s15  }
  0x13   : > { %p3234_p5 = por %p325_p2, %p324_p0  ;;  %p3238_p6 = por %p331_p4, %p330_p3 }
  0x14   : > { %3688 = sst [smem:[#allocation21_spill]] %s3232_s17  ;;  %p338_p8 = scmp.lt.s32.totalorder %s3107_s28, 3 }
  0x15   : > { %s3689_s18 = scalar_select %p3234_p5, 1, 0 }
  0x16   : > { %s3691_s19 = scalar_select %p3238_p6, 1, 0 }
  0x17   : > { %3690 = sst [smem:[#allocation22_spill]] %s3689_s18  ;;  %p3668_p9 = scmp.eq.s32.totalorder %s3217_s29, 0 }
  0x18   : > { %3692 = sst [smem:[#allocation23_spill]] %s3691_s19  ;;  %p3245_p10 = pnand %p2248_p7, %p338_p8 }
  0x19   : > { %s3109_s21 = smov [#allocation5]   ;;  %s3110_s24 = smov [#allocation8]  }
  0x1a   : > { %s3693_s20 = scalar_select %p3245_p10, 1, 0 }
  0x1b   : > { %s364_s22 = sshll.u32 %s3109_s21, 4  ;;  %p2610_p11 = pneg %p3245_p10  ;;  %s365_s22 = int_to_ptr.vmem [resolvable:$true] %s364_s22 }
  0x1c   : > { %s396_s30 = sshll.u32 %s3110_s24, 4  ;;  %s3111_s15 = smov [#allocation2]   ;;  %s3257_s30 = int_to_ptr.vmem [resolvable:$true] %s396_s30 }
  0x1d   : > { %p3253_p12 = pnand %p3668_p9, %p2610_p11  ;;  %s3259_s16 = sshll.u32 %s3111_s15, 4  ;;  %s351_s16 = int_to_ptr.vmem [resolvable:$true] %s3259_s16 }
  0x1e   : > { %s3695_s2 = sld [smem:[#allocation24_spill]] }
  0x1f   : > { %p3269_p0 = pneg %p3253_p12 }
  0x24   : > { %s2893_s21 = scalar_lea.hbm %s3695_s2, 96 }
  0x25   : > { %p2894_p13 = scmp.ne.s32.totalorder %s3695_s2, %s2893_s21  ;;  %p2900_p3 = scmp.lt.u32.totalorder %s2893_s21, %s3695_s2 }
  0x27   : > { %p2896_p1 = pnand %p3269_p0, %p2894_p13 }
  0x29   : > { %p2897_p2 = pneg %p2896_p1 }
  0x2b   : > { %p2902_p4 = pnand %p2900_p3, %p2897_p2 }
  0x2d   : > { %2905 = shalt.err (!%p2902_p4)
}
  0x2e   : > { %s2906_s27 = scalar_lea.vmem %s365_s22, 96  ;;  %p2914_p9 = scmp.lt.s32.totalorder %s365_s22, %s365_s22 }
  0x2f   : > { %p2907_p7 = scmp.ne.s32.totalorder %s365_s22, %s2906_s27  ;;  %p2915_p6 = scmp.lt.s32.totalorder %s2906_s27, %s2906_s27 }
  0x31   : > { %p2909_p8 = pnand %p2907_p7, %p3269_p0  ;;  %p2916_p5 = por %p2915_p6, %p2914_p9 }
  0x33   : > { %p2910_p11 = pneg %p2909_p8 }
  0x35   : > { %p2917_p10 = pnand %p2916_p5, %p2910_p11 }
  0x37   : > { %2920 = shalt.err (!%p2917_p10)
}
  0x38   : > { %2616 = dma.hbm_to_vmem [thread:$0]  (!%p3253_p12), %s3695_s2, 96, %s365_s22, [#allocation6]  }
  0x39   : > { %s3697_s7 = sld [smem:[#allocation25_spill]] }
  0x3f   : > { %s2921_s24 = scalar_lea.hbm %s3697_s7, 1024 }
  0x40   : > { %p2922_p13 = scmp.ne.s32.totalorder %s3697_s7, %s2921_s24  ;;  %p2928_p5 = scmp.lt.u32.totalorder %s2921_s24, %s3697_s7 }
  0x42   : > { %p2924_p1 = pnand %p2922_p13, %p3269_p0 }
  0x44   : > { %p2925_p6 = pneg %p2924_p1 }
  0x46   : > { %p2930_p9 = pnand %p2928_p5, %p2925_p6 }
  0x48   : > { %2933 = shalt.err (!%p2930_p9)
}
  0x49   : > { %s2934_s22 = scalar_lea.vmem %s3257_s30, 1024  ;;  %p2942_p4 = scmp.lt.s32.totalorder %s3257_s30, %s3257_s30 }
  0x4a   : > { %p2935_p10 = scmp.ne.s32.totalorder %s3257_s30, %s2934_s22  ;;  %p2943_p7 = scmp.lt.s32.totalorder %s2934_s22, %s2934_s22 }
  0x4c   : > { %p2937_p2 = pnand %p2935_p10, %p3269_p0  ;;  %p2944_p8 = por %p2943_p7, %p2942_p4 }
  0x4e   : > { %p2938_p3 = pneg %p2937_p2 }
  0x50   : > { %p2945_p11 = pnand %p2944_p8, %p2938_p3 }
  0x52   : > { %2948 = shalt.err (!%p2945_p11)
}
  0x53   : > { %s3673_s28 = smov 64   ;;  %s3675_s13 = smov 4  }
  0x54   : > { %2622 = dma.hbm_to_vmem [thread:$0]  (!%p3253_p12), %s3697_s7, 1024, %s3257_s30, [#allocation9], %s3673_s28, %s3673_s28, %s3675_s13  }
  0x55   : > { %s2949_s24 = scalar_lea.hbm %s3650_s1, 6144 }
  0x56   : > { %p2950_p13 = scmp.ne.s32.totalorder %s3650_s1, %s2949_s24  ;;  %p2956_p5 = scmp.lt.u32.totalorder %s2949_s24, %s3650_s1 }
  0x58   : > { %p2952_p1 = pnand %p2950_p13, %p3269_p0 }
  0x5a   : > { %p2953_p6 = pneg %p2952_p1 }
  0x5c   : > { %p2958_p9 = pnand %p2956_p5, %p2953_p6 }
  0x5e   : > { %2961 = shalt.err (!%p2958_p9)
}
  0x5f   : > { %s2962_s14 = scalar_lea.vmem %s351_s16, 6144  ;;  %p2970_p4 = scmp.lt.s32.totalorder %s351_s16, %s351_s16 }
  0x60   : > { %p2963_p10 = scmp.ne.s32.totalorder %s351_s16, %s2962_s14  ;;  %p2971_p7 = scmp.lt.s32.totalorder %s2962_s14, %s2962_s14 }
  0x62   : > { %p2965_p2 = pnand %p2963_p10, %p3269_p0  ;;  %p2972_p8 = por %p2971_p7, %p2970_p4 }
  0x64   : > { %p2966_p3 = pneg %p2965_p2 }
  0x66   : > { %p2973_p11 = pnand %p2972_p8, %p2966_p3 }
  0x68   : > { %2976 = shalt.err (!%p2973_p11)
}
  0x69   : > { %s3114_s30 = smov 384   ;;  %s3115_s17 = smov 24  }
  0x6a   : > { %2613 = dma.hbm_to_vmem [thread:$0]  (!%p3253_p12), %s3650_s1, 6144, %s351_s16, [#allocation3], %s3114_s30, %s3114_s30, %s3115_s17  }
  0x6b   : > { %s3116_s21 = smov [#allocation7]   ;;  %s3117_s15 = smov [#allocation10]  }
  0x6c   : > { %s374_s24 = sshll.u32 %s3116_s21, 4  ;;  %s412_s27 = sshll.u32 %s3117_s15, 4  ;;  %s375_s24 = int_to_ptr.vmem [resolvable:$true] %s374_s24  ;;  %s413_s27 = int_to_ptr.vmem [resolvable:$true] %s412_s27 }
  0x6d   : > { %s2977_s14 = scalar_lea.hbm %s3652_s3, 6144 }
  0x6e   : > { %p2978_p13 = scmp.ne.s32.totalorder %s3652_s3, %s2977_s14  ;;  %p2984_p5 = scmp.lt.u32.totalorder %s2977_s14, %s3652_s3 }
  0x70   : > { %p2980_p1 = pnand %p2978_p13, %p3269_p0 }
  0x72   : > { %p2981_p6 = pneg %p2980_p1 }
  0x74   : > { %p2986_p9 = pnand %p2984_p5, %p2981_p6 }
  0x76   : > { %2989 = shalt.err (!%p2986_p9)
}
  0x77   : > { %s2990_s16 = scalar_lea.vmem %s375_s24, 6144  ;;  %p2998_p4 = scmp.lt.s32.totalorder %s375_s24, %s375_s24 }
  0x78   : > { %p2991_p10 = scmp.ne.s32.totalorder %s375_s24, %s2990_s16  ;;  %p2999_p7 = scmp.lt.s32.totalorder %s2990_s16, %s2990_s16 }
  0x7a   : > { %p2993_p2 = pnand %p2991_p10, %p3269_p0  ;;  %p3000_p8 = por %p2999_p7, %p2998_p4 }
  0x7c   : > { %p2994_p3 = pneg %p2993_p2 }
  0x7e   : > { %p3001_p11 = pnand %p3000_p8, %p2994_p3 }
  0x80   : > { %3004 = shalt.err (!%p3001_p11)
}
  0x81   : > { %s3698_s7 = smov 4   ;;  %s3699_s28 = smov 64  }
  0x82   : > { %2619 = dma.hbm_to_vmem [thread:$0]  (!%p3253_p12), %s3652_s3, 6144, %s375_s24, [#allocation6], %s3699_s28, %s3699_s28, %s3698_s7  }
  0x83   : > { %s3005_s17 = scalar_lea.hbm %s3658_s9, 1024 }
  0x84   : > { %p3006_p13 = scmp.ne.s32.totalorder %s3658_s9, %s3005_s17  ;;  %p3012_p5 = scmp.lt.u32.totalorder %s3005_s17, %s3658_s9 }
  0x86   : > { %p3008_p1 = pnand %p3006_p13, %p3269_p0 }
  0x88   : > { %p3009_p6 = pneg %p3008_p1 }
  0x8a   : > { %p3014_p9 = pnand %p3012_p5, %p3009_p6 }
  0x8c   : > { %3017 = shalt.err (!%p3014_p9)
}
  0x8d   : > { %s3018_s22 = scalar_lea.vmem %s413_s27, 1024  ;;  %p3026_p4 = scmp.lt.s32.totalorder %s413_s27, %s413_s27 }
  0x8e   : > { %p3019_p10 = scmp.ne.s32.totalorder %s413_s27, %s3018_s22  ;;  %p3027_p7 = scmp.lt.s32.totalorder %s3018_s22, %s3018_s22 }
  0x90   : > { %p3021_p2 = pnand %p3019_p10, %p3269_p0  ;;  %p3028_p8 = por %p3027_p7, %p3026_p4 }
  0x92   : > { %p3022_p3 = pneg %p3021_p2 }
  0x94   : > { %p3029_p11 = pnand %p3028_p8, %p3022_p3 }
  0x96   : > { %3032 = shalt.err (!%p3029_p11)
}
  0x97   : > { %2625 = dma.hbm_to_vmem [thread:$0]  (!%p3253_p12), %s3658_s9, 1024, %s413_s27, [#allocation9], %s3699_s28, %s3699_s28, %s3698_s7  }
  0x98   : > { %p3700_p13 = scmp.ne.s32.totalorder %s3693_s20, 0 }
  0x99   : > { %p3701_p0 = scmp.eq.s32.totalorder (!%p3700_p13), %s3217_s29, 0 }
  0x9a   : > { %446 = sbr.rel (%p3700_p13) target bundleno = 2107 (0x83b), region = 72 }
  0xa1   : > { %3078 = dma.done.wait (%p3701_p0), [#allocation3], 6144   ;;  %p3702_p1 = pmov %p3701_p0 }
  0xa2   : > { %p3703_p6 = pmov %p3701_p0 }
  0xa3   : > { %3080 = vsyncadd (%p3702_p1), [#allocation3], 4294961152 }
  0xa4   : > { %3082 = dma.done.wait (%p3703_p6), [#allocation6], 6240   ;;  %p3704_p5 = pmov %p3701_p0 }
  0xa5   : > { %p3705_p9 = pmov %p3701_p0 }
  0xa6   : > { %3084 = vsyncadd (%p3704_p5), [#allocation6], 4294961056 }
  0xa7   : > { %3086 = dma.done.wait (%p3705_p9), [#allocation9], 2048   ;;  %p3706_p12 = pmov %p3701_p0 }
  0xa8   : > { %s2262_s25 = sshll.u32 %s3217_s29, 1  ;;  %v3118_v0 = vmov 0.0   ;;  %vm3119_vm0 = vmmov 0   ;;  %v2700_v1 = vld [vmem:[%s3654_s5] sm:$0xff]   ;;  %v2701_v2 = vld [vmem:[%s3654_s5 + $0x8] sm:$0xff]   ;;  %v2702_v3 = vld [vmem:[%s3654_s5 + $0x10] sm:$0xff]  }
  0xa9   : > { %3088 = vsyncadd (%p3706_p12), [#allocation9], 4294965248  ;;  %2508 = vmatprep.subr.bf16.mxu0 %v3118_v0  ;;  %2524 = vmatprep.mubr.msk.bf16.mxu0 %vm3119_vm0, %v3118_v0  ;;  %p507_p10 = scmp.lt.s32.totalorder %s2262_s25, 3  ;;  %v2709_v4 = vld [vmem:[#allocation8] sm:$0xff]   ;;  %v2703_v5 = vld [vmem:[%s3654_s5 + $0x18] sm:$0xff]   ;;  %vm995_vm1 = vcmask 23552  }
  0xaa   : > { %2528 = vmatprep.subr.bf16.mxu1 %v3118_v0  ;;  %2544 = vmatprep.mubr.msk.bf16.mxu1 %vm3119_vm0, %v3118_v0  ;;  %v2710_v6 = vld [vmem:[#allocation8 + $0x8] sm:$0xff]   ;;  %v2704_v7 = vld [vmem:[%s3654_s5 + $0x20] sm:$0xff]   ;;  %v2711_v8 = vld [vmem:[#allocation8 + $0x10] sm:$0xff]   ;;  %s3707_s17 = sld [smem:[#allocation17_spill]]  ;;  %s3708_s22 = sld [smem:[#allocation22_spill]] }
  0xab   : > { %s3721_s25 = smov (!%p507_p10, %s2262_s25), 3  ;;  %2509 = vmatpush3.bf16.msra.mxu0 %v2700_v1  ;;  %2529 = vmatpush3.bf16.msra.mxu1 %v2709_v4  ;;  %v2705_v9 = vld [vmem:[%s3654_s5 + $0x28] sm:$0xff]   ;;  %v2712_v10 = vld [vmem:[#allocation8 + $0x18] sm:$0xff]   ;;  %v2706_v11 = vld [vmem:[%s3654_s5 + $0x30] sm:$0xff]   ;;  %s3709_s27 = sld [smem:[#allocation26_spill]] }
  0xac   : > { %2510 = vmatprep.subr.bf16.mxu0 %v3118_v0  ;;  %s2263_s7 = sshll.u32 %s3721_s25, 2  ;;  %2530 = vmatprep.subr.bf16.mxu1 %v3118_v0  ;;  %v2713_v12 = vld [vmem:[#allocation8 + $0x20] sm:$0xff]   ;;  %v2707_v13 = vld [vmem:[%s3654_s5 + $0x38] sm:$0xff]   ;;  %v2714_v14 = vld [vmem:[#allocation8 + $0x28] sm:$0xff]   ;;  %s2405_s25 = sshll.u32 %s3217_s29, 8 }
  0xad   : > { %s510_s30 = scalar_lea.vmem %s3649_s0, %s2263_s7  ;;  %v2715_v16 = vld [vmem:[#allocation8 + $0x30] sm:$0xff]   ;;  %v2716_v17 = vld [vmem:[#allocation8 + $0x38] sm:$0xff]   ;;  %v2717_v18 = vld [vmem:[#allocation10] sm:$0xff]   ;;  %s3123_s29 = smov [#allocation11]  }
  0xae   : > { %v3431_v15 = vld [vmem:[%s510_s30] sm:$0xff]   ;;  %v2718_v19 = vld [vmem:[#allocation10 + $0x8] sm:$0xff]   ;;  %v2719_v20 = vld [vmem:[#allocation10 + $0x10] sm:$0xff]   ;;  %s3037_s18 = sshll.u32 %s3123_s29, 4  ;;  %s3038_s18 = int_to_ptr.vmem [resolvable:$false] %s3037_s18 }
  0xaf   : > { %2511 = vmatpush3.bf16.msra.mxu0 %v2701_v2  ;;  %2531 = vmatpush3.bf16.msra.mxu1 %v2710_v6  ;;  %v2720_v21 = vld [vmem:[#allocation10 + $0x18] sm:$0xff]   ;;  %v2721_v22 = vld [vmem:[#allocation10 + $0x20] sm:$0xff]   ;;  %v2722_v23 = vld [vmem:[#allocation10 + $0x28] sm:$0xff]   ;;  %s3039_s13 = scalar_lea.vmem %s3038_s18, 512 }
  0xb0   : > { %2512 = vmatprep.subr.bf16.mxu0 %v3118_v0  ;;  %2532 = vmatprep.subr.bf16.mxu1 %v3118_v0  ;;  %v2264_v24 = vld [vmem:[%s3655_s6] ss:$0 sm:$0xff]  ;;  %v2723_v32 = vld [vmem:[#allocation10 + $0x30] sm:$0xff]   ;;  %v2726_v52 = vld [vmem:[%s3660_s11 + $0x8] sm:$0xff]   ;;  %s503_s2 = sand.u32 1, %s3707_s17   ;;  %p3711_p3 = scmp.ne.s32.totalorder %s3708_s22, 0 }
  0xb1   : > { %v2724_v33 = vld [vmem:[#allocation10 + $0x38] sm:$0xff]   ;;  %v2727_v53 = vld [vmem:[%s3660_s11 + $0x10] sm:$0xff]   ;;  %v2730_v1 = vld [vmem:[%s3660_s11 + $0x28] sm:$0xff]   ;;  %s2261_s19 = sshll.u32 %s503_s2, 4  ;;  %s3710_s16 = smov %s3709_s27 }
  0xb2   : > { %v2274_v34 = vld [vmem:[%s3657_s8] ss:$0 sm:$0xff]  ;;  %v2728_v62 = vld [vmem:[%s3660_s11 + $0x18] sm:$0xff]   ;;  %v2731_v2 = vld [vmem:[%s3660_s11 + $0x30] sm:$0xff]   ;;  %s505_s24 = scalar_lea.vmem [#allocation11], %s2261_s19  ;;  %s3606_s7 = scalar_lea.hbm %s3709_s27, %s2405_s25 }
  0xb3   : > { %2513 = vmatpush3.bf16.msra.mxu0 %v2702_v3  ;;  %2533 = vmatpush3.bf16.msra.mxu1 %v2711_v8  ;;  %v2283_v44 = vld [vmem:[%s3659_s10] ss:$0 sm:$0xff]  ;;  %v2732_v3 = vld [vmem:[%s3660_s11 + $0x38] sm:$0xff]   ;;  %s2135_s14 = sshll.u32 %s505_s24, 4  ;;  %s3608_s28 = scalar_lea.sflag [#allocation4], %s503_s2  ;;  %s3601_s14 = int_to_ptr.vmem [resolvable:$true] %s2135_s14 }
  0xb4   : > { %2514 = vmatprep.subr.bf16.mxu0 %v3118_v0  ;;  %2534 = vmatprep.subr.bf16.mxu1 %v3118_v0  ;;  %v2725_v51 = vld [vmem:[%s3660_s11] sm:$0xff]   ;;  %s3033_s26 = scalar_lea.vmem %s3601_s14, 256  ;;  %p3040_p8 = scmp.lt.s32.totalorder %s3601_s14, %s3038_s18 }
  0xb5   : > { %v2729_v63 = vld [vmem:[%s3660_s11 + $0x20] sm:$0xff]   ;;  %p3034_p2 = scmp.ne.s32.totalorder %s3601_s14, %s3033_s26  ;;  %p3041_p11 = scmp.lt.s32.totalorder %s3039_s13, %s3033_s26 }
  0xb7   : > { %2515 = vmatpush3.bf16.msra.mxu0 %v2703_v5  ;;  %2535 = vmatpush3.bf16.msra.mxu1 %v2712_v10  ;;  %p3035_p4 = pnand %p3034_p2, %p3711_p3  ;;  %p3042_p13 = por %p3041_p11, %p3040_p8 }
  0xb8   : > { %2516 = vmatprep.subr.bf16.mxu0 %v3118_v0  ;;  %2536 = vmatprep.subr.bf16.mxu1 %v3118_v0 }
  0xb9   : > { %p3036_p7 = pneg %p3035_p4 }
  0xbb   : > { %2517 = vmatpush3.bf16.msra.mxu0 %v2704_v7  ;;  %2537 = vmatpush3.bf16.msra.mxu1 %v2713_v12  ;;  %p3043_p0 = pnand %p3042_p13, %p3036_p7 }
  0xbc   : > { %2518 = vmatprep.subr.bf16.mxu0 %v3118_v0  ;;  %2538 = vmatprep.subr.bf16.mxu1 %v3118_v0 }
  0xbf   : > { %2519 = vmatpush3.bf16.msra.mxu0 %v2705_v9  ;;  %2539 = vmatpush3.bf16.msra.mxu1 %v2714_v14 }
  0xc0   : > { %2520 = vmatprep.subr.bf16.mxu0 %v3118_v0  ;;  %2540 = vmatprep.subr.bf16.mxu1 %v3118_v0 }
  0xc3   : > { %2521 = vmatpush3.bf16.msra.mxu0 %v2706_v11  ;;  %2541 = vmatpush3.bf16.msra.mxu1 %v2715_v16 }
  0xc4   : > { %2522 = vmatprep.subr.bf16.mxu0 %v3118_v0  ;;  %2542 = vmatprep.subr.bf16.mxu1 %v3118_v0 }
  0xc7   : > { %2523 = vmatpush3.bf16.msra.mxu0 %v2707_v13  ;;  %2543 = vmatpush3.bf16.msra.mxu1 %v2716_v17  ;;  %v2292_v13 = vld [vmem:[%s3661_s12] ss:$0 sm:$0xff] }
  0xc8   : > { %2548 = vmatprep.subr.bf16.mxu0 %v3118_v0  ;;  %2568 = vmatprep.subr.bf16.mxu1 %v3118_v0 }
  0xca   : > { %2525 = vmatmul.mubr.bf16.vlgmr.msra.gmra.mrb[0].mxu0 %v3431_v15 }
  0xcb   : > { %2564 = vmatprep.mubr.msk.bf16.mxu0 %vm3119_vm0, %v3118_v0  ;;  %2549 = vmatpush3.bf16.msra.mxu0 %v2717_v18 }
  0xcc   : > { %2550 = vmatprep.subr.bf16.mxu0 %v3118_v0 }
  0xcf   : > { %2551 = vmatpush3.bf16.msra.mxu0 %v2718_v19 }
  0xd0   : > { %2552 = vmatprep.subr.bf16.mxu0 %v3118_v0 }
  0xd3   : > { %2553 = vmatpush3.bf16.msra.mxu0 %v2719_v20 }
  0xd4   : > { %2554 = vmatprep.subr.bf16.mxu0 %v3118_v0 }
  0xd7   : > { %2555 = vmatpush3.bf16.msra.mxu0 %v2720_v21 }
  0xd8   : > { %2556 = vmatprep.subr.bf16.mxu0 %v3118_v0 }
  0xdb   : > { %2557 = vmatpush3.bf16.msra.mxu0 %v2721_v22  ;;  %v2735_v22 = vld [vmem:[#allocation2 + $0x4] ss:$24 sps:$4 sm:$0xff]  }
  0xdc   : > { %2558 = vmatprep.subr.bf16.mxu0 %v3118_v0 }
  0xdf   : > { %2559 = vmatpush3.bf16.msra.mxu0 %v2722_v23  ;;  %v2733_v23 = vld [vmem:[#allocation2] ss:$24 sps:$4 sm:$0xff]  }
  0xe0   : > { %2560 = vmatprep.subr.bf16.mxu0 %v3118_v0 }
  0xe3   : > { %2561 = vmatpush3.bf16.msra.mxu0 %v2723_v32  ;;  %v2760_v32 = vld [vmem:[#allocation2 + $0x38] ss:$24 sps:$4 sm:$0xff]  }
  0xe4   : > { %2562 = vmatprep.subr.bf16.mxu0 %v3118_v0 }
  0xe7   : > { %2563 = vmatpush3.bf16.msra.mxu0 %v2724_v33  ;;  %v3120_v33 = vmov 0  }
  0xe8   : > { %1340 = vmatprep.subr.bf16.mxu0 %v2735_v22  ;;  %2689 = vset.pattern.permute.xlu0 %v3120_v33  ;;  %v2809_v22 = vld [vmem:[#allocation7 + $0x50] sm:$0xff]  }
  0xe9   : > { %2690 = vset.pattern.permute.xlu1 %v3120_v33 }
 0x19d   : > { %v627_v25 = vpop.f32.mrb[0].mxu0 }
 0x19e   : > { %v2526_v26 = vpop.f32.mrb[1].mxu0  ;;  %v628_v28 = vadd.f32 %v2264_v24, %v627_v25  ;;  %v2738_v25 = vld [vmem:[#allocation2 + $0x34] ss:$24 sps:$4 sm:$0xff]  }
 0x19f   : > { %v630_v27 = vpop.f32.mrb[2].mxu0  ;;  %v2741_v26 = vld [vmem:[#allocation2 + $0x64] ss:$24 sps:$4 sm:$0xff]  }
 0x1a0   : > { %v631_v29 = vadd.f32 %v2264_v24, %v630_v27  ;;  %v2527_v30 = vpop.f32.mrb[3].mxu0  ;;  %v2736_v24 = vld [vmem:[#allocation2 + $0x30] ss:$24 sps:$4 sm:$0xff]   ;;  %v2739_v27 = vld [vmem:[#allocation2 + $0x60] ss:$24 sps:$4 sm:$0xff]  }
 0x1a1   : > { %v2744_v30 = vld [vmem:[#allocation2 + $0x94] ss:$24 sps:$4 sm:$0xff]  }
 0x1a2   : > { %v634_v31 = vpack.c.bf16 %v631_v29, %v628_v28  ;;  %v2754_v28 = vld [vmem:[#allocation2 + $0x8] ss:$24 sps:$4 sm:$0xff]   ;;  %v2756_v29 = vld [vmem:[#allocation2 + $0xc] ss:$24 sps:$4 sm:$0xff]  }
 0x1a4   : > { %2545 = vmatmul.mubr.bf16.vlgmr.msra.gmra.mrb[0].mxu1 %v634_v31  ;;  %v2762_v31 = vld [vmem:[#allocation2 + $0x3c] ss:$24 sps:$4 sm:$0xff]  }
 0x1a5   : > { %2584 = vmatprep.mubr.msk.bf16.mxu1 %vm3119_vm0, %v3118_v0  ;;  %2569 = vmatpush3.bf16.msra.mxu1 %v2725_v51  ;;  %v2792_v51 = vld [vmem:[#allocation2 + $0x12c] ss:$24 sps:$4 sm:$0xff]  }
 0x1a6   : > { %2570 = vmatprep.subr.bf16.mxu1 %v3118_v0 }
 0x1a9   : > { %2571 = vmatpush3.bf16.msra.mxu1 %v2726_v52  ;;  %v2765_v52 = vld [vmem:[#allocation2 + $0x14] ss:$24 sps:$4 sm:$0xff]  }
 0x1aa   : > { %2572 = vmatprep.subr.bf16.mxu1 %v3118_v0 }
 0x1ad   : > { %2573 = vmatpush3.bf16.msra.mxu1 %v2727_v53  ;;  %v2790_v53 = vld [vmem:[#allocation2 + $0x128] ss:$24 sps:$4 sm:$0xff]  }
 0x1ae   : > { %2574 = vmatprep.subr.bf16.mxu1 %v3118_v0 }
 0x1b1   : > { %2575 = vmatpush3.bf16.msra.mxu1 %v2728_v62  ;;  %v2781_v62 = vld [vmem:[#allocation2 + $0xa0] ss:$24 sps:$4 sm:$0xff]  }
 0x1b2   : > { %2576 = vmatprep.subr.bf16.mxu1 %v3118_v0 }
 0x1b5   : > { %2577 = vmatpush3.bf16.msra.mxu1 %v2729_v63  ;;  %v2789_v63 = vld [vmem:[#allocation2 + $0xd4] ss:$24 sps:$4 sm:$0xff]  }
 0x1b6   : > { %2578 = vmatprep.subr.bf16.mxu1 %v3118_v0 }
 0x1b9   : > { %2579 = vmatpush3.bf16.msra.mxu1 %v2730_v1  ;;  %v2787_v1 = vld [vmem:[#allocation2 + $0xd0] ss:$24 sps:$4 sm:$0xff]  }
 0x1ba   : > { %2580 = vmatprep.subr.bf16.mxu1 %v3118_v0 }
 0x1bd   : > { %2581 = vmatpush3.bf16.msra.mxu1 %v2731_v2  ;;  %v2795_v2 = vld [vmem:[#allocation2 + $0x104] ss:$24 sps:$4 sm:$0xff]  }
 0x1be   : > { %2582 = vmatprep.subr.bf16.mxu1 %v3118_v0 }
 0x1c1   : > { %2583 = vmatpush3.bf16.msra.mxu1 %v2732_v3  ;;  %v2793_v3 = vld [vmem:[#allocation2 + $0x100] ss:$24 sps:$4 sm:$0xff]  }
 0x1c2   : > { %1383 = vmatprep.subr.bf16.mxu1 %v2756_v29  ;;  %v2824_v29 = vld [vmem:[#allocation7 + $0x90] sm:$0xff]  }
 0x277   : > { %v740_v35 = vpop.f32.mrb[0].mxu1 }
 0x278   : > { %v741_v36 = vadd.f32 %v2274_v34, %v740_v35  ;;  %v2546_v37 = vpop.f32.mrb[1].mxu1  ;;  %v2768_v35 = vld [vmem:[#allocation2 + $0x6c] ss:$24 sps:$4 sm:$0xff]  }
 0x279   : > { %v743_v38 = vpop.f32.mrb[2].mxu1  ;;  %v2766_v37 = vld [vmem:[#allocation2 + $0x68] ss:$24 sps:$4 sm:$0xff]  }
 0x27a   : > { %v744_v39 = vadd.f32 %v2274_v34, %v743_v38  ;;  %v2547_v40 = vpop.f32.mrb[3].mxu1  ;;  %v747_v41 = vmax.f32 %v741_v36, 0.0  ;;  %v2742_v34 = vld [vmem:[#allocation2 + $0x90] ss:$24 sps:$4 sm:$0xff]   ;;  %v2747_v36 = vld [vmem:[#allocation2 + $0xc4] ss:$24 sps:$4 sm:$0xff]  }
 0x27b   : > { %v2745_v38 = vld [vmem:[#allocation2 + $0xc0] ss:$24 sps:$4 sm:$0xff]   ;;  %v2750_v40 = vld [vmem:[#allocation2 + $0xf4] ss:$24 sps:$4 sm:$0xff]  }
 0x27c   : > { %v748_v42 = vmax.f32 %v744_v39, 0.0  ;;  %v2774_v39 = vld [vmem:[#allocation2 + $0x9c] ss:$24 sps:$4 sm:$0xff]  }
 0x27e   : > { %v749_v43 = vpack.c.bf16 %v748_v42, %v747_v41 }
 0x280   : > { %2565 = vmatmul.mubr.bf16.vlgmr.msra.gmra.mrb[4].mxu0 %v749_v43  ;;  %v2780_v43 = vld [vmem:[#allocation2 + $0xcc] ss:$24 sps:$4 sm:$0xff]  }
 0x281   : > { %1341 = vmatpush1.bf16.msra.mxu0 %v2733_v23  ;;  %1372 = vmatprep.mubr.bf16.mxu0 %v3120_v33  ;;  %v2816_v23 = vld [vmem:[#allocation7 + $0x80] sm:$0xff]  }
 0x282   : > { %1342 = vmatprep.subr.bf16.mxu0 %v2738_v25  ;;  %v2820_v25 = vld [vmem:[#allocation7 + $0x88] sm:$0xff]  }
 0x285   : > { %1343 = vmatpush1.bf16.msra.mxu0 %v2736_v24  ;;  %v2818_v24 = vld [vmem:[#allocation7 + $0xc8] sm:$0xff]  }
 0x286   : > { %1344 = vmatprep.subr.bf16.mxu0 %v2741_v26  ;;  %v2810_v26 = vld [vmem:[#allocation7 + $0x10] sm:$0xff]  }
 0x289   : > { %1345 = vmatpush1.bf16.msra.mxu0 %v2739_v27  ;;  %v2822_v27 = vld [vmem:[#allocation7 + $0xd0] sm:$0xff]  }
 0x28a   : > { %1346 = vmatprep.subr.bf16.mxu0 %v2744_v30  ;;  %v2812_v30 = vld [vmem:[#allocation7 + $0x18] sm:$0xff]  }
 0x28d   : > { %1347 = vmatpush1.bf16.msra.mxu0 %v2742_v34  ;;  %v2817_v34 = vld [vmem:[#allocation7 + $0x68] sm:$0xff]  }
 0x28e   : > { %1348 = vmatprep.subr.bf16.mxu0 %v2747_v36  ;;  %v2821_v36 = vld [vmem:[#allocation7 + $0x70] sm:$0xff]  }
 0x291   : > { %1349 = vmatpush1.bf16.msra.mxu0 %v2745_v38 }
 0x292   : > { %1350 = vmatprep.subr.bf16.mxu0 %v2750_v40 }
 0x353   : > { %v855_v45 = vpop.f32.mrb[4].mxu0 }
 0x354   : > { %v856_v46 = vadd.f32 %v2283_v44, %v855_v45  ;;  %v2566_v47 = vpop.f32.mrb[5].mxu0  ;;  %v2778_v45 = vld [vmem:[#allocation2 + $0xc8] ss:$24 sps:$4 sm:$0xff]  }
 0x355   : > { %v858_v48 = vpop.f32.mrb[6].mxu0  ;;  %v2786_v47 = vld [vmem:[#allocation2 + $0xfc] ss:$24 sps:$4 sm:$0xff]  }
 0x356   : > { %862 = vmax.xlane.f32.xlu0 %v856_v46  ;;  %v2567_v49 = vpop.f32.mrb[7].mxu0  ;;  %v859_v50 = vadd.f32 %v2283_v44, %v858_v48  ;;  %v2753_v44 = vld [vmem:[#allocation2 + $0x124] ss:$24 sps:$4 sm:$0xff]   ;;  %v2759_v48 = vld [vmem:[#allocation2 + $0x154] ss:$24 sps:$4 sm:$0xff]  }
 0x357   : > { %v2784_v49 = vld [vmem:[#allocation2 + $0xf8] ss:$24 sps:$4 sm:$0xff]  }
 0x35a   : > { %864 = vmax.xlane.f32.xlu0 %v859_v50 }
 0x3e3   : > { %v863_v54 = vpop.xlane.xlu0 %862 }
 0x3e4   : > { %v866_v55 = vsub.f32 %v856_v46, %v863_v54  ;;  %v2751_v46 = vld [vmem:[#allocation2 + $0x120] ss:$24 sps:$4 sm:$0xff]   ;;  %v2763_v54 = vld [vmem:[#allocation2 + $0x10] ss:$24 sps:$4 sm:$0xff]  }
 0x3e6   : > { %v868_v56 = vmul.f32 1.442695, %v866_v55  ;;  %v2798_v55 = vld [vmem:[#allocation2 + $0x15c] ss:$24 sps:$4 sm:$0xff]  }
 0x3e7   : > { %v865_v57 = vpop.xlane.xlu0 %864 }
 0x3e8   : > { %2853 = vpow2.f32 %v868_v56  ;;  %v867_v58 = vsub.f32 %v859_v50, %v865_v57  ;;  %v2757_v50 = vld [vmem:[#allocation2 + $0x150] ss:$24 sps:$4 sm:$0xff]   ;;  %v2771_v56 = vld [vmem:[#allocation2 + $0x44] ss:$24 sps:$4 sm:$0xff]  }
 0x3e9   : > { %v2796_v57 = vld [vmem:[#allocation2 + $0x158] ss:$24 sps:$4 sm:$0xff]  }
 0x3ea   : > { %v870_v59 = vmul.f32 1.442695, %v867_v58  ;;  %v2769_v58 = vld [vmem:[#allocation2 + $0x40] ss:$24 sps:$4 sm:$0xff]  }
 0x3ec   : > { %2855 = vpow2.f32 %v870_v59  ;;  %v2777_v59 = vld [vmem:[#allocation2 + $0x74] ss:$24 sps:$4 sm:$0xff]  }
 0x3f2   : > { %v2854_v60 = vpop.eup %2853 }
 0x3f3   : > { %872 = vadd.xlane.f32.xlu1 %v2854_v60 }
 0x3f6   : > { %v2856_v61 = vpop.eup %2855 }
 0x3f7   : > { %874 = vadd.xlane.f32.xlu1 %v2856_v61 }
 0x480   : > { %v873_v4 = vpop.xlane.xlu1 %872 }
 0x481   : > { %2857 = vrcp.f32 %v873_v4  ;;  %v2801_v4 = vld [vmem:[#allocation2 + $0x134] ss:$24 sps:$4 sm:$0xff]  }
 0x484   : > { %v875_v5 = vpop.xlane.xlu1 %874 }
 0x485   : > { %2859 = vrcp.f32 %v875_v5  ;;  %v2799_v5 = vld [vmem:[#allocation2 + $0x130] ss:$24 sps:$4 sm:$0xff]  }
 0x48b   : > { %v2858_v6 = vpop.eup %2857 }
 0x48c   : > { %v878_v7 = vmul.f32 %v2858_v6, %v2854_v60  ;;  %v2775_v60 = vld [vmem:[#allocation2 + $0x70] ss:$24 sps:$4 sm:$0xff]   ;;  %v2804_v6 = vld [vmem:[#allocation2 + $0x164] ss:$24 sps:$4 sm:$0xff]  }
 0x48e   : > { %v880_v10 = vmul.f32 %v878_v7, %v747_v41  ;;  %v2772_v41 = vld [vmem:[#allocation2 + $0x98] ss:$24 sps:$4 sm:$0xff]  }
 0x48f   : > { %v2860_v8 = vpop.eup %2859  ;;  %v2802_v7 = vld [vmem:[#allocation2 + $0x160] ss:$24 sps:$4 sm:$0xff]  }
 0x490   : > { %v879_v9 = vmul.f32 %v2860_v8, %v2856_v61  ;;  %v2783_v61 = vld [vmem:[#allocation2 + $0xa4] ss:$24 sps:$4 sm:$0xff]  }
 0x492   : > { %v881_v11 = vmul.f32 %v879_v9, %v748_v42  ;;  %v2748_v42 = vld [vmem:[#allocation2 + $0xf0] ss:$24 sps:$4 sm:$0xff]  }
 0x493   : > { %1351 = vmatpush1.bf16.msra.mxu0 %v2748_v42 }
 0x494   : > { %v882_v12 = vpack.c.bf16 %v881_v11, %v880_v10  ;;  %1352 = vmatprep.subr.bf16.mxu0 %v2753_v44 }
 0x496   : > { %2585 = vmatmul.mubr.bf16.vlgmr.msra.gmra.mrb[4].mxu1 %v882_v12 }
 0x497   : > { %1384 = vmatpush1.bf16.msra.mxu1 %v2754_v28  ;;  %1415 = vmatprep.mubr.bf16.mxu1 %v3120_v33  ;;  %v2811_v28 = vld [vmem:[#allocation7 + $0x58] sm:$0xff]  }
 0x498   : > { %1385 = vmatprep.subr.bf16.mxu1 %v2762_v31  ;;  %1353 = vmatpush1.bf16.msra.mxu0 %v2751_v46  ;;  %v2813_v31 = vld [vmem:[#allocation7 + $0x60] sm:$0xff]  }
 0x499   : > { %1354 = vmatprep.subr.bf16.mxu0 %v2759_v48 }
 0x49b   : > { %1386 = vmatpush1.bf16.msra.mxu1 %v2760_v32  ;;  %v2815_v32 = vld [vmem:[#allocation7 + $0x20] sm:$0xff]  }
 0x49c   : > { %1387 = vmatprep.subr.bf16.mxu1 %v2768_v35  ;;  %1355 = vmatpush1.bf16.msra.mxu0 %v2757_v50  ;;  %v2819_v35 = vld [vmem:[#allocation7 + $0x28] sm:$0xff]  }
 0x49d   : > { %1426 = vmatprep.subr.bf16.mxu0 %v2765_v52 }
 0x49f   : > { %1388 = vmatpush1.bf16.msra.mxu1 %v2766_v37  ;;  %1373 = vmatmul.mubr.bf16.vlgmr.msra.gmra.mrb[8].mxu0 %v3431_v15  ;;  %v2823_v37 = vld [vmem:[#allocation7 + $0x30] sm:$0xff]  }
 0x4a0   : > { %1389 = vmatprep.subr.bf16.mxu1 %v2774_v39  ;;  %1427 = vmatpush1.bf16.msra.mxu0 %v2763_v54 }
 0x4a1   : > { %1428 = vmatprep.subr.bf16.mxu0 %v2771_v56  ;;  %1458 = vmatprep.mubr.bf16.mxu0 %v3120_v33 }
 0x4a3   : > { %1390 = vmatpush1.bf16.msra.mxu1 %v2772_v41 }
 0x4a4   : > { %1391 = vmatprep.subr.bf16.mxu1 %v2780_v43  ;;  %1429 = vmatpush1.bf16.msra.mxu0 %v2769_v58  ;;  %v2825_v58 = vld [vmem:[#allocation7 + $0x78] sm:$0xff]  }
 0x4a5   : > { %1430 = vmatprep.subr.bf16.mxu0 %v2777_v59  ;;  %v2826_v59 = vld [vmem:[#allocation7 + $0xd8] sm:$0xff]  }
 0x4a7   : > { %1392 = vmatpush1.bf16.msra.mxu1 %v2778_v45 }
 0x4a8   : > { %1393 = vmatprep.subr.bf16.mxu1 %v2786_v47  ;;  %1431 = vmatpush1.bf16.msra.mxu0 %v2775_v60  ;;  %v2827_v60 = vld [vmem:[#allocation7 + $0x38] sm:$0xff]  }
 0x4a9   : > { %1432 = vmatprep.subr.bf16.mxu0 %v2783_v61  ;;  %v2828_v61 = vld [vmem:[#allocation7 + $0x98] sm:$0xff]  }
 0x4ab   : > { %1394 = vmatpush1.bf16.msra.mxu1 %v2784_v49 }
 0x4ac   : > { %1395 = vmatprep.subr.bf16.mxu1 %v2792_v51  ;;  %1433 = vmatpush1.bf16.msra.mxu0 %v2781_v62  ;;  %v3121_v62 = vmov 1  }
 0x4ad   : > { %1434 = vmatprep.subr.bf16.mxu0 %v2789_v63  ;;  %v2829_v63 = vld [vmem:[#allocation7 + $0xe0] sm:$0xff]  }
 0x4af   : > { %1396 = vmatpush1.bf16.msra.mxu1 %v2790_v53 }
 0x4b0   : > { %1397 = vmatprep.subr.bf16.mxu1 %v2798_v55  ;;  %1435 = vmatpush1.bf16.msra.mxu0 %v2787_v1  ;;  %v2830_v1 = vld [vmem:[#allocation7 + $0x140] sm:$0xff]  }
 0x4b1   : > { %1436 = vmatprep.subr.bf16.mxu0 %v2795_v2  ;;  %v2831_v2 = vld [vmem:[#allocation7 + $0xa0] sm:$0xff]  }
 0x4b3   : > { %1398 = vmatpush1.bf16.msra.mxu1 %v2796_v57 }
 0x4b4   : > { %1437 = vmatpush1.bf16.msra.mxu0 %v2793_v3  ;;  %v2833_v3 = vld [vmem:[#allocation7 + $0xe8] sm:$0xff]  }
 0x4b5   : > { %1438 = vmatprep.subr.bf16.mxu0 %v2801_v4  ;;  %v2835_v4 = vld [vmem:[#allocation7 + $0xa8] sm:$0xff]  }
 0x4b6   : > { %1416 = vmatmul.mubr.bf16.vlgmr.msra.gmra.mrb[8].mxu1 %v3431_v15 }
 0x4b8   : > { %1439 = vmatpush1.bf16.msra.mxu0 %v2799_v5  ;;  %v3122_v5 = vmov 2  }
 0x4b9   : > { %1440 = vmatprep.subr.bf16.mxu0 %v2804_v6  ;;  %v2837_v6 = vld [vmem:[#allocation7 + $0xf0] sm:$0xff]  }
 0x4bc   : > { %1441 = vmatpush1.bf16.msra.mxu0 %v2802_v7  ;;  %v2839_v7 = vld [vmem:[#allocation7 + $0xb0] sm:$0xff]  }
 0x4bf   : > { %1459 = vmatmul.mubr.bf16.vlgmr.msra.gmra.mrb[12].mxu0 %v3431_v15 }
 0x569   : > { %v988_v14 = vpop.f32.mrb[4].mxu1 }
 0x56a   : > { %v3493_v0 = vadd.f32 %v2292_v13, %v988_v14  ;;  %v2586_v16 = vpop.f32.mrb[5].mxu1 }
 0x56b   : > { %v991_v17 = vpop.f32.mrb[6].mxu1 }
 0x56c   : > { %v3495_v18 = vadd.f32 %v2292_v13, %v991_v17  ;;  %v2587_v19 = vpop.f32.mrb[7].mxu1  ;;  %v996_v20 = vsel %vm995_vm1, %v3493_v0, -inf }
 0x56d   : > { %997 = vmax.xlane.f32.xlu0 %v996_v20  ;;  %v2806_v19 = vld [vmem:[#allocation7] sm:$0xff]   ;;  %v2807_v20 = vld [vmem:[#allocation7 + $0x48] sm:$0xff]  }
 0x56e   : > { %v999_v21 = vsel %vm995_vm1, %v3495_v18, -inf }
 0x56f   : > { %1000 = vmax.xlane.f32.xlu1 %v999_v21  ;;  %v2814_v21 = vld [vmem:[#allocation7 + $0xc0] sm:$0xff]  }
 0x570   : > { %2464 = vmatprep.subr.bf16.mxu0 %v2814_v21 }
 0x571   : > { %2465 = vmatpush3.bf16.msra.mxu0 %v2816_v23 }
 0x572   : > { %2466 = vmatprep.subr.bf16.mxu0 %v2818_v24  ;;  %v3519_v38 = vpop.f32.mrb[8].mxu0 }
 0x573   : > { %v3521_v39 = vpop.f32.mrb[9].mxu0 }
 0x574   : > { %v3523_v40 = vpop.f32.mrb[10].mxu0 }
 0x575   : > { %2467 = vmatpush3.bf16.msra.mxu0 %v2820_v25  ;;  %v3525_v41 = vpop.f32.mrb[11].mxu0 }
 0x576   : > { %2468 = vmatprep.subr.bf16.mxu0 %v2822_v27 }
 0x579   : > { %2469 = vmatpush3.bf16.msra.mxu0 %v2824_v29 }
 0x57a   : > { %2470 = vmatprep.subr.bf16.mxu0 %v2826_v59 }
 0x57d   : > { %2471 = vmatpush3.bf16.msra.mxu0 %v2828_v61 }
 0x57e   : > { %2472 = vmatprep.subr.bf16.mxu0 %v2829_v63 }
 0x581   : > { %2473 = vmatpush3.bf16.msra.mxu0 %v2831_v2 }
 0x582   : > { %2474 = vmatprep.subr.bf16.mxu0 %v2833_v3 }
 0x585   : > { %2475 = vmatpush3.bf16.msra.mxu0 %v2835_v4 }
 0x586   : > { %2476 = vmatprep.subr.bf16.mxu0 %v2837_v6  ;;  %v2832_v6 = vld [vmem:[#allocation7 + $0x100] sm:$0xff]  }
 0x589   : > { %v3527_v42 = vpop.f32.mrb[8].mxu1  ;;  %2477 = vmatpush3.bf16.msra.mxu0 %v2839_v7 }
 0x58a   : > { %v3529_v43 = vpop.f32.mrb[9].mxu1 }
 0x58b   : > { %v3531_v44 = vpop.f32.mrb[10].mxu1 }
 0x58c   : > { %v3533_v45 = vpop.f32.mrb[11].mxu1 }
 0x592   : > { %v3535_v48 = vpop.f32.mrb[12].mxu0 }
 0x593   : > { %v3537_v49 = vpop.f32.mrb[13].mxu0 }
 0x594   : > { %v3539_v50 = vpop.f32.mrb[14].mxu0 }
 0x595   : > { %v3541_v51 = vpop.f32.mrb[15].mxu0 }
 0x5fa   : > { %v998_v8 = vpop.xlane.xlu0 %997 }
 0x5fb   : > { %v1002_v9 = vsub.f32 %v3493_v0, %v998_v8  ;;  %v2805_v0 = vld [vmem:[#allocation7 + $0x40] sm:$0xff]   ;;  %v2841_v8 = vld [vmem:[#allocation7 + $0xf8] sm:$0xff]  }
 0x5fc   : > { %v1001_v10 = vpop.xlane.xlu1 %1000  ;;  %2442 = vmatprep.subr.bf16.mxu1 %v2805_v0  ;;  %2478 = vmatprep.subr.bf16.mxu0 %v2841_v8  ;;  %v2834_v8 = vld [vmem:[#allocation7 + $0x148] sm:$0xff]  }
 0x5fd   : > { %v1004_v11 = vmul.f32 1.442695, %v1002_v9  ;;  %v1003_v12 = vsub.f32 %v3495_v18, %v1001_v10  ;;  %2443 = vmatpush3.bf16.msra.mxu1 %v2806_v19  ;;  %v2808_v18 = vld [vmem:[#allocation7 + $0x8] sm:$0xff]   ;;  %v2843_v9 = vld [vmem:[#allocation7 + $0xb8] sm:$0xff]   ;;  %v1070_v10 = vlaneseq }
 0x5fe   : > { %2444 = vmatprep.subr.bf16.mxu1 %v2807_v20  ;;  %2479 = vmatpush3.bf16.msra.mxu0 %v2843_v9 }
 0x5ff   : > { %2861 = vpow2.f32 %v1004_v11  ;;  %v1006_v13 = vmul.f32 1.442695, %v1003_v12  ;;  %v1071_v11 = vshrl.u32 %v1070_v10, 7 }
 0x601   : > { %2863 = vpow2.f32 %v1006_v13  ;;  %2445 = vmatpush3.bf16.msra.mxu1 %v2808_v18  ;;  %v1072_v12 = vsub.s32 0, %v1071_v11  ;;  %v1068_v13 = vld [vmem:[#allocation5] sm:$0x3f]  ;;  %v1084_v24 = vsub.s32 3, %v1071_v11  ;;  %v1088_v27 = vsub.s32 4, %v1071_v11 }
 0x602   : > { %2446 = vmatprep.subr.bf16.mxu1 %v2809_v22  ;;  %v1080_v22 = vsub.s32 2, %v1071_v11 }
 0x604   : > { %v1081_v25 = vrot.slane %v1068_v13, %v1080_v22 }
 0x605   : > { %2447 = vmatpush3.bf16.msra.mxu1 %v2810_v26  ;;  %v1085_v26 = vrot.slane %v1068_v13, %v1084_v24  ;;  %v2842_v24 = vld [vmem:[#allocation7 + $0x158] sm:$0xff]  }
 0x606   : > { %2448 = vmatprep.subr.bf16.mxu1 %v2811_v28  ;;  %v1092_v28 = vsub.s32 5, %v1071_v11  ;;  %v3551_v29 = vadd.f32 %v3527_v42, %v1081_v25 }
 0x609   : > { %v3511_v14 = vpop.eup %2861  ;;  %2449 = vmatpush3.bf16.msra.mxu1 %v2812_v30  ;;  %v3554_v30 = vadd.f32 %v3529_v43, %v1085_v26 }
 0x60a   : > { %v1008_v16 = vsel %vm995_vm1, %v3511_v14, 0.0  ;;  %2450 = vmatprep.subr.bf16.mxu1 %v2813_v31  ;;  %v1089_v31 = vrot.slane %v1068_v13, %v1088_v27 }
 0x60b   : > { %v3515_v17 = vpop.eup %2863  ;;  %1009 = vadd.xlane.f32.xlu0 %v1008_v16  ;;  %v1073_v16 = vrot.slane %v1068_v13, %v1072_v12  ;;  %v2836_v12 = vld [vmem:[#allocation7 + $0x108] sm:$0xff]  }
 0x60c   : > { %v1011_v15 = vsel %vm995_vm1, %v3515_v17, 0.0 }
 0x60d   : > { %1012 = vadd.xlane.f32.xlu1 %v1011_v15  ;;  %2451 = vmatpush3.bf16.msra.mxu1 %v2815_v32  ;;  %v1375_v15 = vadd.f32 %v3519_v38, %v1073_v16  ;;  %v1093_v32 = vrot.slane %v1068_v13, %v1092_v28 }
 0x60e   : > { %2452 = vmatprep.subr.bf16.mxu1 %v2817_v34  ;;  %v3557_v34 = vadd.f32 %v3531_v44, %v1081_v25 }
 0x60f   : > { %v1469_v20 = vmul.f32 0.70710677, %v1375_v15  ;;  %v3568_v42 = vadd.f32 %v3537_v49, %v1093_v32 }
 0x610   : > { %v1689_v44 = vmul.f32 0.70710677, %v3557_v34 }
 0x611   : > { %2453 = vmatpush3.bf16.msra.mxu1 %v2819_v35 }
 0x612   : > { %2454 = vmatprep.subr.bf16.mxu1 %v2821_v36  ;;  %v1687_v36 = vmul.f32 0.70710677, %v3551_v29 }
 0x615   : > { %2455 = vmatpush3.bf16.msra.mxu1 %v2823_v37  ;;  %v3561_v37 = vadd.f32 %v3533_v45, %v1085_v26 }
 0x616   : > { %2456 = vmatprep.subr.bf16.mxu1 %v2825_v58 }
 0x617   : > { %v1690_v45 = vmul.f32 0.70710677, %v3561_v37 }
 0x619   : > { %2457 = vmatpush3.bf16.msra.mxu1 %v2827_v60 }
 0x61a   : > { %2486 = vmatprep.subr.bf16.mxu1 %v2830_v1 }
 0x698   : > { %v1010_v46 = vpop.xlane.xlu0 %1009 }
 0x699   : > { %2865 = vrcp.f32 %v1010_v46  ;;  %v3572_v46 = vadd.f32 %v3539_v50, %v1089_v31 }
 0x69a   : > { %v1013_v47 = vpop.xlane.xlu1 %1012 }
 0x69b   : > { %2867 = vrcp.f32 %v1013_v47 }
 0x69c   : > { %2869 = verf.f32 %v1469_v20 }
 0x6a3   : > { %v2866_v52 = vpop.eup %2865 }
 0x6a4   : > { %v1016_v53 = vmul.f32 %v2866_v52, %v3511_v14  ;;  %v1076_v14 = vsub.s32 1, %v1071_v11 }
 0x6a5   : > { %v2868_v54 = vpop.eup %2867 }
 0x6a6   : > { %v1017_v55 = vmul.f32 %v2868_v54, %v3515_v17  ;;  %v1018_v56 = vmul.f32 0.5, %v1016_v53  ;;  %v1077_v17 = vrot.slane %v1068_v13, %v1076_v14  ;;  %v2870_v35 = vpop.eup %2869 }
 0x6a7   : > { %v1477_v47 = vadd.f32 1.0, %v2870_v35 }
 0x6a8   : > { %1487 = vperm.xlu0 %2689, %v1018_v56   ;;  %v1019_v57 = vmul.f32 0.5, %v1017_v55  ;;  %v1377_v0 = vadd.f32 %v3521_v39, %v1077_v17  ;;  %v1381_v19 = vadd.f32 %v3525_v41, %v1077_v17  ;;  %v1688_v39 = vmul.f32 0.70710677, %v3554_v30  ;;  %v2838_v17 = vld [vmem:[#allocation7 + $0x150] sm:$0xff]  }
 0x6a9   : > { %v1481_v50 = vmul.f32 %v1477_v47, %v1375_v15 }
 0x6aa   : > { %1492 = vperm.xlu1 %2690, %v1019_v57   ;;  %v1470_v18 = vmul.f32 0.70710677, %v1377_v0  ;;  %v1472_v23 = vmul.f32 0.70710677, %v1381_v19 }
 0x6ac   : > { %2697 = vset.pattern.permute.xlu0 %v3121_v62  ;;  %2871 = verf.f32 %v1470_v18  ;;  %v2840_v18 = vld [vmem:[#allocation7 + $0x110] sm:$0xff]  }
 0x6ad   : > { %1755 = vperm.xlu0 %2697, %v1017_v55  }
 0x6ae   : > { %2691 = vset.pattern.permute.xlu1 %v3121_v62 }
 0x6af   : > { %1704 = vperm.xlu1 %2691, %v1018_v56  }
 0x6b1   : > { %2699 = vset.pattern.permute.xlu0 %v3122_v5 }
 0x6b3   : > { %2692 = vset.pattern.permute.xlu1 %v3122_v5 }
 0x6b4   : > { %1920 = vperm.xlu1 %2692, %v1018_v56   ;;  %v1905_v56 = vmul.f32 0.70710677, %v3572_v46 }
 0x6b6   : > { %v2872_v38 = vpop.eup %2871 }
 0x6b8   : > { %2693 = vset.pattern.permute.xlu1 %v3121_v62 }
 0x6b9   : > { %1708 = vperm.xlu1 %2693, %v1019_v57  }
 0x6bd   : > { %2694 = vset.pattern.permute.xlu1 %v3122_v5 }
 0x6be   : > { %1924 = vperm.xlu1 %2694, %v1019_v57  }
 0x6c2   : > { %2695 = vset.pattern.permute.xlu1 %v3120_v33  ;;  %v1379_v33 = vadd.f32 %v3523_v40, %v1073_v16  ;;  %v3565_v40 = vadd.f32 %v3535_v48, %v1089_v31  ;;  %v3577_v48 = vadd.f32 %v3541_v51, %v1093_v32 }
 0x6c3   : > { %1536 = vperm.xlu1 %2695, %v1016_v53  }
 0x6c4   : > { %v1471_v21 = vmul.f32 0.70710677, %v1379_v33  ;;  %v1903_v52 = vmul.f32 0.70710677, %v3565_v40  ;;  %v1906_v57 = vmul.f32 0.70710677, %v3577_v48 }
 0x6c6   : > { %2873 = verf.f32 %v1471_v21 }
 0x6c7   : > { %1541 = vperm.xlu1 %2695, %v1017_v55   ;;  %2875 = verf.f32 %v1472_v23 }
 0x6c8   : > { %2877 = verf.f32 %v1687_v36  ;;  %v2844_v36 = vld [vmem:[#allocation7 + $0x118] sm:$0xff]  }
 0x6c9   : > { %2879 = verf.f32 %v1688_v39 }
 0x6ca   : > { %2881 = verf.f32 %v1689_v44 }
 0x6cb   : > { %2696 = vset.pattern.permute.xlu1 %v3121_v62  ;;  %2883 = verf.f32 %v1690_v45 }
 0x6cc   : > { %1751 = vperm.xlu1 %2696, %v1016_v53   ;;  %2885 = verf.f32 %v1903_v52  ;;  %v2846_v52 = vld [vmem:[#allocation7 + $0x120] sm:$0xff]  }
 0x6d0   : > { %2698 = vset.pattern.permute.xlu1 %v3122_v5  ;;  %v2874_v41 = vpop.eup %2873 }
 0x6d1   : > { %1967 = vperm.xlu1 %2698, %v1016_v53   ;;  %v2876_v43 = vpop.eup %2875  ;;  %v1478_v53 = vadd.f32 1.0, %v2872_v38  ;;  %v1479_v54 = vadd.f32 1.0, %v2874_v41 }
 0x6d2   : > { %v1480_v49 = vadd.f32 1.0, %v2876_v43  ;;  %v2878_v3 = vpop.eup %2877 }
 0x6d3   : > { %v1482_v59 = vmul.f32 %v1478_v53, %v1377_v0  ;;  %v1483_v60 = vmul.f32 %v1479_v54, %v1379_v33  ;;  %v2880_v7 = vpop.eup %2879  ;;  %v1695_v14 = vadd.f32 1.0, %v2878_v3  ;;  %v2847_v54 = vld [vmem:[#allocation7 + $0x168] sm:$0xff]  }
 0x6d4   : > { %v1484_v61 = vmul.f32 %v1480_v49, %v1381_v19  ;;  %v2882_v10 = vpop.eup %2881  ;;  %v1696_v16 = vadd.f32 1.0, %v2880_v7 }
 0x6d5   : > { %1971 = vperm.xlu1 %2698, %v1017_v55   ;;  %v1904_v55 = vmul.f32 0.70710677, %v3568_v42  ;;  %v2884_v11 = vpop.eup %2883  ;;  %v1697_v33 = vadd.f32 1.0, %v2882_v10  ;;  %v1699_v22 = vmul.f32 %v1695_v14, %v3551_v29  ;;  %v2845_v29 = vld [vmem:[#allocation7 + $0x160] sm:$0xff]  }
 0x6d6   : > { %v2886_v13 = vpop.eup %2885  ;;  %v1698_v19 = vadd.f32 1.0, %v2884_v11  ;;  %v1700_v23 = vmul.f32 %v1696_v16, %v3554_v30 }
 0x6d7   : > { %2887 = verf.f32 %v1904_v55  ;;  %v1911_v25 = vadd.f32 1.0, %v2886_v13  ;;  %v1701_v27 = vmul.f32 %v1697_v33, %v3557_v34 }
 0x6d8   : > { %2889 = verf.f32 %v1905_v56  ;;  %v1702_v28 = vmul.f32 %v1698_v19, %v3561_v37 }
 0x6d9   : > { %2891 = verf.f32 %v1906_v57  ;;  %v1915_v30 = vmul.f32 %v1911_v25, %v3565_v40 }
 0x6e1   : > { %v2888_v15 = vpop.eup %2887 }
 0x6e2   : > { %v2890_v0 = vpop.eup %2889  ;;  %v1912_v26 = vadd.f32 1.0, %v2888_v15 }
 0x6e3   : > { %v2892_v21 = vpop.eup %2891  ;;  %v1913_v31 = vadd.f32 1.0, %v2890_v0 }
 0x6e4   : > { %v1914_v32 = vadd.f32 1.0, %v2892_v21  ;;  %v1916_v44 = vmul.f32 %v1912_v26, %v3568_v42  ;;  %v2848_v42 = vld [vmem:[#allocation7 + $0x128] sm:$0xff]  }
 0x6e5   : > { %v1917_v34 = vmul.f32 %v1913_v31, %v3572_v46  ;;  %v2850_v46 = vld [vmem:[#allocation7 + $0x130] sm:$0xff]  }
 0x6e6   : > { %v1918_v37 = vmul.f32 %v1914_v32, %v3577_v48  ;;  %v2851_v48 = vld [vmem:[#allocation7 + $0x178] sm:$0xff]  }
 0x727   : > { %v1488_v58 = vpop.permute.xlu0 %1487 }
 0x728   : > { %v1495_v62 = vmul.f32 %v1488_v58, %v1481_v50  ;;  %v1496_v63 = vmul.f32 %v1488_v58, %v1482_v59  ;;  %v2849_v58 = vld [vmem:[#allocation7 + $0x170] sm:$0xff]   ;;  %v2852_v59 = vld [vmem:[#allocation7 + $0x138] sm:$0xff]  }
 0x729   : > { %v1493_v51 = vpop.permute.xlu1 %1492 }
 0x72a   : > { %v1497_v1 = vmul.f32 %v1493_v51, %v1483_v60  ;;  %v1498_v2 = vmul.f32 %v1493_v51, %v1484_v61 }
 0x72c   : > { %v1499_v4 = vpack.c.bf16 %v1497_v1, %v1495_v62  ;;  %v1500_v5 = vpack.c.bf16 %v1498_v2, %v1496_v63  ;;  %v1756_v7 = vpop.permute.xlu0 %1755 }
 0x72e   : > { %v1705_v9 = vpop.permute.xlu1 %1704  ;;  %1678 = vmatprep.mubr.bf16.mxu1 %v1500_v5 }
 0x72f   : > { %1679 = vmatmul.mubr.bf16.vlgmr.msra.gmra.mrb[12].mxu1 %v1499_v4  ;;  %v1711_v38 = vmul.f32 %v1705_v9, %v1699_v22  ;;  %v1712_v39 = vmul.f32 %v1705_v9, %v1700_v23  ;;  %v2349_v4 = vld [vmem:[%s3653_s4] ss:$0 sm:$0xff]  ;;  %v2383_v23 = vld [vmem:[%s3653_s4 + $0x2] ss:$0 sm:$0xff] }
 0x730   : > { %2487 = vmatpush3.bf16.msra.mxu1 %v2832_v6  ;;  %v2366_v6 = vld [vmem:[%s3653_s4 + $0x1] ss:$0 sm:$0xff] }
 0x731   : > { %2488 = vmatprep.subr.bf16.mxu1 %v2834_v8  ;;  %v1763_v14 = vmul.f32 %v2366_v6, %v1756_v7 }
 0x733   : > { %v1921_v20 = vpop.permute.xlu1 %1920 }
 0x734   : > { %2489 = vmatpush3.bf16.msra.mxu1 %v2836_v12  ;;  %v1927_v49 = vmul.f32 %v1921_v20, %v1915_v30  ;;  %v1928_v55 = vmul.f32 %v1921_v20, %v1916_v44 }
 0x735   : > { %2490 = vmatprep.subr.bf16.mxu1 %v2838_v17 }
 0x738   : > { %2491 = vmatpush3.bf16.msra.mxu1 %v2840_v18  ;;  %v1709_v35 = vpop.permute.xlu1 %1708 }
 0x739   : > { %v1713_v41 = vmul.f32 %v1709_v35, %v1701_v27  ;;  %v1714_v43 = vmul.f32 %v1709_v35, %v1702_v28  ;;  %2492 = vmatprep.subr.bf16.mxu1 %v2842_v24 }
 0x73b   : > { %v1715_v45 = vpack.c.bf16 %v1713_v41, %v1711_v38  ;;  %v1716_v47 = vpack.c.bf16 %v1714_v43, %v1712_v39 }
 0x73c   : > { %2493 = vmatpush3.bf16.msra.mxu1 %v2844_v36 }
 0x73d   : > { %v1925_v53 = vpop.permute.xlu1 %1924  ;;  %1892 = vmatprep.mubr.bf16.mxu0 %v1716_v47  ;;  %2494 = vmatprep.subr.bf16.mxu1 %v2845_v29 }
 0x73e   : > { %v1929_v56 = vmul.f32 %v1925_v53, %v1917_v34  ;;  %v1930_v50 = vmul.f32 %v1925_v53, %v1918_v37  ;;  %1893 = vmatmul.mubr.bf16.vlgmr.msra.gmra.mrb[16].mxu0 %v1715_v45 }
 0x740   : > { %v1931_v40 = vpack.c.bf16 %v1929_v56, %v1927_v49  ;;  %v1932_v57 = vpack.c.bf16 %v1930_v50, %v1928_v55  ;;  %2495 = vmatpush3.bf16.msra.mxu1 %v2846_v52 }
 0x741   : > { %2496 = vmatprep.subr.bf16.mxu1 %v2847_v54 }
 0x742   : > { %2108 = vmatprep.mubr.bf16.mxu1 %v1932_v57  ;;  %v1537_v51 = vpop.permute.xlu1 %1536 }
 0x743   : > { %v1548_v10 = vmul.f32 %v2349_v4, %v1537_v51 }
 0x744   : > { %2497 = vmatpush3.bf16.msra.mxu1 %v2848_v42 }
 0x745   : > { %2498 = vmatprep.subr.bf16.mxu1 %v2849_v58 }
 0x746   : > { %v1542_v3 = vpop.permute.xlu1 %1541 }
 0x747   : > { %v1549_v17 = vmul.f32 %v2349_v4, %v1542_v3 }
 0x748   : > { %2499 = vmatpush3.bf16.msra.mxu1 %v2850_v46 }
 0x749   : > { %2500 = vmatprep.subr.bf16.mxu1 %v2851_v48 }
 0x74b   : > { %v1752_v5 = vpop.permute.xlu1 %1751 }
 0x74c   : > { %2501 = vmatpush3.bf16.msra.mxu1 %v2852_v59  ;;  %v1762_v11 = vmul.f32 %v2366_v6, %v1752_v5 }
 0x74f   : > { %2109 = vmatmul.mubr.bf16.vlgmr.msra.gmra.mrb[16].mxu1 %v1931_v40 }
 0x750   : > { %v1968_v22 = vpop.permute.xlu1 %1967 }
 0x751   : > { %v1978_v27 = vmul.f32 %v2383_v23, %v1968_v22 }
 0x754   : > { %v1972_v25 = vpop.permute.xlu1 %1971 }
 0x755   : > { %v1979_v35 = vmul.f32 %v2383_v23, %v1972_v25 }
 0x802   : > { %v2458_v60 = vpop.f32.mrb[12].mxu1 }
 0x803   : > { %v2459_v61 = vpop.f32.mrb[13].mxu1 }
 0x804   : > { %v2460_v62 = vadd.f32 %v2459_v61, %v2458_v60  ;;  %v2461_v63 = vpop.f32.mrb[14].mxu1 }
 0x805   : > { %v2462_v1 = vpop.f32.mrb[15].mxu1 }
 0x806   : > { %v2463_v2 = vadd.f32 %v2462_v1, %v2461_v63  ;;  %v1681_v15 = vadd.f32 %v2460_v62, %v1548_v10 }
 0x808   : > { %v1684_v19 = vadd.f32 %v2463_v2, %v1549_v17 }
 0x811   : > { %v2480_v8 = vpop.f32.mrb[16].mxu0 }
 0x812   : > { %v2481_v9 = vpop.f32.mrb[17].mxu0 }
 0x813   : > { %v2482_v12 = vadd.f32 %v2481_v9, %v2480_v8  ;;  %v2483_v13 = vpop.f32.mrb[18].mxu0 }
 0x814   : > { %v2484_v16 = vpop.f32.mrb[19].mxu0 }
 0x815   : > { %v1895_v0 = vadd.f32 %v2482_v12, %v1762_v11  ;;  %v2485_v33 = vadd.f32 %v2484_v16, %v2483_v13 }
 0x817   : > { %v1901_v20 = vadd.f32 %v1895_v0, %v1681_v15  ;;  %v1898_v18 = vadd.f32 %v2485_v33, %v1763_v14 }
 0x819   : > { %v1902_v21 = vadd.f32 %v1898_v18, %v1684_v19 }
 0x822   : > { %v2502_v24 = vpop.f32.mrb[16].mxu1 }
 0x823   : > { %v2503_v26 = vpop.f32.mrb[17].mxu1 }
 0x824   : > { %v2504_v28 = vadd.f32 %v2503_v26, %v2502_v24  ;;  %v2505_v31 = vpop.f32.mrb[18].mxu1 }
 0x825   : > { %v2506_v32 = vpop.f32.mrb[19].mxu1 }
 0x826   : > { %v2111_v36 = vadd.f32 %v2504_v28, %v1978_v27  ;;  %v2507_v38 = vadd.f32 %v2506_v32, %v2505_v31 }
 0x828   : > { %v2117_v39 = vadd.f32 %v2111_v36, %v1901_v20  ;;  %v2114_v41 = vadd.f32 %v2507_v38, %v1979_v35 }
 0x82a   : > { %2119 = vst [vmem:[%s505_s24] sm:$0xff] %v2117_v39  ;;  %v2118_v43 = vadd.f32 %v2114_v41, %v1902_v21 }
 0x82c   : > { %2120 = vst [vmem:[%s505_s24 + $0x8] sm:$0xff] %v2118_v43 }
 0x82d   : > { %3046 = shalt.err (!%p3043_p0)
}
 0x82e   : > { %s3047_s30 = scalar_lea.hbm %s3606_s7, 256  ;;  %s3051_s19 = scalar_lea.hbm %s3710_s16, 512 }
 0x82f   : > { %p3048_p1 = scmp.ne.s32.totalorder %s3606_s7, %s3047_s30  ;;  %p3052_p9 = scmp.lt.u32.totalorder %s3606_s7, %s3710_s16 }
 0x830   : > { %p3053_p12 = scmp.lt.u32.totalorder %s3051_s19, %s3047_s30  ;;  %p3055_p2 = scmp.lt.u32.totalorder %s3047_s30, %s3606_s7 }
 0x831   : > { %p3049_p6 = pnand %p3048_p1, %p3711_p3 }
 0x832   : > { %p3054_p10 = por %p3053_p12, %p3052_p9 }
 0x833   : > { %p3050_p5 = pneg %p3049_p6 }
 0x834   : > { %p3056_p4 = por %p3055_p2, %p3054_p10 }
 0x836   : > { %p3057_p7 = pnand %p3056_p4, %p3050_p5 }
 0x838   : > { %3060 = shalt.err (!%p3057_p7)
}
 0x839   : > { %s3124_s24 = smov 128   ;;  %s3125_s25 = smov 8  }
 0x83a   : > { %2608 = dma.vmem_to_hbm [thread:$0]  (%p3711_p3), %s3601_s14, 256, %s3606_s7, %s3608_s28, %s3124_s24, %s3124_s24, %s3125_s25  }
 0x83b PF: > { %s3712_s20 = sld [smem:[#allocation19_spill]]  ;;  %s3713_s23 = sld [smem:[#allocation16_spill]] }
 0x83c   : > { %s3714_s27 = sld [smem:[#allocation23_spill]] }
 0x841   : > { %p2640_p8 = scmp.ge.s32.totalorder %s3712_s20, 2  ;;  %s2150_s26 = sand.u32 1, %s3713_s23  }
 0x842   : > { %p3715_p11 = scmp.ne.s32.totalorder %s3714_s27, 0  ;;  %s2151_s29 = scalar_lea.sflag [#allocation4], %s2150_s26 }
 0x844   : > { %p2627_p13 = pnand %p2640_p8, %p3715_p11 }
 0x846   : > { %3090 = dma.done.wait (!%p2627_p13), %s2151_s29, 256  }
 0x847   : > { %3092 = vsyncadd (!%p2627_p13), %s2151_s29, 4294967040  ;;  %s3716_s28 = sld [smem:[#allocation20_spill]]  ;;  %s3717_s25 = sld [smem:[#allocation17_spill]] }
 0x848   : > { %s3718_s26 = sld [smem:[#allocation18_spill]]  ;;  %s3719_s27 = sld [smem:[#allocation21_spill]] }
 0x84d   : > { %p26_p0 = scmp.ge.s32.totalorder %s3716_s28, 4  }
 0x84f   :  { %28 = sbr.rel (!%p26_p0) target bundleno = 10 (0xa), region = 128 }
 0x856   :  { %2156 = vsyncpa [#allocation3], 1 }
 0x857   :  { %2158 = vsyncpa [#allocation3 + $0x1], 1 }
 0x858   :  { %2159 = vsyncpa [#allocation6], 1 }
 0x859   :  { %2160 = vsyncpa [#allocation9], 1 }
 0x85a   :  { %2161 = vsyncpa [#allocation4], 1 }
 0x85b   :  { %2163 = vsyncpa [#allocation4 + $0x1], 1 }

</bundles_post_ra>
